<compile_context>
chip_gen: v5e
topology: v5e:2x2
jax: 0.10.0
libtpu: 0.0.40
codegen_flags: <defaults>
</compile_context>

<pallas_src>
import numpy as np
import jax
import jax.numpy as jnp
from jax.experimental import pallas as pl
from jax.experimental.pallas import tpu as pltpu


_VMEM_LIMIT_BYTES = 32 * 1024 * 1024   # fits v7x's 64 MiB VMEM with headroom
_BN_EPS = 1e-5


def _round_up(x, m):
    return (x + m - 1) // m * m


def _pick_tile(padded_dim, preferred):
    """Largest tile <= preferred that divides padded_dim (padded_dim is always
    a multiple of 128)."""
    t = min(preferred, padded_dim)
    while padded_dim % t:
        t //= 2
    return t


# --------------------------------------------------------------------------
# Kernel 1: tiled matmul with fused BN scale/bias (+ReLU) epilogue
# --------------------------------------------------------------------------

def _make_matmul_kernel(relu):
    def kernel(x_ref, w_ref, s_ref, b_ref, o_ref, acc_ref):
        k = pl.program_id(2)

        @pl.when(k == 0)
        def _():
            acc_ref[...] = jnp.zeros_like(acc_ref)

        acc_ref[...] += jnp.dot(x_ref[...], w_ref[...],
                                preferred_element_type=jnp.float32)

        @pl.when(k == pl.num_programs(2) - 1)
        def _():
            out = acc_ref[...] * s_ref[...] + b_ref[...]
            if relu:
                out = jnp.maximum(out, 0.0)
            o_ref[...] = out.astype(o_ref.dtype)

    return kernel


_MATMUL_KERNELS = {True: _make_matmul_kernel(True),
                   False: _make_matmul_kernel(False)}


def matmul_scale_bias(x, w_p, scale_p, bias_p, *, relu, out_dtype=jnp.bfloat16):
    """(M,K) @ (Kp,Np) * scale + bias (+ReLU); weights/scale/bias pre-padded."""
    M, K = x.shape
    Kp, Np = w_p.shape
    tm = min(256, _round_up(M, 16))
    Mp = _round_up(M, tm)
    tk = _pick_tile(Kp, 512)
    tn = _pick_tile(Np, 256)
    xp = jnp.pad(x.astype(jnp.bfloat16), ((0, Mp - M), (0, Kp - K)))
    out = pl.pallas_call(
        _MATMUL_KERNELS[bool(relu)],
        out_shape=jax.ShapeDtypeStruct((Mp, Np), out_dtype),
        grid=(Mp // tm, Np // tn, Kp // tk),
        in_specs=[
            pl.BlockSpec((tm, tk), lambda i, j, k: (i, k)),
            pl.BlockSpec((tk, tn), lambda i, j, k: (k, j)),
            pl.BlockSpec((1, tn), lambda i, j, k: (0, j)),
            pl.BlockSpec((1, tn), lambda i, j, k: (0, j)),
        ],
        out_specs=pl.BlockSpec((tm, tn), lambda i, j, k: (i, j)),
        scratch_shapes=[pltpu.VMEM((tm, tn), jnp.float32)],
        compiler_params=pltpu.CompilerParams(
            dimension_semantics=("parallel", "parallel", "arbitrary"),
            vmem_limit_bytes=_VMEM_LIMIT_BYTES),
    )(xp, w_p, scale_p, bias_p)
    return out[:M]


# --------------------------------------------------------------------------
# Kernel 2: direct 3x3 stride-1 conv + BN (no im2col).
# One haloed window DMA per M tile (double-buffered across grid steps);
# in-kernel unrolled 9-tap MXU reduction over statically shifted slices of the
# flattened, zero-padded activation.
# --------------------------------------------------------------------------

def _make_conv3x3_kernel(tm, Wp, rows_buf, Mt, Nt):
    offs = [dy * Wp + dx for dy in range(3) for dx in range(3)]
    total = Mt * Nt

    def kernel(x_hbm, w_ref, s_ref, b_ref, o_ref, acc_ref, xbuf, sem):
        n = pl.program_id(0)
        m = pl.program_id(1)
        step = n * Mt + m
        slot = step % 2
        nslot = 1 - slot

        def start_dma(mi, sl):
            pltpu.make_async_copy(x_hbm.at[pl.ds(mi * tm, rows_buf)],
                                  xbuf.at[sl], sem.at[sl]).start()

        @pl.when(step == 0)
        def _():
            start_dma(0, 0)                  # prime the first window

        # Wait for this step's window (dummy src slice of matching shape).
        pltpu.make_async_copy(x_hbm.at[pl.ds(0, rows_buf)],
                              xbuf.at[slot], sem.at[slot]).wait()

        @pl.when(step < total - 1)
        def _():
            next_m = jnp.where(m == Mt - 1, 0, m + 1)
            start_dma(next_m, nslot)         # prefetch next step's window

        acc_ref[...] = jnp.dot(xbuf[slot, pl.ds(offs[0], tm), :], w_ref[0],
                               preferred_element_type=jnp.float32)
        for t in range(1, 9):
            acc_ref[...] += jnp.dot(xbuf[slot, pl.ds(offs[t], tm), :], w_ref[t],
                                    preferred_element_type=jnp.float32)
        o_ref[...] = (acc_ref[...] * s_ref[...] + b_ref[...]).astype(o_ref.dtype)

    return kernel


def conv3x3_s1_bn(x, prep):
    """Dense 3x3, stride 1, pad 1, + folded BN (no ReLU), NHWC."""
    B, H, W, Cin = x.shape
    Hp, Wp = H + 2, W + 2
    _, Cin_p, Np = prep["w"].shape
    cout = prep["cout"]
    xq = jnp.pad(x.astype(jnp.bfloat16),
                 ((0, 0), (1, 1), (1, 1), (0, Cin_p - Cin)))
    M = B * Hp * Wp
    tm = min(256, _round_up(M, 16))
    Mt = -(-M // tm)
    d_max = 2 * Wp + 2                       # largest tap offset
    pad_rows = _round_up(d_max, 16)
    rows_buf = tm + pad_rows                 # window = tile + halo
    R = Mt * tm + pad_rows                   # extra rows so shifts stay in-bounds
    xflat = jnp.pad(xq.reshape(M, Cin_p), ((0, R - M), (0, 0)))
    tn = _pick_tile(Np, 256)
    Nt = Np // tn
    out = pl.pallas_call(
        _make_conv3x3_kernel(tm, Wp, rows_buf, Mt, Nt),
        out_shape=jax.ShapeDtypeStruct((Mt * tm, Np), jnp.bfloat16),
        grid=(Nt, Mt),
        in_specs=[
            pl.BlockSpec(memory_space=pl.ANY),                       # raw HBM, manual DMA
            pl.BlockSpec((9, Cin_p, tn), lambda n, m: (0, 0, n)),
            pl.BlockSpec((1, tn), lambda n, m: (0, n)),
            pl.BlockSpec((1, tn), lambda n, m: (0, n)),
        ],
        out_specs=pl.BlockSpec((tm, tn), lambda n, m: (m, n)),
        scratch_shapes=[
            pltpu.VMEM((tm, tn), jnp.float32),
            pltpu.VMEM((2, rows_buf, Cin_p), jnp.bfloat16),
            pltpu.SemaphoreType.DMA((2,)),
        ],
        compiler_params=pltpu.CompilerParams(
            dimension_semantics=("arbitrary", "arbitrary"),
            vmem_limit_bytes=_VMEM_LIMIT_BYTES),
    )(xflat, prep["w"], prep["scale"], prep["bias"])
    return out[:M, :cout].reshape(B, Hp, Wp, cout)[:, :H, :W, :]


# --------------------------------------------------------------------------
# Kernel 3: tiled max pool (3x3 stride 2) — 9 windows, one pass over M tiles
# --------------------------------------------------------------------------

def _make_maxpool_kernel(n_taps):
    def kernel(*refs):
        o_ref = refs[n_taps]
        acc = refs[0][...]
        for i in range(1, n_taps):
            acc = jnp.maximum(acc, refs[i][...])
        o_ref[...] = acc
    return kernel


def max_pool2d_3x3_s2(x):
    B, H, W, C = x.shape
    k, s = 3, 2
    Ho = (H - k) // s + 1
    Wo = (W - k) // s + 1
    Cp = _round_up(C, 128)
    xq = jnp.pad(x, ((0, 0), (0, 0), (0, 0), (0, Cp - C)))
    M = B * Ho * Wo
    tm = min(512, _round_up(M, 16))
    Mp = _round_up(M, tm)
    views = []
    for ky in range(k):
        for kx in range(k):
            v = xq[:, ky:ky + (Ho - 1) * s + 1:s, kx:kx + (Wo - 1) * s + 1:s, :]
            views.append(jnp.pad(v.reshape(M, Cp), ((0, Mp - M), (0, 0))))
    out = pl.pallas_call(
        _make_maxpool_kernel(k * k),
        out_shape=jax.ShapeDtypeStruct((Mp, Cp), x.dtype),
        grid=(Mp // tm,),
        in_specs=[pl.BlockSpec((tm, Cp), lambda m: (m, 0))] * (k * k),
        out_specs=pl.BlockSpec((tm, Cp), lambda m: (m, 0)),
        compiler_params=pltpu.CompilerParams(
            dimension_semantics=("parallel",),
            vmem_limit_bytes=_VMEM_LIMIT_BYTES),
    )(*views)
    return out[:M, :C].reshape(B, Ho, Wo, C)


# --------------------------------------------------------------------------
# Kernel 4: global max pool, tiled over channels
# --------------------------------------------------------------------------

def _global_max_kernel(x_ref, o_ref):
    o_ref[...] = jnp.max(x_ref[...], axis=1)


def global_max_pool(x):
    B, H, W, C = x.shape
    S = H * W
    Bp = _round_up(B, 16)
    Cp = _round_up(C, 128)
    xr = jnp.pad(x.reshape(B, S, C), ((0, Bp - B), (0, 0), (0, Cp - C)))
    tc = _pick_tile(Cp, 256)
    out = pl.pallas_call(
        _global_max_kernel,
        out_shape=jax.ShapeDtypeStruct((Bp, Cp), x.dtype),
        grid=(Cp // tc,),
        in_specs=[pl.BlockSpec((Bp, S, tc), lambda c: (0, 0, c))],
        out_specs=pl.BlockSpec((Bp, tc), lambda c: (0, c)),
        compiler_params=pltpu.CompilerParams(
            dimension_semantics=("parallel",),
            vmem_limit_bytes=_VMEM_LIMIT_BYTES),
    )(xr)
    return out[:B, :C]


# ------------------------------- conv wrappers -----------------------------

def conv1x1_bn(x, prep, *, relu):
    B, H, W, Cin = x.shape
    y = matmul_scale_bias(x.reshape(B * H * W, Cin), prep["w"], prep["scale"],
                          prep["bias"], relu=relu)
    return y[:, :prep["cout"]].reshape(B, H, W, prep["cout"])


def conv_im2col_bn(x, prep, *, stride, padding, relu):
    # TODO(synk): stride-2 3x3 convs (and the stem) still materialize the
    # im2col patch matrix in HBM; only stride-1 3x3 convs use the direct
    # windowed tap-reduction kernel above.
    k, cin, cout = prep["k"], prep["cin"], prep["cout"]
    B = x.shape[0]
    xp = jnp.pad(x, ((0, 0), (padding, padding), (padding, padding), (0, 0)))
    Hp, Wp = xp.shape[1], xp.shape[2]
    Ho = (Hp - k) // stride + 1
    Wo = (Wp - k) // stride + 1
    views = [xp[:, ky:ky + (Ho - 1) * stride + 1:stride,
                 kx:kx + (Wo - 1) * stride + 1:stride, :]
             for ky in range(k) for kx in range(k)]
    patches = jnp.concatenate(views, axis=-1).reshape(B * Ho * Wo, k * k * cin)
    y = matmul_scale_bias(patches, prep["w"], prep["scale"], prep["bias"], relu=relu)
    return y[:, :cout].reshape(B, Ho, Wo, cout)


def channel_shuffle(x, groups):
    B, H, W, C = x.shape
    x = x.reshape(B, H, W, C // groups, groups)
    x = jnp.transpose(x, (0, 1, 2, 4, 3))
    return x.reshape(B, H, W, C)


# ------------------------------ forward passes ------------------------------

def shufflenet_unit(x, p):
    C = x.shape[-1]
    shortcut, y = x[..., :C // 2], x[..., C // 2:]
    y = conv1x1_bn(y, p["conv2d_bn_relu"], relu=True)
    y = conv3x3_s1_bn(y, p["dconv_bn"])
    y = conv1x1_bn(y, p["conv2d_bn_relu"], relu=True)   # same module applied twice (as in reference)
    return jnp.concatenate([shortcut, y], axis=-1)


def shufflenet_unit2(x, p):
    y = conv1x1_bn(x, p["conv1_bn_relu"], relu=True)
    y = conv_im2col_bn(y, p["dconv_bn"], stride=2, padding=1, relu=False)
    y = conv1x1_bn(y, p["conv2_bn_relu"], relu=True)
    sc = conv_im2col_bn(x, p["shortcut_dconv_bn"], stride=2, padding=1, relu=False)
    sc = conv1x1_bn(sc, p["shortcut_conv_bn_relu"], relu=True)
    out = jnp.concatenate([y, sc], axis=-1)
    return channel_shuffle(out, 2)


def _forward_impl(x_nchw, prep):
    x = jnp.transpose(x_nchw, (0, 2, 3, 1)).astype(jnp.bfloat16)   # NCHW -> NHWC
    x = conv_im2col_bn(x, prep["conv1"], stride=2, padding=1, relu=True)
    x = max_pool2d_3x3_s2(x)                                       # nn.MaxPool2d(3, 2)
    for sname in ("stage2", "stage3", "stage4"):
        blocks = prep[sname]
        x = shufflenet_unit2(x, blocks[0])
        for bp in blocks[1:]:
            x = shufflenet_unit(x, bp)
    x = conv1x1_bn(x, prep["conv5"], relu=True)
    x = global_max_pool(x)                                         # (B, 1024)
    lin = prep["linear"]
    logits = matmul_scale_bias(x, lin["w"], lin["scale"], lin["bias"],
                               relu=False, out_dtype=jnp.float32)
    return logits[:, :lin["cout"]]


def make_forward(prep):
    return jax.jit(lambda x: _forward_impl(x, prep))


# ------------------------ parameter init & preparation ----------------------

def init_conv_bn(key, cin, cout, k):
    kc, kb, kg, kt = jax.random.split(key, 4)
    fan_in = cin * k * k
    return {
        "w": jax.random.normal(kc, (k, k, cin, cout), jnp.float32) / np.sqrt(fan_in),
        "b": 0.01 * jax.random.normal(kb, (cout,), jnp.float32),
        "gamma": 1.0 + 0.02 * jax.random.normal(kg, (cout,), jnp.float32),
        "beta": 0.02 * jax.random.normal(kt, (cout,), jnp.float32),
    }


def init_params(key, input_channel, channels_per_stage):
    keys = jax.random.split(key, 6)

    def init_stage(k, cin, cout, num_blocks):
        bkeys = jax.random.split(k, num_blocks)
        ks5 = jax.random.split(bkeys[0], 5)
        blocks = [{
            "conv1_bn_relu": init_conv_bn(ks5[0], cin, cout // 2, 1),
            "dconv_bn": init_conv_bn(ks5[1], cout // 2, cout // 2, 3),
            "conv2_bn_relu": init_conv_bn(ks5[2], cout // 2, cout - cin, 1),
            "shortcut_dconv_bn": init_conv_bn(ks5[3], cin, cin, 3),
            "shortcut_conv_bn_relu": init_conv_bn(ks5[4], cin, cin, 1),
        }]
        for i in range(1, num_blocks):
            ks2 = jax.random.split(bkeys[i], 2)
            blocks.append({
                "conv2d_bn_relu": init_conv_bn(ks2[0], cout // 2, cout // 2, 1),
                "dconv_bn": init_conv_bn(ks2[1], cout // 2, cout // 2, 3),
            })
        return blocks

    c2, c3, c4 = channels_per_stage
    params = {
        "conv1": init_conv_bn(keys[0], 3, input_channel, 3),
        "stage2": init_stage(keys[1], input_channel, c2, 4),
        "stage3": init_stage(keys[2], c2, c3, 8),
        "stage4": init_stage(keys[3], c3, c4, 4),
        "conv5": init_conv_bn(keys[4], c4, 1024, 1),
    }
    kl1, kl2 = jax.random.split(keys[5])
    params["linear"] = {                    # nn.Linear(1024, 1000) stored as (in, out)
        "w": jax.random.normal(kl1, (1024, 1000), jnp.float32) / np.sqrt(1024.0),
        "b": 0.01 * jax.random.normal(kl2, (1000,), jnp.float32),
    }
    return params


def _fold_bn(p):
    # TODO(synk): BatchNorm folded in inference mode (running_mean=0,
    # running_var=1); PyTorch-default training-mode batch statistics are not
    # recomputed here.
    scale = p["gamma"] / jnp.sqrt(1.0 + _BN_EPS)
    bias = p["beta"] + p["b"] * scale
    return scale, bias


def _pad_sb(scale, bias, cout, Np):
    s = jnp.pad(scale, (0, Np - cout)).reshape(1, Np).astype(jnp.float32)
    b = jnp.pad(bias, (0, Np - cout)).reshape(1, Np).astype(jnp.float32)
    return s, b


def _prep_matmul_conv(p):
    """1x1 convs and im2col'd (stride-2) kxk convs: weight as (Kp, Np) bf16."""
    kh, kw, cin, cout = p["w"].shape
    K = kh * kw * cin
    Kp, Np = _round_up(K, 128), _round_up(cout, 128)
    w = jnp.pad(p["w"].reshape(K, cout),
                ((0, Kp - K), (0, Np - cout))).astype(jnp.bfloat16)
    scale, bias = _fold_bn(p)
    s, b = _pad_sb(scale, bias, cout, Np)
    return {"w": w, "scale": s, "bias": b, "cout": cout, "cin": cin, "k": kh}


def _prep_tap_conv(p):
    """Stride-1 3x3 convs: weight stored per tap, (9, Cin_p, Np) bf16."""
    kh, kw, cin, cout = p["w"].shape
    Cin_p, Np = _round_up(cin, 128), _round_up(cout, 128)
    w = jnp.pad(p["w"].reshape(kh * kw, cin, cout),
                ((0, 0), (0, Cin_p - cin), (0, Np - cout))).astype(jnp.bfloat16)
    scale, bias = _fold_bn(p)
    s, b = _pad_sb(scale, bias, cout, Np)
    return {"w": w, "scale": s, "bias": b, "cout": cout}


def prepare_params(params):
    """Fold BN into scale/bias and pre-pad/cast all weights once."""
    prep = {
        "conv1": _prep_matmul_conv(params["conv1"]),
        "conv5": _prep_matmul_conv(params["conv5"]),
    }
    for sname in ("stage2", "stage3", "stage4"):
        raw = params[sname]
        blocks = [{
            "conv1_bn_relu": _prep_matmul_conv(raw[0]["conv1_bn_relu"]),
            "dconv_bn": _prep_matmul_conv(raw[0]["dconv_bn"]),
            "conv2_bn_relu": _prep_matmul_conv(raw[0]["conv2_bn_relu"]),
            "shortcut_dconv_bn": _prep_matmul_conv(raw[0]["shortcut_dconv_bn"]),
            "shortcut_conv_bn_relu": _prep_matmul_conv(raw[0]["shortcut_conv_bn_relu"]),
        }]
        for bp in raw[1:]:
            blocks.append({
                "conv2d_bn_relu": _prep_matmul_conv(bp["conv2d_bn_relu"]),
                "dconv_bn": _prep_tap_conv(bp["dconv_bn"]),
            })
        prep[sname] = blocks
    w, b = params["linear"]["w"], params["linear"]["b"]
    K, N = w.shape
    Kp, Np = _round_up(K, 128), _round_up(N, 128)
    prep["linear"] = {
        "w": jnp.pad(w, ((0, Kp - K), (0, Np - N))).astype(jnp.bfloat16),
        "scale": jnp.ones((1, Np), jnp.float32),
        "bias": jnp.pad(b, (0, Np - N)).reshape(1, Np).astype(jnp.float32),
        "cout": N,
    }
    return prep


if __name__ == "__main__":
    key = jax.random.PRNGKey(0)
    pkey, xkey = jax.random.split(key)

    # Small synthetic configuration (module default is (116, 232, 464)).
    input_channel = 8
    channels_per_stage = (16, 32, 64)
    params = init_params(pkey, input_channel, channels_per_stage)
    prep = prepare_params(params)
    fwd = make_forward(prep)

    # NCHW input, like PyTorch.
    x = jax.random.normal(xkey, (2, 3, 32, 32), jnp.float32)

    logits = jax.block_until_ready(fwd(x))
    assert logits.shape == (2, 1000), logits.shape
    assert bool(jnp.all(jnp.isfinite(logits)))
    print("KERNEL_OK")
</pallas_src>

<mosaic_0001>
module attributes {stable_mosaic.version = 11 : i64} {
  func.func @kernel(%arg0: i32, %arg1: i32, %arg2: i32, %arg3: memref<256x128xbf16, #tpu.memory_space<vmem>>, %arg4: memref<128x128xbf16, #tpu.memory_space<vmem>>, %arg5: memref<1x128xf32, #tpu.memory_space<vmem>>, %arg6: memref<1x128xf32, #tpu.memory_space<vmem>>, %arg7: memref<256x128xbf16, #tpu.memory_space<vmem>>, %arg8: memref<256x128xf32, #tpu.memory_space<vmem>>) attributes {dimension_semantics = [#tpu.dimension_semantics<parallel>, #tpu.dimension_semantics<parallel>, #tpu.dimension_semantics<arbitrary>], iteration_bounds = array<i64: 2, 1, 1>, scalar_prefetch = 0 : i64, scratch_operands = 1 : i64, tpu.core_type = #tpu.core_type<tc>, window_params = [{transform_indices = @transform_0, window_bounds = array<i64: 256, 128>}, {transform_indices = @transform_1, window_bounds = array<i64: 128, 128>}, {transform_indices = @transform_2, window_bounds = array<i64: 1, 128>}, {transform_indices = @transform_3, window_bounds = array<i64: 1, 128>}, {transform_indices = @transform_4, window_bounds = array<i64: 256, 128>}]} {
    %c0_i32 = arith.constant 0 : i32
    %0 = arith.cmpi eq, %arg2, %c0_i32 : i32
    %1 = arith.extui %0 : i1 to i32
    %c0_i32_0 = arith.constant 0 : i32
    %2 = arith.cmpi ne, %1, %c0_i32_0 : i32
    scf.if %2 {
      %cst_10 = arith.constant 0.000000e+00 : f32
      %12 = vector.broadcast %cst_10 : f32 to vector<256x128xf32>
      %c0_11 = arith.constant 0 : index
      %c0_12 = arith.constant 0 : index
      %13 = vector.load %arg8[%c0_11, %c0_12] : memref<256x128xf32, #tpu.memory_space<vmem>>, vector<256x128xf32>
      tpu.vector_store %arg8[%c0_11, %c0_12], %12 {strides = array<i32>} : memref<256x128xf32, #tpu.memory_space<vmem>>, vector<256x128xf32>,
    } else {
    }
    %c0 = arith.constant 0 : index
    %c0_1 = arith.constant 0 : index
    %3 = vector.load %arg8[%c0, %c0_1] : memref<256x128xf32, #tpu.memory_space<vmem>>, vector<256x128xf32>
    %c0_2 = arith.constant 0 : index
    %c0_3 = arith.constant 0 : index
    %4 = vector.load %arg3[%c0_2, %c0_3] : memref<256x128xbf16, #tpu.memory_space<vmem>>, vector<256x128xbf16>
    %c0_4 = arith.constant 0 : index
    %c0_5 = arith.constant 0 : index
    %5 = vector.load %arg4[%c0_4, %c0_5] : memref<128x128xbf16, #tpu.memory_space<vmem>>, vector<128x128xbf16>
    %cst = arith.constant dense<0.000000e+00> : vector<256x128xf32>
    %6 = tpu.matmul %4, %5, %cst {dimension_numbers = #tpu.dot_dimension_numbers<[1], [0], [0], [1], [0, 0, 1, 1], [], []>} : vector<256x128xbf16>, vector<128x128xbf16>, vector<256x128xf32> -> vector<256x128xf32>
    %7 = arith.addf %3, %6 : vector<256x128xf32>
    %c0_6 = arith.constant 0 : index
    %c0_7 = arith.constant 0 : index
    %8 = vector.load %arg8[%c0_6, %c0_7] : memref<256x128xf32, #tpu.memory_space<vmem>>, vector<256x128xf32>
    tpu.vector_store %arg8[%c0_6, %c0_7], %7 {strides = array<i32>} : memref<256x128xf32, #tpu.memory_space<vmem>>, vector<256x128xf32>,
    %c0_i32_8 = arith.constant 0 : i32
    %9 = arith.cmpi eq, %arg2, %c0_i32_8 : i32
    %10 = arith.extui %9 : i1 to i32
    %c0_i32_9 = arith.constant 0 : i32
    %11 = arith.cmpi ne, %10, %c0_i32_9 : i32
    scf.if %11 {
      %c0_10 = arith.constant 0 : index
      %c0_11 = arith.constant 0 : index
      %12 = vector.load %arg8[%c0_10, %c0_11] : memref<256x128xf32, #tpu.memory_space<vmem>>, vector<256x128xf32>
      %c0_12 = arith.constant 0 : index
      %c0_13 = arith.constant 0 : index
      %13 = vector.load %arg5[%c0_12, %c0_13] : memref<1x128xf32, #tpu.memory_space<vmem>>, vector<1x128xf32>
      %14 = vector.broadcast %13 : vector<1x128xf32> to vector<256x128xf32>
      %15 = arith.mulf %12, %14 : vector<256x128xf32>
      %c0_14 = arith.constant 0 : index
      %c0_15 = arith.constant 0 : index
      %16 = vector.load %arg6[%c0_14, %c0_15] : memref<1x128xf32, #tpu.memory_space<vmem>>, vector<1x128xf32>
      %17 = vector.broadcast %16 : vector<1x128xf32> to vector<256x128xf32>
      %18 = arith.addf %15, %17 : vector<256x128xf32>
      %cst_16 = arith.constant 0.000000e+00 : f32
      %19 = vector.broadcast %cst_16 : f32 to vector<256x128xf32>
      %20 = arith.maximumf %18, %19 : vector<256x128xf32>
      %21 = arith.truncf %20 : vector<256x128xf32> to vector<256x128xbf16>
      %c0_17 = arith.constant 0 : index
      %c0_18 = arith.constant 0 : index
      %22 = vector.load %arg7[%c0_17, %c0_18] : memref<256x128xbf16, #tpu.memory_space<vmem>>, vector<256x128xbf16>
      tpu.vector_store %arg7[%c0_17, %c0_18], %21 {strides = array<i32>} : memref<256x128xbf16, #tpu.memory_space<vmem>>, vector<256x128xbf16>,
    } else {
    }
    return
  }
  func.func @transform_0(%arg0: i32, %arg1: i32, %arg2: i32) -> (i32, i32) {
    %c0_i32 = arith.constant 0 : i32
    return %arg0, %arg2 : i32, i32
  }
  func.func @transform_1(%arg0: i32, %arg1: i32, %arg2: i32) -> (i32, i32) {
    %c0_i32 = arith.constant 0 : i32
    return %arg2, %arg1 : i32, i32
  }
  func.func @transform_2(%arg0: i32, %arg1: i32, %arg2: i32) -> (i32, i32) {
    %c0_i32 = arith.constant 0 : i32
    %c0_i32_0 = arith.constant 0 : i32
    return %c0_i32, %arg1 : i32, i32
  }
  func.func @transform_3(%arg0: i32, %arg1: i32, %arg2: i32) -> (i32, i32) {
    %c0_i32 = arith.constant 0 : i32
    %c0_i32_0 = arith.constant 0 : i32
    return %c0_i32, %arg1 : i32, i32
  }
  func.func @transform_4(%arg0: i32, %arg1: i32, %arg2: i32) -> (i32, i32) {
    %c0_i32 = arith.constant 0 : i32
    return %arg0, %arg1 : i32, i32
  }
}

module attributes {stable_mosaic.version = 11 : i64} {
  func.func @kernel(%arg0: i32, %arg1: memref<112x128xbf16, #tpu.memory_space<vmem>>, %arg2: memref<112x128xbf16, #tpu.memory_space<vmem>>, %arg3: memref<112x128xbf16, #tpu.memory_space<vmem>>, %arg4: memref<112x128xbf16, #tpu.memory_space<vmem>>, %arg5: memref<112x128xbf16, #tpu.memory_space<vmem>>, %arg6: memref<112x128xbf16, #tpu.memory_space<vmem>>, %arg7: memref<112x128xbf16, #tpu.memory_space<vmem>>, %arg8: memref<112x128xbf16, #tpu.memory_space<vmem>>, %arg9: memref<112x128xbf16, #tpu.memory_space<vmem>>, %arg10: memref<112x128xbf16, #tpu.memory_space<vmem>>) attributes {dimension_semantics = [#tpu.dimension_semantics<parallel>], iteration_bounds = array<i64: 1>, scalar_prefetch = 0 : i64, scratch_operands = 0 : i64, tpu.core_type = #tpu.core_type<tc>, window_params = [{transform_indices = @transform_0, window_bounds = array<i64: 112, 128>}, {transform_indices = @transform_1, window_bounds = array<i64: 112, 128>}, {transform_indices = @transform_2, window_bounds = array<i64: 112, 128>}, {transform_indices = @transform_3, window_bounds = array<i64: 112, 128>}, {transform_indices = @transform_4, window_bounds = array<i64: 112, 128>}, {transform_indices = @transform_5, window_bounds = array<i64: 112, 128>}, {transform_indices = @transform_6, window_bounds = array<i64: 112, 128>}, {transform_indices = @transform_7, window_bounds = array<i64: 112, 128>}, {transform_indices = @transform_8, window_bounds = array<i64: 112, 128>}, {transform_indices = @transform_9, window_bounds = array<i64: 112, 128>}]} {
    %c0 = arith.constant 0 : index
    %c0_0 = arith.constant 0 : index
    %0 = vector.load %arg1[%c0, %c0_0] : memref<112x128xbf16, #tpu.memory_space<vmem>>, vector<112x128xbf16>
    %c0_1 = arith.constant 0 : index
    %c0_2 = arith.constant 0 : index
    %1 = vector.load %arg2[%c0_1, %c0_2] : memref<112x128xbf16, #tpu.memory_space<vmem>>, vector<112x128xbf16>
    %2 = arith.maximumf %0, %1 : vector<112x128xbf16>
    %c0_3 = arith.constant 0 : index
    %c0_4 = arith.constant 0 : index
    %3 = vector.load %arg3[%c0_3, %c0_4] : memref<112x128xbf16, #tpu.memory_space<vmem>>, vector<112x128xbf16>
    %4 = arith.maximumf %2, %3 : vector<112x128xbf16>
    %c0_5 = arith.constant 0 : index
    %c0_6 = arith.constant 0 : index
    %5 = vector.load %arg4[%c0_5, %c0_6] : memref<112x128xbf16, #tpu.memory_space<vmem>>, vector<112x128xbf16>
    %6 = arith.maximumf %4, %5 : vector<112x128xbf16>
    %c0_7 = arith.constant 0 : index
    %c0_8 = arith.constant 0 : index
    %7 = vector.load %arg5[%c0_7, %c0_8] : memref<112x128xbf16, #tpu.memory_space<vmem>>, vector<112x128xbf16>
    %8 = arith.maximumf %6, %7 : vector<112x128xbf16>
    %c0_9 = arith.constant 0 : index
    %c0_10 = arith.constant 0 : index
    %9 = vector.load %arg6[%c0_9, %c0_10] : memref<112x128xbf16, #tpu.memory_space<vmem>>, vector<112x128xbf16>
    %10 = arith.maximumf %8, %9 : vector<112x128xbf16>
    %c0_11 = arith.constant 0 : index
    %c0_12 = arith.constant 0 : index
    %11 = vector.load %arg7[%c0_11, %c0_12] : memref<112x128xbf16, #tpu.memory_space<vmem>>, vector<112x128xbf16>
    %12 = arith.maximumf %10, %11 : vector<112x128xbf16>
    %c0_13 = arith.constant 0 : index
    %c0_14 = arith.constant 0 : index
    %13 = vector.load %arg8[%c0_13, %c0_14] : memref<112x128xbf16, #tpu.memory_space<vmem>>, vector<112x128xbf16>
    %14 = arith.maximumf %12, %13 : vector<112x128xbf16>
    %c0_15 = arith.constant 0 : index
    %c0_16 = arith.constant 0 : index
    %15 = vector.load %arg9[%c0_15, %c0_16] : memref<112x128xbf16, #tpu.memory_space<vmem>>, vector<112x128xbf16>
    %16 = arith.maximumf %14, %15 : vector<112x128xbf16>
    %c0_17 = arith.constant 0 : index
    %c0_18 = arith.constant 0 : index
    %17 = vector.load %arg10[%c0_17, %c0_18] : memref<112x128xbf16, #tpu.memory_space<vmem>>, vector<112x128xbf16>
    tpu.vector_store %arg10[%c0_17, %c0_18], %16 {strides = array<i32>} : memref<112x128xbf16, #tpu.memory_space<vmem>>, vector<112x128xbf16>,
    return
  }
  func.func @transform_0(%arg0: i32) -> (i32, i32) {
    %c0_i32 = arith.constant 0 : i32
    %c0_i32_0 = arith.constant 0 : i32
    return %arg0, %c0_i32 : i32, i32
  }
  func.func @transform_1(%arg0: i32) -> (i32, i32) {
    %c0_i32 = arith.constant 0 : i32
    %c0_i32_0 = arith.constant 0 : i32
    return %arg0, %c0_i32 : i32, i32
  }
  func.func @transform_2(%arg0: i32) -> (i32, i32) {
    %c0_i32 = arith.constant 0 : i32
    %c0_i32_0 = arith.constant 0 : i32
    return %arg0, %c0_i32 : i32, i32
  }
  func.func @transform_3(%arg0: i32) -> (i32, i32) {
    %c0_i32 = arith.constant 0 : i32
    %c0_i32_0 = arith.constant 0 : i32
    return %arg0, %c0_i32 : i32, i32
  }
  func.func @transform_4(%arg0: i32) -> (i32, i32) {
    %c0_i32 = arith.constant 0 : i32
    %c0_i32_0 = arith.constant 0 : i32
    return %arg0, %c0_i32 : i32, i32
  }
  func.func @transform_5(%arg0: i32) -> (i32, i32) {
    %c0_i32 = arith.constant 0 : i32
    %c0_i32_0 = arith.constant 0 : i32
    return %arg0, %c0_i32 : i32, i32
  }
  func.func @transform_6(%arg0: i32) -> (i32, i32) {
    %c0_i32 = arith.constant 0 : i32
    %c0_i32_0 = arith.constant 0 : i32
    return %arg0, %c0_i32 : i32, i32
  }
  func.func @transform_7(%arg0: i32) -> (i32, i32) {
    %c0_i32 = arith.constant 0 : i32
    %c0_i32_0 = arith.constant 0 : i32
    return %arg0, %c0_i32 : i32, i32
  }
  func.func @transform_8(%arg0: i32) -> (i32, i32) {
    %c0_i32 = arith.constant 0 : i32
    %c0_i32_0 = arith.constant 0 : i32
    return %arg0, %c0_i32 : i32, i32
  }
  func.func @transform_9(%arg0: i32) -> (i32, i32) {
    %c0_i32 = arith.constant 0 : i32
    %c0_i32_0 = arith.constant 0 : i32
    return %arg0, %c0_i32 : i32, i32
  }
}

module attributes {stable_mosaic.version = 11 : i64} {
  func.func @kernel(%arg0: i32, %arg1: i32, %arg2: i32, %arg3: memref<32x128xbf16, #tpu.memory_space<vmem>>, %arg4: memref<128x128xbf16, #tpu.memory_space<vmem>>, %arg5: memref<1x128xf32, #tpu.memory_space<vmem>>, %arg6: memref<1x128xf32, #tpu.memory_space<vmem>>, %arg7: memref<32x128xbf16, #tpu.memory_space<vmem>>, %arg8: memref<32x128xf32, #tpu.memory_space<vmem>>) attributes {dimension_semantics = [#tpu.dimension_semantics<parallel>, #tpu.dimension_semantics<parallel>, #tpu.dimension_semantics<arbitrary>], iteration_bounds = array<i64: 1, 1, 1>, scalar_prefetch = 0 : i64, scratch_operands = 1 : i64, tpu.core_type = #tpu.core_type<tc>, window_params = [{transform_indices = @transform_0, window_bounds = array<i64: 32, 128>}, {transform_indices = @transform_1, window_bounds = array<i64: 128, 128>}, {transform_indices = @transform_2, window_bounds = array<i64: 1, 128>}, {transform_indices = @transform_3, window_bounds = array<i64: 1, 128>}, {transform_indices = @transform_4, window_bounds = array<i64: 32, 128>}]} {
    %c0_i32 = arith.constant 0 : i32
    %0 = arith.cmpi eq, %arg2, %c0_i32 : i32
    %1 = arith.extui %0 : i1 to i32
    %c0_i32_0 = arith.constant 0 : i32
    %2 = arith.cmpi ne, %1, %c0_i32_0 : i32
    scf.if %2 {
      %cst_10 = arith.constant 0.000000e+00 : f32
      %12 = vector.broadcast %cst_10 : f32 to vector<32x128xf32>
      %c0_11 = arith.constant 0 : index
      %c0_12 = arith.constant 0 : index
      %13 = vector.load %arg8[%c0_11, %c0_12] : memref<32x128xf32, #tpu.memory_space<vmem>>, vector<32x128xf32>
      tpu.vector_store %arg8[%c0_11, %c0_12], %12 {strides = array<i32>} : memref<32x128xf32, #tpu.memory_space<vmem>>, vector<32x128xf32>,
    } else {
    }
    %c0 = arith.constant 0 : index
    %c0_1 = arith.constant 0 : index
    %3 = vector.load %arg8[%c0, %c0_1] : memref<32x128xf32, #tpu.memory_space<vmem>>, vector<32x128xf32>
    %c0_2 = arith.constant 0 : index
    %c0_3 = arith.constant 0 : index
    %4 = vector.load %arg3[%c0_2, %c0_3] : memref<32x128xbf16, #tpu.memory_space<vmem>>, vector<32x128xbf16>
    %c0_4 = arith.constant 0 : index
    %c0_5 = arith.constant 0 : index
    %5 = vector.load %arg4[%c0_4, %c0_5] : memref<128x128xbf16, #tpu.memory_space<vmem>>, vector<128x128xbf16>
    %cst = arith.constant dense<0.000000e+00> : vector<32x128xf32>
    %6 = tpu.matmul %4, %5, %cst {dimension_numbers = #tpu.dot_dimension_numbers<[1], [0], [0], [1], [0, 0, 1, 1], [], []>} : vector<32x128xbf16>, vector<128x128xbf16>, vector<32x128xf32> -> vector<32x128xf32>
    %7 = arith.addf %3, %6 : vector<32x128xf32>
    %c0_6 = arith.constant 0 : index
    %c0_7 = arith.constant 0 : index
    %8 = vector.load %arg8[%c0_6, %c0_7] : memref<32x128xf32, #tpu.memory_space<vmem>>, vector<32x128xf32>
    tpu.vector_store %arg8[%c0_6, %c0_7], %7 {strides = array<i32>} : memref<32x128xf32, #tpu.memory_space<vmem>>, vector<32x128xf32>,
    %c0_i32_8 = arith.constant 0 : i32
    %9 = arith.cmpi eq, %arg2, %c0_i32_8 : i32
    %10 = arith.extui %9 : i1 to i32
    %c0_i32_9 = arith.constant 0 : i32
    %11 = arith.cmpi ne, %10, %c0_i32_9 : i32
    scf.if %11 {
      %c0_10 = arith.constant 0 : index
      %c0_11 = arith.constant 0 : index
      %12 = vector.load %arg8[%c0_10, %c0_11] : memref<32x128xf32, #tpu.memory_space<vmem>>, vector<32x128xf32>
      %c0_12 = arith.constant 0 : index
      %c0_13 = arith.constant 0 : index
      %13 = vector.load %arg5[%c0_12, %c0_13] : memref<1x128xf32, #tpu.memory_space<vmem>>, vector<1x128xf32>
      %14 = vector.broadcast %13 : vector<1x128xf32> to vector<32x128xf32>
      %15 = arith.mulf %12, %14 : vector<32x128xf32>
      %c0_14 = arith.constant 0 : index
      %c0_15 = arith.constant 0 : index
      %16 = vector.load %arg6[%c0_14, %c0_15] : memref<1x128xf32, #tpu.memory_space<vmem>>, vector<1x128xf32>
      %17 = vector.broadcast %16 : vector<1x128xf32> to vector<32x128xf32>
      %18 = arith.addf %15, %17 : vector<32x128xf32>
      %cst_16 = arith.constant 0.000000e+00 : f32
      %19 = vector.broadcast %cst_16 : f32 to vector<32x128xf32>
      %20 = arith.maximumf %18, %19 : vector<32x128xf32>
      %21 = arith.truncf %20 : vector<32x128xf32> to vector<32x128xbf16>
      %c0_17 = arith.constant 0 : index
      %c0_18 = arith.constant 0 : index
      %22 = vector.load %arg7[%c0_17, %c0_18] : memref<32x128xbf16, #tpu.memory_space<vmem>>, vector<32x128xbf16>
      tpu.vector_store %arg7[%c0_17, %c0_18], %21 {strides = array<i32>} : memref<32x128xbf16, #tpu.memory_space<vmem>>, vector<32x128xbf16>,
    } else {
    }
    return
  }
  func.func @transform_0(%arg0: i32, %arg1: i32, %arg2: i32) -> (i32, i32) {
    %c0_i32 = arith.constant 0 : i32
    return %arg0, %arg2 : i32, i32
  }
  func.func @transform_1(%arg0: i32, %arg1: i32, %arg2: i32) -> (i32, i32) {
    %c0_i32 = arith.constant 0 : i32
    return %arg2, %arg1 : i32, i32
  }
  func.func @transform_2(%arg0: i32, %arg1: i32, %arg2: i32) -> (i32, i32) {
    %c0_i32 = arith.constant 0 : i32
    %c0_i32_0 = arith.constant 0 : i32
    return %c0_i32, %arg1 : i32, i32
  }
  func.func @transform_3(%arg0: i32, %arg1: i32, %arg2: i32) -> (i32, i32) {
    %c0_i32 = arith.constant 0 : i32
    %c0_i32_0 = arith.constant 0 : i32
    return %c0_i32, %arg1 : i32, i32
  }
  func.func @transform_4(%arg0: i32, %arg1: i32, %arg2: i32) -> (i32, i32) {
    %c0_i32 = arith.constant 0 : i32
    return %arg0, %arg1 : i32, i32
  }
}

module attributes {stable_mosaic.version = 11 : i64} {
  func.func @kernel(%arg0: i32, %arg1: i32, %arg2: i32, %arg3: memref<112x128xbf16, #tpu.memory_space<vmem>>, %arg4: memref<128x128xbf16, #tpu.memory_space<vmem>>, %arg5: memref<1x128xf32, #tpu.memory_space<vmem>>, %arg6: memref<1x128xf32, #tpu.memory_space<vmem>>, %arg7: memref<112x128xbf16, #tpu.memory_space<vmem>>, %arg8: memref<112x128xf32, #tpu.memory_space<vmem>>) attributes {dimension_semantics = [#tpu.dimension_semantics<parallel>, #tpu.dimension_semantics<parallel>, #tpu.dimension_semantics<arbitrary>], iteration_bounds = array<i64: 1, 1, 1>, scalar_prefetch = 0 : i64, scratch_operands = 1 : i64, tpu.core_type = #tpu.core_type<tc>, window_params = [{transform_indices = @transform_0, window_bounds = array<i64: 112, 128>}, {transform_indices = @transform_1, window_bounds = array<i64: 128, 128>}, {transform_indices = @transform_2, window_bounds = array<i64: 1, 128>}, {transform_indices = @transform_3, window_bounds = array<i64: 1, 128>}, {transform_indices = @transform_4, window_bounds = array<i64: 112, 128>}]} {
    %c0_i32 = arith.constant 0 : i32
    %0 = arith.cmpi eq, %arg2, %c0_i32 : i32
    %1 = arith.extui %0 : i1 to i32
    %c0_i32_0 = arith.constant 0 : i32
    %2 = arith.cmpi ne, %1, %c0_i32_0 : i32
    scf.if %2 {
      %cst_10 = arith.constant 0.000000e+00 : f32
      %12 = vector.broadcast %cst_10 : f32 to vector<112x128xf32>
      %c0_11 = arith.constant 0 : index
      %c0_12 = arith.constant 0 : index
      %13 = vector.load %arg8[%c0_11, %c0_12] : memref<112x128xf32, #tpu.memory_space<vmem>>, vector<112x128xf32>
      tpu.vector_store %arg8[%c0_11, %c0_12], %12 {strides = array<i32>} : memref<112x128xf32, #tpu.memory_space<vmem>>, vector<112x128xf32>,
    } else {
    }
    %c0 = arith.constant 0 : index
    %c0_1 = arith.constant 0 : index
    %3 = vector.load %arg8[%c0, %c0_1] : memref<112x128xf32, #tpu.memory_space<vmem>>, vector<112x128xf32>
    %c0_2 = arith.constant 0 : index
    %c0_3 = arith.constant 0 : index
    %4 = vector.load %arg3[%c0_2, %c0_3] : memref<112x128xbf16, #tpu.memory_space<vmem>>, vector<112x128xbf16>
    %c0_4 = arith.constant 0 : index
    %c0_5 = arith.constant 0 : index
    %5 = vector.load %arg4[%c0_4, %c0_5] : memref<128x128xbf16, #tpu.memory_space<vmem>>, vector<128x128xbf16>
    %cst = arith.constant dense<0.000000e+00> : vector<112x128xf32>
    %6 = tpu.matmul %4, %5, %cst {dimension_numbers = #tpu.dot_dimension_numbers<[1], [0], [0], [1], [0, 0, 1, 1], [], []>} : vector<112x128xbf16>, vector<128x128xbf16>, vector<112x128xf32> -> vector<112x128xf32>
    %7 = arith.addf %3, %6 : vector<112x128xf32>
    %c0_6 = arith.constant 0 : index
    %c0_7 = arith.constant 0 : index
    %8 = vector.load %arg8[%c0_6, %c0_7] : memref<112x128xf32, #tpu.memory_space<vmem>>, vector<112x128xf32>
    tpu.vector_store %arg8[%c0_6, %c0_7], %7 {strides = array<i32>} : memref<112x128xf32, #tpu.memory_space<vmem>>, vector<112x128xf32>,
    %c0_i32_8 = arith.constant 0 : i32
    %9 = arith.cmpi eq, %arg2, %c0_i32_8 : i32
    %10 = arith.extui %9 : i1 to i32
    %c0_i32_9 = arith.constant 0 : i32
    %11 = arith.cmpi ne, %10, %c0_i32_9 : i32
    scf.if %11 {
      %c0_10 = arith.constant 0 : index
      %c0_11 = arith.constant 0 : index
      %12 = vector.load %arg8[%c0_10, %c0_11] : memref<112x128xf32, #tpu.memory_space<vmem>>, vector<112x128xf32>
      %c0_12 = arith.constant 0 : index
      %c0_13 = arith.constant 0 : index
      %13 = vector.load %arg5[%c0_12, %c0_13] : memref<1x128xf32, #tpu.memory_space<vmem>>, vector<1x128xf32>
      %14 = vector.broadcast %13 : vector<1x128xf32> to vector<112x128xf32>
      %15 = arith.mulf %12, %14 : vector<112x128xf32>
      %c0_14 = arith.constant 0 : index
      %c0_15 = arith.constant 0 : index
      %16 = vector.load %arg6[%c0_14, %c0_15] : memref<1x128xf32, #tpu.memory_space<vmem>>, vector<1x128xf32>
      %17 = vector.broadcast %16 : vector<1x128xf32> to vector<112x128xf32>
      %18 = arith.addf %15, %17 : vector<112x128xf32>
      %cst_16 = arith.constant 0.000000e+00 : f32
      %19 = vector.broadcast %cst_16 : f32 to vector<112x128xf32>
      %20 = arith.maximumf %18, %19 : vector<112x128xf32>
      %21 = arith.truncf %20 : vector<112x128xf32> to vector<112x128xbf16>
      %c0_17 = arith.constant 0 : index
      %c0_18 = arith.constant 0 : index
      %22 = vector.load %arg7[%c0_17, %c0_18] : memref<112x128xbf16, #tpu.memory_space<vmem>>, vector<112x128xbf16>
      tpu.vector_store %arg7[%c0_17, %c0_18], %21 {strides = array<i32>} : memref<112x128xbf16, #tpu.memory_space<vmem>>, vector<112x128xbf16>,
    } else {
    }
    return
  }
  func.func @transform_0(%arg0: i32, %arg1: i32, %arg2: i32) -> (i32, i32) {
    %c0_i32 = arith.constant 0 : i32
    return %arg0, %arg2 : i32, i32
  }
  func.func @transform_1(%arg0: i32, %arg1: i32, %arg2: i32) -> (i32, i32) {
    %c0_i32 = arith.constant 0 : i32
    return %arg2, %arg1 : i32, i32
  }
  func.func @transform_2(%arg0: i32, %arg1: i32, %arg2: i32) -> (i32, i32) {
    %c0_i32 = arith.constant 0 : i32
    %c0_i32_0 = arith.constant 0 : i32
    return %c0_i32, %arg1 : i32, i32
  }
  func.func @transform_3(%arg0: i32, %arg1: i32, %arg2: i32) -> (i32, i32) {
    %c0_i32 = arith.constant 0 : i32
    %c0_i32_0 = arith.constant 0 : i32
    return %c0_i32, %arg1 : i32, i32
  }
  func.func @transform_4(%arg0: i32, %arg1: i32, %arg2: i32) -> (i32, i32) {
    %c0_i32 = arith.constant 0 : i32
    return %arg0, %arg1 : i32, i32
  }
}

module attributes {stable_mosaic.version = 11 : i64} {
  func.func @kernel(%arg0: i32, %arg1: i32, %arg2: i32, %arg3: memref<32x128xbf16, #tpu.memory_space<vmem>>, %arg4: memref<128x128xbf16, #tpu.memory_space<vmem>>, %arg5: memref<1x128xf32, #tpu.memory_space<vmem>>, %arg6: memref<1x128xf32, #tpu.memory_space<vmem>>, %arg7: memref<32x128xbf16, #tpu.memory_space<vmem>>, %arg8: memref<32x128xf32, #tpu.memory_space<vmem>>) attributes {dimension_semantics = [#tpu.dimension_semantics<parallel>, #tpu.dimension_semantics<parallel>, #tpu.dimension_semantics<arbitrary>], iteration_bounds = array<i64: 1, 1, 1>, scalar_prefetch = 0 : i64, scratch_operands = 1 : i64, tpu.core_type = #tpu.core_type<tc>, window_params = [{transform_indices = @transform_0, window_bounds = array<i64: 32, 128>}, {transform_indices = @transform_1, window_bounds = array<i64: 128, 128>}, {transform_indices = @transform_2, window_bounds = array<i64: 1, 128>}, {transform_indices = @transform_3, window_bounds = array<i64: 1, 128>}, {transform_indices = @transform_4, window_bounds = array<i64: 32, 128>}]} {
    %c0_i32 = arith.constant 0 : i32
    %0 = arith.cmpi eq, %arg2, %c0_i32 : i32
    %1 = arith.extui %0 : i1 to i32
    %c0_i32_0 = arith.constant 0 : i32
    %2 = arith.cmpi ne, %1, %c0_i32_0 : i32
    scf.if %2 {
      %cst_10 = arith.constant 0.000000e+00 : f32
      %12 = vector.broadcast %cst_10 : f32 to vector<32x128xf32>
      %c0_11 = arith.constant 0 : index
      %c0_12 = arith.constant 0 : index
      %13 = vector.load %arg8[%c0_11, %c0_12] : memref<32x128xf32, #tpu.memory_space<vmem>>, vector<32x128xf32>
      tpu.vector_store %arg8[%c0_11, %c0_12], %12 {strides = array<i32>} : memref<32x128xf32, #tpu.memory_space<vmem>>, vector<32x128xf32>,
    } else {
    }
    %c0 = arith.constant 0 : index
    %c0_1 = arith.constant 0 : index
    %3 = vector.load %arg8[%c0, %c0_1] : memref<32x128xf32, #tpu.memory_space<vmem>>, vector<32x128xf32>
    %c0_2 = arith.constant 0 : index
    %c0_3 = arith.constant 0 : index
    %4 = vector.load %arg3[%c0_2, %c0_3] : memref<32x128xbf16, #tpu.memory_space<vmem>>, vector<32x128xbf16>
    %c0_4 = arith.constant 0 : index
    %c0_5 = arith.constant 0 : index
    %5 = vector.load %arg4[%c0_4, %c0_5] : memref<128x128xbf16, #tpu.memory_space<vmem>>, vector<128x128xbf16>
    %cst = arith.constant dense<0.000000e+00> : vector<32x128xf32>
    %6 = tpu.matmul %4, %5, %cst {dimension_numbers = #tpu.dot_dimension_numbers<[1], [0], [0], [1], [0, 0, 1, 1], [], []>} : vector<32x128xbf16>, vector<128x128xbf16>, vector<32x128xf32> -> vector<32x128xf32>
    %7 = arith.addf %3, %6 : vector<32x128xf32>
    %c0_6 = arith.constant 0 : index
    %c0_7 = arith.constant 0 : index
    %8 = vector.load %arg8[%c0_6, %c0_7] : memref<32x128xf32, #tpu.memory_space<vmem>>, vector<32x128xf32>
    tpu.vector_store %arg8[%c0_6, %c0_7], %7 {strides = array<i32>} : memref<32x128xf32, #tpu.memory_space<vmem>>, vector<32x128xf32>,
    %c0_i32_8 = arith.constant 0 : i32
    %9 = arith.cmpi eq, %arg2, %c0_i32_8 : i32
    %10 = arith.extui %9 : i1 to i32
    %c0_i32_9 = arith.constant 0 : i32
    %11 = arith.cmpi ne, %10, %c0_i32_9 : i32
    scf.if %11 {
      %c0_10 = arith.constant 0 : index
      %c0_11 = arith.constant 0 : index
      %12 = vector.load %arg8[%c0_10, %c0_11] : memref<32x128xf32, #tpu.memory_space<vmem>>, vector<32x128xf32>
      %c0_12 = arith.constant 0 : index
      %c0_13 = arith.constant 0 : index
      %13 = vector.load %arg5[%c0_12, %c0_13] : memref<1x128xf32, #tpu.memory_space<vmem>>, vector<1x128xf32>
      %14 = vector.broadcast %13 : vector<1x128xf32> to vector<32x128xf32>
      %15 = arith.mulf %12, %14 : vector<32x128xf32>
      %c0_14 = arith.constant 0 : index
      %c0_15 = arith.constant 0 : index
      %16 = vector.load %arg6[%c0_14, %c0_15] : memref<1x128xf32, #tpu.memory_space<vmem>>, vector<1x128xf32>
      %17 = vector.broadcast %16 : vector<1x128xf32> to vector<32x128xf32>
      %18 = arith.addf %15, %17 : vector<32x128xf32>
      %19 = arith.truncf %18 : vector<32x128xf32> to vector<32x128xbf16>
      %c0_16 = arith.constant 0 : index
      %c0_17 = arith.constant 0 : index
      %20 = vector.load %arg7[%c0_16, %c0_17] : memref<32x128xbf16, #tpu.memory_space<vmem>>, vector<32x128xbf16>
      tpu.vector_store %arg7[%c0_16, %c0_17], %19 {strides = array<i32>} : memref<32x128xbf16, #tpu.memory_space<vmem>>, vector<32x128xbf16>,
    } else {
    }
    return
  }
  func.func @transform_0(%arg0: i32, %arg1: i32, %arg2: i32) -> (i32, i32) {
    %c0_i32 = arith.constant 0 : i32
    return %arg0, %arg2 : i32, i32
  }
  func.func @transform_1(%arg0: i32, %arg1: i32, %arg2: i32) -> (i32, i32) {
    %c0_i32 = arith.constant 0 : i32
    return %arg2, %arg1 : i32, i32
  }
  func.func @transform_2(%arg0: i32, %arg1: i32, %arg2: i32) -> (i32, i32) {
    %c0_i32 = arith.constant 0 : i32
    %c0_i32_0 = arith.constant 0 : i32
    return %c0_i32, %arg1 : i32, i32
  }
  func.func @transform_3(%arg0: i32, %arg1: i32, %arg2: i32) -> (i32, i32) {
    %c0_i32 = arith.constant 0 : i32
    %c0_i32_0 = arith.constant 0 : i32
    return %c0_i32, %arg1 : i32, i32
  }
  func.func @transform_4(%arg0: i32, %arg1: i32, %arg2: i32) -> (i32, i32) {
    %c0_i32 = arith.constant 0 : i32
    return %arg0, %arg1 : i32, i32
  }
}

module attributes {stable_mosaic.version = 11 : i64} {
  func.func @kernel(%arg0: i32, %arg1: i32, %arg2: i32, %arg3: memref<32x128xbf16, #tpu.memory_space<vmem>>, %arg4: memref<128x128xbf16, #tpu.memory_space<vmem>>, %arg5: memref<1x128xf32, #tpu.memory_space<vmem>>, %arg6: memref<1x128xf32, #tpu.memory_space<vmem>>, %arg7: memref<32x128xbf16, #tpu.memory_space<vmem>>, %arg8: memref<32x128xf32, #tpu.memory_space<vmem>>) attributes {dimension_semantics = [#tpu.dimension_semantics<parallel>, #tpu.dimension_semantics<parallel>, #tpu.dimension_semantics<arbitrary>], iteration_bounds = array<i64: 1, 1, 1>, scalar_prefetch = 0 : i64, scratch_operands = 1 : i64, tpu.core_type = #tpu.core_type<tc>, window_params = [{transform_indices = @transform_0, window_bounds = array<i64: 32, 128>}, {transform_indices = @transform_1, window_bounds = array<i64: 128, 128>}, {transform_indices = @transform_2, window_bounds = array<i64: 1, 128>}, {transform_indices = @transform_3, window_bounds = array<i64: 1, 128>}, {transform_indices = @transform_4, window_bounds = array<i64: 32, 128>}]} {
    %c0_i32 = arith.constant 0 : i32
    %0 = arith.cmpi eq, %arg2, %c0_i32 : i32
    %1 = arith.extui %0 : i1 to i32
    %c0_i32_0 = arith.constant 0 : i32
    %2 = arith.cmpi ne, %1, %c0_i32_0 : i32
    scf.if %2 {
      %cst_10 = arith.constant 0.000000e+00 : f32
      %12 = vector.broadcast %cst_10 : f32 to vector<32x128xf32>
      %c0_11 = arith.constant 0 : index
      %c0_12 = arith.constant 0 : index
      %13 = vector.load %arg8[%c0_11, %c0_12] : memref<32x128xf32, #tpu.memory_space<vmem>>, vector<32x128xf32>
      tpu.vector_store %arg8[%c0_11, %c0_12], %12 {strides = array<i32>} : memref<32x128xf32, #tpu.memory_space<vmem>>, vector<32x128xf32>,
    } else {
    }
    %c0 = arith.constant 0 : index
    %c0_1 = arith.constant 0 : index
    %3 = vector.load %arg8[%c0, %c0_1] : memref<32x128xf32, #tpu.memory_space<vmem>>, vector<32x128xf32>
    %c0_2 = arith.constant 0 : index
    %c0_3 = arith.constant 0 : index
    %4 = vector.load %arg3[%c0_2, %c0_3] : memref<32x128xbf16, #tpu.memory_space<vmem>>, vector<32x128xbf16>
    %c0_4 = arith.constant 0 : index
    %c0_5 = arith.constant 0 : index
    %5 = vector.load %arg4[%c0_4, %c0_5] : memref<128x128xbf16, #tpu.memory_space<vmem>>, vector<128x128xbf16>
    %cst = arith.constant dense<0.000000e+00> : vector<32x128xf32>
    %6 = tpu.matmul %4, %5, %cst {dimension_numbers = #tpu.dot_dimension_numbers<[1], [0], [0], [1], [0, 0, 1, 1], [], []>} : vector<32x128xbf16>, vector<128x128xbf16>, vector<32x128xf32> -> vector<32x128xf32>
    %7 = arith.addf %3, %6 : vector<32x128xf32>
    %c0_6 = arith.constant 0 : index
    %c0_7 = arith.constant 0 : index
    %8 = vector.load %arg8[%c0_6, %c0_7] : memref<32x128xf32, #tpu.memory_space<vmem>>, vector<32x128xf32>
    tpu.vector_store %arg8[%c0_6, %c0_7], %7 {strides = array<i32>} : memref<32x128xf32, #tpu.memory_space<vmem>>, vector<32x128xf32>,
    %c0_i32_8 = arith.constant 0 : i32
    %9 = arith.cmpi eq, %arg2, %c0_i32_8 : i32
    %10 = arith.extui %9 : i1 to i32
    %c0_i32_9 = arith.constant 0 : i32
    %11 = arith.cmpi ne, %10, %c0_i32_9 : i32
    scf.if %11 {
      %c0_10 = arith.constant 0 : index
      %c0_11 = arith.constant 0 : index
      %12 = vector.load %arg8[%c0_10, %c0_11] : memref<32x128xf32, #tpu.memory_space<vmem>>, vector<32x128xf32>
      %c0_12 = arith.constant 0 : index
      %c0_13 = arith.constant 0 : index
      %13 = vector.load %arg5[%c0_12, %c0_13] : memref<1x128xf32, #tpu.memory_space<vmem>>, vector<1x128xf32>
      %14 = vector.broadcast %13 : vector<1x128xf32> to vector<32x128xf32>
      %15 = arith.mulf %12, %14 : vector<32x128xf32>
      %c0_14 = arith.constant 0 : index
      %c0_15 = arith.constant 0 : index
      %16 = vector.load %arg6[%c0_14, %c0_15] : memref<1x128xf32, #tpu.memory_space<vmem>>, vector<1x128xf32>
      %17 = vector.broadcast %16 : vector<1x128xf32> to vector<32x128xf32>
      %18 = arith.addf %15, %17 : vector<32x128xf32>
      %cst_16 = arith.constant 0.000000e+00 : f32
      %19 = vector.broadcast %cst_16 : f32 to vector<32x128xf32>
      %20 = arith.maximumf %18, %19 : vector<32x128xf32>
      %21 = arith.truncf %20 : vector<32x128xf32> to vector<32x128xbf16>
      %c0_17 = arith.constant 0 : index
      %c0_18 = arith.constant 0 : index
      %22 = vector.load %arg7[%c0_17, %c0_18] : memref<32x128xbf16, #tpu.memory_space<vmem>>, vector<32x128xbf16>
      tpu.vector_store %arg7[%c0_17, %c0_18], %21 {strides = array<i32>} : memref<32x128xbf16, #tpu.memory_space<vmem>>, vector<32x128xbf16>,
    } else {
    }
    return
  }
  func.func @transform_0(%arg0: i32, %arg1: i32, %arg2: i32) -> (i32, i32) {
    %c0_i32 = arith.constant 0 : i32
    return %arg0, %arg2 : i32, i32
  }
  func.func @transform_1(%arg0: i32, %arg1: i32, %arg2: i32) -> (i32, i32) {
    %c0_i32 = arith.constant 0 : i32
    return %arg2, %arg1 : i32, i32
  }
  func.func @transform_2(%arg0: i32, %arg1: i32, %arg2: i32) -> (i32, i32) {
    %c0_i32 = arith.constant 0 : i32
    %c0_i32_0 = arith.constant 0 : i32
    return %c0_i32, %arg1 : i32, i32
  }
  func.func @transform_3(%arg0: i32, %arg1: i32, %arg2: i32) -> (i32, i32) {
    %c0_i32 = arith.constant 0 : i32
    %c0_i32_0 = arith.constant 0 : i32
    return %c0_i32, %arg1 : i32, i32
  }
  func.func @transform_4(%arg0: i32, %arg1: i32, %arg2: i32) -> (i32, i32) {
    %c0_i32 = arith.constant 0 : i32
    return %arg0, %arg1 : i32, i32
  }
}

module attributes {stable_mosaic.version = 11 : i64} {
  func.func @kernel(%arg0: i32, %arg1: i32, %arg2: memref<96x128xbf16, #tpu.memory_space<any>>, %arg3: memref<9x128x128xbf16, #tpu.memory_space<vmem>>, %arg4: memref<1x128xf32, #tpu.memory_space<vmem>>, %arg5: memref<1x128xf32, #tpu.memory_space<vmem>>, %arg6: memref<80x128xbf16, #tpu.memory_space<vmem>>, %arg7: memref<80x128xf32, #tpu.memory_space<vmem>>, %arg8: memref<2x96x128xbf16, #tpu.memory_space<vmem>>, %arg9: memref<2x!tpu.dma_semaphore, #tpu.memory_space<semaphore_mem>>) attributes {dimension_semantics = [#tpu.dimension_semantics<arbitrary>, #tpu.dimension_semantics<arbitrary>], iteration_bounds = array<i64: 1, 1>, scalar_prefetch = 0 : i64, scratch_operands = 3 : i64, tpu.core_type = #tpu.core_type<tc>, window_params = [{}, {transform_indices = @transform_1, window_bounds = array<i64: 9, 128, 128>}, {transform_indices = @transform_2, window_bounds = array<i64: 1, 128>}, {transform_indices = @transform_3, window_bounds = array<i64: 1, 128>}, {transform_indices = @transform_4, window_bounds = array<i64: 80, 128>}]} {
    %c1_i32 = arith.constant 1 : i32
    %0 = arith.muli %arg0, %c1_i32 : i32
    %1 = arith.addi %0, %arg1 : i32
    %c2_i32 = arith.constant 2 : i32
    %c0_i32 = arith.constant 0 : i32
    %2 = arith.cmpi eq, %c2_i32, %c0_i32 : i32
    %c1_i32_0 = arith.constant 1 : i32
    %3 = arith.select %2, %c1_i32_0, %c2_i32 : i32
    %4 = arith.remsi %1, %3 : i32
    %c0_i32_1 = arith.constant 0 : i32
    %5 = arith.cmpi ne, %4, %c0_i32_1 : i32
    %c0_i32_2 = arith.constant 0 : i32
    %6 = arith.cmpi slt, %4, %c0_i32_2 : i32
    %c0_i32_3 = arith.constant 0 : i32
    %7 = arith.cmpi slt, %3, %c0_i32_3 : i32
    %8 = arith.xori %6, %7 : i1
    %9 = arith.andi %8, %5 : i1
    %10 = arith.addi %4, %3 : i32
    %11 = arith.select %9, %10, %4 : i32
    %c1_i32_4 = arith.constant 1 : i32
    %12 = arith.subi %c1_i32_4, %11 : i32
    %c0_i32_5 = arith.constant 0 : i32
    %13 = arith.cmpi eq, %1, %c0_i32_5 : i32
    %14 = arith.extui %13 : i1 to i32
    %c0_i32_6 = arith.constant 0 : i32
    %15 = arith.cmpi ne, %14, %c0_i32_6 : i32
    scf.if %15 {
      %c0_i32_96 = arith.constant 0 : i32
      %c0_i32_97 = arith.constant 0 : i32
      %c0_i32_98 = arith.constant 0 : i32
      %c0_i32_99 = arith.constant 0 : i32
      %112 = tpu.memref_slice %arg2[%c0_i32_98, %c0_i32_99] : memref<96x128xbf16, #tpu.memory_space<any>> -> memref<96x128xbf16, #tpu.memory_space<any>>
      %c0_i32_100 = arith.constant 0 : i32
      %c0_i32_101 = arith.constant 0 : i32
      %113 = tpu.memref_slice %arg8[%c0_i32_96, %c0_i32_100, %c0_i32_101] : memref<2x96x128xbf16, #tpu.memory_space<vmem>> -> memref<1x96x128xbf16, #tpu.memory_space<vmem>>
      %114 = tpu.memref_squeeze %113 : memref<1x96x128xbf16, #tpu.memory_space<vmem>> -> memref<96x128xbf16, #tpu.memory_space<vmem>>
      %115 = tpu.memref_slice %arg9[%c0_i32_97] : memref<2x!tpu.dma_semaphore, #tpu.memory_space<semaphore_mem>> -> memref<1x!tpu.dma_semaphore, #tpu.memory_space<semaphore_mem>>
      %116 = tpu.memref_squeeze %115 : memref<1x!tpu.dma_semaphore, #tpu.memory_space<semaphore_mem>> -> memref<!tpu.dma_semaphore, #tpu.memory_space<semaphore_mem>>
      tpu.enqueue_dma source(%112 : memref<96x128xbf16, #tpu.memory_space<any>>) target(%114 : memref<96x128xbf16, #tpu.memory_space<vmem>>) target_semaphore(%116 : memref<!tpu.dma_semaphore, #tpu.memory_space<semaphore_mem>>)
    } else {
    }
    %c0_i32_7 = arith.constant 0 : i32
    %c0_i32_8 = arith.constant 0 : i32
    %16 = tpu.memref_slice %arg2[%c0_i32_7, %c0_i32_8] : memref<96x128xbf16, #tpu.memory_space<any>> -> memref<96x128xbf16, #tpu.memory_space<any>>
    %c0_i32_9 = arith.constant 0 : i32
    %c0_i32_10 = arith.constant 0 : i32
    %17 = tpu.memref_slice %arg8[%11, %c0_i32_9, %c0_i32_10] : memref<2x96x128xbf16, #tpu.memory_space<vmem>> -> memref<1x96x128xbf16, #tpu.memory_space<vmem>>
    %18 = tpu.memref_squeeze %17 : memref<1x96x128xbf16, #tpu.memory_space<vmem>> -> memref<96x128xbf16, #tpu.memory_space<vmem>>
    %19 = tpu.memref_slice %arg9[%11] : memref<2x!tpu.dma_semaphore, #tpu.memory_space<semaphore_mem>> -> memref<1x!tpu.dma_semaphore, #tpu.memory_space<semaphore_mem>>
    %20 = tpu.memref_squeeze %19 : memref<1x!tpu.dma_semaphore, #tpu.memory_space<semaphore_mem>> -> memref<!tpu.dma_semaphore, #tpu.memory_space<semaphore_mem>>
    tpu.wait_dma2 semaphore(%20 : memref<!tpu.dma_semaphore, #tpu.memory_space<semaphore_mem>>) src(%16 : memref<96x128xbf16, #tpu.memory_space<any>>) dst(%18 : memref<96x128xbf16, #tpu.memory_space<vmem>>)
    %c0_i32_11 = arith.constant 0 : i32
    %21 = arith.cmpi slt, %1, %c0_i32_11 : i32
    %22 = arith.extui %21 : i1 to i32
    %c0_i32_12 = arith.constant 0 : i32
    %23 = arith.cmpi ne, %22, %c0_i32_12 : i32
    scf.if %23 {
      %c0_i32_96 = arith.constant 0 : i32
      %112 = arith.cmpi eq, %arg1, %c0_i32_96 : i32
      %c1_i32_97 = arith.constant 1 : i32
      %113 = arith.addi %arg1, %c1_i32_97 : i32
      %c0_i32_98 = arith.constant 0 : i32
      %114 = arith.select %112, %c0_i32_98, %113 : i32
      %c80_i32 = arith.constant 80 : i32
      %115 = arith.muli %114, %c80_i32 : i32
      %c0_i32_99 = arith.constant 0 : i32
      %116 = tpu.memref_slice %arg2[%115, %c0_i32_99] : memref<96x128xbf16, #tpu.memory_space<any>> -> memref<96x128xbf16, #tpu.memory_space<any>>
      %c0_i32_100 = arith.constant 0 : i32
      %c0_i32_101 = arith.constant 0 : i32
      %117 = tpu.memref_slice %arg8[%12, %c0_i32_100, %c0_i32_101] : memref<2x96x128xbf16, #tpu.memory_space<vmem>> -> memref<1x96x128xbf16, #tpu.memory_space<vmem>>
      %118 = tpu.memref_squeeze %117 : memref<1x96x128xbf16, #tpu.memory_space<vmem>> -> memref<96x128xbf16, #tpu.memory_space<vmem>>
      %119 = tpu.memref_slice %arg9[%12] : memref<2x!tpu.dma_semaphore, #tpu.memory_space<semaphore_mem>> -> memref<1x!tpu.dma_semaphore, #tpu.memory_space<semaphore_mem>>
      %120 = tpu.memref_squeeze %119 : memref<1x!tpu.dma_semaphore, #tpu.memory_space<semaphore_mem>> -> memref<!tpu.dma_semaphore, #tpu.memory_space<semaphore_mem>>
      tpu.enqueue_dma source(%116 : memref<96x128xbf16, #tpu.memory_space<any>>) target(%118 : memref<96x128xbf16, #tpu.memory_space<vmem>>) target_semaphore(%120 : memref<!tpu.dma_semaphore, #tpu.memory_space<semaphore_mem>>)
    } else {
    }
    %24 = arith.index_cast %11 : i32 to index
    %c0 = arith.constant 0 : index
    %c0_13 = arith.constant 0 : index
    %25 = vector.load %arg8[%24, %c0, %c0_13] : memref<2x96x128xbf16, #tpu.memory_space<vmem>>, vector<1x80x128xbf16>
    %26 = vector.shape_cast %25 : vector<1x80x128xbf16> to vector<80x128xbf16>
    %c0_14 = arith.constant 0 : index
    %c0_15 = arith.constant 0 : index
    %c0_16 = arith.constant 0 : index
    %27 = vector.load %arg3[%c0_14, %c0_15, %c0_16] : memref<9x128x128xbf16, #tpu.memory_space<vmem>>, vector<1x128x128xbf16>
    %28 = vector.shape_cast %27 : vector<1x128x128xbf16> to vector<128x128xbf16>
    %cst = arith.constant dense<0.000000e+00> : vector<80x128xf32>
    %29 = tpu.matmul %26, %28, %cst {dimension_numbers = #tpu.dot_dimension_numbers<[1], [0], [0], [1], [0, 0, 1, 1], [], []>} : vector<80x128xbf16>, vector<128x128xbf16>, vector<80x128xf32> -> vector<80x128xf32>
    %c0_17 = arith.constant 0 : index
    %c0_18 = arith.constant 0 : index
    %30 = vector.load %arg7[%c0_17, %c0_18] : memref<80x128xf32, #tpu.memory_space<vmem>>, vector<80x128xf32>
    tpu.vector_store %arg7[%c0_17, %c0_18], %29 {strides = array<i32>} : memref<80x128xf32, #tpu.memory_space<vmem>>, vector<80x128xf32>,
    %c0_19 = arith.constant 0 : index
    %c0_20 = arith.constant 0 : index
    %31 = vector.load %arg7[%c0_19, %c0_20] : memref<80x128xf32, #tpu.memory_space<vmem>>, vector<80x128xf32>
    %32 = arith.index_cast %11 : i32 to index
    %c1 = arith.constant 1 : index
    %c0_21 = arith.constant 0 : index
    %33 = vector.load %arg8[%32, %c1, %c0_21] : memref<2x96x128xbf16, #tpu.memory_space<vmem>>, vector<1x80x128xbf16>
    %34 = vector.shape_cast %33 : vector<1x80x128xbf16> to vector<80x128xbf16>
    %c1_22 = arith.constant 1 : index
    %c0_23 = arith.constant 0 : index
    %c0_24 = arith.constant 0 : index
    %35 = vector.load %arg3[%c1_22, %c0_23, %c0_24] : memref<9x128x128xbf16, #tpu.memory_space<vmem>>, vector<1x128x128xbf16>
    %36 = vector.shape_cast %35 : vector<1x128x128xbf16> to vector<128x128xbf16>
    %cst_25 = arith.constant dense<0.000000e+00> : vector<80x128xf32>
    %37 = tpu.matmul %34, %36, %cst_25 {dimension_numbers = #tpu.dot_dimension_numbers<[1], [0], [0], [1], [0, 0, 1, 1], [], []>} : vector<80x128xbf16>, vector<128x128xbf16>, vector<80x128xf32> -> vector<80x128xf32>
    %38 = arith.addf %31, %37 : vector<80x128xf32>
    %c0_26 = arith.constant 0 : index
    %c0_27 = arith.constant 0 : index
    %39 = vector.load %arg7[%c0_26, %c0_27] : memref<80x128xf32, #tpu.memory_space<vmem>>, vector<80x128xf32>
    tpu.vector_store %arg7[%c0_26, %c0_27], %38 {strides = array<i32>} : memref<80x128xf32, #tpu.memory_space<vmem>>, vector<80x128xf32>,
    %c0_28 = arith.constant 0 : index
    %c0_29 = arith.constant 0 : index
    %40 = vector.load %arg7[%c0_28, %c0_29] : memref<80x128xf32, #tpu.memory_space<vmem>>, vector<80x128xf32>
    %41 = arith.index_cast %11 : i32 to index
    %c2 = arith.constant 2 : index
    %c0_30 = arith.constant 0 : index
    %42 = vector.load %arg8[%41, %c2, %c0_30] : memref<2x96x128xbf16, #tpu.memory_space<vmem>>, vector<1x80x128xbf16>
    %43 = vector.shape_cast %42 : vector<1x80x128xbf16> to vector<80x128xbf16>
    %c2_31 = arith.constant 2 : index
    %c0_32 = arith.constant 0 : index
    %c0_33 = arith.constant 0 : index
    %44 = vector.load %arg3[%c2_31, %c0_32, %c0_33] : memref<9x128x128xbf16, #tpu.memory_space<vmem>>, vector<1x128x128xbf16>
    %45 = vector.shape_cast %44 : vector<1x128x128xbf16> to vector<128x128xbf16>
    %cst_34 = arith.constant dense<0.000000e+00> : vector<80x128xf32>
    %46 = tpu.matmul %43, %45, %cst_34 {dimension_numbers = #tpu.dot_dimension_numbers<[1], [0], [0], [1], [0, 0, 1, 1], [], []>} : vector<80x128xbf16>, vector<128x128xbf16>, vector<80x128xf32> -> vector<80x128xf32>
    %47 = arith.addf %40, %46 : vector<80x128xf32>
    %c0_35 = arith.constant 0 : index
    %c0_36 = arith.constant 0 : index
    %48 = vector.load %arg7[%c0_35, %c0_36] : memref<80x128xf32, #tpu.memory_space<vmem>>, vector<80x128xf32>
    tpu.vector_store %arg7[%c0_35, %c0_36], %47 {strides = array<i32>} : memref<80x128xf32, #tpu.memory_space<vmem>>, vector<80x128xf32>,
    %c0_37 = arith.constant 0 : index
    %c0_38 = arith.constant 0 : index
    %49 = vector.load %arg7[%c0_37, %c0_38] : memref<80x128xf32, #tpu.memory_space<vmem>>, vector<80x128xf32>
    %50 = arith.index_cast %11 : i32 to index
    %c6 = arith.constant 6 : index
    %c0_39 = arith.constant 0 : index
    %51 = vector.load %arg8[%50, %c6, %c0_39] : memref<2x96x128xbf16, #tpu.memory_space<vmem>>, vector<1x80x128xbf16>
    %52 = vector.shape_cast %51 : vector<1x80x128xbf16> to vector<80x128xbf16>
    %c3 = arith.constant 3 : index
    %c0_40 = arith.constant 0 : index
    %c0_41 = arith.constant 0 : index
    %53 = vector.load %arg3[%c3, %c0_40, %c0_41] : memref<9x128x128xbf16, #tpu.memory_space<vmem>>, vector<1x128x128xbf16>
    %54 = vector.shape_cast %53 : vector<1x128x128xbf16> to vector<128x128xbf16>
    %cst_42 = arith.constant dense<0.000000e+00> : vector<80x128xf32>
    %55 = tpu.matmul %52, %54, %cst_42 {dimension_numbers = #tpu.dot_dimension_numbers<[1], [0], [0], [1], [0, 0, 1, 1], [], []>} : vector<80x128xbf16>, vector<128x128xbf16>, vector<80x128xf32> -> vector<80x128xf32>
    %56 = arith.addf %49, %55 : vector<80x128xf32>
    %c0_43 = arith.constant 0 : index
    %c0_44 = arith.constant 0 : index
    %57 = vector.load %arg7[%c0_43, %c0_44] : memref<80x128xf32, #tpu.memory_space<vmem>>, vector<80x128xf32>
    tpu.vector_store %arg7[%c0_43, %c0_44], %56 {strides = array<i32>} : memref<80x128xf32, #tpu.memory_space<vmem>>, vector<80x128xf32>,
    %c0_45 = arith.constant 0 : index
    %c0_46 = arith.constant 0 : index
    %58 = vector.load %arg7[%c0_45, %c0_46] : memref<80x128xf32, #tpu.memory_space<vmem>>, vector<80x128xf32>
    %59 = arith.index_cast %11 : i32 to index
    %c7 = arith.constant 7 : index
    %c0_47 = arith.constant 0 : index
    %60 = vector.load %arg8[%59, %c7, %c0_47] : memref<2x96x128xbf16, #tpu.memory_space<vmem>>, vector<1x80x128xbf16>
    %61 = vector.shape_cast %60 : vector<1x80x128xbf16> to vector<80x128xbf16>
    %c4 = arith.constant 4 : index
    %c0_48 = arith.constant 0 : index
    %c0_49 = arith.constant 0 : index
    %62 = vector.load %arg3[%c4, %c0_48, %c0_49] : memref<9x128x128xbf16, #tpu.memory_space<vmem>>, vector<1x128x128xbf16>
    %63 = vector.shape_cast %62 : vector<1x128x128xbf16> to vector<128x128xbf16>
    %cst_50 = arith.constant dense<0.000000e+00> : vector<80x128xf32>
    %64 = tpu.matmul %61, %63, %cst_50 {dimension_numbers = #tpu.dot_dimension_numbers<[1], [0], [0], [1], [0, 0, 1, 1], [], []>} : vector<80x128xbf16>, vector<128x128xbf16>, vector<80x128xf32> -> vector<80x128xf32>
    %65 = arith.addf %58, %64 : vector<80x128xf32>
    %c0_51 = arith.constant 0 : index
    %c0_52 = arith.constant 0 : index
    %66 = vector.load %arg7[%c0_51, %c0_52] : memref<80x128xf32, #tpu.memory_space<vmem>>, vector<80x128xf32>
    tpu.vector_store %arg7[%c0_51, %c0_52], %65 {strides = array<i32>} : memref<80x128xf32, #tpu.memory_space<vmem>>, vector<80x128xf32>,
    %c0_53 = arith.constant 0 : index
    %c0_54 = arith.constant 0 : index
    %67 = vector.load %arg7[%c0_53, %c0_54] : memref<80x128xf32, #tpu.memory_space<vmem>>, vector<80x128xf32>
    %68 = arith.index_cast %11 : i32 to index
    %c8 = arith.constant 8 : index
    %c0_55 = arith.constant 0 : index
    %69 = vector.load %arg8[%68, %c8, %c0_55] : memref<2x96x128xbf16, #tpu.memory_space<vmem>>, vector<1x80x128xbf16>
    %70 = vector.shape_cast %69 : vector<1x80x128xbf16> to vector<80x128xbf16>
    %c5 = arith.constant 5 : index
    %c0_56 = arith.constant 0 : index
    %c0_57 = arith.constant 0 : index
    %71 = vector.load %arg3[%c5, %c0_56, %c0_57] : memref<9x128x128xbf16, #tpu.memory_space<vmem>>, vector<1x128x128xbf16>
    %72 = vector.shape_cast %71 : vector<1x128x128xbf16> to vector<128x128xbf16>
    %cst_58 = arith.constant dense<0.000000e+00> : vector<80x128xf32>
    %73 = tpu.matmul %70, %72, %cst_58 {dimension_numbers = #tpu.dot_dimension_numbers<[1], [0], [0], [1], [0, 0, 1, 1], [], []>} : vector<80x128xbf16>, vector<128x128xbf16>, vector<80x128xf32> -> vector<80x128xf32>
    %74 = arith.addf %67, %73 : vector<80x128xf32>
    %c0_59 = arith.constant 0 : index
    %c0_60 = arith.constant 0 : index
    %75 = vector.load %arg7[%c0_59, %c0_60] : memref<80x128xf32, #tpu.memory_space<vmem>>, vector<80x128xf32>
    tpu.vector_store %arg7[%c0_59, %c0_60], %74 {strides = array<i32>} : memref<80x128xf32, #tpu.memory_space<vmem>>, vector<80x128xf32>,
    %c0_61 = arith.constant 0 : index
    %c0_62 = arith.constant 0 : index
    %76 = vector.load %arg7[%c0_61, %c0_62] : memref<80x128xf32, #tpu.memory_space<vmem>>, vector<80x128xf32>
    %77 = arith.index_cast %11 : i32 to index
    %c12 = arith.constant 12 : index
    %c0_63 = arith.constant 0 : index
    %78 = vector.load %arg8[%77, %c12, %c0_63] : memref<2x96x128xbf16, #tpu.memory_space<vmem>>, vector<1x80x128xbf16>
    %79 = vector.shape_cast %78 : vector<1x80x128xbf16> to vector<80x128xbf16>
    %c6_64 = arith.constant 6 : index
    %c0_65 = arith.constant 0 : index
    %c0_66 = arith.constant 0 : index
    %80 = vector.load %arg3[%c6_64, %c0_65, %c0_66] : memref<9x128x128xbf16, #tpu.memory_space<vmem>>, vector<1x128x128xbf16>
    %81 = vector.shape_cast %80 : vector<1x128x128xbf16> to vector<128x128xbf16>
    %cst_67 = arith.constant dense<0.000000e+00> : vector<80x128xf32>
    %82 = tpu.matmul %79, %81, %cst_67 {dimension_numbers = #tpu.dot_dimension_numbers<[1], [0], [0], [1], [0, 0, 1, 1], [], []>} : vector<80x128xbf16>, vector<128x128xbf16>, vector<80x128xf32> -> vector<80x128xf32>
    %83 = arith.addf %76, %82 : vector<80x128xf32>
    %c0_68 = arith.constant 0 : index
    %c0_69 = arith.constant 0 : index
    %84 = vector.load %arg7[%c0_68, %c0_69] : memref<80x128xf32, #tpu.memory_space<vmem>>, vector<80x128xf32>
    tpu.vector_store %arg7[%c0_68, %c0_69], %83 {strides = array<i32>} : memref<80x128xf32, #tpu.memory_space<vmem>>, vector<80x128xf32>,
    %c0_70 = arith.constant 0 : index
    %c0_71 = arith.constant 0 : index
    %85 = vector.load %arg7[%c0_70, %c0_71] : memref<80x128xf32, #tpu.memory_space<vmem>>, vector<80x128xf32>
    %86 = arith.index_cast %11 : i32 to index
    %c13 = arith.constant 13 : index
    %c0_72 = arith.constant 0 : index
    %87 = vector.load %arg8[%86, %c13, %c0_72] : memref<2x96x128xbf16, #tpu.memory_space<vmem>>, vector<1x80x128xbf16>
    %88 = vector.shape_cast %87 : vector<1x80x128xbf16> to vector<80x128xbf16>
    %c7_73 = arith.constant 7 : index
    %c0_74 = arith.constant 0 : index
    %c0_75 = arith.constant 0 : index
    %89 = vector.load %arg3[%c7_73, %c0_74, %c0_75] : memref<9x128x128xbf16, #tpu.memory_space<vmem>>, vector<1x128x128xbf16>
    %90 = vector.shape_cast %89 : vector<1x128x128xbf16> to vector<128x128xbf16>
    %cst_76 = arith.constant dense<0.000000e+00> : vector<80x128xf32>
    %91 = tpu.matmul %88, %90, %cst_76 {dimension_numbers = #tpu.dot_dimension_numbers<[1], [0], [0], [1], [0, 0, 1, 1], [], []>} : vector<80x128xbf16>, vector<128x128xbf16>, vector<80x128xf32> -> vector<80x128xf32>
    %92 = arith.addf %85, %91 : vector<80x128xf32>
    %c0_77 = arith.constant 0 : index
    %c0_78 = arith.constant 0 : index
    %93 = vector.load %arg7[%c0_77, %c0_78] : memref<80x128xf32, #tpu.memory_space<vmem>>, vector<80x128xf32>
    tpu.vector_store %arg7[%c0_77, %c0_78], %92 {strides = array<i32>} : memref<80x128xf32, #tpu.memory_space<vmem>>, vector<80x128xf32>,
    %c0_79 = arith.constant 0 : index
    %c0_80 = arith.constant 0 : index
    %94 = vector.load %arg7[%c0_79, %c0_80] : memref<80x128xf32, #tpu.memory_space<vmem>>, vector<80x128xf32>
    %95 = arith.index_cast %11 : i32 to index
    %c14 = arith.constant 14 : index
    %c0_81 = arith.constant 0 : index
    %96 = vector.load %arg8[%95, %c14, %c0_81] : memref<2x96x128xbf16, #tpu.memory_space<vmem>>, vector<1x80x128xbf16>
    %97 = vector.shape_cast %96 : vector<1x80x128xbf16> to vector<80x128xbf16>
    %c8_82 = arith.constant 8 : index
    %c0_83 = arith.constant 0 : index
    %c0_84 = arith.constant 0 : index
    %98 = vector.load %arg3[%c8_82, %c0_83, %c0_84] : memref<9x128x128xbf16, #tpu.memory_space<vmem>>, vector<1x128x128xbf16>
    %99 = vector.shape_cast %98 : vector<1x128x128xbf16> to vector<128x128xbf16>
    %cst_85 = arith.constant dense<0.000000e+00> : vector<80x128xf32>
    %100 = tpu.matmul %97, %99, %cst_85 {dimension_numbers = #tpu.dot_dimension_numbers<[1], [0], [0], [1], [0, 0, 1, 1], [], []>} : vector<80x128xbf16>, vector<128x128xbf16>, vector<80x128xf32> -> vector<80x128xf32>
    %101 = arith.addf %94, %100 : vector<80x128xf32>
    %c0_86 = arith.constant 0 : index
    %c0_87 = arith.constant 0 : index
    %102 = vector.load %arg7[%c0_86, %c0_87] : memref<80x128xf32, #tpu.memory_space<vmem>>, vector<80x128xf32>
    tpu.vector_store %arg7[%c0_86, %c0_87], %101 {strides = array<i32>} : memref<80x128xf32, #tpu.memory_space<vmem>>, vector<80x128xf32>,
    %c0_88 = arith.constant 0 : index
    %c0_89 = arith.constant 0 : index
    %103 = vector.load %arg7[%c0_88, %c0_89] : memref<80x128xf32, #tpu.memory_space<vmem>>, vector<80x128xf32>
    %c0_90 = arith.constant 0 : index
    %c0_91 = arith.constant 0 : index
    %104 = vector.load %arg4[%c0_90, %c0_91] : memref<1x128xf32, #tpu.memory_space<vmem>>, vector<1x128xf32>
    %105 = vector.broadcast %104 : vector<1x128xf32> to vector<80x128xf32>
    %106 = arith.mulf %103, %105 : vector<80x128xf32>
    %c0_92 = arith.constant 0 : index
    %c0_93 = arith.constant 0 : index
    %107 = vector.load %arg5[%c0_92, %c0_93] : memref<1x128xf32, #tpu.memory_space<vmem>>, vector<1x128xf32>
    %108 = vector.broadcast %107 : vector<1x128xf32> to vector<80x128xf32>
    %109 = arith.addf %106, %108 : vector<80x128xf32>
    %110 = arith.truncf %109 : vector<80x128xf32> to vector<80x128xbf16>
    %c0_94 = arith.constant 0 : index
    %c0_95 = arith.constant 0 : index
    %111 = vector.load %arg6[%c0_94, %c0_95] : memref<80x128xbf16, #tpu.memory_space<vmem>>, vector<80x128xbf16>
    tpu.vector_store %arg6[%c0_94, %c0_95], %110 {strides = array<i32>} : memref<80x128xbf16, #tpu.memory_space<vmem>>, vector<80x128xbf16>,
    return
  }
  func.func @transform_1(%arg0: i32, %arg1: i32) -> (i32, i32, i32) {
    %c0_i32 = arith.constant 0 : i32
    %c0_i32_0 = arith.constant 0 : i32
    %c0_i32_1 = arith.constant 0 : i32
    return %c0_i32, %c0_i32_0, %arg0 : i32, i32, i32
  }
  func.func @transform_2(%arg0: i32, %arg1: i32) -> (i32, i32) {
    %c0_i32 = arith.constant 0 : i32
    %c0_i32_0 = arith.constant 0 : i32
    return %c0_i32, %arg0 : i32, i32
  }
  func.func @transform_3(%arg0: i32, %arg1: i32) -> (i32, i32) {
    %c0_i32 = arith.constant 0 : i32
    %c0_i32_0 = arith.constant 0 : i32
    return %c0_i32, %arg0 : i32, i32
  }
  func.func @transform_4(%arg0: i32, %arg1: i32) -> (i32, i32) {
    %c0_i32 = arith.constant 0 : i32
    return %arg1, %arg0 : i32, i32
  }
}

module attributes {stable_mosaic.version = 11 : i64} {
  func.func @kernel(%arg0: i32, %arg1: i32, %arg2: i32, %arg3: memref<16x256xbf16, #tpu.memory_space<vmem>>, %arg4: memref<256x128xbf16, #tpu.memory_space<vmem>>, %arg5: memref<1x128xf32, #tpu.memory_space<vmem>>, %arg6: memref<1x128xf32, #tpu.memory_space<vmem>>, %arg7: memref<16x128xbf16, #tpu.memory_space<vmem>>, %arg8: memref<16x128xf32, #tpu.memory_space<vmem>>) attributes {dimension_semantics = [#tpu.dimension_semantics<parallel>, #tpu.dimension_semantics<parallel>, #tpu.dimension_semantics<arbitrary>], iteration_bounds = array<i64: 1, 1, 1>, scalar_prefetch = 0 : i64, scratch_operands = 1 : i64, tpu.core_type = #tpu.core_type<tc>, window_params = [{transform_indices = @transform_0, window_bounds = array<i64: 16, 256>}, {transform_indices = @transform_1, window_bounds = array<i64: 256, 128>}, {transform_indices = @transform_2, window_bounds = array<i64: 1, 128>}, {transform_indices = @transform_3, window_bounds = array<i64: 1, 128>}, {transform_indices = @transform_4, window_bounds = array<i64: 16, 128>}]} {
    %c0_i32 = arith.constant 0 : i32
    %0 = arith.cmpi eq, %arg2, %c0_i32 : i32
    %1 = arith.extui %0 : i1 to i32
    %c0_i32_0 = arith.constant 0 : i32
    %2 = arith.cmpi ne, %1, %c0_i32_0 : i32
    scf.if %2 {
      %cst_10 = arith.constant 0.000000e+00 : f32
      %12 = vector.broadcast %cst_10 : f32 to vector<16x128xf32>
      %c0_11 = arith.constant 0 : index
      %c0_12 = arith.constant 0 : index
      %13 = vector.load %arg8[%c0_11, %c0_12] : memref<16x128xf32, #tpu.memory_space<vmem>>, vector<16x128xf32>
      tpu.vector_store %arg8[%c0_11, %c0_12], %12 {strides = array<i32>} : memref<16x128xf32, #tpu.memory_space<vmem>>, vector<16x128xf32>,
    } else {
    }
    %c0 = arith.constant 0 : index
    %c0_1 = arith.constant 0 : index
    %3 = vector.load %arg8[%c0, %c0_1] : memref<16x128xf32, #tpu.memory_space<vmem>>, vector<16x128xf32>
    %c0_2 = arith.constant 0 : index
    %c0_3 = arith.constant 0 : index
    %4 = vector.load %arg3[%c0_2, %c0_3] : memref<16x256xbf16, #tpu.memory_space<vmem>>, vector<16x256xbf16>
    %c0_4 = arith.constant 0 : index
    %c0_5 = arith.constant 0 : index
    %5 = vector.load %arg4[%c0_4, %c0_5] : memref<256x128xbf16, #tpu.memory_space<vmem>>, vector<256x128xbf16>
    %cst = arith.constant dense<0.000000e+00> : vector<16x128xf32>
    %6 = tpu.matmul %4, %5, %cst {dimension_numbers = #tpu.dot_dimension_numbers<[1], [0], [0], [1], [0, 0, 1, 1], [], []>} : vector<16x256xbf16>, vector<256x128xbf16>, vector<16x128xf32> -> vector<16x128xf32>
    %7 = arith.addf %3, %6 : vector<16x128xf32>
    %c0_6 = arith.constant 0 : index
    %c0_7 = arith.constant 0 : index
    %8 = vector.load %arg8[%c0_6, %c0_7] : memref<16x128xf32, #tpu.memory_space<vmem>>, vector<16x128xf32>
    tpu.vector_store %arg8[%c0_6, %c0_7], %7 {strides = array<i32>} : memref<16x128xf32, #tpu.memory_space<vmem>>, vector<16x128xf32>,
    %c0_i32_8 = arith.constant 0 : i32
    %9 = arith.cmpi eq, %arg2, %c0_i32_8 : i32
    %10 = arith.extui %9 : i1 to i32
    %c0_i32_9 = arith.constant 0 : i32
    %11 = arith.cmpi ne, %10, %c0_i32_9 : i32
    scf.if %11 {
      %c0_10 = arith.constant 0 : index
      %c0_11 = arith.constant 0 : index
      %12 = vector.load %arg8[%c0_10, %c0_11] : memref<16x128xf32, #tpu.memory_space<vmem>>, vector<16x128xf32>
      %c0_12 = arith.constant 0 : index
      %c0_13 = arith.constant 0 : index
      %13 = vector.load %arg5[%c0_12, %c0_13] : memref<1x128xf32, #tpu.memory_space<vmem>>, vector<1x128xf32>
      %14 = vector.broadcast %13 : vector<1x128xf32> to vector<16x128xf32>
      %15 = arith.mulf %12, %14 : vector<16x128xf32>
      %c0_14 = arith.constant 0 : index
      %c0_15 = arith.constant 0 : index
      %16 = vector.load %arg6[%c0_14, %c0_15] : memref<1x128xf32, #tpu.memory_space<vmem>>, vector<1x128xf32>
      %17 = vector.broadcast %16 : vector<1x128xf32> to vector<16x128xf32>
      %18 = arith.addf %15, %17 : vector<16x128xf32>
      %19 = arith.truncf %18 : vector<16x128xf32> to vector<16x128xbf16>
      %c0_16 = arith.constant 0 : index
      %c0_17 = arith.constant 0 : index
      %20 = vector.load %arg7[%c0_16, %c0_17] : memref<16x128xbf16, #tpu.memory_space<vmem>>, vector<16x128xbf16>
      tpu.vector_store %arg7[%c0_16, %c0_17], %19 {strides = array<i32>} : memref<16x128xbf16, #tpu.memory_space<vmem>>, vector<16x128xbf16>,
    } else {
    }
    return
  }
  func.func @transform_0(%arg0: i32, %arg1: i32, %arg2: i32) -> (i32, i32) {
    %c0_i32 = arith.constant 0 : i32
    return %arg0, %arg2 : i32, i32
  }
  func.func @transform_1(%arg0: i32, %arg1: i32, %arg2: i32) -> (i32, i32) {
    %c0_i32 = arith.constant 0 : i32
    return %arg2, %arg1 : i32, i32
  }
  func.func @transform_2(%arg0: i32, %arg1: i32, %arg2: i32) -> (i32, i32) {
    %c0_i32 = arith.constant 0 : i32
    %c0_i32_0 = arith.constant 0 : i32
    return %c0_i32, %arg1 : i32, i32
  }
  func.func @transform_3(%arg0: i32, %arg1: i32, %arg2: i32) -> (i32, i32) {
    %c0_i32 = arith.constant 0 : i32
    %c0_i32_0 = arith.constant 0 : i32
    return %c0_i32, %arg1 : i32, i32
  }
  func.func @transform_4(%arg0: i32, %arg1: i32, %arg2: i32) -> (i32, i32) {
    %c0_i32 = arith.constant 0 : i32
    return %arg0, %arg1 : i32, i32
  }
}

module attributes {stable_mosaic.version = 11 : i64} {
  func.func @kernel(%arg0: i32, %arg1: i32, %arg2: i32, %arg3: memref<16x128xbf16, #tpu.memory_space<vmem>>, %arg4: memref<128x128xbf16, #tpu.memory_space<vmem>>, %arg5: memref<1x128xf32, #tpu.memory_space<vmem>>, %arg6: memref<1x128xf32, #tpu.memory_space<vmem>>, %arg7: memref<16x128xbf16, #tpu.memory_space<vmem>>, %arg8: memref<16x128xf32, #tpu.memory_space<vmem>>) attributes {dimension_semantics = [#tpu.dimension_semantics<parallel>, #tpu.dimension_semantics<parallel>, #tpu.dimension_semantics<arbitrary>], iteration_bounds = array<i64: 1, 1, 1>, scalar_prefetch = 0 : i64, scratch_operands = 1 : i64, tpu.core_type = #tpu.core_type<tc>, window_params = [{transform_indices = @transform_0, window_bounds = array<i64: 16, 128>}, {transform_indices = @transform_1, window_bounds = array<i64: 128, 128>}, {transform_indices = @transform_2, window_bounds = array<i64: 1, 128>}, {transform_indices = @transform_3, window_bounds = array<i64: 1, 128>}, {transform_indices = @transform_4, window_bounds = array<i64: 16, 128>}]} {
    %c0_i32 = arith.constant 0 : i32
    %0 = arith.cmpi eq, %arg2, %c0_i32 : i32
    %1 = arith.extui %0 : i1 to i32
    %c0_i32_0 = arith.constant 0 : i32
    %2 = arith.cmpi ne, %1, %c0_i32_0 : i32
    scf.if %2 {
      %cst_10 = arith.constant 0.000000e+00 : f32
      %12 = vector.broadcast %cst_10 : f32 to vector<16x128xf32>
      %c0_11 = arith.constant 0 : index
      %c0_12 = arith.constant 0 : index
      %13 = vector.load %arg8[%c0_11, %c0_12] : memref<16x128xf32, #tpu.memory_space<vmem>>, vector<16x128xf32>
      tpu.vector_store %arg8[%c0_11, %c0_12], %12 {strides = array<i32>} : memref<16x128xf32, #tpu.memory_space<vmem>>, vector<16x128xf32>,
    } else {
    }
    %c0 = arith.constant 0 : index
    %c0_1 = arith.constant 0 : index
    %3 = vector.load %arg8[%c0, %c0_1] : memref<16x128xf32, #tpu.memory_space<vmem>>, vector<16x128xf32>
    %c0_2 = arith.constant 0 : index
    %c0_3 = arith.constant 0 : index
    %4 = vector.load %arg3[%c0_2, %c0_3] : memref<16x128xbf16, #tpu.memory_space<vmem>>, vector<16x128xbf16>
    %c0_4 = arith.constant 0 : index
    %c0_5 = arith.constant 0 : index
    %5 = vector.load %arg4[%c0_4, %c0_5] : memref<128x128xbf16, #tpu.memory_space<vmem>>, vector<128x128xbf16>
    %cst = arith.constant dense<0.000000e+00> : vector<16x128xf32>
    %6 = tpu.matmul %4, %5, %cst {dimension_numbers = #tpu.dot_dimension_numbers<[1], [0], [0], [1], [0, 0, 1, 1], [], []>} : vector<16x128xbf16>, vector<128x128xbf16>, vector<16x128xf32> -> vector<16x128xf32>
    %7 = arith.addf %3, %6 : vector<16x128xf32>
    %c0_6 = arith.constant 0 : index
    %c0_7 = arith.constant 0 : index
    %8 = vector.load %arg8[%c0_6, %c0_7] : memref<16x128xf32, #tpu.memory_space<vmem>>, vector<16x128xf32>
    tpu.vector_store %arg8[%c0_6, %c0_7], %7 {strides = array<i32>} : memref<16x128xf32, #tpu.memory_space<vmem>>, vector<16x128xf32>,
    %c0_i32_8 = arith.constant 0 : i32
    %9 = arith.cmpi eq, %arg2, %c0_i32_8 : i32
    %10 = arith.extui %9 : i1 to i32
    %c0_i32_9 = arith.constant 0 : i32
    %11 = arith.cmpi ne, %10, %c0_i32_9 : i32
    scf.if %11 {
      %c0_10 = arith.constant 0 : index
      %c0_11 = arith.constant 0 : index
      %12 = vector.load %arg8[%c0_10, %c0_11] : memref<16x128xf32, #tpu.memory_space<vmem>>, vector<16x128xf32>
      %c0_12 = arith.constant 0 : index
      %c0_13 = arith.constant 0 : index
      %13 = vector.load %arg5[%c0_12, %c0_13] : memref<1x128xf32, #tpu.memory_space<vmem>>, vector<1x128xf32>
      %14 = vector.broadcast %13 : vector<1x128xf32> to vector<16x128xf32>
      %15 = arith.mulf %12, %14 : vector<16x128xf32>
      %c0_14 = arith.constant 0 : index
      %c0_15 = arith.constant 0 : index
      %16 = vector.load %arg6[%c0_14, %c0_15] : memref<1x128xf32, #tpu.memory_space<vmem>>, vector<1x128xf32>
      %17 = vector.broadcast %16 : vector<1x128xf32> to vector<16x128xf32>
      %18 = arith.addf %15, %17 : vector<16x128xf32>
      %cst_16 = arith.constant 0.000000e+00 : f32
      %19 = vector.broadcast %cst_16 : f32 to vector<16x128xf32>
      %20 = arith.maximumf %18, %19 : vector<16x128xf32>
      %21 = arith.truncf %20 : vector<16x128xf32> to vector<16x128xbf16>
      %c0_17 = arith.constant 0 : index
      %c0_18 = arith.constant 0 : index
      %22 = vector.load %arg7[%c0_17, %c0_18] : memref<16x128xbf16, #tpu.memory_space<vmem>>, vector<16x128xbf16>
      tpu.vector_store %arg7[%c0_17, %c0_18], %21 {strides = array<i32>} : memref<16x128xbf16, #tpu.memory_space<vmem>>, vector<16x128xbf16>,
    } else {
    }
    return
  }
  func.func @transform_0(%arg0: i32, %arg1: i32, %arg2: i32) -> (i32, i32) {
    %c0_i32 = arith.constant 0 : i32
    return %arg0, %arg2 : i32, i32
  }
  func.func @transform_1(%arg0: i32, %arg1: i32, %arg2: i32) -> (i32, i32) {
    %c0_i32 = arith.constant 0 : i32
    return %arg2, %arg1 : i32, i32
  }
  func.func @transform_2(%arg0: i32, %arg1: i32, %arg2: i32) -> (i32, i32) {
    %c0_i32 = arith.constant 0 : i32
    %c0_i32_0 = arith.constant 0 : i32
    return %c0_i32, %arg1 : i32, i32
  }
  func.func @transform_3(%arg0: i32, %arg1: i32, %arg2: i32) -> (i32, i32) {
    %c0_i32 = arith.constant 0 : i32
    %c0_i32_0 = arith.constant 0 : i32
    return %c0_i32, %arg1 : i32, i32
  }
  func.func @transform_4(%arg0: i32, %arg1: i32, %arg2: i32) -> (i32, i32) {
    %c0_i32 = arith.constant 0 : i32
    return %arg0, %arg1 : i32, i32
  }
}

module attributes {stable_mosaic.version = 11 : i64} {
  func.func @kernel(%arg0: i32, %arg1: i32, %arg2: memref<48x128xbf16, #tpu.memory_space<any>>, %arg3: memref<9x128x128xbf16, #tpu.memory_space<vmem>>, %arg4: memref<1x128xf32, #tpu.memory_space<vmem>>, %arg5: memref<1x128xf32, #tpu.memory_space<vmem>>, %arg6: memref<32x128xbf16, #tpu.memory_space<vmem>>, %arg7: memref<32x128xf32, #tpu.memory_space<vmem>>, %arg8: memref<2x48x128xbf16, #tpu.memory_space<vmem>>, %arg9: memref<2x!tpu.dma_semaphore, #tpu.memory_space<semaphore_mem>>) attributes {dimension_semantics = [#tpu.dimension_semantics<arbitrary>, #tpu.dimension_semantics<arbitrary>], iteration_bounds = array<i64: 1, 1>, scalar_prefetch = 0 : i64, scratch_operands = 3 : i64, tpu.core_type = #tpu.core_type<tc>, window_params = [{}, {transform_indices = @transform_1, window_bounds = array<i64: 9, 128, 128>}, {transform_indices = @transform_2, window_bounds = array<i64: 1, 128>}, {transform_indices = @transform_3, window_bounds = array<i64: 1, 128>}, {transform_indices = @transform_4, window_bounds = array<i64: 32, 128>}]} {
    %c1_i32 = arith.constant 1 : i32
    %0 = arith.muli %arg0, %c1_i32 : i32
    %1 = arith.addi %0, %arg1 : i32
    %c2_i32 = arith.constant 2 : i32
    %c0_i32 = arith.constant 0 : i32
    %2 = arith.cmpi eq, %c2_i32, %c0_i32 : i32
    %c1_i32_0 = arith.constant 1 : i32
    %3 = arith.select %2, %c1_i32_0, %c2_i32 : i32
    %4 = arith.remsi %1, %3 : i32
    %c0_i32_1 = arith.constant 0 : i32
    %5 = arith.cmpi ne, %4, %c0_i32_1 : i32
    %c0_i32_2 = arith.constant 0 : i32
    %6 = arith.cmpi slt, %4, %c0_i32_2 : i32
    %c0_i32_3 = arith.constant 0 : i32
    %7 = arith.cmpi slt, %3, %c0_i32_3 : i32
    %8 = arith.xori %6, %7 : i1
    %9 = arith.andi %8, %5 : i1
    %10 = arith.addi %4, %3 : i32
    %11 = arith.select %9, %10, %4 : i32
    %c1_i32_4 = arith.constant 1 : i32
    %12 = arith.subi %c1_i32_4, %11 : i32
    %c0_i32_5 = arith.constant 0 : i32
    %13 = arith.cmpi eq, %1, %c0_i32_5 : i32
    %14 = arith.extui %13 : i1 to i32
    %c0_i32_6 = arith.constant 0 : i32
    %15 = arith.cmpi ne, %14, %c0_i32_6 : i32
    scf.if %15 {
      %c0_i32_97 = arith.constant 0 : i32
      %c0_i32_98 = arith.constant 0 : i32
      %c0_i32_99 = arith.constant 0 : i32
      %c0_i32_100 = arith.constant 0 : i32
      %112 = tpu.memref_slice %arg2[%c0_i32_99, %c0_i32_100] : memref<48x128xbf16, #tpu.memory_space<any>> -> memref<48x128xbf16, #tpu.memory_space<any>>
      %c0_i32_101 = arith.constant 0 : i32
      %c0_i32_102 = arith.constant 0 : i32
      %113 = tpu.memref_slice %arg8[%c0_i32_97, %c0_i32_101, %c0_i32_102] : memref<2x48x128xbf16, #tpu.memory_space<vmem>> -> memref<1x48x128xbf16, #tpu.memory_space<vmem>>
      %114 = tpu.memref_squeeze %113 : memref<1x48x128xbf16, #tpu.memory_space<vmem>> -> memref<48x128xbf16, #tpu.memory_space<vmem>>
      %115 = tpu.memref_slice %arg9[%c0_i32_98] : memref<2x!tpu.dma_semaphore, #tpu.memory_space<semaphore_mem>> -> memref<1x!tpu.dma_semaphore, #tpu.memory_space<semaphore_mem>>
      %116 = tpu.memref_squeeze %115 : memref<1x!tpu.dma_semaphore, #tpu.memory_space<semaphore_mem>> -> memref<!tpu.dma_semaphore, #tpu.memory_space<semaphore_mem>>
      tpu.enqueue_dma source(%112 : memref<48x128xbf16, #tpu.memory_space<any>>) target(%114 : memref<48x128xbf16, #tpu.memory_space<vmem>>) target_semaphore(%116 : memref<!tpu.dma_semaphore, #tpu.memory_space<semaphore_mem>>)
    } else {
    }
    %c0_i32_7 = arith.constant 0 : i32
    %c0_i32_8 = arith.constant 0 : i32
    %16 = tpu.memref_slice %arg2[%c0_i32_7, %c0_i32_8] : memref<48x128xbf16, #tpu.memory_space<any>> -> memref<48x128xbf16, #tpu.memory_space<any>>
    %c0_i32_9 = arith.constant 0 : i32
    %c0_i32_10 = arith.constant 0 : i32
    %17 = tpu.memref_slice %arg8[%11, %c0_i32_9, %c0_i32_10] : memref<2x48x128xbf16, #tpu.memory_space<vmem>> -> memref<1x48x128xbf16, #tpu.memory_space<vmem>>
    %18 = tpu.memref_squeeze %17 : memref<1x48x128xbf16, #tpu.memory_space<vmem>> -> memref<48x128xbf16, #tpu.memory_space<vmem>>
    %19 = tpu.memref_slice %arg9[%11] : memref<2x!tpu.dma_semaphore, #tpu.memory_space<semaphore_mem>> -> memref<1x!tpu.dma_semaphore, #tpu.memory_space<semaphore_mem>>
    %20 = tpu.memref_squeeze %19 : memref<1x!tpu.dma_semaphore, #tpu.memory_space<semaphore_mem>> -> memref<!tpu.dma_semaphore, #tpu.memory_space<semaphore_mem>>
    tpu.wait_dma2 semaphore(%20 : memref<!tpu.dma_semaphore, #tpu.memory_space<semaphore_mem>>) src(%16 : memref<48x128xbf16, #tpu.memory_space<any>>) dst(%18 : memref<48x128xbf16, #tpu.memory_space<vmem>>)
    %c0_i32_11 = arith.constant 0 : i32
    %21 = arith.cmpi slt, %1, %c0_i32_11 : i32
    %22 = arith.extui %21 : i1 to i32
    %c0_i32_12 = arith.constant 0 : i32
    %23 = arith.cmpi ne, %22, %c0_i32_12 : i32
    scf.if %23 {
      %c0_i32_97 = arith.constant 0 : i32
      %112 = arith.cmpi eq, %arg1, %c0_i32_97 : i32
      %c1_i32_98 = arith.constant 1 : i32
      %113 = arith.addi %arg1, %c1_i32_98 : i32
      %c0_i32_99 = arith.constant 0 : i32
      %114 = arith.select %112, %c0_i32_99, %113 : i32
      %c32_i32 = arith.constant 32 : i32
      %115 = arith.muli %114, %c32_i32 : i32
      %c0_i32_100 = arith.constant 0 : i32
      %116 = tpu.memref_slice %arg2[%115, %c0_i32_100] : memref<48x128xbf16, #tpu.memory_space<any>> -> memref<48x128xbf16, #tpu.memory_space<any>>
      %c0_i32_101 = arith.constant 0 : i32
      %c0_i32_102 = arith.constant 0 : i32
      %117 = tpu.memref_slice %arg8[%12, %c0_i32_101, %c0_i32_102] : memref<2x48x128xbf16, #tpu.memory_space<vmem>> -> memref<1x48x128xbf16, #tpu.memory_space<vmem>>
      %118 = tpu.memref_squeeze %117 : memref<1x48x128xbf16, #tpu.memory_space<vmem>> -> memref<48x128xbf16, #tpu.memory_space<vmem>>
      %119 = tpu.memref_slice %arg9[%12] : memref<2x!tpu.dma_semaphore, #tpu.memory_space<semaphore_mem>> -> memref<1x!tpu.dma_semaphore, #tpu.memory_space<semaphore_mem>>
      %120 = tpu.memref_squeeze %119 : memref<1x!tpu.dma_semaphore, #tpu.memory_space<semaphore_mem>> -> memref<!tpu.dma_semaphore, #tpu.memory_space<semaphore_mem>>
      tpu.enqueue_dma source(%116 : memref<48x128xbf16, #tpu.memory_space<any>>) target(%118 : memref<48x128xbf16, #tpu.memory_space<vmem>>) target_semaphore(%120 : memref<!tpu.dma_semaphore, #tpu.memory_space<semaphore_mem>>)
    } else {
    }
    %24 = arith.index_cast %11 : i32 to index
    %c0 = arith.constant 0 : index
    %c0_13 = arith.constant 0 : index
    %25 = vector.load %arg8[%24, %c0, %c0_13] : memref<2x48x128xbf16, #tpu.memory_space<vmem>>, vector<1x32x128xbf16>
    %26 = vector.shape_cast %25 : vector<1x32x128xbf16> to vector<32x128xbf16>
    %c0_14 = arith.constant 0 : index
    %c0_15 = arith.constant 0 : index
    %c0_16 = arith.constant 0 : index
    %27 = vector.load %arg3[%c0_14, %c0_15, %c0_16] : memref<9x128x128xbf16, #tpu.memory_space<vmem>>, vector<1x128x128xbf16>
    %28 = vector.shape_cast %27 : vector<1x128x128xbf16> to vector<128x128xbf16>
    %cst = arith.constant dense<0.000000e+00> : vector<32x128xf32>
    %29 = tpu.matmul %26, %28, %cst {dimension_numbers = #tpu.dot_dimension_numbers<[1], [0], [0], [1], [0, 0, 1, 1], [], []>} : vector<32x128xbf16>, vector<128x128xbf16>, vector<32x128xf32> -> vector<32x128xf32>
    %c0_17 = arith.constant 0 : index
    %c0_18 = arith.constant 0 : index
    %30 = vector.load %arg7[%c0_17, %c0_18] : memref<32x128xf32, #tpu.memory_space<vmem>>, vector<32x128xf32>
    tpu.vector_store %arg7[%c0_17, %c0_18], %29 {strides = array<i32>} : memref<32x128xf32, #tpu.memory_space<vmem>>, vector<32x128xf32>,
    %c0_19 = arith.constant 0 : index
    %c0_20 = arith.constant 0 : index
    %31 = vector.load %arg7[%c0_19, %c0_20] : memref<32x128xf32, #tpu.memory_space<vmem>>, vector<32x128xf32>
    %32 = arith.index_cast %11 : i32 to index
    %c1 = arith.constant 1 : index
    %c0_21 = arith.constant 0 : index
    %33 = vector.load %arg8[%32, %c1, %c0_21] : memref<2x48x128xbf16, #tpu.memory_space<vmem>>, vector<1x32x128xbf16>
    %34 = vector.shape_cast %33 : vector<1x32x128xbf16> to vector<32x128xbf16>
    %c1_22 = arith.constant 1 : index
    %c0_23 = arith.constant 0 : index
    %c0_24 = arith.constant 0 : index
    %35 = vector.load %arg3[%c1_22, %c0_23, %c0_24] : memref<9x128x128xbf16, #tpu.memory_space<vmem>>, vector<1x128x128xbf16>
    %36 = vector.shape_cast %35 : vector<1x128x128xbf16> to vector<128x128xbf16>
    %cst_25 = arith.constant dense<0.000000e+00> : vector<32x128xf32>
    %37 = tpu.matmul %34, %36, %cst_25 {dimension_numbers = #tpu.dot_dimension_numbers<[1], [0], [0], [1], [0, 0, 1, 1], [], []>} : vector<32x128xbf16>, vector<128x128xbf16>, vector<32x128xf32> -> vector<32x128xf32>
    %38 = arith.addf %31, %37 : vector<32x128xf32>
    %c0_26 = arith.constant 0 : index
    %c0_27 = arith.constant 0 : index
    %39 = vector.load %arg7[%c0_26, %c0_27] : memref<32x128xf32, #tpu.memory_space<vmem>>, vector<32x128xf32>
    tpu.vector_store %arg7[%c0_26, %c0_27], %38 {strides = array<i32>} : memref<32x128xf32, #tpu.memory_space<vmem>>, vector<32x128xf32>,
    %c0_28 = arith.constant 0 : index
    %c0_29 = arith.constant 0 : index
    %40 = vector.load %arg7[%c0_28, %c0_29] : memref<32x128xf32, #tpu.memory_space<vmem>>, vector<32x128xf32>
    %41 = arith.index_cast %11 : i32 to index
    %c2 = arith.constant 2 : index
    %c0_30 = arith.constant 0 : index
    %42 = vector.load %arg8[%41, %c2, %c0_30] : memref<2x48x128xbf16, #tpu.memory_space<vmem>>, vector<1x32x128xbf16>
    %43 = vector.shape_cast %42 : vector<1x32x128xbf16> to vector<32x128xbf16>
    %c2_31 = arith.constant 2 : index
    %c0_32 = arith.constant 0 : index
    %c0_33 = arith.constant 0 : index
    %44 = vector.load %arg3[%c2_31, %c0_32, %c0_33] : memref<9x128x128xbf16, #tpu.memory_space<vmem>>, vector<1x128x128xbf16>
    %45 = vector.shape_cast %44 : vector<1x128x128xbf16> to vector<128x128xbf16>
    %cst_34 = arith.constant dense<0.000000e+00> : vector<32x128xf32>
    %46 = tpu.matmul %43, %45, %cst_34 {dimension_numbers = #tpu.dot_dimension_numbers<[1], [0], [0], [1], [0, 0, 1, 1], [], []>} : vector<32x128xbf16>, vector<128x128xbf16>, vector<32x128xf32> -> vector<32x128xf32>
    %47 = arith.addf %40, %46 : vector<32x128xf32>
    %c0_35 = arith.constant 0 : index
    %c0_36 = arith.constant 0 : index
    %48 = vector.load %arg7[%c0_35, %c0_36] : memref<32x128xf32, #tpu.memory_space<vmem>>, vector<32x128xf32>
    tpu.vector_store %arg7[%c0_35, %c0_36], %47 {strides = array<i32>} : memref<32x128xf32, #tpu.memory_space<vmem>>, vector<32x128xf32>,
    %c0_37 = arith.constant 0 : index
    %c0_38 = arith.constant 0 : index
    %49 = vector.load %arg7[%c0_37, %c0_38] : memref<32x128xf32, #tpu.memory_space<vmem>>, vector<32x128xf32>
    %50 = arith.index_cast %11 : i32 to index
    %c4 = arith.constant 4 : index
    %c0_39 = arith.constant 0 : index
    %51 = vector.load %arg8[%50, %c4, %c0_39] : memref<2x48x128xbf16, #tpu.memory_space<vmem>>, vector<1x32x128xbf16>
    %52 = vector.shape_cast %51 : vector<1x32x128xbf16> to vector<32x128xbf16>
    %c3 = arith.constant 3 : index
    %c0_40 = arith.constant 0 : index
    %c0_41 = arith.constant 0 : index
    %53 = vector.load %arg3[%c3, %c0_40, %c0_41] : memref<9x128x128xbf16, #tpu.memory_space<vmem>>, vector<1x128x128xbf16>
    %54 = vector.shape_cast %53 : vector<1x128x128xbf16> to vector<128x128xbf16>
    %cst_42 = arith.constant dense<0.000000e+00> : vector<32x128xf32>
    %55 = tpu.matmul %52, %54, %cst_42 {dimension_numbers = #tpu.dot_dimension_numbers<[1], [0], [0], [1], [0, 0, 1, 1], [], []>} : vector<32x128xbf16>, vector<128x128xbf16>, vector<32x128xf32> -> vector<32x128xf32>
    %56 = arith.addf %49, %55 : vector<32x128xf32>
    %c0_43 = arith.constant 0 : index
    %c0_44 = arith.constant 0 : index
    %57 = vector.load %arg7[%c0_43, %c0_44] : memref<32x128xf32, #tpu.memory_space<vmem>>, vector<32x128xf32>
    tpu.vector_store %arg7[%c0_43, %c0_44], %56 {strides = array<i32>} : memref<32x128xf32, #tpu.memory_space<vmem>>, vector<32x128xf32>,
    %c0_45 = arith.constant 0 : index
    %c0_46 = arith.constant 0 : index
    %58 = vector.load %arg7[%c0_45, %c0_46] : memref<32x128xf32, #tpu.memory_space<vmem>>, vector<32x128xf32>
    %59 = arith.index_cast %11 : i32 to index
    %c5 = arith.constant 5 : index
    %c0_47 = arith.constant 0 : index
    %60 = vector.load %arg8[%59, %c5, %c0_47] : memref<2x48x128xbf16, #tpu.memory_space<vmem>>, vector<1x32x128xbf16>
    %61 = vector.shape_cast %60 : vector<1x32x128xbf16> to vector<32x128xbf16>
    %c4_48 = arith.constant 4 : index
    %c0_49 = arith.constant 0 : index
    %c0_50 = arith.constant 0 : index
    %62 = vector.load %arg3[%c4_48, %c0_49, %c0_50] : memref<9x128x128xbf16, #tpu.memory_space<vmem>>, vector<1x128x128xbf16>
    %63 = vector.shape_cast %62 : vector<1x128x128xbf16> to vector<128x128xbf16>
    %cst_51 = arith.constant dense<0.000000e+00> : vector<32x128xf32>
    %64 = tpu.matmul %61, %63, %cst_51 {dimension_numbers = #tpu.dot_dimension_numbers<[1], [0], [0], [1], [0, 0, 1, 1], [], []>} : vector<32x128xbf16>, vector<128x128xbf16>, vector<32x128xf32> -> vector<32x128xf32>
    %65 = arith.addf %58, %64 : vector<32x128xf32>
    %c0_52 = arith.constant 0 : index
    %c0_53 = arith.constant 0 : index
    %66 = vector.load %arg7[%c0_52, %c0_53] : memref<32x128xf32, #tpu.memory_space<vmem>>, vector<32x128xf32>
    tpu.vector_store %arg7[%c0_52, %c0_53], %65 {strides = array<i32>} : memref<32x128xf32, #tpu.memory_space<vmem>>, vector<32x128xf32>,
    %c0_54 = arith.constant 0 : index
    %c0_55 = arith.constant 0 : index
    %67 = vector.load %arg7[%c0_54, %c0_55] : memref<32x128xf32, #tpu.memory_space<vmem>>, vector<32x128xf32>
    %68 = arith.index_cast %11 : i32 to index
    %c6 = arith.constant 6 : index
    %c0_56 = arith.constant 0 : index
    %69 = vector.load %arg8[%68, %c6, %c0_56] : memref<2x48x128xbf16, #tpu.memory_space<vmem>>, vector<1x32x128xbf16>
    %70 = vector.shape_cast %69 : vector<1x32x128xbf16> to vector<32x128xbf16>
    %c5_57 = arith.constant 5 : index
    %c0_58 = arith.constant 0 : index
    %c0_59 = arith.constant 0 : index
    %71 = vector.load %arg3[%c5_57, %c0_58, %c0_59] : memref<9x128x128xbf16, #tpu.memory_space<vmem>>, vector<1x128x128xbf16>
    %72 = vector.shape_cast %71 : vector<1x128x128xbf16> to vector<128x128xbf16>
    %cst_60 = arith.constant dense<0.000000e+00> : vector<32x128xf32>
    %73 = tpu.matmul %70, %72, %cst_60 {dimension_numbers = #tpu.dot_dimension_numbers<[1], [0], [0], [1], [0, 0, 1, 1], [], []>} : vector<32x128xbf16>, vector<128x128xbf16>, vector<32x128xf32> -> vector<32x128xf32>
    %74 = arith.addf %67, %73 : vector<32x128xf32>
    %c0_61 = arith.constant 0 : index
    %c0_62 = arith.constant 0 : index
    %75 = vector.load %arg7[%c0_61, %c0_62] : memref<32x128xf32, #tpu.memory_space<vmem>>, vector<32x128xf32>
    tpu.vector_store %arg7[%c0_61, %c0_62], %74 {strides = array<i32>} : memref<32x128xf32, #tpu.memory_space<vmem>>, vector<32x128xf32>,
    %c0_63 = arith.constant 0 : index
    %c0_64 = arith.constant 0 : index
    %76 = vector.load %arg7[%c0_63, %c0_64] : memref<32x128xf32, #tpu.memory_space<vmem>>, vector<32x128xf32>
    %77 = arith.index_cast %11 : i32 to index
    %c8 = arith.constant 8 : index
    %c0_65 = arith.constant 0 : index
    %78 = vector.load %arg8[%77, %c8, %c0_65] : memref<2x48x128xbf16, #tpu.memory_space<vmem>>, vector<1x32x128xbf16>
    %79 = vector.shape_cast %78 : vector<1x32x128xbf16> to vector<32x128xbf16>
    %c6_66 = arith.constant 6 : index
    %c0_67 = arith.constant 0 : index
    %c0_68 = arith.constant 0 : index
    %80 = vector.load %arg3[%c6_66, %c0_67, %c0_68] : memref<9x128x128xbf16, #tpu.memory_space<vmem>>, vector<1x128x128xbf16>
    %81 = vector.shape_cast %80 : vector<1x128x128xbf16> to vector<128x128xbf16>
    %cst_69 = arith.constant dense<0.000000e+00> : vector<32x128xf32>
    %82 = tpu.matmul %79, %81, %cst_69 {dimension_numbers = #tpu.dot_dimension_numbers<[1], [0], [0], [1], [0, 0, 1, 1], [], []>} : vector<32x128xbf16>, vector<128x128xbf16>, vector<32x128xf32> -> vector<32x128xf32>
    %83 = arith.addf %76, %82 : vector<32x128xf32>
    %c0_70 = arith.constant 0 : index
    %c0_71 = arith.constant 0 : index
    %84 = vector.load %arg7[%c0_70, %c0_71] : memref<32x128xf32, #tpu.memory_space<vmem>>, vector<32x128xf32>
    tpu.vector_store %arg7[%c0_70, %c0_71], %83 {strides = array<i32>} : memref<32x128xf32, #tpu.memory_space<vmem>>, vector<32x128xf32>,
    %c0_72 = arith.constant 0 : index
    %c0_73 = arith.constant 0 : index
    %85 = vector.load %arg7[%c0_72, %c0_73] : memref<32x128xf32, #tpu.memory_space<vmem>>, vector<32x128xf32>
    %86 = arith.index_cast %11 : i32 to index
    %c9 = arith.constant 9 : index
    %c0_74 = arith.constant 0 : index
    %87 = vector.load %arg8[%86, %c9, %c0_74] : memref<2x48x128xbf16, #tpu.memory_space<vmem>>, vector<1x32x128xbf16>
    %88 = vector.shape_cast %87 : vector<1x32x128xbf16> to vector<32x128xbf16>
    %c7 = arith.constant 7 : index
    %c0_75 = arith.constant 0 : index
    %c0_76 = arith.constant 0 : index
    %89 = vector.load %arg3[%c7, %c0_75, %c0_76] : memref<9x128x128xbf16, #tpu.memory_space<vmem>>, vector<1x128x128xbf16>
    %90 = vector.shape_cast %89 : vector<1x128x128xbf16> to vector<128x128xbf16>
    %cst_77 = arith.constant dense<0.000000e+00> : vector<32x128xf32>
    %91 = tpu.matmul %88, %90, %cst_77 {dimension_numbers = #tpu.dot_dimension_numbers<[1], [0], [0], [1], [0, 0, 1, 1], [], []>} : vector<32x128xbf16>, vector<128x128xbf16>, vector<32x128xf32> -> vector<32x128xf32>
    %92 = arith.addf %85, %91 : vector<32x128xf32>
    %c0_78 = arith.constant 0 : index
    %c0_79 = arith.constant 0 : index
    %93 = vector.load %arg7[%c0_78, %c0_79] : memref<32x128xf32, #tpu.memory_space<vmem>>, vector<32x128xf32>
    tpu.vector_store %arg7[%c0_78, %c0_79], %92 {strides = array<i32>} : memref<32x128xf32, #tpu.memory_space<vmem>>, vector<32x128xf32>,
    %c0_80 = arith.constant 0 : index
    %c0_81 = arith.constant 0 : index
    %94 = vector.load %arg7[%c0_80, %c0_81] : memref<32x128xf32, #tpu.memory_space<vmem>>, vector<32x128xf32>
    %95 = arith.index_cast %11 : i32 to index
    %c10 = arith.constant 10 : index
    %c0_82 = arith.constant 0 : index
    %96 = vector.load %arg8[%95, %c10, %c0_82] : memref<2x48x128xbf16, #tpu.memory_space<vmem>>, vector<1x32x128xbf16>
    %97 = vector.shape_cast %96 : vector<1x32x128xbf16> to vector<32x128xbf16>
    %c8_83 = arith.constant 8 : index
    %c0_84 = arith.constant 0 : index
    %c0_85 = arith.constant 0 : index
    %98 = vector.load %arg3[%c8_83, %c0_84, %c0_85] : memref<9x128x128xbf16, #tpu.memory_space<vmem>>, vector<1x128x128xbf16>
    %99 = vector.shape_cast %98 : vector<1x128x128xbf16> to vector<128x128xbf16>
    %cst_86 = arith.constant dense<0.000000e+00> : vector<32x128xf32>
    %100 = tpu.matmul %97, %99, %cst_86 {dimension_numbers = #tpu.dot_dimension_numbers<[1], [0], [0], [1], [0, 0, 1, 1], [], []>} : vector<32x128xbf16>, vector<128x128xbf16>, vector<32x128xf32> -> vector<32x128xf32>
    %101 = arith.addf %94, %100 : vector<32x128xf32>
    %c0_87 = arith.constant 0 : index
    %c0_88 = arith.constant 0 : index
    %102 = vector.load %arg7[%c0_87, %c0_88] : memref<32x128xf32, #tpu.memory_space<vmem>>, vector<32x128xf32>
    tpu.vector_store %arg7[%c0_87, %c0_88], %101 {strides = array<i32>} : memref<32x128xf32, #tpu.memory_space<vmem>>, vector<32x128xf32>,
    %c0_89 = arith.constant 0 : index
    %c0_90 = arith.constant 0 : index
    %103 = vector.load %arg7[%c0_89, %c0_90] : memref<32x128xf32, #tpu.memory_space<vmem>>, vector<32x128xf32>
    %c0_91 = arith.constant 0 : index
    %c0_92 = arith.constant 0 : index
    %104 = vector.load %arg4[%c0_91, %c0_92] : memref<1x128xf32, #tpu.memory_space<vmem>>, vector<1x128xf32>
    %105 = vector.broadcast %104 : vector<1x128xf32> to vector<32x128xf32>
    %106 = arith.mulf %103, %105 : vector<32x128xf32>
    %c0_93 = arith.constant 0 : index
    %c0_94 = arith.constant 0 : index
    %107 = vector.load %arg5[%c0_93, %c0_94] : memref<1x128xf32, #tpu.memory_space<vmem>>, vector<1x128xf32>
    %108 = vector.broadcast %107 : vector<1x128xf32> to vector<32x128xf32>
    %109 = arith.addf %106, %108 : vector<32x128xf32>
    %110 = arith.truncf %109 : vector<32x128xf32> to vector<32x128xbf16>
    %c0_95 = arith.constant 0 : index
    %c0_96 = arith.constant 0 : index
    %111 = vector.load %arg6[%c0_95, %c0_96] : memref<32x128xbf16, #tpu.memory_space<vmem>>, vector<32x128xbf16>
    tpu.vector_store %arg6[%c0_95, %c0_96], %110 {strides = array<i32>} : memref<32x128xbf16, #tpu.memory_space<vmem>>, vector<32x128xbf16>,
    return
  }
  func.func @transform_1(%arg0: i32, %arg1: i32) -> (i32, i32, i32) {
    %c0_i32 = arith.constant 0 : i32
    %c0_i32_0 = arith.constant 0 : i32
    %c0_i32_1 = arith.constant 0 : i32
    return %c0_i32, %c0_i32_0, %arg0 : i32, i32, i32
  }
  func.func @transform_2(%arg0: i32, %arg1: i32) -> (i32, i32) {
    %c0_i32 = arith.constant 0 : i32
    %c0_i32_0 = arith.constant 0 : i32
    return %c0_i32, %arg0 : i32, i32
  }
  func.func @transform_3(%arg0: i32, %arg1: i32) -> (i32, i32) {
    %c0_i32 = arith.constant 0 : i32
    %c0_i32_0 = arith.constant 0 : i32
    return %c0_i32, %arg0 : i32, i32
  }
  func.func @transform_4(%arg0: i32, %arg1: i32) -> (i32, i32) {
    %c0_i32 = arith.constant 0 : i32
    return %arg1, %arg0 : i32, i32
  }
}

module attributes {stable_mosaic.version = 11 : i64} {
  func.func @kernel(%arg0: i32, %arg1: i32, %arg2: i32, %arg3: memref<16x384xbf16, #tpu.memory_space<vmem>>, %arg4: memref<384x128xbf16, #tpu.memory_space<vmem>>, %arg5: memref<1x128xf32, #tpu.memory_space<vmem>>, %arg6: memref<1x128xf32, #tpu.memory_space<vmem>>, %arg7: memref<16x128xbf16, #tpu.memory_space<vmem>>, %arg8: memref<16x128xf32, #tpu.memory_space<vmem>>) attributes {dimension_semantics = [#tpu.dimension_semantics<parallel>, #tpu.dimension_semantics<parallel>, #tpu.dimension_semantics<arbitrary>], iteration_bounds = array<i64: 1, 1, 1>, scalar_prefetch = 0 : i64, scratch_operands = 1 : i64, tpu.core_type = #tpu.core_type<tc>, window_params = [{transform_indices = @transform_0, window_bounds = array<i64: 16, 384>}, {transform_indices = @transform_1, window_bounds = array<i64: 384, 128>}, {transform_indices = @transform_2, window_bounds = array<i64: 1, 128>}, {transform_indices = @transform_3, window_bounds = array<i64: 1, 128>}, {transform_indices = @transform_4, window_bounds = array<i64: 16, 128>}]} {
    %c0_i32 = arith.constant 0 : i32
    %0 = arith.cmpi eq, %arg2, %c0_i32 : i32
    %1 = arith.extui %0 : i1 to i32
    %c0_i32_0 = arith.constant 0 : i32
    %2 = arith.cmpi ne, %1, %c0_i32_0 : i32
    scf.if %2 {
      %cst_10 = arith.constant 0.000000e+00 : f32
      %12 = vector.broadcast %cst_10 : f32 to vector<16x128xf32>
      %c0_11 = arith.constant 0 : index
      %c0_12 = arith.constant 0 : index
      %13 = vector.load %arg8[%c0_11, %c0_12] : memref<16x128xf32, #tpu.memory_space<vmem>>, vector<16x128xf32>
      tpu.vector_store %arg8[%c0_11, %c0_12], %12 {strides = array<i32>} : memref<16x128xf32, #tpu.memory_space<vmem>>, vector<16x128xf32>,
    } else {
    }
    %c0 = arith.constant 0 : index
    %c0_1 = arith.constant 0 : index
    %3 = vector.load %arg8[%c0, %c0_1] : memref<16x128xf32, #tpu.memory_space<vmem>>, vector<16x128xf32>
    %c0_2 = arith.constant 0 : index
    %c0_3 = arith.constant 0 : index
    %4 = vector.load %arg3[%c0_2, %c0_3] : memref<16x384xbf16, #tpu.memory_space<vmem>>, vector<16x384xbf16>
    %c0_4 = arith.constant 0 : index
    %c0_5 = arith.constant 0 : index
    %5 = vector.load %arg4[%c0_4, %c0_5] : memref<384x128xbf16, #tpu.memory_space<vmem>>, vector<384x128xbf16>
    %cst = arith.constant dense<0.000000e+00> : vector<16x128xf32>
    %6 = tpu.matmul %4, %5, %cst {dimension_numbers = #tpu.dot_dimension_numbers<[1], [0], [0], [1], [0, 0, 1, 1], [], []>} : vector<16x384xbf16>, vector<384x128xbf16>, vector<16x128xf32> -> vector<16x128xf32>
    %7 = arith.addf %3, %6 : vector<16x128xf32>
    %c0_6 = arith.constant 0 : index
    %c0_7 = arith.constant 0 : index
    %8 = vector.load %arg8[%c0_6, %c0_7] : memref<16x128xf32, #tpu.memory_space<vmem>>, vector<16x128xf32>
    tpu.vector_store %arg8[%c0_6, %c0_7], %7 {strides = array<i32>} : memref<16x128xf32, #tpu.memory_space<vmem>>, vector<16x128xf32>,
    %c0_i32_8 = arith.constant 0 : i32
    %9 = arith.cmpi eq, %arg2, %c0_i32_8 : i32
    %10 = arith.extui %9 : i1 to i32
    %c0_i32_9 = arith.constant 0 : i32
    %11 = arith.cmpi ne, %10, %c0_i32_9 : i32
    scf.if %11 {
      %c0_10 = arith.constant 0 : index
      %c0_11 = arith.constant 0 : index
      %12 = vector.load %arg8[%c0_10, %c0_11] : memref<16x128xf32, #tpu.memory_space<vmem>>, vector<16x128xf32>
      %c0_12 = arith.constant 0 : index
      %c0_13 = arith.constant 0 : index
      %13 = vector.load %arg5[%c0_12, %c0_13] : memref<1x128xf32, #tpu.memory_space<vmem>>, vector<1x128xf32>
      %14 = vector.broadcast %13 : vector<1x128xf32> to vector<16x128xf32>
      %15 = arith.mulf %12, %14 : vector<16x128xf32>
      %c0_14 = arith.constant 0 : index
      %c0_15 = arith.constant 0 : index
      %16 = vector.load %arg6[%c0_14, %c0_15] : memref<1x128xf32, #tpu.memory_space<vmem>>, vector<1x128xf32>
      %17 = vector.broadcast %16 : vector<1x128xf32> to vector<16x128xf32>
      %18 = arith.addf %15, %17 : vector<16x128xf32>
      %19 = arith.truncf %18 : vector<16x128xf32> to vector<16x128xbf16>
      %c0_16 = arith.constant 0 : index
      %c0_17 = arith.constant 0 : index
      %20 = vector.load %arg7[%c0_16, %c0_17] : memref<16x128xbf16, #tpu.memory_space<vmem>>, vector<16x128xbf16>
      tpu.vector_store %arg7[%c0_16, %c0_17], %19 {strides = array<i32>} : memref<16x128xbf16, #tpu.memory_space<vmem>>, vector<16x128xbf16>,
    } else {
    }
    return
  }
  func.func @transform_0(%arg0: i32, %arg1: i32, %arg2: i32) -> (i32, i32) {
    %c0_i32 = arith.constant 0 : i32
    return %arg0, %arg2 : i32, i32
  }
  func.func @transform_1(%arg0: i32, %arg1: i32, %arg2: i32) -> (i32, i32) {
    %c0_i32 = arith.constant 0 : i32
    return %arg2, %arg1 : i32, i32
  }
  func.func @transform_2(%arg0: i32, %arg1: i32, %arg2: i32) -> (i32, i32) {
    %c0_i32 = arith.constant 0 : i32
    %c0_i32_0 = arith.constant 0 : i32
    return %c0_i32, %arg1 : i32, i32
  }
  func.func @transform_3(%arg0: i32, %arg1: i32, %arg2: i32) -> (i32, i32) {
    %c0_i32 = arith.constant 0 : i32
    %c0_i32_0 = arith.constant 0 : i32
    return %c0_i32, %arg1 : i32, i32
  }
  func.func @transform_4(%arg0: i32, %arg1: i32, %arg2: i32) -> (i32, i32) {
    %c0_i32 = arith.constant 0 : i32
    return %arg0, %arg1 : i32, i32
  }
}

module attributes {stable_mosaic.version = 11 : i64} {
  func.func @kernel(%arg0: i32, %arg1: i32, %arg2: i32, %arg3: memref<16x128xbf16, #tpu.memory_space<vmem>>, %arg4: memref<128x256xbf16, #tpu.memory_space<vmem>>, %arg5: memref<1x256xf32, #tpu.memory_space<vmem>>, %arg6: memref<1x256xf32, #tpu.memory_space<vmem>>, %arg7: memref<16x256xbf16, #tpu.memory_space<vmem>>, %arg8: memref<16x256xf32, #tpu.memory_space<vmem>>) attributes {dimension_semantics = [#tpu.dimension_semantics<parallel>, #tpu.dimension_semantics<parallel>, #tpu.dimension_semantics<arbitrary>], iteration_bounds = array<i64: 1, 4, 1>, scalar_prefetch = 0 : i64, scratch_operands = 1 : i64, tpu.core_type = #tpu.core_type<tc>, window_params = [{transform_indices = @transform_0, window_bounds = array<i64: 16, 128>}, {transform_indices = @transform_1, window_bounds = array<i64: 128, 256>}, {transform_indices = @transform_2, window_bounds = array<i64: 1, 256>}, {transform_indices = @transform_3, window_bounds = array<i64: 1, 256>}, {transform_indices = @transform_4, window_bounds = array<i64: 16, 256>}]} {
    %c0_i32 = arith.constant 0 : i32
    %0 = arith.cmpi eq, %arg2, %c0_i32 : i32
    %1 = arith.extui %0 : i1 to i32
    %c0_i32_0 = arith.constant 0 : i32
    %2 = arith.cmpi ne, %1, %c0_i32_0 : i32
    scf.if %2 {
      %cst_10 = arith.constant 0.000000e+00 : f32
      %12 = vector.broadcast %cst_10 : f32 to vector<16x256xf32>
      %c0_11 = arith.constant 0 : index
      %c0_12 = arith.constant 0 : index
      %13 = vector.load %arg8[%c0_11, %c0_12] : memref<16x256xf32, #tpu.memory_space<vmem>>, vector<16x256xf32>
      tpu.vector_store %arg8[%c0_11, %c0_12], %12 {strides = array<i32>} : memref<16x256xf32, #tpu.memory_space<vmem>>, vector<16x256xf32>,
    } else {
    }
    %c0 = arith.constant 0 : index
    %c0_1 = arith.constant 0 : index
    %3 = vector.load %arg8[%c0, %c0_1] : memref<16x256xf32, #tpu.memory_space<vmem>>, vector<16x256xf32>
    %c0_2 = arith.constant 0 : index
    %c0_3 = arith.constant 0 : index
    %4 = vector.load %arg3[%c0_2, %c0_3] : memref<16x128xbf16, #tpu.memory_space<vmem>>, vector<16x128xbf16>
    %c0_4 = arith.constant 0 : index
    %c0_5 = arith.constant 0 : index
    %5 = vector.load %arg4[%c0_4, %c0_5] : memref<128x256xbf16, #tpu.memory_space<vmem>>, vector<128x256xbf16>
    %cst = arith.constant dense<0.000000e+00> : vector<16x256xf32>
    %6 = tpu.matmul %4, %5, %cst {dimension_numbers = #tpu.dot_dimension_numbers<[1], [0], [0], [1], [0, 0, 1, 1], [], []>} : vector<16x128xbf16>, vector<128x256xbf16>, vector<16x256xf32> -> vector<16x256xf32>
    %7 = arith.addf %3, %6 : vector<16x256xf32>
    %c0_6 = arith.constant 0 : index
    %c0_7 = arith.constant 0 : index
    %8 = vector.load %arg8[%c0_6, %c0_7] : memref<16x256xf32, #tpu.memory_space<vmem>>, vector<16x256xf32>
    tpu.vector_store %arg8[%c0_6, %c0_7], %7 {strides = array<i32>} : memref<16x256xf32, #tpu.memory_space<vmem>>, vector<16x256xf32>,
    %c0_i32_8 = arith.constant 0 : i32
    %9 = arith.cmpi eq, %arg2, %c0_i32_8 : i32
    %10 = arith.extui %9 : i1 to i32
    %c0_i32_9 = arith.constant 0 : i32
    %11 = arith.cmpi ne, %10, %c0_i32_9 : i32
    scf.if %11 {
      %c0_10 = arith.constant 0 : index
      %c0_11 = arith.constant 0 : index
      %12 = vector.load %arg8[%c0_10, %c0_11] : memref<16x256xf32, #tpu.memory_space<vmem>>, vector<16x256xf32>
      %c0_12 = arith.constant 0 : index
      %c0_13 = arith.constant 0 : index
      %13 = vector.load %arg5[%c0_12, %c0_13] : memref<1x256xf32, #tpu.memory_space<vmem>>, vector<1x256xf32>
      %14 = vector.broadcast %13 : vector<1x256xf32> to vector<16x256xf32>
      %15 = arith.mulf %12, %14 : vector<16x256xf32>
      %c0_14 = arith.constant 0 : index
      %c0_15 = arith.constant 0 : index
      %16 = vector.load %arg6[%c0_14, %c0_15] : memref<1x256xf32, #tpu.memory_space<vmem>>, vector<1x256xf32>
      %17 = vector.broadcast %16 : vector<1x256xf32> to vector<16x256xf32>
      %18 = arith.addf %15, %17 : vector<16x256xf32>
      %cst_16 = arith.constant 0.000000e+00 : f32
      %19 = vector.broadcast %cst_16 : f32 to vector<16x256xf32>
      %20 = arith.maximumf %18, %19 : vector<16x256xf32>
      %21 = arith.truncf %20 : vector<16x256xf32> to vector<16x256xbf16>
      %c0_17 = arith.constant 0 : index
      %c0_18 = arith.constant 0 : index
      %22 = vector.load %arg7[%c0_17, %c0_18] : memref<16x256xbf16, #tpu.memory_space<vmem>>, vector<16x256xbf16>
      tpu.vector_store %arg7[%c0_17, %c0_18], %21 {strides = array<i32>} : memref<16x256xbf16, #tpu.memory_space<vmem>>, vector<16x256xbf16>,
    } else {
    }
    return
  }
  func.func @transform_0(%arg0: i32, %arg1: i32, %arg2: i32) -> (i32, i32) {
    %c0_i32 = arith.constant 0 : i32
    return %arg0, %arg2 : i32, i32
  }
  func.func @transform_1(%arg0: i32, %arg1: i32, %arg2: i32) -> (i32, i32) {
    %c0_i32 = arith.constant 0 : i32
    return %arg2, %arg1 : i32, i32
  }
  func.func @transform_2(%arg0: i32, %arg1: i32, %arg2: i32) -> (i32, i32) {
    %c0_i32 = arith.constant 0 : i32
    %c0_i32_0 = arith.constant 0 : i32
    return %c0_i32, %arg1 : i32, i32
  }
  func.func @transform_3(%arg0: i32, %arg1: i32, %arg2: i32) -> (i32, i32) {
    %c0_i32 = arith.constant 0 : i32
    %c0_i32_0 = arith.constant 0 : i32
    return %c0_i32, %arg1 : i32, i32
  }
  func.func @transform_4(%arg0: i32, %arg1: i32, %arg2: i32) -> (i32, i32) {
    %c0_i32 = arith.constant 0 : i32
    return %arg0, %arg1 : i32, i32
  }
}

module attributes {stable_mosaic.version = 11 : i64} {
  func.func @kernel(%arg0: i32, %arg1: i32, %arg2: memref<48x128xbf16, #tpu.memory_space<any>>, %arg3: memref<9x128x128xbf16, #tpu.memory_space<vmem>>, %arg4: memref<1x128xf32, #tpu.memory_space<vmem>>, %arg5: memref<1x128xf32, #tpu.memory_space<vmem>>, %arg6: memref<32x128xbf16, #tpu.memory_space<vmem>>, %arg7: memref<32x128xf32, #tpu.memory_space<vmem>>, %arg8: memref<2x48x128xbf16, #tpu.memory_space<vmem>>, %arg9: memref<2x!tpu.dma_semaphore, #tpu.memory_space<semaphore_mem>>) attributes {dimension_semantics = [#tpu.dimension_semantics<arbitrary>, #tpu.dimension_semantics<arbitrary>], iteration_bounds = array<i64: 1, 1>, scalar_prefetch = 0 : i64, scratch_operands = 3 : i64, tpu.core_type = #tpu.core_type<tc>, window_params = [{}, {transform_indices = @transform_1, window_bounds = array<i64: 9, 128, 128>}, {transform_indices = @transform_2, window_bounds = array<i64: 1, 128>}, {transform_indices = @transform_3, window_bounds = array<i64: 1, 128>}, {transform_indices = @transform_4, window_bounds = array<i64: 32, 128>}]} {
    %c1_i32 = arith.constant 1 : i32
    %0 = arith.muli %arg0, %c1_i32 : i32
    %1 = arith.addi %0, %arg1 : i32
    %c2_i32 = arith.constant 2 : i32
    %c0_i32 = arith.constant 0 : i32
    %2 = arith.cmpi eq, %c2_i32, %c0_i32 : i32
    %c1_i32_0 = arith.constant 1 : i32
    %3 = arith.select %2, %c1_i32_0, %c2_i32 : i32
    %4 = arith.remsi %1, %3 : i32
    %c0_i32_1 = arith.constant 0 : i32
    %5 = arith.cmpi ne, %4, %c0_i32_1 : i32
    %c0_i32_2 = arith.constant 0 : i32
    %6 = arith.cmpi slt, %4, %c0_i32_2 : i32
    %c0_i32_3 = arith.constant 0 : i32
    %7 = arith.cmpi slt, %3, %c0_i32_3 : i32
    %8 = arith.xori %6, %7 : i1
    %9 = arith.andi %8, %5 : i1
    %10 = arith.addi %4, %3 : i32
    %11 = arith.select %9, %10, %4 : i32
    %c1_i32_4 = arith.constant 1 : i32
    %12 = arith.subi %c1_i32_4, %11 : i32
    %c0_i32_5 = arith.constant 0 : i32
    %13 = arith.cmpi eq, %1, %c0_i32_5 : i32
    %14 = arith.extui %13 : i1 to i32
    %c0_i32_6 = arith.constant 0 : i32
    %15 = arith.cmpi ne, %14, %c0_i32_6 : i32
    scf.if %15 {
      %c0_i32_99 = arith.constant 0 : i32
      %c0_i32_100 = arith.constant 0 : i32
      %c0_i32_101 = arith.constant 0 : i32
      %c0_i32_102 = arith.constant 0 : i32
      %112 = tpu.memref_slice %arg2[%c0_i32_101, %c0_i32_102] : memref<48x128xbf16, #tpu.memory_space<any>> -> memref<48x128xbf16, #tpu.memory_space<any>>
      %c0_i32_103 = arith.constant 0 : i32
      %c0_i32_104 = arith.constant 0 : i32
      %113 = tpu.memref_slice %arg8[%c0_i32_99, %c0_i32_103, %c0_i32_104] : memref<2x48x128xbf16, #tpu.memory_space<vmem>> -> memref<1x48x128xbf16, #tpu.memory_space<vmem>>
      %114 = tpu.memref_squeeze %113 : memref<1x48x128xbf16, #tpu.memory_space<vmem>> -> memref<48x128xbf16, #tpu.memory_space<vmem>>
      %115 = tpu.memref_slice %arg9[%c0_i32_100] : memref<2x!tpu.dma_semaphore, #tpu.memory_space<semaphore_mem>> -> memref<1x!tpu.dma_semaphore, #tpu.memory_space<semaphore_mem>>
      %116 = tpu.memref_squeeze %115 : memref<1x!tpu.dma_semaphore, #tpu.memory_space<semaphore_mem>> -> memref<!tpu.dma_semaphore, #tpu.memory_space<semaphore_mem>>
      tpu.enqueue_dma source(%112 : memref<48x128xbf16, #tpu.memory_space<any>>) target(%114 : memref<48x128xbf16, #tpu.memory_space<vmem>>) target_semaphore(%116 : memref<!tpu.dma_semaphore, #tpu.memory_space<semaphore_mem>>)
    } else {
    }
    %c0_i32_7 = arith.constant 0 : i32
    %c0_i32_8 = arith.constant 0 : i32
    %16 = tpu.memref_slice %arg2[%c0_i32_7, %c0_i32_8] : memref<48x128xbf16, #tpu.memory_space<any>> -> memref<48x128xbf16, #tpu.memory_space<any>>
    %c0_i32_9 = arith.constant 0 : i32
    %c0_i32_10 = arith.constant 0 : i32
    %17 = tpu.memref_slice %arg8[%11, %c0_i32_9, %c0_i32_10] : memref<2x48x128xbf16, #tpu.memory_space<vmem>> -> memref<1x48x128xbf16, #tpu.memory_space<vmem>>
    %18 = tpu.memref_squeeze %17 : memref<1x48x128xbf16, #tpu.memory_space<vmem>> -> memref<48x128xbf16, #tpu.memory_space<vmem>>
    %19 = tpu.memref_slice %arg9[%11] : memref<2x!tpu.dma_semaphore, #tpu.memory_space<semaphore_mem>> -> memref<1x!tpu.dma_semaphore, #tpu.memory_space<semaphore_mem>>
    %20 = tpu.memref_squeeze %19 : memref<1x!tpu.dma_semaphore, #tpu.memory_space<semaphore_mem>> -> memref<!tpu.dma_semaphore, #tpu.memory_space<semaphore_mem>>
    tpu.wait_dma2 semaphore(%20 : memref<!tpu.dma_semaphore, #tpu.memory_space<semaphore_mem>>) src(%16 : memref<48x128xbf16, #tpu.memory_space<any>>) dst(%18 : memref<48x128xbf16, #tpu.memory_space<vmem>>)
    %c0_i32_11 = arith.constant 0 : i32
    %21 = arith.cmpi slt, %1, %c0_i32_11 : i32
    %22 = arith.extui %21 : i1 to i32
    %c0_i32_12 = arith.constant 0 : i32
    %23 = arith.cmpi ne, %22, %c0_i32_12 : i32
    scf.if %23 {
      %c0_i32_99 = arith.constant 0 : i32
      %112 = arith.cmpi eq, %arg1, %c0_i32_99 : i32
      %c1_i32_100 = arith.constant 1 : i32
      %113 = arith.addi %arg1, %c1_i32_100 : i32
      %c0_i32_101 = arith.constant 0 : i32
      %114 = arith.select %112, %c0_i32_101, %113 : i32
      %c32_i32 = arith.constant 32 : i32
      %115 = arith.muli %114, %c32_i32 : i32
      %c0_i32_102 = arith.constant 0 : i32
      %116 = tpu.memref_slice %arg2[%115, %c0_i32_102] : memref<48x128xbf16, #tpu.memory_space<any>> -> memref<48x128xbf16, #tpu.memory_space<any>>
      %c0_i32_103 = arith.constant 0 : i32
      %c0_i32_104 = arith.constant 0 : i32
      %117 = tpu.memref_slice %arg8[%12, %c0_i32_103, %c0_i32_104] : memref<2x48x128xbf16, #tpu.memory_space<vmem>> -> memref<1x48x128xbf16, #tpu.memory_space<vmem>>
      %118 = tpu.memref_squeeze %117 : memref<1x48x128xbf16, #tpu.memory_space<vmem>> -> memref<48x128xbf16, #tpu.memory_space<vmem>>
      %119 = tpu.memref_slice %arg9[%12] : memref<2x!tpu.dma_semaphore, #tpu.memory_space<semaphore_mem>> -> memref<1x!tpu.dma_semaphore, #tpu.memory_space<semaphore_mem>>
      %120 = tpu.memref_squeeze %119 : memref<1x!tpu.dma_semaphore, #tpu.memory_space<semaphore_mem>> -> memref<!tpu.dma_semaphore, #tpu.memory_space<semaphore_mem>>
      tpu.enqueue_dma source(%116 : memref<48x128xbf16, #tpu.memory_space<any>>) target(%118 : memref<48x128xbf16, #tpu.memory_space<vmem>>) target_semaphore(%120 : memref<!tpu.dma_semaphore, #tpu.memory_space<semaphore_mem>>)
    } else {
    }
    %24 = arith.index_cast %11 : i32 to index
    %c0 = arith.constant 0 : index
    %c0_13 = arith.constant 0 : index
    %25 = vector.load %arg8[%24, %c0, %c0_13] : memref<2x48x128xbf16, #tpu.memory_space<vmem>>, vector<1x32x128xbf16>
    %26 = vector.shape_cast %25 : vector<1x32x128xbf16> to vector<32x128xbf16>
    %c0_14 = arith.constant 0 : index
    %c0_15 = arith.constant 0 : index
    %c0_16 = arith.constant 0 : index
    %27 = vector.load %arg3[%c0_14, %c0_15, %c0_16] : memref<9x128x128xbf16, #tpu.memory_space<vmem>>, vector<1x128x128xbf16>
    %28 = vector.shape_cast %27 : vector<1x128x128xbf16> to vector<128x128xbf16>
    %cst = arith.constant dense<0.000000e+00> : vector<32x128xf32>
    %29 = tpu.matmul %26, %28, %cst {dimension_numbers = #tpu.dot_dimension_numbers<[1], [0], [0], [1], [0, 0, 1, 1], [], []>} : vector<32x128xbf16>, vector<128x128xbf16>, vector<32x128xf32> -> vector<32x128xf32>
    %c0_17 = arith.constant 0 : index
    %c0_18 = arith.constant 0 : index
    %30 = vector.load %arg7[%c0_17, %c0_18] : memref<32x128xf32, #tpu.memory_space<vmem>>, vector<32x128xf32>
    tpu.vector_store %arg7[%c0_17, %c0_18], %29 {strides = array<i32>} : memref<32x128xf32, #tpu.memory_space<vmem>>, vector<32x128xf32>,
    %c0_19 = arith.constant 0 : index
    %c0_20 = arith.constant 0 : index
    %31 = vector.load %arg7[%c0_19, %c0_20] : memref<32x128xf32, #tpu.memory_space<vmem>>, vector<32x128xf32>
    %32 = arith.index_cast %11 : i32 to index
    %c1 = arith.constant 1 : index
    %c0_21 = arith.constant 0 : index
    %33 = vector.load %arg8[%32, %c1, %c0_21] : memref<2x48x128xbf16, #tpu.memory_space<vmem>>, vector<1x32x128xbf16>
    %34 = vector.shape_cast %33 : vector<1x32x128xbf16> to vector<32x128xbf16>
    %c1_22 = arith.constant 1 : index
    %c0_23 = arith.constant 0 : index
    %c0_24 = arith.constant 0 : index
    %35 = vector.load %arg3[%c1_22, %c0_23, %c0_24] : memref<9x128x128xbf16, #tpu.memory_space<vmem>>, vector<1x128x128xbf16>
    %36 = vector.shape_cast %35 : vector<1x128x128xbf16> to vector<128x128xbf16>
    %cst_25 = arith.constant dense<0.000000e+00> : vector<32x128xf32>
    %37 = tpu.matmul %34, %36, %cst_25 {dimension_numbers = #tpu.dot_dimension_numbers<[1], [0], [0], [1], [0, 0, 1, 1], [], []>} : vector<32x128xbf16>, vector<128x128xbf16>, vector<32x128xf32> -> vector<32x128xf32>
    %38 = arith.addf %31, %37 : vector<32x128xf32>
    %c0_26 = arith.constant 0 : index
    %c0_27 = arith.constant 0 : index
    %39 = vector.load %arg7[%c0_26, %c0_27] : memref<32x128xf32, #tpu.memory_space<vmem>>, vector<32x128xf32>
    tpu.vector_store %arg7[%c0_26, %c0_27], %38 {strides = array<i32>} : memref<32x128xf32, #tpu.memory_space<vmem>>, vector<32x128xf32>,
    %c0_28 = arith.constant 0 : index
    %c0_29 = arith.constant 0 : index
    %40 = vector.load %arg7[%c0_28, %c0_29] : memref<32x128xf32, #tpu.memory_space<vmem>>, vector<32x128xf32>
    %41 = arith.index_cast %11 : i32 to index
    %c2 = arith.constant 2 : index
    %c0_30 = arith.constant 0 : index
    %42 = vector.load %arg8[%41, %c2, %c0_30] : memref<2x48x128xbf16, #tpu.memory_space<vmem>>, vector<1x32x128xbf16>
    %43 = vector.shape_cast %42 : vector<1x32x128xbf16> to vector<32x128xbf16>
    %c2_31 = arith.constant 2 : index
    %c0_32 = arith.constant 0 : index
    %c0_33 = arith.constant 0 : index
    %44 = vector.load %arg3[%c2_31, %c0_32, %c0_33] : memref<9x128x128xbf16, #tpu.memory_space<vmem>>, vector<1x128x128xbf16>
    %45 = vector.shape_cast %44 : vector<1x128x128xbf16> to vector<128x128xbf16>
    %cst_34 = arith.constant dense<0.000000e+00> : vector<32x128xf32>
    %46 = tpu.matmul %43, %45, %cst_34 {dimension_numbers = #tpu.dot_dimension_numbers<[1], [0], [0], [1], [0, 0, 1, 1], [], []>} : vector<32x128xbf16>, vector<128x128xbf16>, vector<32x128xf32> -> vector<32x128xf32>
    %47 = arith.addf %40, %46 : vector<32x128xf32>
    %c0_35 = arith.constant 0 : index
    %c0_36 = arith.constant 0 : index
    %48 = vector.load %arg7[%c0_35, %c0_36] : memref<32x128xf32, #tpu.memory_space<vmem>>, vector<32x128xf32>
    tpu.vector_store %arg7[%c0_35, %c0_36], %47 {strides = array<i32>} : memref<32x128xf32, #tpu.memory_space<vmem>>, vector<32x128xf32>,
    %c0_37 = arith.constant 0 : index
    %c0_38 = arith.constant 0 : index
    %49 = vector.load %arg7[%c0_37, %c0_38] : memref<32x128xf32, #tpu.memory_space<vmem>>, vector<32x128xf32>
    %50 = arith.index_cast %11 : i32 to index
    %c3 = arith.constant 3 : index
    %c0_39 = arith.constant 0 : index
    %51 = vector.load %arg8[%50, %c3, %c0_39] : memref<2x48x128xbf16, #tpu.memory_space<vmem>>, vector<1x32x128xbf16>
    %52 = vector.shape_cast %51 : vector<1x32x128xbf16> to vector<32x128xbf16>
    %c3_40 = arith.constant 3 : index
    %c0_41 = arith.constant 0 : index
    %c0_42 = arith.constant 0 : index
    %53 = vector.load %arg3[%c3_40, %c0_41, %c0_42] : memref<9x128x128xbf16, #tpu.memory_space<vmem>>, vector<1x128x128xbf16>
    %54 = vector.shape_cast %53 : vector<1x128x128xbf16> to vector<128x128xbf16>
    %cst_43 = arith.constant dense<0.000000e+00> : vector<32x128xf32>
    %55 = tpu.matmul %52, %54, %cst_43 {dimension_numbers = #tpu.dot_dimension_numbers<[1], [0], [0], [1], [0, 0, 1, 1], [], []>} : vector<32x128xbf16>, vector<128x128xbf16>, vector<32x128xf32> -> vector<32x128xf32>
    %56 = arith.addf %49, %55 : vector<32x128xf32>
    %c0_44 = arith.constant 0 : index
    %c0_45 = arith.constant 0 : index
    %57 = vector.load %arg7[%c0_44, %c0_45] : memref<32x128xf32, #tpu.memory_space<vmem>>, vector<32x128xf32>
    tpu.vector_store %arg7[%c0_44, %c0_45], %56 {strides = array<i32>} : memref<32x128xf32, #tpu.memory_space<vmem>>, vector<32x128xf32>,
    %c0_46 = arith.constant 0 : index
    %c0_47 = arith.constant 0 : index
    %58 = vector.load %arg7[%c0_46, %c0_47] : memref<32x128xf32, #tpu.memory_space<vmem>>, vector<32x128xf32>
    %59 = arith.index_cast %11 : i32 to index
    %c4 = arith.constant 4 : index
    %c0_48 = arith.constant 0 : index
    %60 = vector.load %arg8[%59, %c4, %c0_48] : memref<2x48x128xbf16, #tpu.memory_space<vmem>>, vector<1x32x128xbf16>
    %61 = vector.shape_cast %60 : vector<1x32x128xbf16> to vector<32x128xbf16>
    %c4_49 = arith.constant 4 : index
    %c0_50 = arith.constant 0 : index
    %c0_51 = arith.constant 0 : index
    %62 = vector.load %arg3[%c4_49, %c0_50, %c0_51] : memref<9x128x128xbf16, #tpu.memory_space<vmem>>, vector<1x128x128xbf16>
    %63 = vector.shape_cast %62 : vector<1x128x128xbf16> to vector<128x128xbf16>
    %cst_52 = arith.constant dense<0.000000e+00> : vector<32x128xf32>
    %64 = tpu.matmul %61, %63, %cst_52 {dimension_numbers = #tpu.dot_dimension_numbers<[1], [0], [0], [1], [0, 0, 1, 1], [], []>} : vector<32x128xbf16>, vector<128x128xbf16>, vector<32x128xf32> -> vector<32x128xf32>
    %65 = arith.addf %58, %64 : vector<32x128xf32>
    %c0_53 = arith.constant 0 : index
    %c0_54 = arith.constant 0 : index
    %66 = vector.load %arg7[%c0_53, %c0_54] : memref<32x128xf32, #tpu.memory_space<vmem>>, vector<32x128xf32>
    tpu.vector_store %arg7[%c0_53, %c0_54], %65 {strides = array<i32>} : memref<32x128xf32, #tpu.memory_space<vmem>>, vector<32x128xf32>,
    %c0_55 = arith.constant 0 : index
    %c0_56 = arith.constant 0 : index
    %67 = vector.load %arg7[%c0_55, %c0_56] : memref<32x128xf32, #tpu.memory_space<vmem>>, vector<32x128xf32>
    %68 = arith.index_cast %11 : i32 to index
    %c5 = arith.constant 5 : index
    %c0_57 = arith.constant 0 : index
    %69 = vector.load %arg8[%68, %c5, %c0_57] : memref<2x48x128xbf16, #tpu.memory_space<vmem>>, vector<1x32x128xbf16>
    %70 = vector.shape_cast %69 : vector<1x32x128xbf16> to vector<32x128xbf16>
    %c5_58 = arith.constant 5 : index
    %c0_59 = arith.constant 0 : index
    %c0_60 = arith.constant 0 : index
    %71 = vector.load %arg3[%c5_58, %c0_59, %c0_60] : memref<9x128x128xbf16, #tpu.memory_space<vmem>>, vector<1x128x128xbf16>
    %72 = vector.shape_cast %71 : vector<1x128x128xbf16> to vector<128x128xbf16>
    %cst_61 = arith.constant dense<0.000000e+00> : vector<32x128xf32>
    %73 = tpu.matmul %70, %72, %cst_61 {dimension_numbers = #tpu.dot_dimension_numbers<[1], [0], [0], [1], [0, 0, 1, 1], [], []>} : vector<32x128xbf16>, vector<128x128xbf16>, vector<32x128xf32> -> vector<32x128xf32>
    %74 = arith.addf %67, %73 : vector<32x128xf32>
    %c0_62 = arith.constant 0 : index
    %c0_63 = arith.constant 0 : index
    %75 = vector.load %arg7[%c0_62, %c0_63] : memref<32x128xf32, #tpu.memory_space<vmem>>, vector<32x128xf32>
    tpu.vector_store %arg7[%c0_62, %c0_63], %74 {strides = array<i32>} : memref<32x128xf32, #tpu.memory_space<vmem>>, vector<32x128xf32>,
    %c0_64 = arith.constant 0 : index
    %c0_65 = arith.constant 0 : index
    %76 = vector.load %arg7[%c0_64, %c0_65] : memref<32x128xf32, #tpu.memory_space<vmem>>, vector<32x128xf32>
    %77 = arith.index_cast %11 : i32 to index
    %c6 = arith.constant 6 : index
    %c0_66 = arith.constant 0 : index
    %78 = vector.load %arg8[%77, %c6, %c0_66] : memref<2x48x128xbf16, #tpu.memory_space<vmem>>, vector<1x32x128xbf16>
    %79 = vector.shape_cast %78 : vector<1x32x128xbf16> to vector<32x128xbf16>
    %c6_67 = arith.constant 6 : index
    %c0_68 = arith.constant 0 : index
    %c0_69 = arith.constant 0 : index
    %80 = vector.load %arg3[%c6_67, %c0_68, %c0_69] : memref<9x128x128xbf16, #tpu.memory_space<vmem>>, vector<1x128x128xbf16>
    %81 = vector.shape_cast %80 : vector<1x128x128xbf16> to vector<128x128xbf16>
    %cst_70 = arith.constant dense<0.000000e+00> : vector<32x128xf32>
    %82 = tpu.matmul %79, %81, %cst_70 {dimension_numbers = #tpu.dot_dimension_numbers<[1], [0], [0], [1], [0, 0, 1, 1], [], []>} : vector<32x128xbf16>, vector<128x128xbf16>, vector<32x128xf32> -> vector<32x128xf32>
    %83 = arith.addf %76, %82 : vector<32x128xf32>
    %c0_71 = arith.constant 0 : index
    %c0_72 = arith.constant 0 : index
    %84 = vector.load %arg7[%c0_71, %c0_72] : memref<32x128xf32, #tpu.memory_space<vmem>>, vector<32x128xf32>
    tpu.vector_store %arg7[%c0_71, %c0_72], %83 {strides = array<i32>} : memref<32x128xf32, #tpu.memory_space<vmem>>, vector<32x128xf32>,
    %c0_73 = arith.constant 0 : index
    %c0_74 = arith.constant 0 : index
    %85 = vector.load %arg7[%c0_73, %c0_74] : memref<32x128xf32, #tpu.memory_space<vmem>>, vector<32x128xf32>
    %86 = arith.index_cast %11 : i32 to index
    %c7 = arith.constant 7 : index
    %c0_75 = arith.constant 0 : index
    %87 = vector.load %arg8[%86, %c7, %c0_75] : memref<2x48x128xbf16, #tpu.memory_space<vmem>>, vector<1x32x128xbf16>
    %88 = vector.shape_cast %87 : vector<1x32x128xbf16> to vector<32x128xbf16>
    %c7_76 = arith.constant 7 : index
    %c0_77 = arith.constant 0 : index
    %c0_78 = arith.constant 0 : index
    %89 = vector.load %arg3[%c7_76, %c0_77, %c0_78] : memref<9x128x128xbf16, #tpu.memory_space<vmem>>, vector<1x128x128xbf16>
    %90 = vector.shape_cast %89 : vector<1x128x128xbf16> to vector<128x128xbf16>
    %cst_79 = arith.constant dense<0.000000e+00> : vector<32x128xf32>
    %91 = tpu.matmul %88, %90, %cst_79 {dimension_numbers = #tpu.dot_dimension_numbers<[1], [0], [0], [1], [0, 0, 1, 1], [], []>} : vector<32x128xbf16>, vector<128x128xbf16>, vector<32x128xf32> -> vector<32x128xf32>
    %92 = arith.addf %85, %91 : vector<32x128xf32>
    %c0_80 = arith.constant 0 : index
    %c0_81 = arith.constant 0 : index
    %93 = vector.load %arg7[%c0_80, %c0_81] : memref<32x128xf32, #tpu.memory_space<vmem>>, vector<32x128xf32>
    tpu.vector_store %arg7[%c0_80, %c0_81], %92 {strides = array<i32>} : memref<32x128xf32, #tpu.memory_space<vmem>>, vector<32x128xf32>,
    %c0_82 = arith.constant 0 : index
    %c0_83 = arith.constant 0 : index
    %94 = vector.load %arg7[%c0_82, %c0_83] : memref<32x128xf32, #tpu.memory_space<vmem>>, vector<32x128xf32>
    %95 = arith.index_cast %11 : i32 to index
    %c8 = arith.constant 8 : index
    %c0_84 = arith.constant 0 : index
    %96 = vector.load %arg8[%95, %c8, %c0_84] : memref<2x48x128xbf16, #tpu.memory_space<vmem>>, vector<1x32x128xbf16>
    %97 = vector.shape_cast %96 : vector<1x32x128xbf16> to vector<32x128xbf16>
    %c8_85 = arith.constant 8 : index
    %c0_86 = arith.constant 0 : index
    %c0_87 = arith.constant 0 : index
    %98 = vector.load %arg3[%c8_85, %c0_86, %c0_87] : memref<9x128x128xbf16, #tpu.memory_space<vmem>>, vector<1x128x128xbf16>
    %99 = vector.shape_cast %98 : vector<1x128x128xbf16> to vector<128x128xbf16>
    %cst_88 = arith.constant dense<0.000000e+00> : vector<32x128xf32>
    %100 = tpu.matmul %97, %99, %cst_88 {dimension_numbers = #tpu.dot_dimension_numbers<[1], [0], [0], [1], [0, 0, 1, 1], [], []>} : vector<32x128xbf16>, vector<128x128xbf16>, vector<32x128xf32> -> vector<32x128xf32>
    %101 = arith.addf %94, %100 : vector<32x128xf32>
    %c0_89 = arith.constant 0 : index
    %c0_90 = arith.constant 0 : index
    %102 = vector.load %arg7[%c0_89, %c0_90] : memref<32x128xf32, #tpu.memory_space<vmem>>, vector<32x128xf32>
    tpu.vector_store %arg7[%c0_89, %c0_90], %101 {strides = array<i32>} : memref<32x128xf32, #tpu.memory_space<vmem>>, vector<32x128xf32>,
    %c0_91 = arith.constant 0 : index
    %c0_92 = arith.constant 0 : index
    %103 = vector.load %arg7[%c0_91, %c0_92] : memref<32x128xf32, #tpu.memory_space<vmem>>, vector<32x128xf32>
    %c0_93 = arith.constant 0 : index
    %c0_94 = arith.constant 0 : index
    %104 = vector.load %arg4[%c0_93, %c0_94] : memref<1x128xf32, #tpu.memory_space<vmem>>, vector<1x128xf32>
    %105 = vector.broadcast %104 : vector<1x128xf32> to vector<32x128xf32>
    %106 = arith.mulf %103, %105 : vector<32x128xf32>
    %c0_95 = arith.constant 0 : index
    %c0_96 = arith.constant 0 : index
    %107 = vector.load %arg5[%c0_95, %c0_96] : memref<1x128xf32, #tpu.memory_space<vmem>>, vector<1x128xf32>
    %108 = vector.broadcast %107 : vector<1x128xf32> to vector<32x128xf32>
    %109 = arith.addf %106, %108 : vector<32x128xf32>
    %110 = arith.truncf %109 : vector<32x128xf32> to vector<32x128xbf16>
    %c0_97 = arith.constant 0 : index
    %c0_98 = arith.constant 0 : index
    %111 = vector.load %arg6[%c0_97, %c0_98] : memref<32x128xbf16, #tpu.memory_space<vmem>>, vector<32x128xbf16>
    tpu.vector_store %arg6[%c0_97, %c0_98], %110 {strides = array<i32>} : memref<32x128xbf16, #tpu.memory_space<vmem>>, vector<32x128xbf16>,
    return
  }
  func.func @transform_1(%arg0: i32, %arg1: i32) -> (i32, i32, i32) {
    %c0_i32 = arith.constant 0 : i32
    %c0_i32_0 = arith.constant 0 : i32
    %c0_i32_1 = arith.constant 0 : i32
    return %c0_i32, %c0_i32_0, %arg0 : i32, i32, i32
  }
  func.func @transform_2(%arg0: i32, %arg1: i32) -> (i32, i32) {
    %c0_i32 = arith.constant 0 : i32
    %c0_i32_0 = arith.constant 0 : i32
    return %c0_i32, %arg0 : i32, i32
  }
  func.func @transform_3(%arg0: i32, %arg1: i32) -> (i32, i32) {
    %c0_i32 = arith.constant 0 : i32
    %c0_i32_0 = arith.constant 0 : i32
    return %c0_i32, %arg0 : i32, i32
  }
  func.func @transform_4(%arg0: i32, %arg1: i32) -> (i32, i32) {
    %c0_i32 = arith.constant 0 : i32
    return %arg1, %arg0 : i32, i32
  }
}

module attributes {stable_mosaic.version = 11 : i64} {
  func.func @_global_max_kernel(%arg0: i32, %arg1: memref<16x1x256xbf16, #tpu.memory_space<vmem>>, %arg2: memref<16x256xbf16, #tpu.memory_space<vmem>>) attributes {dimension_semantics = [#tpu.dimension_semantics<parallel>], iteration_bounds = array<i64: 4>, scalar_prefetch = 0 : i64, scratch_operands = 0 : i64, tpu.core_type = #tpu.core_type<tc>, window_params = [{transform_indices = @transform_0, window_bounds = array<i64: 16, 1, 256>}, {transform_indices = @transform_1, window_bounds = array<i64: 16, 256>}]} {
    %c0 = arith.constant 0 : index
    %c0_0 = arith.constant 0 : index
    %c0_1 = arith.constant 0 : index
    %0 = vector.load %arg1[%c0, %c0_0, %c0_1] : memref<16x1x256xbf16, #tpu.memory_space<vmem>>, vector<16x1x256xbf16>
    %cst = arith.constant dense<0xFF80> : vector<16x256xbf16>
    %1 = vector.multi_reduction <maximumf>, %0, %cst [1] : vector<16x1x256xbf16> to vector<16x256xbf16>
    %c0_2 = arith.constant 0 : index
    %c0_3 = arith.constant 0 : index
    %2 = vector.load %arg2[%c0_2, %c0_3] : memref<16x256xbf16, #tpu.memory_space<vmem>>, vector<16x256xbf16>
    tpu.vector_store %arg2[%c0_2, %c0_3], %1 {strides = array<i32>} : memref<16x256xbf16, #tpu.memory_space<vmem>>, vector<16x256xbf16>,
    return
  }
  func.func @transform_0(%arg0: i32) -> (i32, i32, i32) {
    %c0_i32 = arith.constant 0 : i32
    %c0_i32_0 = arith.constant 0 : i32
    %c0_i32_1 = arith.constant 0 : i32
    return %c0_i32, %c0_i32_0, %arg0 : i32, i32, i32
  }
  func.func @transform_1(%arg0: i32) -> (i32, i32) {
    %c0_i32 = arith.constant 0 : i32
    %c0_i32_0 = arith.constant 0 : i32
    return %c0_i32, %arg0 : i32, i32
  }
}

module attributes {stable_mosaic.version = 11 : i64} {
  func.func @kernel(%arg0: i32, %arg1: i32, %arg2: i32, %arg3: memref<16x512xbf16, #tpu.memory_space<vmem>>, %arg4: memref<512x256xbf16, #tpu.memory_space<vmem>>, %arg5: memref<1x256xf32, #tpu.memory_space<vmem>>, %arg6: memref<1x256xf32, #tpu.memory_space<vmem>>, %arg7: memref<16x256xf32, #tpu.memory_space<vmem>>, %arg8: memref<16x256xf32, #tpu.memory_space<vmem>>) attributes {dimension_semantics = [#tpu.dimension_semantics<parallel>, #tpu.dimension_semantics<parallel>, #tpu.dimension_semantics<arbitrary>], iteration_bounds = array<i64: 1, 4, 2>, scalar_prefetch = 0 : i64, scratch_operands = 1 : i64, tpu.core_type = #tpu.core_type<tc>, window_params = [{transform_indices = @transform_0, window_bounds = array<i64: 16, 512>}, {transform_indices = @transform_1, window_bounds = array<i64: 512, 256>}, {transform_indices = @transform_2, window_bounds = array<i64: 1, 256>}, {transform_indices = @transform_3, window_bounds = array<i64: 1, 256>}, {transform_indices = @transform_4, window_bounds = array<i64: 16, 256>}]} {
    %c0_i32 = arith.constant 0 : i32
    %0 = arith.cmpi eq, %arg2, %c0_i32 : i32
    %1 = arith.extui %0 : i1 to i32
    %c0_i32_0 = arith.constant 0 : i32
    %2 = arith.cmpi ne, %1, %c0_i32_0 : i32
    scf.if %2 {
      %cst_9 = arith.constant 0.000000e+00 : f32
      %12 = vector.broadcast %cst_9 : f32 to vector<16x256xf32>
      %c0_10 = arith.constant 0 : index
      %c0_11 = arith.constant 0 : index
      %13 = vector.load %arg8[%c0_10, %c0_11] : memref<16x256xf32, #tpu.memory_space<vmem>>, vector<16x256xf32>
      tpu.vector_store %arg8[%c0_10, %c0_11], %12 {strides = array<i32>} : memref<16x256xf32, #tpu.memory_space<vmem>>, vector<16x256xf32>,
    } else {
    }
    %c0 = arith.constant 0 : index
    %c0_1 = arith.constant 0 : index
    %3 = vector.load %arg8[%c0, %c0_1] : memref<16x256xf32, #tpu.memory_space<vmem>>, vector<16x256xf32>
    %c0_2 = arith.constant 0 : index
    %c0_3 = arith.constant 0 : index
    %4 = vector.load %arg3[%c0_2, %c0_3] : memref<16x512xbf16, #tpu.memory_space<vmem>>, vector<16x512xbf16>
    %c0_4 = arith.constant 0 : index
    %c0_5 = arith.constant 0 : index
    %5 = vector.load %arg4[%c0_4, %c0_5] : memref<512x256xbf16, #tpu.memory_space<vmem>>, vector<512x256xbf16>
    %cst = arith.constant dense<0.000000e+00> : vector<16x256xf32>
    %6 = tpu.matmul %4, %5, %cst {dimension_numbers = #tpu.dot_dimension_numbers<[1], [0], [0], [1], [0, 0, 1, 1], [], []>} : vector<16x512xbf16>, vector<512x256xbf16>, vector<16x256xf32> -> vector<16x256xf32>
    %7 = arith.addf %3, %6 : vector<16x256xf32>
    %c0_6 = arith.constant 0 : index
    %c0_7 = arith.constant 0 : index
    %8 = vector.load %arg8[%c0_6, %c0_7] : memref<16x256xf32, #tpu.memory_space<vmem>>, vector<16x256xf32>
    tpu.vector_store %arg8[%c0_6, %c0_7], %7 {strides = array<i32>} : memref<16x256xf32, #tpu.memory_space<vmem>>, vector<16x256xf32>,
    %c1_i32 = arith.constant 1 : i32
    %9 = arith.cmpi eq, %arg2, %c1_i32 : i32
    %10 = arith.extui %9 : i1 to i32
    %c0_i32_8 = arith.constant 0 : i32
    %11 = arith.cmpi ne, %10, %c0_i32_8 : i32
    scf.if %11 {
      %c0_9 = arith.constant 0 : index
      %c0_10 = arith.constant 0 : index
      %12 = vector.load %arg8[%c0_9, %c0_10] : memref<16x256xf32, #tpu.memory_space<vmem>>, vector<16x256xf32>
      %c0_11 = arith.constant 0 : index
      %c0_12 = arith.constant 0 : index
      %13 = vector.load %arg5[%c0_11, %c0_12] : memref<1x256xf32, #tpu.memory_space<vmem>>, vector<1x256xf32>
      %14 = vector.broadcast %13 : vector<1x256xf32> to vector<16x256xf32>
      %15 = arith.mulf %12, %14 : vector<16x256xf32>
      %c0_13 = arith.constant 0 : index
      %c0_14 = arith.constant 0 : index
      %16 = vector.load %arg6[%c0_13, %c0_14] : memref<1x256xf32, #tpu.memory_space<vmem>>, vector<1x256xf32>
      %17 = vector.broadcast %16 : vector<1x256xf32> to vector<16x256xf32>
      %18 = arith.addf %15, %17 : vector<16x256xf32>
      %c0_15 = arith.constant 0 : index
      %c0_16 = arith.constant 0 : index
      %19 = vector.load %arg7[%c0_15, %c0_16] : memref<16x256xf32, #tpu.memory_space<vmem>>, vector<16x256xf32>
      tpu.vector_store %arg7[%c0_15, %c0_16], %18 {strides = array<i32>} : memref<16x256xf32, #tpu.memory_space<vmem>>, vector<16x256xf32>,
    } else {
    }
    return
  }
  func.func @transform_0(%arg0: i32, %arg1: i32, %arg2: i32) -> (i32, i32) {
    %c0_i32 = arith.constant 0 : i32
    return %arg0, %arg2 : i32, i32
  }
  func.func @transform_1(%arg0: i32, %arg1: i32, %arg2: i32) -> (i32, i32) {
    %c0_i32 = arith.constant 0 : i32
    return %arg2, %arg1 : i32, i32
  }
  func.func @transform_2(%arg0: i32, %arg1: i32, %arg2: i32) -> (i32, i32) {
    %c0_i32 = arith.constant 0 : i32
    %c0_i32_0 = arith.constant 0 : i32
    return %c0_i32, %arg1 : i32, i32
  }
  func.func @transform_3(%arg0: i32, %arg1: i32, %arg2: i32) -> (i32, i32) {
    %c0_i32 = arith.constant 0 : i32
    %c0_i32_0 = arith.constant 0 : i32
    return %c0_i32, %arg1 : i32, i32
  }
  func.func @transform_4(%arg0: i32, %arg1: i32, %arg2: i32) -> (i32, i32) {
    %c0_i32 = arith.constant 0 : i32
    return %arg0, %arg1 : i32, i32
  }
}

</mosaic_0001>

<bundles_post_ra>
// kernel: _lambda_.59
= control target key start
LH: loop header
LB: loop body
LE: loop exit
PB: predicated region body
PF: predicated region fallthrough
CT: control target
= control target key end

     0   :  { %9 = vsyncpa [#allocation4], 0  ;;  %s1699_s0 = inlined_call_operand.vmem [shape: bf16[512,128], index: 0, kind: input, shape index: {}]   ;;  %s1700_s1 = inlined_call_operand.hbm [shape: bf16[128,128], index: 1, kind: input, shape index: {}]   ;;  %s1701_s2 = inlined_call_operand.hbm [shape: f32[1,128], index: 2, kind: input, shape index: {}]   ;;  %s1702_s3 = inlined_call_operand.hbm [shape: f32[1,128], index: 3, kind: input, shape index: {}]   ;;  %s1703_s4 = inlined_call_operand.vmem [shape: bf16[512,128], index: 4, kind: output, shape index: {}]  }
   0x1   :  { %10 = vsyncpa [#allocation6], 0  ;;  %s1510_s15 = smov 0   ;;  %s1512_s16 = smov 0  }
   0x2   :  { %s1514_s17 = smov 0  }
   0x3 LB: > { %s207_s20 = sshll.u32 %s1701_s2, 4  ;;  %s1043_s21 = sadd.s32 4294967295, %s1478_s17   ;;  %s1478_s17 = sphi %s1514_s17, %s16_s17   ;;  %s1474_s16 = sphi %s1512_s16, %s1708_s16   ;;  %s1470_s15 = sphi %s1510_s15, %s1707_s15   ;;  %s208_s20 = int_to_ptr.hbm [resolvable:$true] %s207_s20 }
   0x4   : > { %p1045_p0 = scmp.ge.s32.totalorder %s1478_s17, 1  ;;  %p176_p1 = scmp.lt.s32.totalorder %s1478_s17, 3 }
   0x5   : > { %p1531_p2 = scmp.eq.s32.totalorder %s1043_s21, 0  ;;  %s1480_s24 = smov [#allocation5]  }
   0x6   : > { %p1535_p3 = pnand %p1045_p0, %p176_p1  ;;  %s209_s25 = sshll.u32 %s1480_s24, 4  ;;  %s210_s25 = int_to_ptr.vmem [resolvable:$true] %s209_s25 }
   0x7   : > { %s35_s27 = sadd.s32 1, %s1474_s16  ;;  %s191_s30 = sshll.u32 %s1700_s1, 4  ;;  %s192_s30 = int_to_ptr.hbm [resolvable:$true] %s191_s30 }
   0x8   : > { %p1311_p4 = pneg %p1535_p3  ;;  %p37_p6 = scmp.ge.s32.totalorder %s35_s27, 2 }
   0x9   : > { %s1481_s5 = smov [#allocation3]   ;;  %s220_s9 = sshll.u32 %s1702_s3, 4  ;;  %s221_s9 = int_to_ptr.hbm [resolvable:$true] %s220_s9 }
   0xa   : > { %p1543_p5 = pnand %p1531_p2, %p1311_p4  ;;  %s1710_s27 = smov (%p37_p6, %s35_s27), 0 }
   0xb   : > { %s193_s6 = sshll.u32 %s1481_s5, 4  ;;  %s1482_s10 = smov 64   ;;  %s194_s6 = int_to_ptr.vmem [resolvable:$true] %s193_s6 }
   0xc   : > { %1317 = dma.hbm_to_vmem [thread:$0]  (!%p1543_p5), %s208_s20, 16, %s210_s25, [#allocation6]  }
   0xd   : > { %s1483_s11 = smov 4   ;;  %s1484_s12 = smov [#allocation7]  }
   0xe   : > { %1314 = dma.hbm_to_vmem [thread:$0]  (!%p1543_p5), %s192_s30, 1024, %s194_s6, [#allocation4], %s1482_s10, %s1482_s10, %s1483_s11  }
   0xf   : > { %s222_s13 = sshll.u32 %s1484_s12, 4  ;;  %247 = sbr.rel (%p1535_p3) target bundleno = 254 (0xfe), region = 36  ;;  %s223_s13 = int_to_ptr.vmem [resolvable:$true] %s222_s13 }
  0x10   : > { %1320 = dma.hbm_to_vmem [thread:$0]  (!%p1543_p5), %s221_s9, 16, %s223_s13, [#allocation6]  }
  0x14   : > { %1461 = dma.done.wait (%p1531_p2), [#allocation4], 1024  }
  0x15   : > { %1463 = vsyncadd (%p1531_p2), [#allocation4], 4294966272 }
  0x16   : > { %1465 = dma.done.wait (%p1531_p2), [#allocation6], 32  }
  0x17   : > { %1467 = vsyncadd (%p1531_p2), [#allocation6], 4294967264  ;;  %v1179_v0 = vld [vmem:[#allocation3 + $0x38] sm:$0xff]  ;;  %v1178_v1 = vld [vmem:[#allocation3 + $0x30] sm:$0xff]  ;;  %s1054_s14 = sshll.u32 %s1470_s15, 5 }
  0x18   : > { %569 = vmatpush.bf16.msra.mxu0 %v1179_v0  ;;  %1275 = vmatpush.bf16.msra.mxu1 %v1179_v0  ;;  %v1177_v2 = vld [vmem:[#allocation3 + $0x28] sm:$0xff]  ;;  %v1176_v3 = vld [vmem:[#allocation3 + $0x20] sm:$0xff]  ;;  %v1175_v4 = vld [vmem:[#allocation3 + $0x18] sm:$0xff]  ;;  %p291_p7 = scmp.lt.s32.totalorder %s1054_s14, 63 }
  0x19   : > { %1276 = vmatpush.bf16.msra.mxu2 %v1179_v0  ;;  %1277 = vmatpush.bf16.msra.mxu3 %v1179_v0  ;;  %v1174_v5 = vld [vmem:[#allocation3 + $0x10] sm:$0xff]  ;;  %v1173_v6 = vld [vmem:[#allocation3 + $0x8] sm:$0xff]  ;;  %v1172_v7 = vld [vmem:[#allocation3] sm:$0xff] }
  0x1a   : > { %s1712_s14 = smov (!%p291_p7, %s1054_s14), 63  ;;  %v1599_v26 = vld [vmem:[#allocation5] ss:$0 sm:$0xff]  ;;  %v1602_v28 = vld [vmem:[#allocation7] ss:$0 sm:$0xff] }
  0x1b   : > { %s1055_s15 = sshll.u32 %s1712_s14, 2 }
  0x1c   : > { %570 = vmatpush.bf16.msra.mxu0 %v1178_v1  ;;  %1278 = vmatpush.bf16.msra.mxu1 %v1178_v1  ;;  %s1581_s20 = scalar_lea.vmem %s1699_s0, %s1055_s15  ;;  %s1618_s23 = scalar_lea.vmem %s1703_s4, %s1055_s15 }
  0x1d   : > { %1279 = vmatpush.bf16.msra.mxu2 %v1178_v1  ;;  %1280 = vmatpush.bf16.msra.mxu3 %v1178_v1  ;;  %v1156_v8 = vld [vmem:[%s1581_s20] sm:$0xff]  ;;  %v1157_v12 = vld [vmem:[%s1581_s20 + $0x8] sm:$0xff]  ;;  %v1158_v16 = vld [vmem:[%s1581_s20 + $0x10] sm:$0xff] }
  0x1e   : > { %v1160_v9 = vld [vmem:[%s1581_s20 + $0x20] sm:$0xff]  ;;  %v1161_v13 = vld [vmem:[%s1581_s20 + $0x28] sm:$0xff]  ;;  %v1162_v17 = vld [vmem:[%s1581_s20 + $0x30] sm:$0xff] }
  0x1f   : > { %v1164_v10 = vld [vmem:[%s1581_s20 + $0x40] sm:$0xff]  ;;  %v1165_v14 = vld [vmem:[%s1581_s20 + $0x48] sm:$0xff]  ;;  %v1166_v18 = vld [vmem:[%s1581_s20 + $0x50] sm:$0xff] }
  0x20   : > { %571 = vmatpush.bf16.msra.mxu0 %v1177_v2  ;;  %1281 = vmatpush.bf16.msra.mxu1 %v1177_v2  ;;  %v1168_v11 = vld [vmem:[%s1581_s20 + $0x60] sm:$0xff]  ;;  %v1169_v15 = vld [vmem:[%s1581_s20 + $0x68] sm:$0xff]  ;;  %v1170_v19 = vld [vmem:[%s1581_s20 + $0x70] sm:$0xff] }
  0x21   : > { %1282 = vmatpush.bf16.msra.mxu2 %v1177_v2  ;;  %1283 = vmatpush.bf16.msra.mxu3 %v1177_v2  ;;  %v1159_v20 = vld [vmem:[%s1581_s20 + $0x18] sm:$0xff] }
  0x22   : > { %v1163_v21 = vld [vmem:[%s1581_s20 + $0x38] sm:$0xff] }
  0x23   : > { %v1167_v22 = vld [vmem:[%s1581_s20 + $0x58] sm:$0xff] }
  0x24   : > { %572 = vmatpush.bf16.msra.mxu0 %v1176_v3  ;;  %1284 = vmatpush.bf16.msra.mxu1 %v1176_v3  ;;  %v1171_v23 = vld [vmem:[%s1581_s20 + $0x78] sm:$0xff] }
  0x25   : > { %1285 = vmatpush.bf16.msra.mxu2 %v1176_v3  ;;  %1286 = vmatpush.bf16.msra.mxu3 %v1176_v3 }
  0x28   : > { %573 = vmatpush.bf16.msra.mxu0 %v1175_v4  ;;  %1287 = vmatpush.bf16.msra.mxu1 %v1175_v4 }
  0x29   : > { %1288 = vmatpush.bf16.msra.mxu2 %v1175_v4  ;;  %1289 = vmatpush.bf16.msra.mxu3 %v1175_v4 }
  0x2c   : > { %574 = vmatpush.bf16.msra.mxu0 %v1174_v5  ;;  %1290 = vmatpush.bf16.msra.mxu1 %v1174_v5 }
  0x2d   : > { %1291 = vmatpush.bf16.msra.mxu2 %v1174_v5  ;;  %1292 = vmatpush.bf16.msra.mxu3 %v1174_v5 }
  0x30   : > { %575 = vmatpush.bf16.msra.mxu0 %v1173_v6  ;;  %1293 = vmatpush.bf16.msra.mxu1 %v1173_v6 }
  0x31   : > { %1294 = vmatpush.bf16.msra.mxu2 %v1173_v6  ;;  %1295 = vmatpush.bf16.msra.mxu3 %v1173_v6 }
  0x34   : > { %576 = vmatpush.bf16.msra.mxu0 %v1172_v7  ;;  %1296 = vmatpush.bf16.msra.mxu1 %v1172_v7 }
  0x35   : > { %1297 = vmatpush.bf16.msra.mxu2 %v1172_v7  ;;  %1298 = vmatpush.bf16.msra.mxu3 %v1172_v7 }
  0x37   : > { %577 = vmatmul.bf16.vlgmr.msra.gmra.mxu0 %v1156_v8  ;;  %597 = vmatmul.bf16.vlgmr.msra.gmra.mxu1 %v1160_v9 }
  0x38   : > { %617 = vmatmul.bf16.vlgmr.msra.gmra.mxu2 %v1164_v10  ;;  %637 = vmatmul.bf16.vlgmr.msra.gmra.mxu3 %v1168_v11 }
  0x47   : > { %582 = vmatmul.bf16.gmra.mxu0 %v1157_v12  ;;  %602 = vmatmul.bf16.gmra.mxu1 %v1161_v13 }
  0x48   : > { %622 = vmatmul.bf16.gmra.mxu2 %v1165_v14  ;;  %642 = vmatmul.bf16.gmra.mxu3 %v1169_v15 }
  0x57   : > { %587 = vmatmul.bf16.gmra.mxu0 %v1158_v16  ;;  %607 = vmatmul.bf16.gmra.mxu1 %v1162_v17 }
  0x58   : > { %627 = vmatmul.bf16.gmra.mxu2 %v1166_v18  ;;  %647 = vmatmul.bf16.gmra.mxu3 %v1170_v19 }
  0x67   : > { %592 = vmatmul.bf16.gmra.mxu0 %v1159_v20  ;;  %612 = vmatmul.bf16.gmra.mxu1 %v1163_v21 }
  0x68   : > { %632 = vmatmul.bf16.gmra.mxu2 %v1167_v22  ;;  %652 = vmatmul.bf16.gmra.mxu3 %v1171_v23 }
  0xb4   : > { %v578_v24 = vpop.f32.mrf.mxu0  ;;  %v598_v25 = vpop.f32.mrf.mxu1 }
  0xb5   : > { %v761_v27 = vmul.f32 %v1599_v26, %v578_v24  ;;  %v769_v29 = vmul.f32 %v1599_v26, %v598_v25 }
  0xb7   : > { %v797_v34 = vadd.f32 %v1602_v28, %v761_v27  ;;  %v805_v35 = vadd.f32 %v1602_v28, %v769_v29 }
  0xb9   : > { %v829_v42 = vmax.f32 %v797_v34, 0.0  ;;  %v837_v43 = vmax.f32 %v805_v35, 0.0 }
  0xbb   : > { %v618_v30 = vpop.f32.mrf.mxu2  ;;  %v638_v31 = vpop.f32.mrf.mxu3 }
  0xbc   : > { %v580_v32 = vpop.f32.mrf.mxu0  ;;  %v600_v33 = vpop.f32.mrf.mxu1  ;;  %v777_v40 = vmul.f32 %v1599_v26, %v618_v30  ;;  %v785_v41 = vmul.f32 %v1599_v26, %v638_v31 }
  0xbd   : > { %v762_v36 = vmul.f32 %v1599_v26, %v580_v32  ;;  %v770_v37 = vmul.f32 %v1599_v26, %v600_v33 }
  0xbe   : > { %v813_v50 = vadd.f32 %v1602_v28, %v777_v40  ;;  %v821_v51 = vadd.f32 %v1602_v28, %v785_v41 }
  0xbf   : > { %v798_v38 = vadd.f32 %v1602_v28, %v762_v36  ;;  %v806_v39 = vadd.f32 %v1602_v28, %v770_v37 }
  0xc0   : > { %v845_v58 = vmax.f32 %v813_v50, 0.0  ;;  %v853_v59 = vmax.f32 %v821_v51, 0.0 }
  0xc1   : > { %v830_v44 = vmax.f32 %v798_v38, 0.0  ;;  %v838_v45 = vmax.f32 %v806_v39, 0.0 }
  0xc3   : > { %v1183_v46 = vpack.c.bf16 %v830_v44, %v829_v42  ;;  %v1203_v47 = vpack.c.bf16 %v838_v45, %v837_v43  ;;  %v620_v48 = vpop.f32.mrf.mxu2  ;;  %v640_v49 = vpop.f32.mrf.mxu3 }
  0xc4   : > { %v778_v52 = vmul.f32 %v1599_v26, %v620_v48  ;;  %v786_v53 = vmul.f32 %v1599_v26, %v640_v49  ;;  %v583_v54 = vpop.f32.mrf.mxu0  ;;  %v603_v55 = vpop.f32.mrf.mxu1 }
  0xc5   : > { %1184 = vst [vmem:[%s1618_s23] sm:$0xff] %v1183_v46   ;;  %v763_v62 = vmul.f32 %v1599_v26, %v583_v54  ;;  %v771_v63 = vmul.f32 %v1599_v26, %v603_v55 }
  0xc6   : > { %1263 = vst [vmem:[%s1618_s23 + $0x20] sm:$0xff] %v1203_v47   ;;  %v814_v56 = vadd.f32 %v1602_v28, %v778_v52  ;;  %v822_v57 = vadd.f32 %v1602_v28, %v786_v53 }
  0xc7   : > { %v799_v6 = vadd.f32 %v1602_v28, %v763_v62  ;;  %v807_v7 = vadd.f32 %v1602_v28, %v771_v63 }
  0xc8   : > { %v846_v60 = vmax.f32 %v814_v56, 0.0  ;;  %v854_v61 = vmax.f32 %v822_v57, 0.0 }
  0xc9   : > { %v831_v14 = vmax.f32 %v799_v6, 0.0  ;;  %v839_v15 = vmax.f32 %v807_v7, 0.0 }
  0xca   : > { %v1223_v0 = vpack.c.bf16 %v846_v60, %v845_v58  ;;  %v1243_v1 = vpack.c.bf16 %v854_v61, %v853_v59 }
  0xcb   : > { %v623_v2 = vpop.f32.mrf.mxu2  ;;  %v643_v3 = vpop.f32.mrf.mxu3 }
  0xcc   : > { %1267 = vst [vmem:[%s1618_s23 + $0x40] sm:$0xff] %v1223_v0   ;;  %v585_v4 = vpop.f32.mrf.mxu0  ;;  %v605_v5 = vpop.f32.mrf.mxu1  ;;  %v779_v12 = vmul.f32 %v1599_v26, %v623_v2  ;;  %v787_v13 = vmul.f32 %v1599_v26, %v643_v3 }
  0xcd   : > { %1271 = vst [vmem:[%s1618_s23 + $0x60] sm:$0xff] %v1243_v1   ;;  %v764_v8 = vmul.f32 %v1599_v26, %v585_v4  ;;  %v772_v9 = vmul.f32 %v1599_v26, %v605_v5 }
  0xce   : > { %v815_v22 = vadd.f32 %v1602_v28, %v779_v12  ;;  %v823_v23 = vadd.f32 %v1602_v28, %v787_v13 }
  0xcf   : > { %v800_v10 = vadd.f32 %v1602_v28, %v764_v8  ;;  %v808_v11 = vadd.f32 %v1602_v28, %v772_v9 }
  0xd0   : > { %v847_v32 = vmax.f32 %v815_v22, 0.0  ;;  %v855_v33 = vmax.f32 %v823_v23, 0.0 }
  0xd1   : > { %v832_v16 = vmax.f32 %v800_v10, 0.0  ;;  %v840_v17 = vmax.f32 %v808_v11, 0.0 }
  0xd3   : > { %v1188_v18 = vpack.c.bf16 %v832_v16, %v831_v14  ;;  %v1208_v19 = vpack.c.bf16 %v840_v17, %v839_v15  ;;  %v625_v20 = vpop.f32.mrf.mxu2  ;;  %v645_v21 = vpop.f32.mrf.mxu3 }
  0xd4   : > { %v780_v24 = vmul.f32 %v1599_v26, %v625_v20  ;;  %v788_v25 = vmul.f32 %v1599_v26, %v645_v21  ;;  %v588_v27 = vpop.f32.mrf.mxu0  ;;  %v608_v29 = vpop.f32.mrf.mxu1 }
  0xd5   : > { %1260 = vst [vmem:[%s1618_s23 + $0x8] sm:$0xff] %v1188_v18   ;;  %v765_v36 = vmul.f32 %v1599_v26, %v588_v27  ;;  %v773_v37 = vmul.f32 %v1599_v26, %v608_v29 }
  0xd6   : > { %1264 = vst [vmem:[%s1618_s23 + $0x28] sm:$0xff] %v1208_v19   ;;  %v816_v30 = vadd.f32 %v1602_v28, %v780_v24  ;;  %v824_v31 = vadd.f32 %v1602_v28, %v788_v25 }
  0xd7   : > { %v801_v44 = vadd.f32 %v1602_v28, %v765_v36  ;;  %v809_v45 = vadd.f32 %v1602_v28, %v773_v37 }
  0xd8   : > { %v848_v34 = vmax.f32 %v816_v30, 0.0  ;;  %v856_v35 = vmax.f32 %v824_v31, 0.0 }
  0xd9   : > { %v833_v52 = vmax.f32 %v801_v44, 0.0  ;;  %v841_v53 = vmax.f32 %v809_v45, 0.0 }
  0xda   : > { %v1228_v38 = vpack.c.bf16 %v848_v34, %v847_v32  ;;  %v1248_v39 = vpack.c.bf16 %v856_v35, %v855_v33 }
  0xdb   : > { %v628_v40 = vpop.f32.mrf.mxu2  ;;  %v648_v41 = vpop.f32.mrf.mxu3 }
  0xdc   : > { %1268 = vst [vmem:[%s1618_s23 + $0x48] sm:$0xff] %v1228_v38   ;;  %v590_v42 = vpop.f32.mrf.mxu0  ;;  %v610_v43 = vpop.f32.mrf.mxu1  ;;  %v781_v50 = vmul.f32 %v1599_v26, %v628_v40  ;;  %v789_v51 = vmul.f32 %v1599_v26, %v648_v41 }
  0xdd   : > { %1272 = vst [vmem:[%s1618_s23 + $0x68] sm:$0xff] %v1248_v39   ;;  %v766_v46 = vmul.f32 %v1599_v26, %v590_v42  ;;  %v774_v47 = vmul.f32 %v1599_v26, %v610_v43 }
  0xde   : > { %v817_v60 = vadd.f32 %v1602_v28, %v781_v50  ;;  %v825_v61 = vadd.f32 %v1602_v28, %v789_v51 }
  0xdf   : > { %v802_v48 = vadd.f32 %v1602_v28, %v766_v46  ;;  %v810_v49 = vadd.f32 %v1602_v28, %v774_v47 }
  0xe0   : > { %v849_v4 = vmax.f32 %v817_v60, 0.0  ;;  %v857_v5 = vmax.f32 %v825_v61, 0.0 }
  0xe1   : > { %v834_v54 = vmax.f32 %v802_v48, 0.0  ;;  %v842_v55 = vmax.f32 %v810_v49, 0.0 }
  0xe3   : > { %v1193_v56 = vpack.c.bf16 %v834_v54, %v833_v52  ;;  %v1213_v57 = vpack.c.bf16 %v842_v55, %v841_v53  ;;  %v630_v58 = vpop.f32.mrf.mxu2  ;;  %v650_v59 = vpop.f32.mrf.mxu3 }
  0xe4   : > { %v782_v62 = vmul.f32 %v1599_v26, %v630_v58  ;;  %v790_v63 = vmul.f32 %v1599_v26, %v650_v59  ;;  %v593_v0 = vpop.f32.mrf.mxu0  ;;  %v613_v1 = vpop.f32.mrf.mxu1 }
  0xe5   : > { %1261 = vst [vmem:[%s1618_s23 + $0x10] sm:$0xff] %v1193_v56   ;;  %v767_v8 = vmul.f32 %v1599_v26, %v593_v0  ;;  %v775_v9 = vmul.f32 %v1599_v26, %v613_v1 }
  0xe6   : > { %1265 = vst [vmem:[%s1618_s23 + $0x30] sm:$0xff] %v1213_v57   ;;  %v818_v2 = vadd.f32 %v1602_v28, %v782_v62  ;;  %v826_v3 = vadd.f32 %v1602_v28, %v790_v63 }
  0xe7   : > { %v803_v16 = vadd.f32 %v1602_v28, %v767_v8  ;;  %v811_v17 = vadd.f32 %v1602_v28, %v775_v9 }
  0xe8   : > { %v850_v6 = vmax.f32 %v818_v2, 0.0  ;;  %v858_v7 = vmax.f32 %v826_v3, 0.0 }
  0xe9   : > { %v835_v24 = vmax.f32 %v803_v16, 0.0  ;;  %v843_v25 = vmax.f32 %v811_v17, 0.0 }
  0xea   : > { %v1233_v10 = vpack.c.bf16 %v850_v6, %v849_v4  ;;  %v1253_v11 = vpack.c.bf16 %v858_v7, %v857_v5 }
  0xeb   : > { %v633_v12 = vpop.f32.mrf.mxu2  ;;  %v653_v13 = vpop.f32.mrf.mxu3 }
  0xec   : > { %1269 = vst [vmem:[%s1618_s23 + $0x50] sm:$0xff] %v1233_v10   ;;  %v595_v14 = vpop.f32.mrf.mxu0  ;;  %v615_v15 = vpop.f32.mrf.mxu1  ;;  %v783_v22 = vmul.f32 %v1599_v26, %v633_v12  ;;  %v791_v23 = vmul.f32 %v1599_v26, %v653_v13 }
  0xed   : > { %1273 = vst [vmem:[%s1618_s23 + $0x70] sm:$0xff] %v1253_v11   ;;  %v768_v18 = vmul.f32 %v1599_v26, %v595_v14  ;;  %v776_v19 = vmul.f32 %v1599_v26, %v615_v15 }
  0xee   : > { %v819_v34 = vadd.f32 %v1602_v28, %v783_v22  ;;  %v827_v35 = vadd.f32 %v1602_v28, %v791_v23 }
  0xef   : > { %v804_v20 = vadd.f32 %v1602_v28, %v768_v18  ;;  %v812_v21 = vadd.f32 %v1602_v28, %v776_v19 }
  0xf0   : > { %v851_v40 = vmax.f32 %v819_v34, 0.0  ;;  %v859_v41 = vmax.f32 %v827_v35, 0.0 }
  0xf1   : > { %v836_v27 = vmax.f32 %v804_v20, 0.0  ;;  %v844_v29 = vmax.f32 %v812_v21, 0.0 }
  0xf3   : > { %v1198_v30 = vpack.c.bf16 %v836_v27, %v835_v24  ;;  %v1218_v31 = vpack.c.bf16 %v844_v29, %v843_v25  ;;  %v635_v32 = vpop.f32.mrf.mxu2  ;;  %v655_v33 = vpop.f32.mrf.mxu3 }
  0xf4   : > { %v784_v36 = vmul.f32 %v1599_v26, %v635_v32  ;;  %v792_v37 = vmul.f32 %v1599_v26, %v655_v33 }
  0xf5   : > { %1262 = vst [vmem:[%s1618_s23 + $0x18] sm:$0xff] %v1198_v30  }
  0xf6   : > { %1266 = vst [vmem:[%s1618_s23 + $0x38] sm:$0xff] %v1218_v31   ;;  %v820_v38 = vadd.f32 %v1602_v28, %v784_v36  ;;  %v828_v39 = vadd.f32 %v1602_v28, %v792_v37 }
  0xf8   : > { %v852_v42 = vmax.f32 %v820_v38, 0.0  ;;  %v860_v43 = vmax.f32 %v828_v39, 0.0 }
  0xfa   : > { %v1238_v44 = vpack.c.bf16 %v852_v42, %v851_v40  ;;  %v1258_v45 = vpack.c.bf16 %v860_v43, %v859_v41 }
  0xfc   : > { %1270 = vst [vmem:[%s1618_s23 + $0x58] sm:$0xff] %v1238_v44  }
  0xfd   : > { %1274 = vst [vmem:[%s1618_s23 + $0x78] sm:$0xff] %v1258_v45  }
  0xfe PF: > { %s16_s17 = sadd.s32 1, %s1478_s17   ;;  %s1707_s15 = smov %s1474_s16 }
  0xff   : > { %p13_p8 = scmp.ge.s32.totalorder %s16_s17, 4   ;;  %s1708_s16 = smov %s1710_s27 }
 0x101   :  { %15 = sbr.rel (!%p13_p8) target bundleno = 3 (0x3), region = 90 }
 0x106   :  { %953 = vsyncpa [#allocation4], 1 }
 0x107   :  { %955 = vsyncpa [#allocation4 + $0x1], 1 }
 0x108   :  { %956 = vsyncpa [#allocation6], 1 }

// kernel: _lambda_.60
= control target key start
LH: loop header
LB: loop body
LE: loop exit
PB: predicated region body
PF: predicated region fallthrough
CT: control target
= control target key end

     0   :  { %s1239_s0 = inlined_call_operand.vmem [shape: bf16[112,128], index: 0, kind: input, shape index: {}]   ;;  %s1240_s1 = inlined_call_operand.vmem [shape: bf16[112,128], index: 1, kind: input, shape index: {}]   ;;  %s1241_s2 = inlined_call_operand.vmem [shape: bf16[112,128], index: 2, kind: input, shape index: {}]   ;;  %s1242_s3 = inlined_call_operand.vmem [shape: bf16[112,128], index: 3, kind: input, shape index: {}]   ;;  %s1243_s4 = inlined_call_operand.vmem [shape: bf16[112,128], index: 4, kind: input, shape index: {}]   ;;  %s1244_s5 = inlined_call_operand.vmem [shape: bf16[112,128], index: 5, kind: input, shape index: {}]   ;;  %s1245_s6 = inlined_call_operand.vmem [shape: bf16[112,128], index: 6, kind: input, shape index: {}]   ;;  %s1246_s7 = inlined_call_operand.vmem [shape: bf16[112,128], index: 7, kind: input, shape index: {}]   ;;  %s1247_s8 = inlined_call_operand.vmem [shape: bf16[112,128], index: 8, kind: input, shape index: {}]   ;;  %s1248_s9 = inlined_call_operand.vmem [shape: bf16[112,128], index: 9, kind: output, shape index: {}]  }
   0x1   :  { %v625_v0 = vld [vmem:[%s1239_s0] sm:$0xff]   ;;  %v911_v20 = vld [vmem:[%s1239_s0 + $0x8] sm:$0xff]   ;;  %v912_v61 = vld [vmem:[%s1239_s0 + $0x10] sm:$0xff]  }
   0x2   :  { %v653_v1 = vld [vmem:[%s1240_s1] sm:$0xff]   ;;  %v626_v3 = vunpack.c.l.bf16 %v625_v0  ;;  %v627_v4 = vunpack.c.h.bf16 %v625_v0  ;;  %v917_v25 = vld [vmem:[%s1240_s1 + $0x8] sm:$0xff]   ;;  %v630_v34 = vunpack.c.l.bf16 %v911_v20  ;;  %v631_v35 = vunpack.c.h.bf16 %v911_v20 }
   0x3   :  { %v681_v2 = vld [vmem:[%s1241_s2] sm:$0xff]   ;;  %v654_v5 = vunpack.c.l.bf16 %v653_v1  ;;  %v655_v6 = vunpack.c.h.bf16 %v653_v1  ;;  %v923_v30 = vld [vmem:[%s1241_s2 + $0x8] sm:$0xff]   ;;  %v658_v38 = vunpack.c.l.bf16 %v917_v25  ;;  %v659_v39 = vunpack.c.h.bf16 %v917_v25  ;;  %v936_v25 = vld [vmem:[%s1243_s4 + $0x10] sm:$0xff]  }
   0x4   :  { %v709_v7 = vld [vmem:[%s1242_s3] sm:$0xff]   ;;  %v682_v10 = vunpack.c.l.bf16 %v681_v2  ;;  %v683_v11 = vunpack.c.h.bf16 %v681_v2  ;;  %v929_v31 = vld [vmem:[%s1242_s3 + $0x8] sm:$0xff]   ;;  %v686_v42 = vunpack.c.l.bf16 %v923_v30  ;;  %v687_v43 = vunpack.c.h.bf16 %v923_v30  ;;  %v942_v30 = vld [vmem:[%s1244_s5 + $0x10] sm:$0xff]  }
   0x5   :  { %v737_v8 = vld [vmem:[%s1243_s4] sm:$0xff]   ;;  %v710_v12 = vunpack.c.l.bf16 %v709_v7  ;;  %v88_v15 = vmax.f32 %v626_v3, %v654_v5  ;;  %v89_v16 = vmax.f32 %v627_v4, %v655_v6  ;;  %v711_v17 = vunpack.c.h.bf16 %v709_v7  ;;  %v935_v40 = vld [vmem:[%s1243_s4 + $0x8] sm:$0xff]   ;;  %v918_v6 = vld [vmem:[%s1240_s1 + $0x10] sm:$0xff]  }
   0x6   :  { %v765_v9 = vld [vmem:[%s1244_s5] sm:$0xff]   ;;  %v738_v18 = vunpack.c.l.bf16 %v737_v8  ;;  %v739_v21 = vunpack.c.h.bf16 %v737_v8  ;;  %v941_v41 = vld [vmem:[%s1244_s5 + $0x8] sm:$0xff]   ;;  %v714_v44 = vunpack.c.l.bf16 %v929_v31  ;;  %v715_v45 = vunpack.c.h.bf16 %v929_v31  ;;  %v924_v7 = vld [vmem:[%s1241_s2 + $0x10] sm:$0xff]  }
   0x7   :  { %v793_v13 = vld [vmem:[%s1245_s6] sm:$0xff]   ;;  %v766_v22 = vunpack.c.l.bf16 %v765_v9  ;;  %v767_v23 = vunpack.c.h.bf16 %v765_v9  ;;  %v158_v26 = vmax.f32 %v88_v15, %v682_v10  ;;  %v159_v27 = vmax.f32 %v89_v16, %v683_v11  ;;  %v947_v50 = vld [vmem:[%s1245_s6 + $0x8] sm:$0xff]   ;;  %v930_v16 = vld [vmem:[%s1242_s3 + $0x10] sm:$0xff]  }
   0x8   :  { %v1045_v14 = vld [vmem:[%s1246_s7] sm:$0xff]   ;;  %v794_v24 = vunpack.c.l.bf16 %v793_v13  ;;  %v795_v28 = vunpack.c.h.bf16 %v793_v13  ;;  %v90_v48 = vmax.f32 %v630_v34, %v658_v38  ;;  %v91_v49 = vmax.f32 %v631_v35, %v659_v39  ;;  %v953_v51 = vld [vmem:[%s1246_s7 + $0x8] sm:$0xff]  }
   0x9   :  { %v1050_v19 = vld [vmem:[%s1247_s8] sm:$0xff]   ;;  %v822_v29 = vunpack.c.l.bf16 %v1045_v14  ;;  %v823_v32 = vunpack.c.h.bf16 %v1045_v14  ;;  %v228_v36 = vmax.f32 %v158_v26, %v710_v12  ;;  %v229_v37 = vmax.f32 %v159_v27, %v711_v17  ;;  %v959_v60 = vld [vmem:[%s1247_s8 + $0x8] sm:$0xff]  }
   0xa   :  { %v850_v33 = vunpack.c.l.bf16 %v1050_v19  ;;  %v851_v52 = vunpack.c.h.bf16 %v1050_v19  ;;  %v742_v53 = vunpack.c.l.bf16 %v935_v40  ;;  %v743_v54 = vunpack.c.h.bf16 %v935_v40  ;;  %v954_v40 = vld [vmem:[%s1246_s7 + $0x10] sm:$0xff]  }
   0xb   :  { %v298_v46 = vmax.f32 %v228_v36, %v738_v18  ;;  %v299_v47 = vmax.f32 %v229_v37, %v739_v21  ;;  %v770_v55 = vunpack.c.l.bf16 %v941_v41  ;;  %v160_v58 = vmax.f32 %v90_v48, %v686_v42 }
   0xc   :  { %v161_v59 = vmax.f32 %v91_v49, %v687_v43  ;;  %v771_v62 = vunpack.c.h.bf16 %v941_v41  ;;  %v798_v63 = vunpack.c.l.bf16 %v947_v50  ;;  %v799_v0 = vunpack.c.h.bf16 %v947_v50 }
   0xd   :  { %v368_v56 = vmax.f32 %v298_v46, %v766_v22  ;;  %v369_v57 = vmax.f32 %v299_v47, %v767_v23  ;;  %v826_v1 = vunpack.c.l.bf16 %v953_v51  ;;  %v230_v4 = vmax.f32 %v160_v58, %v714_v44  ;;  %v913_v46 = vld [vmem:[%s1239_s0 + $0x18] sm:$0xff]  }
   0xe   :  { %v231_v5 = vmax.f32 %v161_v59, %v715_v45  ;;  %v827_v8 = vunpack.c.h.bf16 %v953_v51  ;;  %v854_v9 = vunpack.c.l.bf16 %v959_v60  ;;  %v634_v10 = vunpack.c.l.bf16 %v912_v61  ;;  %v960_v45 = vld [vmem:[%s1247_s8 + $0x10] sm:$0xff]   ;;  %v919_v51 = vld [vmem:[%s1240_s1 + $0x18] sm:$0xff]  }
   0xf   :  { %v438_v2 = vmax.f32 %v368_v56, %v794_v24  ;;  %v439_v3 = vmax.f32 %v369_v57, %v795_v28  ;;  %v635_v11 = vunpack.c.h.bf16 %v912_v61  ;;  %v300_v14 = vmax.f32 %v230_v4, %v742_v53  ;;  %v925_v56 = vld [vmem:[%s1241_s2 + $0x18] sm:$0xff]  }
  0x10   :  { %v301_v15 = vmax.f32 %v231_v5, %v743_v54  ;;  %v662_v17 = vunpack.c.l.bf16 %v918_v6  ;;  %v663_v18 = vunpack.c.h.bf16 %v918_v6  ;;  %v690_v19 = vunpack.c.l.bf16 %v924_v7  ;;  %v931_v61 = vld [vmem:[%s1242_s3 + $0x18] sm:$0xff]  }
  0x11   :  { %v508_v12 = vmax.f32 %v438_v2, %v822_v29  ;;  %v509_v13 = vmax.f32 %v439_v3, %v823_v32  ;;  %v691_v20 = vunpack.c.h.bf16 %v924_v7  ;;  %v370_v23 = vmax.f32 %v300_v14, %v770_v55  ;;  %v937_v2 = vld [vmem:[%s1243_s4 + $0x18] sm:$0xff]  }
  0x12   :  { %v371_v24 = vmax.f32 %v301_v15, %v771_v62  ;;  %v92_v26 = vmax.f32 %v634_v10, %v662_v17  ;;  %v93_v27 = vmax.f32 %v635_v11, %v663_v18  ;;  %v718_v28 = vunpack.c.l.bf16 %v930_v16  ;;  %v943_v7 = vld [vmem:[%s1244_s5 + $0x18] sm:$0xff]  }
  0x13   :  { %v578_v21 = vmax.f32 %v508_v12, %v850_v33  ;;  %v579_v22 = vmax.f32 %v509_v13, %v851_v52  ;;  %v719_v29 = vunpack.c.h.bf16 %v930_v16  ;;  %v440_v32 = vmax.f32 %v370_v23, %v798_v63  ;;  %v948_v33 = vld [vmem:[%s1245_s6 + $0x10] sm:$0xff]   ;;  %v949_v12 = vld [vmem:[%s1245_s6 + $0x18] sm:$0xff]  }
  0x14   :  { %v441_v34 = vmax.f32 %v371_v24, %v799_v0  ;;  %v855_v35 = vunpack.c.h.bf16 %v959_v60  ;;  %v162_v36 = vmax.f32 %v92_v26, %v690_v19  ;;  %v163_v37 = vmax.f32 %v93_v27, %v691_v20  ;;  %v955_v17 = vld [vmem:[%s1246_s7 + $0x18] sm:$0xff]   ;;  %v914_v27 = vld [vmem:[%s1239_s0 + $0x20] sm:$0xff]  }
  0x15   :  { %v879_v31 = vpack.c.bf16 %v579_v22, %v578_v21  ;;  %v746_v38 = vunpack.c.l.bf16 %v936_v25  ;;  %v747_v39 = vunpack.c.h.bf16 %v936_v25  ;;  %v510_v41 = vmax.f32 %v440_v32, %v826_v1  ;;  %v961_v22 = vld [vmem:[%s1247_s8 + $0x18] sm:$0xff]   ;;  %v920_v32 = vld [vmem:[%s1240_s1 + $0x20] sm:$0xff]  }
  0x16   :  { %v511_v42 = vmax.f32 %v441_v34, %v827_v8  ;;  %v774_v43 = vunpack.c.l.bf16 %v942_v30  ;;  %v775_v44 = vunpack.c.h.bf16 %v942_v30  ;;  %v232_v47 = vmax.f32 %v162_v36, %v718_v28  ;;  %v926_v34 = vld [vmem:[%s1241_s2 + $0x20] sm:$0xff]  }
  0x17   :  { %880 = vst [vmem:[%s1248_s9] sm:$0xff] %v879_v31   ;;  %v233_v48 = vmax.f32 %v163_v37, %v719_v29  ;;  %v802_v49 = vunpack.c.l.bf16 %v948_v33  ;;  %v803_v50 = vunpack.c.h.bf16 %v948_v33  ;;  %v580_v52 = vmax.f32 %v510_v41, %v854_v9 }
  0x18   :  { %v581_v53 = vmax.f32 %v511_v42, %v855_v35  ;;  %v830_v54 = vunpack.c.l.bf16 %v954_v40  ;;  %v831_v55 = vunpack.c.h.bf16 %v954_v40  ;;  %v302_v57 = vmax.f32 %v232_v47, %v746_v38  ;;  %v932_v42 = vld [vmem:[%s1242_s3 + $0x20] sm:$0xff]  }
  0x19   :  { %v303_v58 = vmax.f32 %v233_v48, %v747_v39  ;;  %v858_v59 = vunpack.c.l.bf16 %v960_v45  ;;  %v638_v60 = vunpack.c.l.bf16 %v913_v46  ;;  %v639_v63 = vunpack.c.h.bf16 %v913_v46  ;;  %v938_v47 = vld [vmem:[%s1243_s4 + $0x20] sm:$0xff]  }
  0x1a   :  { %v884_v62 = vpack.c.bf16 %v581_v53, %v580_v52  ;;  %v666_v0 = vunpack.c.l.bf16 %v919_v51  ;;  %v667_v1 = vunpack.c.h.bf16 %v919_v51  ;;  %v372_v3 = vmax.f32 %v302_v57, %v774_v43  ;;  %v944_v52 = vld [vmem:[%s1244_s5 + $0x20] sm:$0xff]  }
  0x1b   :  { %v373_v4 = vmax.f32 %v303_v58, %v775_v44  ;;  %v694_v5 = vunpack.c.l.bf16 %v925_v56  ;;  %v695_v6 = vunpack.c.h.bf16 %v925_v56  ;;  %v722_v10 = vunpack.c.l.bf16 %v931_v61  ;;  %v950_v57 = vld [vmem:[%s1245_s6 + $0x20] sm:$0xff]  }
  0x1c   :  { %965 = vst [vmem:[%s1248_s9 + $0x8] sm:$0xff] %v884_v62   ;;  %v94_v8 = vmax.f32 %v638_v60, %v666_v0  ;;  %v95_v9 = vmax.f32 %v639_v63, %v667_v1  ;;  %v723_v11 = vunpack.c.h.bf16 %v931_v61  ;;  %v442_v13 = vmax.f32 %v372_v3, %v802_v49  ;;  %v956_v62 = vld [vmem:[%s1246_s7 + $0x20] sm:$0xff]  }
  0x1d   :  { %v443_v14 = vmax.f32 %v373_v4, %v803_v50  ;;  %v859_v15 = vunpack.c.h.bf16 %v960_v45  ;;  %v750_v16 = vunpack.c.l.bf16 %v937_v2  ;;  %v751_v20 = vunpack.c.h.bf16 %v937_v2  ;;  %v962_v3 = vld [vmem:[%s1247_s8 + $0x20] sm:$0xff]   ;;  %v915_v4 = vld [vmem:[%s1239_s0 + $0x28] sm:$0xff]  }
  0x1e   :  { %v164_v18 = vmax.f32 %v94_v8, %v694_v5  ;;  %v165_v19 = vmax.f32 %v95_v9, %v695_v6  ;;  %v778_v21 = vunpack.c.l.bf16 %v943_v7  ;;  %v512_v23 = vmax.f32 %v442_v13, %v830_v54  ;;  %v921_v9 = vld [vmem:[%s1240_s1 + $0x28] sm:$0xff]  }
  0x1f   :  { %v513_v24 = vmax.f32 %v443_v14, %v831_v55  ;;  %v779_v25 = vunpack.c.h.bf16 %v943_v7  ;;  %v806_v26 = vunpack.c.l.bf16 %v949_v12  ;;  %v807_v30 = vunpack.c.h.bf16 %v949_v12  ;;  %v927_v14 = vld [vmem:[%s1241_s2 + $0x28] sm:$0xff]  }
  0x20   :  { %v234_v28 = vmax.f32 %v164_v18, %v722_v10  ;;  %v235_v29 = vmax.f32 %v165_v19, %v723_v11  ;;  %v834_v31 = vunpack.c.l.bf16 %v955_v17  ;;  %v582_v35 = vmax.f32 %v512_v23, %v858_v59  ;;  %v933_v19 = vld [vmem:[%s1242_s3 + $0x28] sm:$0xff]  }
  0x21   :  { %v583_v33 = vmax.f32 %v513_v24, %v859_v15  ;;  %v835_v36 = vunpack.c.h.bf16 %v955_v17  ;;  %v862_v37 = vunpack.c.l.bf16 %v961_v22  ;;  %v642_v40 = vunpack.c.l.bf16 %v914_v27  ;;  %v939_v24 = vld [vmem:[%s1243_s4 + $0x28] sm:$0xff]  }
  0x22   :  { %v304_v38 = vmax.f32 %v234_v28, %v750_v16  ;;  %v305_v39 = vmax.f32 %v235_v29, %v751_v20  ;;  %v643_v41 = vunpack.c.h.bf16 %v914_v27  ;;  %v670_v44 = vunpack.c.l.bf16 %v920_v32 }
  0x23   :  { %v889_v43 = vpack.c.bf16 %v583_v33, %v582_v35  ;;  %v671_v45 = vunpack.c.h.bf16 %v920_v32  ;;  %v698_v46 = vunpack.c.l.bf16 %v926_v34  ;;  %v863_v50 = vunpack.c.h.bf16 %v961_v22  ;;  %v951_v35 = vld [vmem:[%s1245_s6 + $0x28] sm:$0xff]  }
  0x24   :  { %v374_v48 = vmax.f32 %v304_v38, %v778_v21  ;;  %v375_v49 = vmax.f32 %v305_v39, %v779_v25  ;;  %v699_v51 = vunpack.c.h.bf16 %v926_v34  ;;  %v96_v53 = vmax.f32 %v642_v40, %v670_v44  ;;  %v945_v34 = vld [vmem:[%s1244_s5 + $0x28] sm:$0xff]  }
  0x25   :  { %966 = vst [vmem:[%s1248_s9 + $0x10] sm:$0xff] %v889_v43   ;;  %v97_v54 = vmax.f32 %v643_v41, %v671_v45  ;;  %v726_v55 = vunpack.c.l.bf16 %v932_v42  ;;  %v727_v56 = vunpack.c.h.bf16 %v932_v42  ;;  %v754_v60 = vunpack.c.l.bf16 %v938_v47  ;;  %v957_v43 = vld [vmem:[%s1246_s7 + $0x28] sm:$0xff]  }
  0x26   :  { %v444_v58 = vmax.f32 %v374_v48, %v806_v26  ;;  %v445_v59 = vmax.f32 %v375_v49, %v807_v30  ;;  %v755_v61 = vunpack.c.h.bf16 %v938_v47  ;;  %v166_v63 = vmax.f32 %v96_v53, %v698_v46  ;;  %v963_v44 = vld [vmem:[%s1247_s8 + $0x28] sm:$0xff]   ;;  %v916_v49 = vld [vmem:[%s1239_s0 + $0x30] sm:$0xff]  }
  0x27   :  { %v167_v0 = vmax.f32 %v97_v54, %v699_v51  ;;  %v782_v1 = vunpack.c.l.bf16 %v944_v52  ;;  %v783_v2 = vunpack.c.h.bf16 %v944_v52  ;;  %v810_v7 = vunpack.c.l.bf16 %v950_v57  ;;  %v922_v54 = vld [vmem:[%s1240_s1 + $0x30] sm:$0xff]  }
  0x28   :  { %v514_v5 = vmax.f32 %v444_v58, %v834_v31  ;;  %v515_v6 = vmax.f32 %v445_v59, %v835_v36  ;;  %v811_v8 = vunpack.c.h.bf16 %v950_v57  ;;  %v236_v10 = vmax.f32 %v166_v63, %v726_v55  ;;  %v928_v59 = vld [vmem:[%s1241_s2 + $0x30] sm:$0xff]  }
  0x29   :  { %v237_v11 = vmax.f32 %v167_v0, %v727_v56  ;;  %v838_v12 = vunpack.c.l.bf16 %v956_v62  ;;  %v839_v13 = vunpack.c.h.bf16 %v956_v62  ;;  %v866_v17 = vunpack.c.l.bf16 %v962_v3  ;;  %v934_v0 = vld [vmem:[%s1242_s3 + $0x30] sm:$0xff]  }
  0x2a   :  { %v584_v15 = vmax.f32 %v514_v5, %v862_v37  ;;  %v585_v16 = vmax.f32 %v515_v6, %v863_v50  ;;  %v646_v18 = vunpack.c.l.bf16 %v915_v4  ;;  %v306_v20 = vmax.f32 %v236_v10, %v754_v60  ;;  %v940_v5 = vld [vmem:[%s1243_s4 + $0x30] sm:$0xff]  }
  0x2b   :  { %v307_v21 = vmax.f32 %v237_v11, %v755_v61  ;;  %v647_v22 = vunpack.c.h.bf16 %v915_v4  ;;  %v674_v23 = vunpack.c.l.bf16 %v921_v9  ;;  %v675_v26 = vunpack.c.h.bf16 %v921_v9 }
  0x2c   :  { %v894_v25 = vpack.c.bf16 %v585_v16, %v584_v15  ;;  %v702_v27 = vunpack.c.l.bf16 %v927_v14  ;;  %v703_v28 = vunpack.c.h.bf16 %v927_v14  ;;  %v376_v29 = vmax.f32 %v306_v20, %v782_v1  ;;  %v946_v14 = vld [vmem:[%s1244_s5 + $0x30] sm:$0xff]  }
  0x2d   :  { %v377_v30 = vmax.f32 %v307_v21, %v783_v2  ;;  %v98_v31 = vmax.f32 %v646_v18, %v674_v23  ;;  %v730_v32 = vunpack.c.l.bf16 %v933_v19  ;;  %v867_v33 = vunpack.c.h.bf16 %v962_v3  ;;  %v952_v23 = vld [vmem:[%s1245_s6 + $0x30] sm:$0xff]  }
  0x2e   :  { %967 = vst [vmem:[%s1248_s9 + $0x18] sm:$0xff] %v894_v25   ;;  %v99_v36 = vmax.f32 %v647_v22, %v675_v26  ;;  %v731_v37 = vunpack.c.h.bf16 %v933_v19  ;;  %v758_v38 = vunpack.c.l.bf16 %v939_v24  ;;  %v446_v39 = vmax.f32 %v376_v29, %v810_v7 }
  0x2f   :  { %v447_v40 = vmax.f32 %v377_v30, %v811_v8  ;;  %v168_v41 = vmax.f32 %v98_v31, %v702_v27  ;;  %v759_v42 = vunpack.c.h.bf16 %v939_v24  ;;  %v786_v46 = vunpack.c.l.bf16 %v945_v34  ;;  %v958_v30 = vld [vmem:[%s1246_s7 + $0x30] sm:$0xff]  }
  0x30   :  { %v169_v45 = vmax.f32 %v99_v36, %v703_v28  ;;  %v787_v47 = vunpack.c.h.bf16 %v945_v34  ;;  %v814_v48 = vunpack.c.l.bf16 %v951_v35  ;;  %v516_v50 = vmax.f32 %v446_v39, %v838_v12 }
  0x31   :  { %v517_v51 = vmax.f32 %v447_v40, %v839_v13  ;;  %v238_v52 = vmax.f32 %v168_v41, %v730_v32  ;;  %v815_v53 = vunpack.c.h.bf16 %v951_v35  ;;  %v842_v56 = vunpack.c.l.bf16 %v957_v43 }
  0x32   :  { %v239_v55 = vmax.f32 %v169_v45, %v731_v37  ;;  %v843_v57 = vunpack.c.h.bf16 %v957_v43  ;;  %v870_v58 = vunpack.c.l.bf16 %v963_v44  ;;  %v586_v60 = vmax.f32 %v516_v50, %v866_v17 }
  0x33   :  { %v587_v61 = vmax.f32 %v517_v51, %v867_v33  ;;  %v308_v62 = vmax.f32 %v238_v52, %v758_v38  ;;  %v650_v63 = vunpack.c.l.bf16 %v916_v49  ;;  %v651_v2 = vunpack.c.h.bf16 %v916_v49  ;;  %v964_v38 = vld [vmem:[%s1247_s8 + $0x30] sm:$0xff]  }
  0x34   :  { %v309_v1 = vmax.f32 %v239_v55, %v759_v42  ;;  %v678_v3 = vunpack.c.l.bf16 %v922_v54  ;;  %v679_v4 = vunpack.c.h.bf16 %v922_v54  ;;  %v706_v8 = vunpack.c.l.bf16 %v928_v59 }
  0x35   :  { %v899_v6 = vpack.c.bf16 %v587_v61, %v586_v60  ;;  %v378_v7 = vmax.f32 %v308_v62, %v786_v46  ;;  %v707_v9 = vunpack.c.h.bf16 %v928_v59  ;;  %v734_v13 = vunpack.c.l.bf16 %v934_v0 }
  0x36   :  { %v379_v10 = vmax.f32 %v309_v1, %v787_v47  ;;  %v100_v11 = vmax.f32 %v650_v63, %v678_v3  ;;  %v101_v12 = vmax.f32 %v651_v2, %v679_v4  ;;  %v871_v16 = vunpack.c.h.bf16 %v963_v44 }
  0x37   :  { %968 = vst [vmem:[%s1248_s9 + $0x20] sm:$0xff] %v899_v6   ;;  %v448_v15 = vmax.f32 %v378_v7, %v814_v48  ;;  %v735_v17 = vunpack.c.h.bf16 %v934_v0  ;;  %v762_v18 = vunpack.c.l.bf16 %v940_v5  ;;  %v763_v22 = vunpack.c.h.bf16 %v940_v5 }
  0x38   :  { %v449_v19 = vmax.f32 %v379_v10, %v815_v53  ;;  %v170_v20 = vmax.f32 %v100_v11, %v706_v8  ;;  %v171_v21 = vmax.f32 %v101_v12, %v707_v9  ;;  %v790_v25 = vunpack.c.l.bf16 %v946_v14 }
  0x39   :  { %v518_v24 = vmax.f32 %v448_v15, %v842_v56  ;;  %v791_v29 = vunpack.c.h.bf16 %v946_v14  ;;  %v818_v32 = vunpack.c.l.bf16 %v952_v23  ;;  %v819_v36 = vunpack.c.h.bf16 %v952_v23 }
  0x3a   :  { %v519_v26 = vmax.f32 %v449_v19, %v843_v57  ;;  %v240_v27 = vmax.f32 %v170_v20, %v734_v13  ;;  %v241_v28 = vmax.f32 %v171_v21, %v735_v17  ;;  %v846_v37 = vunpack.c.l.bf16 %v958_v30 }
  0x3b   :  { %v588_v31 = vmax.f32 %v518_v24, %v870_v58  ;;  %v847_v42 = vunpack.c.h.bf16 %v958_v30  ;;  %v874_v45 = vunpack.c.l.bf16 %v964_v38  ;;  %v875_v46 = vunpack.c.h.bf16 %v964_v38 }
  0x3c   :  { %v589_v34 = vmax.f32 %v519_v26, %v871_v16  ;;  %v310_v35 = vmax.f32 %v240_v27, %v762_v18  ;;  %v311_v33 = vmax.f32 %v241_v28, %v763_v22 }
  0x3e   :  { %v904_v39 = vpack.c.bf16 %v589_v34, %v588_v31  ;;  %v380_v40 = vmax.f32 %v310_v35, %v790_v25  ;;  %v381_v41 = vmax.f32 %v311_v33, %v791_v29 }
  0x40   :  { %969 = vst [vmem:[%s1248_s9 + $0x28] sm:$0xff] %v904_v39   ;;  %v450_v43 = vmax.f32 %v380_v40, %v818_v32  ;;  %v451_v44 = vmax.f32 %v381_v41, %v819_v36 }
  0x42   :  { %v520_v47 = vmax.f32 %v450_v43, %v846_v37  ;;  %v521_v48 = vmax.f32 %v451_v44, %v847_v42 }
  0x44   :  { %v590_v49 = vmax.f32 %v520_v47, %v874_v45  ;;  %v591_v50 = vmax.f32 %v521_v48, %v875_v46 }
  0x46   :  { %v909_v51 = vpack.c.bf16 %v591_v50, %v590_v49 }
  0x48   :  { %970 = vst [vmem:[%s1248_s9 + $0x30] sm:$0xff] %v909_v51  }

// kernel: _lambda_.63
= control target key start
LH: loop header
LB: loop body
LE: loop exit
PB: predicated region body
PF: predicated region fallthrough
CT: control target
= control target key end

     0   :  { %9 = vsyncpa [#allocation4], 0  ;;  %s423_s0 = inlined_call_operand.vmem [shape: bf16[32,128], index: 0, kind: input, shape index: {}]   ;;  %s424_s1 = inlined_call_operand.hbm [shape: bf16[128,128], index: 1, kind: input, shape index: {}]   ;;  %s425_s2 = inlined_call_operand.hbm [shape: f32[1,128], index: 2, kind: input, shape index: {}]   ;;  %s426_s3 = inlined_call_operand.hbm [shape: f32[1,128], index: 3, kind: input, shape index: {}]   ;;  %s427_s4 = inlined_call_operand.vmem [shape: bf16[32,128], index: 4, kind: output, shape index: {}]  }
   0x1   :  { %10 = vsyncpa [#allocation6], 0  ;;  %s31_s17 = sshll.u32 %s425_s2, 4  ;;  %s372_s18 = smov [#allocation5]   ;;  %s32_s17 = int_to_ptr.hbm [resolvable:$true] %s31_s17 }
   0x2   :  { %s33_s19 = sshll.u32 %s372_s18, 4  ;;  %s17_s22 = sshll.u32 %s424_s1, 4  ;;  %s34_s19 = int_to_ptr.vmem [resolvable:$true] %s33_s19  ;;  %s18_s22 = int_to_ptr.hbm [resolvable:$true] %s17_s22 }
   0x3   :  { %36 = dma.hbm_to_vmem [thread:$0]  %s32_s17, 16, %s34_s19, [#allocation6]  }
   0x4   :  { %s373_s23 = smov [#allocation3]   ;;  %s374_s25 = smov 64  }
   0x5   :  { %s19_s24 = sshll.u32 %s373_s23, 4  ;;  %s375_s26 = smov 4   ;;  %s20_s24 = int_to_ptr.vmem [resolvable:$true] %s19_s24 }
   0x6   :  { %25 = dma.hbm_to_vmem [thread:$0]  %s18_s22, 1024, %s20_s24, [#allocation4], %s374_s25, %s374_s25, %s375_s26  }
   0x7   :  { %s42_s2 = sshll.u32 %s426_s3, 4  ;;  %s376_s29 = smov [#allocation7]   ;;  %s43_s2 = int_to_ptr.hbm [resolvable:$true] %s42_s2 }
   0x8   :  { %s44_s30 = sshll.u32 %s376_s29, 4  ;;  %s45_s30 = int_to_ptr.vmem [resolvable:$true] %s44_s30 }
   0x9   :  { %47 = dma.hbm_to_vmem [thread:$0]  %s43_s2, 16, %s45_s30, [#allocation6]  }
   0xa   :  { %368 = dma.done.wait [#allocation4], 1024  }
   0xb   :  { %369 = vsyncadd [#allocation4], 4294966272 }
   0xc   :  { %370 = dma.done.wait [#allocation6], 32  }
   0xd   :  { %371 = vsyncadd [#allocation6], 4294967264  ;;  %v269_v0 = vld [vmem:[#allocation3 + $0x38] sm:$0xff]  ;;  %v268_v1 = vld [vmem:[#allocation3 + $0x30] sm:$0xff] }
   0xe   :  { %152 = vmatpush.bf16.msra.mxu0 %v269_v0  ;;  %281 = vmatpush.bf16.msra.mxu1 %v269_v0  ;;  %v267_v2 = vld [vmem:[#allocation3 + $0x28] sm:$0xff]  ;;  %v266_v3 = vld [vmem:[#allocation3 + $0x20] sm:$0xff]  ;;  %v265_v4 = vld [vmem:[#allocation3 + $0x18] sm:$0xff] }
   0xf   :  { %v264_v5 = vld [vmem:[#allocation3 + $0x10] sm:$0xff]  ;;  %v263_v6 = vld [vmem:[#allocation3 + $0x8] sm:$0xff]  ;;  %v262_v7 = vld [vmem:[#allocation3] sm:$0xff] }
  0x10   :  { %v260_v8 = vld [vmem:[%s423_s0] sm:$0xff]  ;;  %v261_v9 = vld [vmem:[%s423_s0 + $0x8] sm:$0xff] }
  0x11   :  { %v294_v12 = vld [vmem:[#allocation5] ss:$0 sm:$0xff]  ;;  %v295_v14 = vld [vmem:[#allocation7] ss:$0 sm:$0xff] }
  0x12   :  { %153 = vmatpush.bf16.msra.mxu0 %v268_v1  ;;  %282 = vmatpush.bf16.msra.mxu1 %v268_v1 }
  0x16   :  { %154 = vmatpush.bf16.msra.mxu0 %v267_v2  ;;  %283 = vmatpush.bf16.msra.mxu1 %v267_v2 }
  0x1a   :  { %155 = vmatpush.bf16.msra.mxu0 %v266_v3  ;;  %284 = vmatpush.bf16.msra.mxu1 %v266_v3 }
  0x1e   :  { %156 = vmatpush.bf16.msra.mxu0 %v265_v4  ;;  %285 = vmatpush.bf16.msra.mxu1 %v265_v4 }
  0x22   :  { %157 = vmatpush.bf16.msra.mxu0 %v264_v5  ;;  %286 = vmatpush.bf16.msra.mxu1 %v264_v5 }
  0x26   :  { %158 = vmatpush.bf16.msra.mxu0 %v263_v6  ;;  %287 = vmatpush.bf16.msra.mxu1 %v263_v6 }
  0x2a   :  { %159 = vmatpush.bf16.msra.mxu0 %v262_v7  ;;  %288 = vmatpush.bf16.msra.mxu1 %v262_v7 }
  0x2d   :  { %160 = vmatmul.bf16.vlgmr.msra.gmra.mxu0 %v260_v8  ;;  %165 = vmatmul.bf16.vlgmr.msra.gmra.mxu1 %v261_v9 }
  0xaa   :  { %v161_v10 = vpop.f32.mrf.mxu0  ;;  %v166_v11 = vpop.f32.mrf.mxu1 }
  0xab   :  { %v190_v13 = vmul.f32 %v294_v12, %v161_v10  ;;  %v192_v15 = vmul.f32 %v294_v12, %v166_v11 }
  0xad   :  { %v198_v18 = vadd.f32 %v295_v14, %v190_v13  ;;  %v200_v19 = vadd.f32 %v295_v14, %v192_v15 }
  0xaf   :  { %v202_v24 = vmax.f32 %v198_v18, 0.0  ;;  %v204_v25 = vmax.f32 %v200_v19, 0.0 }
  0xb2   :  { %v163_v16 = vpop.f32.mrf.mxu0  ;;  %v168_v17 = vpop.f32.mrf.mxu1 }
  0xb3   :  { %v191_v20 = vmul.f32 %v294_v12, %v163_v16  ;;  %v193_v21 = vmul.f32 %v294_v12, %v168_v17 }
  0xb5   :  { %v199_v22 = vadd.f32 %v295_v14, %v191_v20  ;;  %v201_v23 = vadd.f32 %v295_v14, %v193_v21 }
  0xb7   :  { %v203_v26 = vmax.f32 %v199_v22, 0.0  ;;  %v205_v27 = vmax.f32 %v201_v23, 0.0 }
  0xb9   :  { %v273_v28 = vpack.c.bf16 %v203_v26, %v202_v24  ;;  %v278_v29 = vpack.c.bf16 %v205_v27, %v204_v25 }
  0xbb   :  { %274 = vst [vmem:[%s427_s4] sm:$0xff] %v273_v28  }
  0xbc   :  { %280 = vst [vmem:[%s427_s4 + $0x8] sm:$0xff] %v278_v29  }
  0xbd   :  { %218 = vsyncpa [#allocation4], 1 }
  0xbe   :  { %219 = vsyncpa [#allocation6], 1 }

// kernel: _lambda_.61
= control target key start
LH: loop header
LB: loop body
LE: loop exit
PB: predicated region body
PF: predicated region fallthrough
CT: control target
= control target key end

     0   :  { %9 = vsyncpa [#allocation4], 0  ;;  %s665_s0 = inlined_call_operand.vmem [shape: bf16[112,128], index: 0, kind: input, shape index: {}]   ;;  %s666_s1 = inlined_call_operand.vmem [shape: bf16[128,128], index: 1, kind: input, shape index: {}]   ;;  %s667_s2 = inlined_call_operand.hbm [shape: f32[1,128], index: 2, kind: input, shape index: {}]   ;;  %s668_s3 = inlined_call_operand.hbm [shape: f32[1,128], index: 3, kind: input, shape index: {}]   ;;  %s669_s4 = inlined_call_operand.vmem [shape: bf16[112,128], index: 4, kind: output, shape index: {}]  }
   0x1   :  { %s20_s17 = sshll.u32 %s667_s2, 4  ;;  %s21_s17 = int_to_ptr.hbm [resolvable:$true] %s20_s17 }
   0x2   :  { %10 = vsyncpa [#allocation6], 0  ;;  %s566_s18 = smov [#allocation3]   ;;  %s31_s22 = sshll.u32 %s668_s3, 4  ;;  %s32_s22 = int_to_ptr.hbm [resolvable:$true] %s31_s22 }
   0x3   :  { %s22_s19 = sshll.u32 %s566_s18, 4  ;;  %s567_s23 = smov [#allocation5]   ;;  %s23_s19 = int_to_ptr.vmem [resolvable:$true] %s22_s19 }
   0x4   :  { %25 = dma.hbm_to_vmem [thread:$0]  %s21_s17, 16, %s23_s19, [#allocation4]  }
   0x5   :  { %s33_s24 = sshll.u32 %s567_s23, 4  ;;  %s34_s24 = int_to_ptr.vmem [resolvable:$true] %s33_s24 }
   0x6   :  { %36 = dma.hbm_to_vmem [thread:$0]  %s32_s22, 16, %s34_s24, [#allocation6]  }
   0x7   :  { %562 = dma.done.wait [#allocation4], 16  }
   0x8   :  { %563 = vsyncadd [#allocation4], 4294967280 }
   0x9   :  { %564 = dma.done.wait [#allocation6], 16  }
   0xa   :  { %565 = vsyncadd [#allocation6], 4294967280  ;;  %v444_v0 = vld [vmem:[%s666_s1 + $0x38] sm:$0xff]  ;;  %v443_v1 = vld [vmem:[%s666_s1 + $0x30] sm:$0xff] }
   0xb   :  { %486 = vmatpush.bf16.msra.mxu1 %v444_v0  ;;  %487 = vmatpush.bf16.msra.mxu2 %v444_v0  ;;  %v442_v2 = vld [vmem:[%s666_s1 + $0x28] sm:$0xff]  ;;  %v441_v3 = vld [vmem:[%s666_s1 + $0x20] sm:$0xff]  ;;  %v440_v4 = vld [vmem:[%s666_s1 + $0x18] sm:$0xff] }
   0xc   :  { %488 = vmatpush.bf16.msra.mxu3 %v444_v0  ;;  %197 = vmatpush.bf16.msra.mxu0 %v444_v0  ;;  %v439_v5 = vld [vmem:[%s666_s1 + $0x10] sm:$0xff]  ;;  %v438_v6 = vld [vmem:[%s666_s1 + $0x8] sm:$0xff]  ;;  %v437_v7 = vld [vmem:[%s666_s1] sm:$0xff] }
   0xd   :  { %v431_v8 = vld [vmem:[%s665_s0 + $0x8] sm:$0xff]  ;;  %v433_v9 = vld [vmem:[%s665_s0 + $0x18] sm:$0xff]  ;;  %v430_v11 = vld [vmem:[%s665_s0] sm:$0xff] }
   0xe   :  { %v435_v10 = vld [vmem:[%s665_s0 + $0x28] sm:$0xff]  ;;  %v432_v12 = vld [vmem:[%s665_s0 + $0x10] sm:$0xff]  ;;  %v434_v13 = vld [vmem:[%s665_s0 + $0x20] sm:$0xff] }
   0xf   :  { %489 = vmatpush.bf16.msra.mxu1 %v443_v1  ;;  %490 = vmatpush.bf16.msra.mxu2 %v443_v1  ;;  %v436_v14 = vld [vmem:[%s665_s0 + $0x30] sm:$0xff]  ;;  %v512_v16 = vld [vmem:[#allocation3] ss:$0 sm:$0xff]  ;;  %v513_v20 = vld [vmem:[#allocation5] ss:$0 sm:$0xff] }
  0x10   :  { %491 = vmatpush.bf16.msra.mxu3 %v443_v1  ;;  %198 = vmatpush.bf16.msra.mxu0 %v443_v1 }
  0x13   :  { %492 = vmatpush.bf16.msra.mxu1 %v442_v2  ;;  %493 = vmatpush.bf16.msra.mxu2 %v442_v2 }
  0x14   :  { %494 = vmatpush.bf16.msra.mxu3 %v442_v2  ;;  %199 = vmatpush.bf16.msra.mxu0 %v442_v2 }
  0x17   :  { %495 = vmatpush.bf16.msra.mxu1 %v441_v3  ;;  %496 = vmatpush.bf16.msra.mxu2 %v441_v3 }
  0x18   :  { %497 = vmatpush.bf16.msra.mxu3 %v441_v3  ;;  %200 = vmatpush.bf16.msra.mxu0 %v441_v3 }
  0x1b   :  { %498 = vmatpush.bf16.msra.mxu1 %v440_v4  ;;  %499 = vmatpush.bf16.msra.mxu2 %v440_v4 }
  0x1c   :  { %500 = vmatpush.bf16.msra.mxu3 %v440_v4  ;;  %201 = vmatpush.bf16.msra.mxu0 %v440_v4 }
  0x1f   :  { %501 = vmatpush.bf16.msra.mxu1 %v439_v5  ;;  %502 = vmatpush.bf16.msra.mxu2 %v439_v5 }
  0x20   :  { %503 = vmatpush.bf16.msra.mxu3 %v439_v5  ;;  %202 = vmatpush.bf16.msra.mxu0 %v439_v5 }
  0x23   :  { %504 = vmatpush.bf16.msra.mxu1 %v438_v6  ;;  %505 = vmatpush.bf16.msra.mxu2 %v438_v6 }
  0x24   :  { %506 = vmatpush.bf16.msra.mxu3 %v438_v6  ;;  %203 = vmatpush.bf16.msra.mxu0 %v438_v6 }
  0x27   :  { %507 = vmatpush.bf16.msra.mxu1 %v437_v7  ;;  %508 = vmatpush.bf16.msra.mxu2 %v437_v7 }
  0x28   :  { %509 = vmatpush.bf16.msra.mxu3 %v437_v7  ;;  %204 = vmatpush.bf16.msra.mxu0 %v437_v7 }
  0x2a   :  { %210 = vmatmul.bf16.vlgmr.msra.gmra.mxu1 %v431_v8  ;;  %220 = vmatmul.bf16.vlgmr.msra.gmra.mxu2 %v433_v9 }
  0x2b   :  { %230 = vmatmul.bf16.vlgmr.msra.gmra.mxu3 %v435_v10  ;;  %205 = vmatmul.bf16.vlgmr.msra.gmra.mxu0 %v430_v11 }
  0x3a   :  { %215 = vmatmul.bf16.gmra.mxu1 %v432_v12  ;;  %225 = vmatmul.bf16.gmra.mxu2 %v434_v13 }
  0x3b   :  { %235 = vmatmul.bf16.gmra.mxu3 %v436_v14 }
  0xa7   :  { %v211_v15 = vpop.f32.mrf.mxu1 }
  0xa8   :  { %v206_v17 = vpop.f32.mrf.mxu0  ;;  %v292_v19 = vmul.f32 %v512_v16, %v211_v15 }
  0xa9   :  { %v290_v18 = vmul.f32 %v512_v16, %v206_v17 }
  0xaa   :  { %v310_v25 = vadd.f32 %v513_v20, %v292_v19 }
  0xab   :  { %v308_v24 = vadd.f32 %v513_v20, %v290_v18 }
  0xac   :  { %v324_v34 = vmax.f32 %v310_v25, 0.0 }
  0xad   :  { %v221_v21 = vpop.f32.mrf.mxu2  ;;  %v322_v32 = vmax.f32 %v308_v24, 0.0 }
  0xae   :  { %v231_v22 = vpop.f32.mrf.mxu3  ;;  %v296_v29 = vmul.f32 %v512_v16, %v221_v21 }
  0xaf   :  { %v213_v23 = vpop.f32.mrf.mxu1  ;;  %v300_v31 = vmul.f32 %v512_v16, %v231_v22 }
  0xb0   :  { %v293_v26 = vmul.f32 %v512_v16, %v213_v23  ;;  %v208_v27 = vpop.f32.mrf.mxu0  ;;  %v314_v38 = vadd.f32 %v513_v20, %v296_v29 }
  0xb1   :  { %v291_v28 = vmul.f32 %v512_v16, %v208_v27  ;;  %v318_v42 = vadd.f32 %v513_v20, %v300_v31 }
  0xb2   :  { %v311_v30 = vadd.f32 %v513_v20, %v293_v26  ;;  %v328_v48 = vmax.f32 %v314_v38, 0.0 }
  0xb3   :  { %v309_v33 = vadd.f32 %v513_v20, %v291_v28  ;;  %v332_v50 = vmax.f32 %v318_v42, 0.0 }
  0xb4   :  { %v325_v35 = vmax.f32 %v311_v30, 0.0 }
  0xb5   :  { %v223_v36 = vpop.f32.mrf.mxu2  ;;  %v323_v37 = vmax.f32 %v309_v33, 0.0 }
  0xb6   :  { %v453_v39 = vpack.c.bf16 %v325_v35, %v324_v34  ;;  %v297_v40 = vmul.f32 %v512_v16, %v223_v36  ;;  %v233_v41 = vpop.f32.mrf.mxu3 }
  0xb7   :  { %v301_v43 = vmul.f32 %v512_v16, %v233_v41  ;;  %v216_v44 = vpop.f32.mrf.mxu1  ;;  %v448_v45 = vpack.c.bf16 %v323_v37, %v322_v32 }
  0xb8   :  { %480 = vst [vmem:[%s669_s4 + $0x8] sm:$0xff] %v453_v39   ;;  %v315_v46 = vadd.f32 %v513_v20, %v297_v40  ;;  %v294_v53 = vmul.f32 %v512_v16, %v216_v44 }
  0xb9   :  { %v319_v47 = vadd.f32 %v513_v20, %v301_v43  ;;  %449 = vst [vmem:[%s669_s4] sm:$0xff] %v448_v45  }
  0xba   :  { %v329_v49 = vmax.f32 %v315_v46, 0.0  ;;  %v312_v58 = vadd.f32 %v513_v20, %v294_v53 }
  0xbb   :  { %v333_v51 = vmax.f32 %v319_v47, 0.0 }
  0xbc   :  { %v463_v52 = vpack.c.bf16 %v329_v49, %v328_v48  ;;  %v326_v63 = vmax.f32 %v312_v58, 0.0 }
  0xbd   :  { %v473_v54 = vpack.c.bf16 %v333_v51, %v332_v50  ;;  %v226_v55 = vpop.f32.mrf.mxu2 }
  0xbe   :  { %482 = vst [vmem:[%s669_s4 + $0x18] sm:$0xff] %v463_v52   ;;  %v236_v56 = vpop.f32.mrf.mxu3  ;;  %v298_v60 = vmul.f32 %v512_v16, %v226_v55 }
  0xbf   :  { %484 = vst [vmem:[%s669_s4 + $0x28] sm:$0xff] %v473_v54   ;;  %v218_v57 = vpop.f32.mrf.mxu1  ;;  %v302_v62 = vmul.f32 %v512_v16, %v236_v56 }
  0xc0   :  { %v295_v59 = vmul.f32 %v512_v16, %v218_v57  ;;  %v316_v2 = vadd.f32 %v513_v20, %v298_v60 }
  0xc1   :  { %v320_v6 = vadd.f32 %v513_v20, %v302_v62 }
  0xc2   :  { %v313_v61 = vadd.f32 %v513_v20, %v295_v59  ;;  %v330_v10 = vmax.f32 %v316_v2, 0.0 }
  0xc3   :  { %v334_v12 = vmax.f32 %v320_v6, 0.0 }
  0xc4   :  { %v327_v0 = vmax.f32 %v313_v61, 0.0 }
  0xc5   :  { %v228_v1 = vpop.f32.mrf.mxu2 }
  0xc6   :  { %v458_v3 = vpack.c.bf16 %v327_v0, %v326_v63  ;;  %v299_v4 = vmul.f32 %v512_v16, %v228_v1  ;;  %v238_v5 = vpop.f32.mrf.mxu3 }
  0xc7   :  { %v303_v7 = vmul.f32 %v512_v16, %v238_v5 }
  0xc8   :  { %481 = vst [vmem:[%s669_s4 + $0x10] sm:$0xff] %v458_v3   ;;  %v317_v8 = vadd.f32 %v513_v20, %v299_v4 }
  0xc9   :  { %v321_v9 = vadd.f32 %v513_v20, %v303_v7 }
  0xca   :  { %v331_v11 = vmax.f32 %v317_v8, 0.0 }
  0xcb   :  { %v335_v13 = vmax.f32 %v321_v9, 0.0 }
  0xcc   :  { %v468_v14 = vpack.c.bf16 %v331_v11, %v330_v10 }
  0xcd   :  { %v478_v15 = vpack.c.bf16 %v335_v13, %v334_v12 }
  0xce   :  { %483 = vst [vmem:[%s669_s4 + $0x20] sm:$0xff] %v468_v14  }
  0xcf   :  { %485 = vst [vmem:[%s669_s4 + $0x30] sm:$0xff] %v478_v15  }
  0xd0   :  { %368 = vsyncpa [#allocation4], 1 }
  0xd1   :  { %369 = vsyncpa [#allocation6], 1 }

// kernel: _lambda_.64
= control target key start
LH: loop header
LB: loop body
LE: loop exit
PB: predicated region body
PF: predicated region fallthrough
CT: control target
= control target key end

     0   :  { %9 = vsyncpa [#allocation4], 0  ;;  %s419_s0 = inlined_call_operand.vmem [shape: bf16[32,128], index: 0, kind: input, shape index: {}]   ;;  %s420_s1 = inlined_call_operand.hbm [shape: bf16[128,128], index: 1, kind: input, shape index: {}]   ;;  %s421_s2 = inlined_call_operand.hbm [shape: f32[1,128], index: 2, kind: input, shape index: {}]   ;;  %s422_s3 = inlined_call_operand.hbm [shape: f32[1,128], index: 3, kind: input, shape index: {}]   ;;  %s423_s4 = inlined_call_operand.vmem [shape: bf16[32,128], index: 4, kind: output, shape index: {}]  }
   0x1   :  { %10 = vsyncpa [#allocation6], 0  ;;  %s31_s17 = sshll.u32 %s421_s2, 4  ;;  %s368_s18 = smov [#allocation5]   ;;  %s32_s17 = int_to_ptr.hbm [resolvable:$true] %s31_s17 }
   0x2   :  { %s33_s19 = sshll.u32 %s368_s18, 4  ;;  %s17_s22 = sshll.u32 %s420_s1, 4  ;;  %s34_s19 = int_to_ptr.vmem [resolvable:$true] %s33_s19  ;;  %s18_s22 = int_to_ptr.hbm [resolvable:$true] %s17_s22 }
   0x3   :  { %36 = dma.hbm_to_vmem [thread:$0]  %s32_s17, 16, %s34_s19, [#allocation6]  }
   0x4   :  { %s369_s23 = smov [#allocation3]   ;;  %s370_s25 = smov 64  }
   0x5   :  { %s19_s24 = sshll.u32 %s369_s23, 4  ;;  %s371_s26 = smov 4   ;;  %s20_s24 = int_to_ptr.vmem [resolvable:$true] %s19_s24 }
   0x6   :  { %25 = dma.hbm_to_vmem [thread:$0]  %s18_s22, 1024, %s20_s24, [#allocation4], %s370_s25, %s370_s25, %s371_s26  }
   0x7   :  { %s42_s2 = sshll.u32 %s422_s3, 4  ;;  %s372_s29 = smov [#allocation7]   ;;  %s43_s2 = int_to_ptr.hbm [resolvable:$true] %s42_s2 }
   0x8   :  { %s44_s30 = sshll.u32 %s372_s29, 4  ;;  %s45_s30 = int_to_ptr.vmem [resolvable:$true] %s44_s30 }
   0x9   :  { %47 = dma.hbm_to_vmem [thread:$0]  %s43_s2, 16, %s45_s30, [#allocation6]  }
   0xa   :  { %364 = dma.done.wait [#allocation4], 1024  }
   0xb   :  { %365 = vsyncadd [#allocation4], 4294966272 }
   0xc   :  { %366 = dma.done.wait [#allocation6], 32  }
   0xd   :  { %367 = vsyncadd [#allocation6], 4294967264  ;;  %v265_v0 = vld [vmem:[#allocation3 + $0x38] sm:$0xff]  ;;  %v264_v1 = vld [vmem:[#allocation3 + $0x30] sm:$0xff] }
   0xe   :  { %152 = vmatpush.bf16.msra.mxu0 %v265_v0  ;;  %277 = vmatpush.bf16.msra.mxu1 %v265_v0  ;;  %v263_v2 = vld [vmem:[#allocation3 + $0x28] sm:$0xff]  ;;  %v262_v3 = vld [vmem:[#allocation3 + $0x20] sm:$0xff]  ;;  %v261_v4 = vld [vmem:[#allocation3 + $0x18] sm:$0xff] }
   0xf   :  { %v260_v5 = vld [vmem:[#allocation3 + $0x10] sm:$0xff]  ;;  %v259_v6 = vld [vmem:[#allocation3 + $0x8] sm:$0xff]  ;;  %v258_v7 = vld [vmem:[#allocation3] sm:$0xff] }
  0x10   :  { %v256_v8 = vld [vmem:[%s419_s0] sm:$0xff]  ;;  %v257_v9 = vld [vmem:[%s419_s0 + $0x8] sm:$0xff] }
  0x11   :  { %v290_v12 = vld [vmem:[#allocation5] ss:$0 sm:$0xff]  ;;  %v291_v14 = vld [vmem:[#allocation7] ss:$0 sm:$0xff] }
  0x12   :  { %153 = vmatpush.bf16.msra.mxu0 %v264_v1  ;;  %278 = vmatpush.bf16.msra.mxu1 %v264_v1 }
  0x16   :  { %154 = vmatpush.bf16.msra.mxu0 %v263_v2  ;;  %279 = vmatpush.bf16.msra.mxu1 %v263_v2 }
  0x1a   :  { %155 = vmatpush.bf16.msra.mxu0 %v262_v3  ;;  %280 = vmatpush.bf16.msra.mxu1 %v262_v3 }
  0x1e   :  { %156 = vmatpush.bf16.msra.mxu0 %v261_v4  ;;  %281 = vmatpush.bf16.msra.mxu1 %v261_v4 }
  0x22   :  { %157 = vmatpush.bf16.msra.mxu0 %v260_v5  ;;  %282 = vmatpush.bf16.msra.mxu1 %v260_v5 }
  0x26   :  { %158 = vmatpush.bf16.msra.mxu0 %v259_v6  ;;  %283 = vmatpush.bf16.msra.mxu1 %v259_v6 }
  0x2a   :  { %159 = vmatpush.bf16.msra.mxu0 %v258_v7  ;;  %284 = vmatpush.bf16.msra.mxu1 %v258_v7 }
  0x2d   :  { %160 = vmatmul.bf16.vlgmr.msra.gmra.mxu0 %v256_v8  ;;  %165 = vmatmul.bf16.vlgmr.msra.gmra.mxu1 %v257_v9 }
  0xaa   :  { %v161_v10 = vpop.f32.mrf.mxu0  ;;  %v166_v11 = vpop.f32.mrf.mxu1 }
  0xab   :  { %v190_v13 = vmul.f32 %v290_v12, %v161_v10  ;;  %v192_v15 = vmul.f32 %v290_v12, %v166_v11 }
  0xad   :  { %v198_v20 = vadd.f32 %v291_v14, %v190_v13  ;;  %v200_v21 = vadd.f32 %v291_v14, %v192_v15 }
  0xb2   :  { %v163_v16 = vpop.f32.mrf.mxu0  ;;  %v168_v17 = vpop.f32.mrf.mxu1 }
  0xb3   :  { %v191_v18 = vmul.f32 %v290_v12, %v163_v16  ;;  %v193_v19 = vmul.f32 %v290_v12, %v168_v17 }
  0xb5   :  { %v199_v22 = vadd.f32 %v291_v14, %v191_v18  ;;  %v201_v23 = vadd.f32 %v291_v14, %v193_v19 }
  0xb7   :  { %v269_v24 = vpack.c.bf16 %v199_v22, %v198_v20  ;;  %v274_v25 = vpack.c.bf16 %v201_v23, %v200_v21 }
  0xb9   :  { %270 = vst [vmem:[%s423_s4] sm:$0xff] %v269_v24  }
  0xba   :  { %276 = vst [vmem:[%s423_s4 + $0x8] sm:$0xff] %v274_v25  }
  0xbb   :  { %214 = vsyncpa [#allocation4], 1 }
  0xbc   :  { %215 = vsyncpa [#allocation6], 1 }

// kernel: _lambda_.66
= control target key start
LH: loop header
LB: loop body
LE: loop exit
PB: predicated region body
PF: predicated region fallthrough
CT: control target
= control target key end

     0   :  { %9 = vsyncpa [#allocation4], 0  ;;  %s399_s0 = inlined_call_operand.vmem [shape: bf16[32,128], index: 0, kind: input, shape index: {}]   ;;  %s400_s1 = inlined_call_operand.vmem [shape: bf16[128,128], index: 1, kind: input, shape index: {}]   ;;  %s401_s2 = inlined_call_operand.hbm [shape: f32[1,128], index: 2, kind: input, shape index: {}]   ;;  %s402_s3 = inlined_call_operand.hbm [shape: f32[1,128], index: 3, kind: input, shape index: {}]   ;;  %s403_s4 = inlined_call_operand.vmem [shape: bf16[32,128], index: 4, kind: output, shape index: {}]  }
   0x1   :  { %s20_s17 = sshll.u32 %s401_s2, 4  ;;  %s21_s17 = int_to_ptr.hbm [resolvable:$true] %s20_s17 }
   0x2   :  { %10 = vsyncpa [#allocation6], 0  ;;  %s330_s18 = smov [#allocation3]   ;;  %s31_s22 = sshll.u32 %s402_s3, 4  ;;  %s32_s22 = int_to_ptr.hbm [resolvable:$true] %s31_s22 }
   0x3   :  { %s22_s19 = sshll.u32 %s330_s18, 4  ;;  %s331_s23 = smov [#allocation5]   ;;  %s23_s19 = int_to_ptr.vmem [resolvable:$true] %s22_s19 }
   0x4   :  { %25 = dma.hbm_to_vmem [thread:$0]  %s21_s17, 16, %s23_s19, [#allocation4]  }
   0x5   :  { %s33_s24 = sshll.u32 %s331_s23, 4  ;;  %s34_s24 = int_to_ptr.vmem [resolvable:$true] %s33_s24 }
   0x6   :  { %36 = dma.hbm_to_vmem [thread:$0]  %s32_s22, 16, %s34_s24, [#allocation6]  }
   0x7   :  { %326 = dma.done.wait [#allocation4], 16  }
   0x8   :  { %327 = vsyncadd [#allocation4], 4294967280 }
   0x9   :  { %328 = dma.done.wait [#allocation6], 16  }
   0xa   :  { %329 = vsyncadd [#allocation6], 4294967280  ;;  %v254_v0 = vld [vmem:[%s400_s1 + $0x38] sm:$0xff]  ;;  %v253_v1 = vld [vmem:[%s400_s1 + $0x30] sm:$0xff] }
   0xb   :  { %137 = vmatpush.bf16.msra.mxu0 %v254_v0  ;;  %266 = vmatpush.bf16.msra.mxu1 %v254_v0  ;;  %v252_v2 = vld [vmem:[%s400_s1 + $0x28] sm:$0xff]  ;;  %v251_v3 = vld [vmem:[%s400_s1 + $0x20] sm:$0xff]  ;;  %v250_v4 = vld [vmem:[%s400_s1 + $0x18] sm:$0xff] }
   0xc   :  { %v249_v5 = vld [vmem:[%s400_s1 + $0x10] sm:$0xff]  ;;  %v248_v6 = vld [vmem:[%s400_s1 + $0x8] sm:$0xff]  ;;  %v247_v7 = vld [vmem:[%s400_s1] sm:$0xff] }
   0xd   :  { %v245_v8 = vld [vmem:[%s399_s0] sm:$0xff]  ;;  %v246_v9 = vld [vmem:[%s399_s0 + $0x8] sm:$0xff] }
   0xe   :  { %v276_v12 = vld [vmem:[#allocation3] ss:$0 sm:$0xff]  ;;  %v277_v14 = vld [vmem:[#allocation5] ss:$0 sm:$0xff] }
   0xf   :  { %138 = vmatpush.bf16.msra.mxu0 %v253_v1  ;;  %267 = vmatpush.bf16.msra.mxu1 %v253_v1 }
  0x13   :  { %139 = vmatpush.bf16.msra.mxu0 %v252_v2  ;;  %268 = vmatpush.bf16.msra.mxu1 %v252_v2 }
  0x17   :  { %140 = vmatpush.bf16.msra.mxu0 %v251_v3  ;;  %269 = vmatpush.bf16.msra.mxu1 %v251_v3 }
  0x1b   :  { %141 = vmatpush.bf16.msra.mxu0 %v250_v4  ;;  %270 = vmatpush.bf16.msra.mxu1 %v250_v4 }
  0x1f   :  { %142 = vmatpush.bf16.msra.mxu0 %v249_v5  ;;  %271 = vmatpush.bf16.msra.mxu1 %v249_v5 }
  0x23   :  { %143 = vmatpush.bf16.msra.mxu0 %v248_v6  ;;  %272 = vmatpush.bf16.msra.mxu1 %v248_v6 }
  0x27   :  { %144 = vmatpush.bf16.msra.mxu0 %v247_v7  ;;  %273 = vmatpush.bf16.msra.mxu1 %v247_v7 }
  0x2a   :  { %145 = vmatmul.bf16.vlgmr.msra.gmra.mxu0 %v245_v8  ;;  %150 = vmatmul.bf16.vlgmr.msra.gmra.mxu1 %v246_v9 }
  0xa7   :  { %v146_v10 = vpop.f32.mrf.mxu0  ;;  %v151_v11 = vpop.f32.mrf.mxu1 }
  0xa8   :  { %v175_v13 = vmul.f32 %v276_v12, %v146_v10  ;;  %v177_v15 = vmul.f32 %v276_v12, %v151_v11 }
  0xaa   :  { %v183_v18 = vadd.f32 %v277_v14, %v175_v13  ;;  %v185_v19 = vadd.f32 %v277_v14, %v177_v15 }
  0xac   :  { %v187_v24 = vmax.f32 %v183_v18, 0.0  ;;  %v189_v25 = vmax.f32 %v185_v19, 0.0 }
  0xaf   :  { %v148_v16 = vpop.f32.mrf.mxu0  ;;  %v153_v17 = vpop.f32.mrf.mxu1 }
  0xb0   :  { %v176_v20 = vmul.f32 %v276_v12, %v148_v16  ;;  %v178_v21 = vmul.f32 %v276_v12, %v153_v17 }
  0xb2   :  { %v184_v22 = vadd.f32 %v277_v14, %v176_v20  ;;  %v186_v23 = vadd.f32 %v277_v14, %v178_v21 }
  0xb4   :  { %v188_v26 = vmax.f32 %v184_v22, 0.0  ;;  %v190_v27 = vmax.f32 %v186_v23, 0.0 }
  0xb6   :  { %v258_v28 = vpack.c.bf16 %v188_v26, %v187_v24  ;;  %v263_v29 = vpack.c.bf16 %v190_v27, %v189_v25 }
  0xb8   :  { %259 = vst [vmem:[%s403_s4] sm:$0xff] %v258_v28  }
  0xb9   :  { %265 = vst [vmem:[%s403_s4 + $0x8] sm:$0xff] %v263_v29  }
  0xba   :  { %203 = vsyncpa [#allocation4], 1 }
  0xbb   :  { %204 = vsyncpa [#allocation6], 1 }

// kernel: _lambda_.76
= control target key start
LH: loop header
LB: loop body
LE: loop exit
PB: predicated region body
PF: predicated region fallthrough
CT: control target
= control target key end

     0   :  { %9 = vsyncpa [#allocation4], 0  ;;  %s499_s0 = inlined_call_operand.vmem [shape: bf16[16,256], index: 0, kind: input, shape index: {}]   ;;  %s500_s1 = inlined_call_operand.vmem [shape: bf16[256,128], index: 1, kind: input, shape index: {}]   ;;  %s501_s2 = inlined_call_operand.hbm [shape: f32[1,128], index: 2, kind: input, shape index: {}]   ;;  %s502_s3 = inlined_call_operand.hbm [shape: f32[1,128], index: 3, kind: input, shape index: {}]   ;;  %s503_s4 = inlined_call_operand.vmem [shape: bf16[16,128], index: 4, kind: output, shape index: {}]  }
   0x1   :  { %s20_s17 = sshll.u32 %s501_s2, 4  ;;  %s21_s17 = int_to_ptr.hbm [resolvable:$true] %s20_s17 }
   0x2   :  { %10 = vsyncpa [#allocation6], 0  ;;  %s403_s18 = smov [#allocation3]   ;;  %s31_s22 = sshll.u32 %s502_s3, 4  ;;  %s32_s22 = int_to_ptr.hbm [resolvable:$true] %s31_s22 }
   0x3   :  { %s22_s19 = sshll.u32 %s403_s18, 4  ;;  %s404_s23 = smov [#allocation5]   ;;  %s23_s19 = int_to_ptr.vmem [resolvable:$true] %s22_s19 }
   0x4   :  { %25 = dma.hbm_to_vmem [thread:$0]  %s21_s17, 16, %s23_s19, [#allocation4]  }
   0x5   :  { %s33_s24 = sshll.u32 %s404_s23, 4  ;;  %s34_s24 = int_to_ptr.vmem [resolvable:$true] %s33_s24 }
   0x6   :  { %36 = dma.hbm_to_vmem [thread:$0]  %s32_s22, 16, %s34_s24, [#allocation6]  }
   0x7   :  { %399 = dma.done.wait [#allocation4], 16  }
   0x8   :  { %400 = vsyncadd [#allocation4], 4294967280 }
   0x9   :  { %401 = dma.done.wait [#allocation6], 16  }
   0xa   :  { %402 = vsyncadd [#allocation6], 4294967280  ;;  %v333_v0 = vld [vmem:[%s500_s1 + $0x38] sm:$0xff]  ;;  %v332_v2 = vld [vmem:[%s500_s1 + $0x30] sm:$0xff] }
   0xb   :  { %v341_v1 = vld [vmem:[%s500_s1 + $0x78] sm:$0xff]  ;;  %193 = vmatpush.bf16.msra.mxu0 %v333_v0  ;;  %v340_v3 = vld [vmem:[%s500_s1 + $0x70] sm:$0xff]  ;;  %v331_v4 = vld [vmem:[%s500_s1 + $0x28] sm:$0xff] }
   0xc   :  { %207 = vmatpush.bf16.msra.mxu1 %v341_v1  ;;  %v339_v5 = vld [vmem:[%s500_s1 + $0x68] sm:$0xff]  ;;  %v330_v6 = vld [vmem:[%s500_s1 + $0x20] sm:$0xff]  ;;  %v329_v8 = vld [vmem:[%s500_s1 + $0x18] sm:$0xff] }
   0xd   :  { %v338_v7 = vld [vmem:[%s500_s1 + $0x60] sm:$0xff]  ;;  %v337_v9 = vld [vmem:[%s500_s1 + $0x58] sm:$0xff]  ;;  %v328_v10 = vld [vmem:[%s500_s1 + $0x10] sm:$0xff] }
   0xe   :  { %v336_v11 = vld [vmem:[%s500_s1 + $0x50] sm:$0xff]  ;;  %v327_v12 = vld [vmem:[%s500_s1 + $0x8] sm:$0xff]  ;;  %v326_v14 = vld [vmem:[%s500_s1] sm:$0xff] }
   0xf   :  { %194 = vmatpush.bf16.msra.mxu0 %v332_v2  ;;  %v335_v13 = vld [vmem:[%s500_s1 + $0x48] sm:$0xff]  ;;  %v334_v15 = vld [vmem:[%s500_s1 + $0x40] sm:$0xff] }
  0x10   :  { %208 = vmatpush.bf16.msra.mxu1 %v340_v3  ;;  %v254_v16 = vld [vmem:[%s499_s0] sm:$0xf]  ;;  %v325_v17 = vld [vmem:[%s499_s0 + $0x4] sm:$0xf0]  ;;  %v324_v18 = vld [vmem:[%s499_s0 + $0x4] sm:$0xf] }
  0x11   :  { %v256_v19 = vld [vmem:[%s499_s0 + $0x8] sm:$0xf0]  ;;  %v255_v20 = vor.u32 %v325_v17, %v254_v16  ;;  %v349_v25 = vld [vmem:[#allocation3] ss:$0 sm:$0xff]  ;;  %v350_v29 = vld [vmem:[#allocation5] ss:$0 sm:$0xff] }
  0x12   :  { %v259_v21 = vor.u32 %v324_v18, %v256_v19 }
  0x13   :  { %195 = vmatpush.bf16.msra.mxu0 %v331_v4 }
  0x14   :  { %209 = vmatpush.bf16.msra.mxu1 %v339_v5 }
  0x17   :  { %196 = vmatpush.bf16.msra.mxu0 %v330_v6 }
  0x18   :  { %210 = vmatpush.bf16.msra.mxu1 %v338_v7 }
  0x1b   :  { %197 = vmatpush.bf16.msra.mxu0 %v329_v8 }
  0x1c   :  { %211 = vmatpush.bf16.msra.mxu1 %v337_v9 }
  0x1f   :  { %198 = vmatpush.bf16.msra.mxu0 %v328_v10 }
  0x20   :  { %212 = vmatpush.bf16.msra.mxu1 %v336_v11 }
  0x23   :  { %199 = vmatpush.bf16.msra.mxu0 %v327_v12 }
  0x24   :  { %213 = vmatpush.bf16.msra.mxu1 %v335_v13 }
  0x27   :  { %200 = vmatpush.bf16.msra.mxu0 %v326_v14 }
  0x28   :  { %214 = vmatpush.bf16.msra.mxu1 %v334_v15 }
  0x2a   :  { %201 = vmatmul.bf16.vlgmr.msra.gmra.mxu0 %v255_v20 }
  0x2b   :  { %215 = vmatmul.bf16.vlgmr.msra.gmra.mxu1 %v259_v21 }
  0xa7   :  { %v202_v22 = vpop.f32.mrf.mxu0 }
  0xa8   :  { %v216_v23 = vpop.f32.mrf.mxu1 }
  0xa9   :  { %v217_v24 = vadd.f32 %v216_v23, %v202_v22 }
  0xab   :  { %v234_v28 = vmul.f32 %v349_v25, %v217_v24 }
  0xad   :  { %v240_v32 = vadd.f32 %v350_v29, %v234_v28 }
  0xaf   :  { %v204_v26 = vpop.f32.mrf.mxu0 }
  0xb0   :  { %v218_v27 = vpop.f32.mrf.mxu1 }
  0xb1   :  { %v219_v30 = vadd.f32 %v218_v27, %v204_v26 }
  0xb3   :  { %v235_v31 = vmul.f32 %v349_v25, %v219_v30 }
  0xb5   :  { %v241_v33 = vadd.f32 %v350_v29, %v235_v31 }
  0xb7   :  { %v345_v34 = vpack.c.bf16 %v241_v33, %v240_v32 }
  0xb9   :  { %346 = vst [vmem:[%s503_s4] sm:$0xff] %v345_v34  }
  0xba   :  { %250 = vsyncpa [#allocation4], 1 }
  0xbb   :  { %251 = vsyncpa [#allocation6], 1 }

// kernel: _lambda_.77
= control target key start
LH: loop header
LB: loop body
LE: loop exit
PB: predicated region body
PF: predicated region fallthrough
CT: control target
= control target key end

     0   :  { %9 = vsyncpa [#allocation4], 0  ;;  %s341_s0 = inlined_call_operand.vmem [shape: bf16[16,128], index: 0, kind: input, shape index: {}]   ;;  %s342_s1 = inlined_call_operand.vmem [shape: bf16[128,128], index: 1, kind: input, shape index: {}]   ;;  %s343_s2 = inlined_call_operand.hbm [shape: f32[1,128], index: 2, kind: input, shape index: {}]   ;;  %s344_s3 = inlined_call_operand.hbm [shape: f32[1,128], index: 3, kind: input, shape index: {}]   ;;  %s345_s4 = inlined_call_operand.vmem [shape: bf16[16,128], index: 4, kind: output, shape index: {}]  }
   0x1   :  { %s20_s17 = sshll.u32 %s343_s2, 4  ;;  %s21_s17 = int_to_ptr.hbm [resolvable:$true] %s20_s17 }
   0x2   :  { %10 = vsyncpa [#allocation6], 0  ;;  %s278_s18 = smov [#allocation3]   ;;  %s31_s22 = sshll.u32 %s344_s3, 4  ;;  %s32_s22 = int_to_ptr.hbm [resolvable:$true] %s31_s22 }
   0x3   :  { %s22_s19 = sshll.u32 %s278_s18, 4  ;;  %s279_s23 = smov [#allocation5]   ;;  %s23_s19 = int_to_ptr.vmem [resolvable:$true] %s22_s19 }
   0x4   :  { %25 = dma.hbm_to_vmem [thread:$0]  %s21_s17, 16, %s23_s19, [#allocation4]  }
   0x5   :  { %s33_s24 = sshll.u32 %s279_s23, 4  ;;  %s34_s24 = int_to_ptr.vmem [resolvable:$true] %s33_s24 }
   0x6   :  { %36 = dma.hbm_to_vmem [thread:$0]  %s32_s22, 16, %s34_s24, [#allocation6]  }
   0x7   :  { %274 = dma.done.wait [#allocation4], 16  }
   0x8   :  { %275 = vsyncadd [#allocation4], 4294967280 }
   0x9   :  { %276 = dma.done.wait [#allocation6], 16  }
   0xa   :  { %277 = vsyncadd [#allocation6], 4294967280  ;;  %v216_v0 = vld [vmem:[%s342_s1 + $0x38] sm:$0xff]  ;;  %v215_v1 = vld [vmem:[%s342_s1 + $0x30] sm:$0xff] }
   0xb   :  { %125 = vmatpush.bf16.msra.mxu0 %v216_v0  ;;  %v214_v2 = vld [vmem:[%s342_s1 + $0x28] sm:$0xff]  ;;  %v213_v3 = vld [vmem:[%s342_s1 + $0x20] sm:$0xff]  ;;  %v212_v4 = vld [vmem:[%s342_s1 + $0x18] sm:$0xff] }
   0xc   :  { %v211_v5 = vld [vmem:[%s342_s1 + $0x10] sm:$0xff]  ;;  %v210_v6 = vld [vmem:[%s342_s1 + $0x8] sm:$0xff]  ;;  %v209_v7 = vld [vmem:[%s342_s1] sm:$0xff] }
   0xd   :  { %v208_v8 = vld [vmem:[%s341_s0] sm:$0xff] }
   0xe   :  { %v224_v10 = vld [vmem:[#allocation3] ss:$0 sm:$0xff]  ;;  %v225_v12 = vld [vmem:[#allocation5] ss:$0 sm:$0xff] }
   0xf   :  { %126 = vmatpush.bf16.msra.mxu0 %v215_v1 }
  0x13   :  { %127 = vmatpush.bf16.msra.mxu0 %v214_v2 }
  0x17   :  { %128 = vmatpush.bf16.msra.mxu0 %v213_v3 }
  0x1b   :  { %129 = vmatpush.bf16.msra.mxu0 %v212_v4 }
  0x1f   :  { %130 = vmatpush.bf16.msra.mxu0 %v211_v5 }
  0x23   :  { %131 = vmatpush.bf16.msra.mxu0 %v210_v6 }
  0x27   :  { %132 = vmatpush.bf16.msra.mxu0 %v209_v7 }
  0x2a   :  { %133 = vmatmul.bf16.vlgmr.msra.gmra.mxu0 %v208_v8 }
  0xa7   :  { %v134_v9 = vpop.f32.mrf.mxu0 }
  0xa8   :  { %v152_v11 = vmul.f32 %v224_v10, %v134_v9 }
  0xaa   :  { %v158_v14 = vadd.f32 %v225_v12, %v152_v11 }
  0xac   :  { %v160_v17 = vmax.f32 %v158_v14, 0.0 }
  0xaf   :  { %v136_v13 = vpop.f32.mrf.mxu0 }
  0xb0   :  { %v153_v15 = vmul.f32 %v224_v10, %v136_v13 }
  0xb2   :  { %v159_v16 = vadd.f32 %v225_v12, %v153_v15 }
  0xb4   :  { %v161_v18 = vmax.f32 %v159_v16, 0.0 }
  0xb6   :  { %v220_v19 = vpack.c.bf16 %v161_v18, %v160_v17 }
  0xb8   :  { %221 = vst [vmem:[%s345_s4] sm:$0xff] %v220_v19  }
  0xb9   :  { %170 = vsyncpa [#allocation4], 1 }
  0xba   :  { %171 = vsyncpa [#allocation6], 1 }

// kernel: _lambda_.67
= control target key start
LH: loop header
LB: loop body
LE: loop exit
PB: predicated region body
PF: predicated region fallthrough
CT: control target
= control target key end

     0   :  { %9 = vsyncpa [#allocation6], 0  ;;  %s3218_s0 = inlined_call_operand.vmem [shape: bf16[96,128], index: 0, kind: input, shape index: {}]   ;;  %s3219_s1 = inlined_call_operand.vmem [shape: bf16[9,128,128], index: 1, kind: input, shape index: {}]   ;;  %s3220_s2 = inlined_call_operand.hbm [shape: f32[1,128], index: 2, kind: input, shape index: {}]   ;;  %s3221_s3 = inlined_call_operand.hbm [shape: f32[1,128], index: 3, kind: input, shape index: {}]   ;;  %s3222_s4 = inlined_call_operand.vmem [shape: bf16[80,128], index: 4, kind: output, shape index: {}]  }
   0x1   :  { %s18_s17 = sshll.u32 %s3220_s2, 4  ;;  %s19_s17 = int_to_ptr.hbm [resolvable:$true] %s18_s17 }
   0x2   :  { %10 = vsyncpa [#allocation8], 0  ;;  %s2780_s18 = smov [#allocation5]   ;;  %s29_s22 = sshll.u32 %s3221_s3, 4  ;;  %s30_s22 = int_to_ptr.hbm [resolvable:$true] %s29_s22 }
   0x3   :  { %s20_s19 = sshll.u32 %s2780_s18, 4  ;;  %s2781_s23 = smov [#allocation7]   ;;  %s21_s19 = int_to_ptr.vmem [resolvable:$true] %s20_s19 }
   0x4   :  { %23 = dma.hbm_to_vmem [thread:$0]  %s19_s17, 16, %s21_s19, [#allocation6]  }
   0x5   :  { %s31_s24 = sshll.u32 %s2781_s23, 4  ;;  %s32_s24 = int_to_ptr.vmem [resolvable:$true] %s31_s24 }
   0x6   :  { %34 = dma.hbm_to_vmem [thread:$0]  %s30_s22, 16, %s32_s24, [#allocation8]  }
   0x7   :  { %2774 = dma.done.wait [#allocation6], 16  }
   0x8   :  { %2775 = vsyncadd [#allocation6], 4294967280 }
   0x9   :  { %2776 = dma.done.wait [#allocation8], 16  }
   0xa   :  { %2777 = vsyncadd [#allocation8], 4294967280  ;;  %v71_v0 = vld [vmem:[%s3218_s0] sm:$0xff]  ;;  %v73_v1 = vld [vmem:[%s3218_s0 + $0x8] sm:$0xff] }
   0xb   :  { %v75_v2 = vld [vmem:[%s3218_s0 + $0x10] sm:$0xff]  ;;  %72 = vst [vmem:[#allocation3] sm:$0xff] %v71_v0  ;;  %v77_v3 = vld [vmem:[%s3218_s0 + $0x18] sm:$0xff]  ;;  %v79_v4 = vld [vmem:[%s3218_s0 + $0x20] sm:$0xff] }
   0xc   :  { %74 = vst [vmem:[#allocation3 + $0x8] sm:$0xff] %v73_v1  ;;  %v81_v5 = vld [vmem:[%s3218_s0 + $0x28] sm:$0xff] }
   0xd   :  { %76 = vst [vmem:[#allocation3 + $0x10] sm:$0xff] %v75_v2 }
   0xe   :  { %78 = vst [vmem:[#allocation3 + $0x18] sm:$0xff] %v77_v3 }
   0xf   :  { %80 = vst [vmem:[#allocation3 + $0x20] sm:$0xff] %v79_v4 }
  0x10   :  { %82 = vst [vmem:[#allocation3 + $0x28] sm:$0xff] %v81_v5 }
  0x11   :  { %88 = vsyncadd [#allocation4], 768 }
  0x12   :  { %2778 = dma.done.wait [#allocation4], 768 }
  0x13   :  { %2779 = vsyncadd [#allocation4], 4294966528  ;;  %v2572_v6 = vld [vmem:[%s3219_s1 + $0x38] sm:$0xff]  ;;  %v2571_v7 = vld [vmem:[%s3219_s1 + $0x30] sm:$0xff]  ;;  %vm758_vm0 = vcmask 1044480   ;;  %vm573_vm1 = vcmask 1046528  }
  0x14   :  { %245 = vmatpush.bf16.msra.mxu0 %v2572_v6  ;;  %2706 = vmatpush.bf16.msra.mxu1 %v2572_v6  ;;  %v2611_v8 = vld [vmem:[%s3219_s1 + $0xf8] sm:$0xff]  ;;  %v2610_v9 = vld [vmem:[%s3219_s1 + $0xf0] sm:$0xff]  ;;  %v2570_v10 = vld [vmem:[%s3219_s1 + $0x28] sm:$0xff]  ;;  %vm355_vm2 = vsmask.f32 7424  ;;  %vm1339_vm5 = vcmask 1045504  }
  0x15   :  { %2707 = vmatpush.bf16.msra.mxu2 %v2572_v6  ;;  %823 = vmatpush.bf16.msra.mxu3 %v2611_v8  ;;  %v2609_v11 = vld [vmem:[%s3219_s1 + $0xe8] sm:$0xff]  ;;  %v2569_v12 = vld [vmem:[%s3219_s1 + $0x20] sm:$0xff]  ;;  %v2568_v14 = vld [vmem:[%s3219_s1 + $0x18] sm:$0xff]  ;;  %vm943_vm3 = vsmask.f32 4352 }
  0x16   :  { %v2608_v13 = vld [vmem:[%s3219_s1 + $0xe0] sm:$0xff]  ;;  %v2607_v15 = vld [vmem:[%s3219_s1 + $0xd8] sm:$0xff]  ;;  %v2567_v16 = vld [vmem:[%s3219_s1 + $0x10] sm:$0xff]  ;;  %vm1524_vm4 = vsmask.f32 5376 }
  0x17   :  { %v2606_v17 = vld [vmem:[%s3219_s1 + $0xd0] sm:$0xff]  ;;  %v2566_v18 = vld [vmem:[%s3219_s1 + $0x8] sm:$0xff]  ;;  %v2168_v19 = vld [vmem:[#allocation3] sm:$0x8] }
  0x18   :  { %246 = vmatpush.bf16.msra.mxu0 %v2571_v7  ;;  %2708 = vmatpush.bf16.msra.mxu1 %v2571_v7  ;;  %v2599_v20 = vld [vmem:[#allocation3] sm:$0xf0]  ;;  %v2605_v21 = vld [vmem:[%s3219_s1 + $0xc8] sm:$0xff]  ;;  %v2585_v25 = vld [vmem:[%s3219_s1 + $0x78] sm:$0xff] }
  0x19   :  { %2709 = vmatpush.bf16.msra.mxu2 %v2571_v7  ;;  %824 = vmatpush.bf16.msra.mxu3 %v2610_v9  ;;  %v2565_v22 = vld [vmem:[%s3219_s1] sm:$0xff]  ;;  %v2876_v23 = vld [vmem:[#allocation3 + $0x8] sm:$0xff]  ;;  %v2169_v24 = vor.u32 %v2599_v20, %v2168_v19  ;;  %v2598_v26 = vld [vmem:[%s3219_s1 + $0xb8] sm:$0xff] }
  0x1a   :  { %v2624_v27 = vld [vmem:[%s3219_s1 + $0x138] sm:$0xff]  ;;  %v2560_v28 = vld [vmem:[#allocation3] sm:$0xff]  ;;  %v2562_v29 = vld [vmem:[#allocation3 + $0x10] sm:$0xff]  ;;  %v760_v33 = vrot.slane %v2876_v23, 3 }
  0x1b   :  { %v2564_v30 = vld [vmem:[#allocation3 + $0x20] sm:$0xff]  ;;  %v759_v32 = vrot.slane %v2169_v24, 3  ;;  %v2584_v34 = vld [vmem:[%s3219_s1 + $0x70] sm:$0xff]  ;;  %v2663_v35 = vld [vmem:[%s3219_s1 + $0x1f8] sm:$0xff] }
  0x1c   :  { %247 = vmatpush.bf16.msra.mxu0 %v2570_v10  ;;  %2710 = vmatpush.bf16.msra.mxu1 %v2570_v10  ;;  %v2604_v31 = vld [vmem:[%s3219_s1 + $0xc0] sm:$0xff]  ;;  %v2597_v36 = vld [vmem:[%s3219_s1 + $0xb0] sm:$0xff]  ;;  %v2583_v39 = vld [vmem:[%s3219_s1 + $0x68] sm:$0xff] }
  0x1d   :  { %2711 = vmatpush.bf16.msra.mxu2 %v2570_v10  ;;  %825 = vmatpush.bf16.msra.mxu3 %v2609_v11  ;;  %v2623_v37 = vld [vmem:[%s3219_s1 + $0x130] sm:$0xff]  ;;  %v761_v38 = vsel %vm758_vm0, %v759_v32, %v760_v33  ;;  %v2596_v41 = vld [vmem:[%s3219_s1 + $0xa8] sm:$0xff]  ;;  %v2582_v43 = vld [vmem:[%s3219_s1 + $0x60] sm:$0xff] }
  0x1e   :  { %v2662_v40 = vld [vmem:[%s3219_s1 + $0x1f0] sm:$0xff]  ;;  %v2622_v42 = vld [vmem:[%s3219_s1 + $0x128] sm:$0xff]  ;;  %v2595_v44 = vld [vmem:[%s3219_s1 + $0xa0] sm:$0xff] }
  0x1f   :  { %v2621_v45 = vld [vmem:[%s3219_s1 + $0x120] sm:$0xff]  ;;  %v2927_v48 = vld [vmem:[#allocation3 + $0x10] sm:$0xff]  ;;  %v2581_v49 = vld [vmem:[%s3219_s1 + $0x58] sm:$0xff] }
  0x20   :  { %248 = vmatpush.bf16.msra.mxu0 %v2569_v12  ;;  %2712 = vmatpush.bf16.msra.mxu1 %v2569_v12  ;;  %v2236_v46 = vld [vmem:[#allocation3] sm:$0x8]  ;;  %v2612_v47 = vld [vmem:[#allocation3] sm:$0xf0]  ;;  %v2594_v50 = vld [vmem:[%s3219_s1 + $0x98] sm:$0xff]  ;;  %v762_v57 = vrot.slane %v2927_v48, 3 }
  0x21   :  { %2713 = vmatpush.bf16.msra.mxu2 %v2569_v12  ;;  %826 = vmatpush.bf16.msra.mxu3 %v2608_v13  ;;  %v2620_v51 = vld [vmem:[%s3219_s1 + $0x118] sm:$0xff]  ;;  %v2561_v52 = vld [vmem:[#allocation3 + $0x8] sm:$0xff]  ;;  %v2573_v54 = vld [vmem:[#allocation3] sm:$0xff]  ;;  %v2237_v55 = vor.u32 %v2612_v47, %v2236_v46 }
  0x22   :  { %v2563_v53 = vld [vmem:[#allocation3 + $0x18] sm:$0xff]  ;;  %v2613_v56 = vld [vmem:[#allocation3 + $0x8] sm:$0xff]  ;;  %v2580_v58 = vld [vmem:[%s3219_s1 + $0x50] sm:$0xff]  ;;  %v359_v0 = vshll.u32 %v2573_v54, 16  ;;  %v763_v6 = vsel %vm758_vm0, %v760_v33, %v762_v57  ;;  %v357_v12 = vshrl.u32 %v2573_v54, 16 }
  0x23   :  { %v2593_v59 = vld [vmem:[%s3219_s1 + $0x90] sm:$0xff]  ;;  %v2100_v61 = vld [vmem:[#allocation3] sm:$0xe]  ;;  %v2586_v62 = vld [vmem:[#allocation3] sm:$0xf0]  ;;  %v945_v1 = vshrl.u32 %v2237_v55, 16 }
  0x24   :  { %249 = vmatpush.bf16.msra.mxu0 %v2568_v14  ;;  %2714 = vmatpush.bf16.msra.mxu1 %v2568_v14  ;;  %v2619_v60 = vld [vmem:[%s3219_s1 + $0x110] sm:$0xff]  ;;  %v2948_v63 = vld [vmem:[#allocation3 + $0x8] sm:$0xff]  ;;  %v948_v3 = vshll.u32 %v2237_v55, 16  ;;  %v953_v4 = vshrl.u32 %v2613_v56, 16  ;;  %v956_v5 = vshll.u32 %v2613_v56, 16  ;;  %v2101_v11 = vor.u32 %v2586_v62, %v2100_v61  ;;  %v2578_v19 = vld [vmem:[%s3219_s1 + $0x40] sm:$0xff] }
  0x25   :  { %2715 = vmatpush.bf16.msra.mxu2 %v2568_v14  ;;  %827 = vmatpush.bf16.msra.mxu3 %v2607_v15  ;;  %v2661_v2 = vld [vmem:[%s3219_s1 + $0x1e8] sm:$0xff]  ;;  %v361_v13 = vrot.slane %v359_v0, 1  ;;  %v364_v14 = vshll.u32 %v2948_v63, 16  ;;  %v947_v15 = vrot.slane %v945_v1, 3  ;;  %v2591_v20 = vld [vmem:[%s3219_s1 + $0x80] sm:$0xff]  ;;  %v2650_v24 = vld [vmem:[%s3219_s1 + $0x1b8] sm:$0xff] }
  0x26   :  { %v2579_v7 = vld [vmem:[%s3219_s1 + $0x48] sm:$0xff]  ;;  %v2617_v23 = vld [vmem:[%s3219_s1 + $0x100] sm:$0xff]  ;;  %v2646_v61 = vld [vmem:[%s3219_s1 + $0x198] sm:$0xff] }
  0x27   :  { %v2592_v8 = vld [vmem:[%s3219_s1 + $0x88] sm:$0xff]  ;;  %v2647_v54 = vld [vmem:[%s3219_s1 + $0x1a0] sm:$0xff] }
  0x28   :  { %250 = vmatpush.bf16.msra.mxu0 %v2567_v16  ;;  %2716 = vmatpush.bf16.msra.mxu1 %v2567_v16  ;;  %v2618_v9 = vld [vmem:[%s3219_s1 + $0x108] sm:$0xff]  ;;  %v2634_v55 = vld [vmem:[%s3219_s1 + $0x160] sm:$0xff] }
  0x29   :  { %2717 = vmatpush.bf16.msra.mxu2 %v2567_v16  ;;  %828 = vmatpush.bf16.msra.mxu3 %v2606_v17  ;;  %v2967_v10 = vld [vmem:[#allocation3 + $0x8] sm:$0xff]  ;;  %v950_v16 = vrot.slane %v948_v3, 4  ;;  %v955_v17 = vrot.slane %v953_v4, 3  ;;  %v2673_v56 = vld [vmem:[%s3219_s1 + $0x220] sm:$0xff]  ;;  %v2615_v3 = vld [vmem:[#allocation3 + $0x18] sm:$0xff] }
  0x2a   :  { %v2674_v47 = vld [vmem:[%s3219_s1 + $0x228] sm:$0xff]  ;;  %v3043_v62 = vld [vmem:[#allocation3 + $0x20] sm:$0xff] }
  0x2b   :  { %v766_v4 = vrot.slane %v3043_v62, 3 }
  0x2c   :  { %251 = vmatpush.bf16.msra.mxu0 %v2566_v18  ;;  %2718 = vmatpush.bf16.msra.mxu1 %v2566_v18 }
  0x2d   :  { %2719 = vmatpush.bf16.msra.mxu2 %v2566_v18  ;;  %829 = vmatpush.bf16.msra.mxu3 %v2605_v21  ;;  %v958_v18 = vrot.slane %v956_v5, 4  ;;  %v574_v21 = vrot.slane %v2101_v11, 1  ;;  %v2645_v5 = vld [vmem:[%s3219_s1 + $0x190] sm:$0xff]  ;;  %v974_v11 = vshll.u32 %v2615_v3, 16 }
  0x30   :  { %252 = vmatpush.bf16.msra.mxu0 %v2565_v22  ;;  %2720 = vmatpush.bf16.msra.mxu1 %v2565_v22 }
  0x31   :  { %2721 = vmatpush.bf16.msra.mxu2 %v2565_v22  ;;  %830 = vmatpush.bf16.msra.mxu3 %v2604_v31  ;;  %v575_v22 = vrot.slane %v2967_v10, 1  ;;  %v2989_v31 = vld [vmem:[#allocation3 + $0x18] sm:$0xff]  ;;  %v971_v10 = vshrl.u32 %v2615_v3, 16 }
  0x33   :  { %253 = vmatmul.bf16.vlgmr.msra.gmra.mxu0 %v2560_v28  ;;  %263 = vmatmul.bf16.vlgmr.msra.gmra.mxu1 %v2562_v29  ;;  %v951_v28 = vor.u32 %v950_v16, %v947_v15  ;;  %v959_v29 = vor.u32 %v958_v18, %v955_v17  ;;  %v576_v32 = vsel %vm573_vm1, %v574_v21, %v575_v22  ;;  %v712_v15 = vld [vmem:[#allocation3 + $0x28] sm:$0x7]  ;;  %v3078_v17 = vld [vmem:[#allocation3 + $0x18] sm:$0xff]  ;;  %v976_v21 = vrot.slane %v974_v11, 4 }
  0x34   :  { %453 = vmatpush.bf16.msrb.mxu1 %v2585_v25  ;;  %1050 = vmatpush.bf16.msrb.mxu0 %v2624_v27  ;;  %v2637_v25 = vld [vmem:[%s3219_s1 + $0x178] sm:$0xff]  ;;  %v366_v27 = vrot.slane %v364_v14, 1  ;;  %v2671_v14 = vld [vmem:[%s3219_s1 + $0x210] sm:$0xff]  ;;  %v2657_v16 = vld [vmem:[%s3219_s1 + $0x1c8] sm:$0xff] }
  0x35   :  { %638 = vmatpush.bf16.msrb.mxu2 %v2598_v26  ;;  %1631 = vmatpush.bf16.msrb.mxu3 %v2663_v35  ;;  %v362_v26 = vor.u32 %v361_v13, %v357_v12  ;;  %v2649_v35 = vld [vmem:[%s3219_s1 + $0x1b0] sm:$0xff]  ;;  %v2644_v13 = vld [vmem:[%s3219_s1 + $0x188] sm:$0xff] }
  0x36   :  { %273 = vmatmul.bf16.vlgmr.msra.gmra.mxu2 %v2564_v30  ;;  %831 = vmatmul.bf16.vlgmr.msra.gmra.mxu3 %v761_v38  ;;  %v2676_v30 = vld [vmem:[%s3219_s1 + $0x238] sm:$0xff]  ;;  %v764_v38 = vrot.slane %v2989_v31, 3 }
  0x37   :  { %v367_v33 = vsel %vm355_vm2, %v362_v26, %v366_v27 }
  0x38   :  { %454 = vmatpush.bf16.msrb.mxu1 %v2584_v34  ;;  %1051 = vmatpush.bf16.msrb.mxu0 %v2623_v37  ;;  %v960_v34 = vsel %vm943_vm3, %v951_v28, %v959_v29  ;;  %v2614_v37 = vld [vmem:[#allocation3 + $0x10] sm:$0xff]  ;;  %v765_v46 = vsel %vm758_vm0, %v762_v57, %v764_v38  ;;  %v767_v12 = vsel %vm758_vm0, %v764_v38, %v766_v4 }
  0x39   :  { %639 = vmatpush.bf16.msrb.mxu2 %v2597_v36  ;;  %1632 = vmatpush.bf16.msrb.mxu3 %v2662_v40  ;;  %v2636_v36 = vld [vmem:[%s3219_s1 + $0x170] sm:$0xff]  ;;  %v2660_v40 = vld [vmem:[%s3219_s1 + $0x1e0] sm:$0xff] }
  0x3c   :  { %455 = vmatpush.bf16.msrb.mxu1 %v2583_v39  ;;  %1052 = vmatpush.bf16.msrb.mxu0 %v2622_v42  ;;  %v2675_v39 = vld [vmem:[%s3219_s1 + $0x230] sm:$0xff]  ;;  %v962_v42 = vshrl.u32 %v2614_v37, 16 }
  0x3d   :  { %640 = vmatpush.bf16.msrb.mxu2 %v2596_v41  ;;  %1633 = vmatpush.bf16.msrb.mxu3 %v2661_v2  ;;  %v3009_v41 = vld [vmem:[#allocation3 + $0x10] sm:$0xff] }
  0x3e   :  { %v964_v48 = vrot.slane %v962_v42, 3  ;;  %v376_v18 = vshrl.u32 %v3009_v41, 16 }
  0x40   :  { %456 = vmatpush.bf16.msrb.mxu1 %v2582_v43  ;;  %1053 = vmatpush.bf16.msrb.mxu0 %v2621_v45  ;;  %v965_v43 = vshll.u32 %v2614_v37, 16  ;;  %v2635_v45 = vld [vmem:[%s3219_s1 + $0x168] sm:$0xff] }
  0x41   :  { %641 = vmatpush.bf16.msrb.mxu2 %v2595_v44  ;;  %v2648_v44 = vld [vmem:[%s3219_s1 + $0x1a8] sm:$0xff]  ;;  %1634 = vmatpush.bf16.msrb.mxu3 %v2660_v40 }
  0x42   :  { %v2670_v40 = vld [vmem:[%s3219_s1 + $0x208] sm:$0xff] }
  0x43   :  { %258 = vmatmul.bf16.gmra.mxu0 %v2561_v52  ;;  %268 = vmatmul.bf16.gmra.mxu1 %v2563_v53  ;;  %v372_v52 = vshll.u32 %v3009_v41, 16  ;;  %v967_v53 = vrot.slane %v965_v43, 4  ;;  %v2656_v41 = vld [vmem:[%s3219_s1 + $0x1c0] sm:$0xff] }
  0x44   :  { %457 = vmatpush.bf16.msrb.mxu1 %v2581_v49  ;;  %1054 = vmatpush.bf16.msrb.mxu0 %v2620_v51  ;;  %v2659_v49 = vld [vmem:[%s3219_s1 + $0x1d8] sm:$0xff]  ;;  %v368_v51 = vshrl.u32 %v2948_v63, 16  ;;  %v2630_v43 = vld [vmem:[%s3219_s1 + $0x140] sm:$0xff] }
  0x45   :  { %642 = vmatpush.bf16.msrb.mxu2 %v2594_v50  ;;  %v3026_v50 = vld [vmem:[#allocation3 + $0x10] sm:$0xff]  ;;  %1635 = vmatpush.bf16.msrb.mxu3 %v2659_v49  ;;  %v2633_v63 = vld [vmem:[%s3219_s1 + $0x158] sm:$0xff] }
  0x46   :  { %836 = vmatmul.bf16.gmra.mxu3 %v763_v6  ;;  %v577_v57 = vrot.slane %v3026_v50, 1  ;;  %v2672_v6 = vld [vmem:[%s3219_s1 + $0x218] sm:$0xff] }
  0x48   :  { %458 = vmatpush.bf16.msrb.mxu1 %v2580_v58  ;;  %1055 = vmatpush.bf16.msrb.mxu0 %v2619_v60  ;;  %v370_v58 = vor.u32 %v368_v51, %v366_v27  ;;  %v968_v60 = vor.u32 %v967_v53, %v964_v48  ;;  %v578_v0 = vsel %vm573_vm1, %v575_v22, %v577_v57  ;;  %v751_v22 = vunpack.c.l.b16 %v712_v15 }
  0x49   :  { %643 = vmatpush.bf16.msrb.mxu2 %v2593_v59  ;;  %v374_v59 = vrot.slane %v372_v52, 1  ;;  %v897_v52 = vld [vmem:[#allocation3 + $0x28] sm:$0xf] }
  0x4a   :  { %v969_v2 = vsel %vm943_vm3, %v959_v29, %v968_v60  ;;  %v757_v27 = vpack.c.b16 %v751_v22, %v751_v22  ;;  %v2616_v29 = vld [vmem:[#allocation3 + $0x20] sm:$0xff] }
  0x4b   :  { %v375_v1 = vsel %vm355_vm2, %v370_v58, %v374_v59  ;;  %v980_v37 = vshrl.u32 %v2616_v29, 16  ;;  %v983_v38 = vshll.u32 %v2616_v29, 16 }
  0x4c   :  { %459 = vmatpush.bf16.msrb.mxu1 %v2579_v7  ;;  %1056 = vmatpush.bf16.msrb.mxu0 %v2618_v9  ;;  %v2658_v7 = vld [vmem:[%s3219_s1 + $0x1d0] sm:$0xff]  ;;  %v3066_v9 = vld [vmem:[#allocation3 + $0x18] sm:$0xff] }
  0x4d   :  { %644 = vmatpush.bf16.msrb.mxu2 %v2592_v8  ;;  %v2632_v8 = vld [vmem:[%s3219_s1 + $0x150] sm:$0xff]  ;;  %1636 = vmatpush.bf16.msrb.mxu3 %v2658_v7  ;;  %v982_v50 = vrot.slane %v980_v37, 3  ;;  %v985_v51 = vrot.slane %v983_v38, 4  ;;  %v2654_v37 = vld [vmem:[#allocation3 + $0x1c] sm:$0xff]  ;;  %v2508_v38 = vld [vmem:[#allocation3 + $0x4] sm:$0x8] }
  0x50   :  { %460 = vmatpush.bf16.msrb.mxu1 %v2578_v19  ;;  %1057 = vmatpush.bf16.msrb.mxu0 %v2617_v23  ;;  %v380_v19 = vshll.u32 %v3066_v9, 16  ;;  %v579_v23 = vrot.slane %v3078_v17, 1 }
  0x51   :  { %645 = vmatpush.bf16.msrb.mxu2 %v2591_v20  ;;  %v973_v20 = vrot.slane %v971_v10, 3  ;;  %1637 = vmatpush.bf16.msrb.mxu3 %v2657_v16  ;;  %v2653_v16 = vld [vmem:[#allocation3 + $0x14] sm:$0xff] }
  0x52   :  { %v580_v28 = vsel %vm573_vm1, %v577_v57, %v579_v23  ;;  %v1543_v22 = vshrl.u32 %v2653_v16, 16 }
  0x53   :  { %461 = vmatmul.bf16.vlgmr.msrb.gmra.mxu1 %v367_v33  ;;  %1058 = vmatmul.bf16.vlgmr.msrb.gmra.mxu0 %v960_v34  ;;  %v977_v26 = vor.u32 %v976_v21, %v973_v20  ;;  %v2631_v33 = vld [vmem:[%s3219_s1 + $0x148] sm:$0xff]  ;;  %v2440_v34 = vld [vmem:[#allocation3 + $0x4] sm:$0xc] }
  0x54   :  { %1219 = vmatpush.bf16.msra.mxu1 %v2637_v25  ;;  %1815 = vmatpush.bf16.msra.mxu0 %v2676_v30  ;;  %v382_v25 = vrot.slane %v380_v19, 1 }
  0x55   :  { %1404 = vmatpush.bf16.msra.mxu2 %v2650_v24  ;;  %v378_v24 = vor.u32 %v376_v18, %v374_v59  ;;  %v978_v31 = vsel %vm943_vm3, %v968_v60, %v977_v26  ;;  %1638 = vmatpush.bf16.msrb.mxu3 %v2656_v41  ;;  %v986_v59 = vor.u32 %v985_v51, %v982_v50  ;;  %v936_v60 = vunpack.c.l.b16 %v897_v52 }
  0x56   :  { %646 = vmatmul.bf16.vlgmr.msrb.gmra.mxu2 %v576_v32  ;;  %841 = vmatmul.bf16.gmra.mxu3 %v765_v46  ;;  %v768_v32 = vrot.slane %v757_v27, 3  ;;  %v2590_v46 = vld [vmem:[#allocation3 + $0x20] sm:$0xff] }
  0x57   :  { %v383_v30 = vsel %vm355_vm2, %v378_v24, %v382_v25  ;;  %v987_v7 = vsel %vm943_vm3, %v977_v26, %v986_v59 }
  0x58   :  { %1220 = vmatpush.bf16.msra.mxu1 %v2636_v36  ;;  %1816 = vmatpush.bf16.msra.mxu0 %v2675_v39  ;;  %v3089_v36 = vld [vmem:[#allocation3 + $0x20] sm:$0xff]  ;;  %v769_v42 = vsel %vm758_vm0, %v766_v4, %v768_v32  ;;  %v527_v4 = vld [vmem:[#allocation3 + $0x28] sm:$0x1] }
  0x59   :  { %1405 = vmatpush.bf16.msra.mxu2 %v2649_v35  ;;  %v2651_v35 = vld [vmem:[#allocation3 + $0x4] sm:$0xf0]  ;;  %v2643_v39 = vld [vmem:[%s3219_s1 + $0x180] sm:$0xff]  ;;  %v388_v49 = vshll.u32 %v3089_v36, 16  ;;  %v566_v11 = vunpack.c.l.b16 %v527_v4  ;;  %v392_v18 = vshrl.u32 %v3089_v36, 16 }
  0x5a   :  { %v1478_v4 = vld [vmem:[#allocation3 + $0x2c] sm:$0x7] }
  0x5b   :  { %v390_v58 = vrot.slane %v388_v49, 1  ;;  %v572_v17 = vpack.c.b16 %v566_v11, %v566_v11 }
  0x5c   :  { %1221 = vmatpush.bf16.msra.mxu1 %v2635_v45  ;;  %1817 = vmatpush.bf16.msra.mxu0 %v2674_v47  ;;  %v2441_v45 = vor.u32 %v2651_v35, %v2440_v34  ;;  %v384_v47 = vshrl.u32 %v3066_v9, 16  ;;  %v2372_v34 = vld [vmem:[#allocation3 + $0x4] sm:$0xc]  ;;  %v2638_v35 = vld [vmem:[#allocation3 + $0x4] sm:$0xf0] }
  0x5d   :  { %1406 = vmatpush.bf16.msra.mxu2 %v2648_v44  ;;  %v2652_v44 = vld [vmem:[#allocation3 + $0xc] sm:$0xff]  ;;  %v583_v24 = vrot.slane %v572_v17, 1  ;;  %v2373_v41 = vor.u32 %v2638_v35, %v2372_v34  ;;  %v2668_v35 = vld [vmem:[#allocation3 + $0x24] sm:$0xff] }
  0x5e   :  { %v1526_v48 = vshrl.u32 %v2441_v45, 16  ;;  %v1529_v53 = vshll.u32 %v2441_v45, 16  ;;  %v386_v57 = vor.u32 %v384_v47, %v382_v25  ;;  %v394_v25 = vor.u32 %v392_v18, %v390_v58 }
  0x5f   :  { %v1555_v45 = vshll.u32 %v2654_v37, 16 }
  0x60   :  { %1222 = vmatpush.bf16.msra.mxu1 %v2634_v55  ;;  %1818 = vmatpush.bf16.msra.mxu0 %v2673_v56  ;;  %v1537_v55 = vshll.u32 %v2652_v44, 16  ;;  %v581_v56 = vrot.slane %v2590_v46, 1  ;;  %v1528_v62 = vrot.slane %v1526_v48, 2  ;;  %v391_v3 = vsel %vm355_vm2, %v386_v57, %v390_v58  ;;  %v2655_v57 = vld [vmem:[#allocation3 + $0x24] sm:$0xff]  ;;  %v2640_v58 = vld [vmem:[#allocation3 + $0x14] sm:$0xff] }
  0x61   :  { %1407 = vmatpush.bf16.msra.mxu2 %v2647_v54  ;;  %v1534_v54 = vshrl.u32 %v2652_v44, 16  ;;  %v1552_v44 = vshrl.u32 %v2654_v37, 16  ;;  %v1340_v46 = vrot.slane %v2373_v41, 2  ;;  %v1557_v52 = vrot.slane %v1555_v45, 3  ;;  %v2628_v41 = vld [vmem:[#allocation3 + $0x1c] sm:$0xff] }
  0x63   :  { %466 = vmatmul.bf16.gmra.mxu1 %v375_v1  ;;  %1063 = vmatmul.bf16.gmra.mxu0 %v969_v2  ;;  %v1539_v1 = vrot.slane %v1537_v55, 3  ;;  %v582_v2 = vsel %vm573_vm1, %v579_v23, %v581_v56  ;;  %v1546_v23 = vshll.u32 %v2653_v16, 16  ;;  %v1554_v51 = vrot.slane %v1552_v44, 2 }
  0x64   :  { %1223 = vmatpush.bf16.msra.mxu1 %v2633_v63  ;;  %1819 = vmatpush.bf16.msra.mxu0 %v2672_v6  ;;  %v1531_v63 = vrot.slane %v1529_v53, 3  ;;  %v2669_v6 = vld [vmem:[%s3219_s1 + $0x200] sm:$0xff] }
  0x65   :  { %1408 = vmatpush.bf16.msra.mxu2 %v2646_v61  ;;  %v309_v61 = vld [vmem:[#allocation3 + $0x28] sm:$0x1]  ;;  %v1548_v29 = vrot.slane %v1546_v23, 3  ;;  %v1558_v55 = vor.u32 %v1557_v52, %v1554_v51 }
  0x66   :  { %651 = vmatmul.bf16.gmra.mxu2 %v578_v0  ;;  %846 = vmatmul.bf16.gmra.mxu3 %v767_v12  ;;  %v1536_v0 = vrot.slane %v1534_v54, 2  ;;  %v1532_v9 = vor.u32 %v1531_v63, %v1528_v62  ;;  %v2625_v53 = vld [vmem:[#allocation3 + $0x4] sm:$0xff]  ;;  %v1343_v62 = vrot.slane %v2640_v58, 2 }
  0x68   :  { %1224 = vmatpush.bf16.msra.mxu1 %v2632_v8  ;;  %1820 = vmatpush.bf16.msra.mxu0 %v2671_v14  ;;  %v942_v8 = vpack.c.b16 %v936_v60, %v936_v60  ;;  %v1540_v10 = vor.u32 %v1539_v1, %v1536_v0  ;;  %v1561_v60 = vshrl.u32 %v2655_v57, 16 }
  0x69   :  { %1409 = vmatpush.bf16.msra.mxu2 %v2645_v5  ;;  %v348_v5 = vunpack.c.l.b16 %v309_v61  ;;  %v1564_v61 = vshll.u32 %v2655_v57, 16 }
  0x6a   :  { %v992_v14 = vshll.u32 %v942_v8, 16  ;;  %v1541_v15 = vsel %vm1524_vm4, %v1532_v9, %v1540_v10  ;;  %v1563_v0 = vrot.slane %v1561_v60, 2  ;;  %v1517_v9 = vunpack.c.l.b16 %v1478_v4 }
  0x6b   :  { %v354_v12 = vpack.c.b16 %v348_v5, %v348_v5  ;;  %v1566_v1 = vrot.slane %v1564_v61, 3 }
  0x6c   :  { %1225 = vmatpush.bf16.msra.mxu1 %v2631_v33  ;;  %1821 = vmatpush.bf16.msra.mxu0 %v2670_v40  ;;  %v994_v21 = vrot.slane %v992_v14, 4  ;;  %v2639_v40 = vld [vmem:[#allocation3 + $0xc] sm:$0xff]  ;;  %v1523_v11 = vpack.c.b16 %v1517_v9, %v1517_v9 }
  0x6d   :  { %1410 = vmatpush.bf16.msra.mxu2 %v2644_v13  ;;  %v989_v13 = vshrl.u32 %v942_v8, 16  ;;  %v396_v19 = vshll.u32 %v354_v12, 16  ;;  %v1341_v47 = vrot.slane %v2639_v40, 2  ;;  %v1567_v8 = vor.u32 %v1566_v1, %v1563_v0  ;;  %v2641_v12 = vld [vmem:[#allocation3 + $0x1c] sm:$0xff] }
  0x6e   :  { %v1570_v16 = vshrl.u32 %v1523_v11, 16  ;;  %v1573_v17 = vshll.u32 %v1523_v11, 16  ;;  %v1345_v18 = vrot.slane %v2641_v12, 2 }
  0x6f   :  { %v991_v20 = vrot.slane %v989_v13, 3  ;;  %v398_v26 = vrot.slane %v396_v19, 1  ;;  %v1342_v48 = vsel %vm1339_vm5, %v1340_v46, %v1341_v47 }
  0x70   :  { %1226 = vmatpush.bf16.msra.mxu1 %v2630_v43  ;;  %1822 = vmatpush.bf16.msra.mxu0 %v2669_v6  ;;  %v1346_v23 = vsel %vm1339_vm5, %v1343_v62, %v1345_v18 }
  0x71   :  { %1411 = vmatpush.bf16.msra.mxu2 %v2643_v39  ;;  %v995_v27 = vor.u32 %v994_v21, %v991_v20  ;;  %v2664_v39 = vld [vmem:[#allocation3 + $0x4] sm:$0xf0]  ;;  %v1572_v21 = vrot.slane %v1570_v16, 2 }
  0x72   :  { %v2509_v43 = vor.u32 %v2664_v39, %v2508_v38  ;;  %v1758_v39 = vrot.slane %v2668_v35, 3 }
  0x73   :  { %471 = vmatmul.bf16.gmra.mxu1 %v383_v30  ;;  %1068 = vmatmul.bf16.gmra.mxu0 %v978_v31  ;;  %v584_v30 = vsel %vm573_vm1, %v581_v56, %v583_v24  ;;  %v399_v31 = vsel %vm355_vm2, %v394_v25, %v398_v26  ;;  %v996_v32 = vsel %vm943_vm3, %v986_v59, %v995_v27  ;;  %v2666_v59 = vld [vmem:[#allocation3 + $0x14] sm:$0xff] }
  0x74   :  { %v1751_v49 = vrot.slane %v2509_v43, 3  ;;  %v1754_v63 = vrot.slane %v2666_v59, 3  ;;  %v2627_v24 = vld [vmem:[#allocation3 + $0x14] sm:$0xff] }
  0x76   :  { %656 = vmatmul.bf16.gmra.mxu2 %v580_v28  ;;  %851 = vmatmul.bf16.gmra.mxu3 %v769_v42  ;;  %v1545_v28 = vrot.slane %v1543_v22, 2  ;;  %v2665_v42 = vld [vmem:[#allocation3 + $0xc] sm:$0xff]  ;;  %v1575_v22 = vrot.slane %v1573_v17, 3 }
  0x77   :  { %v1752_v50 = vrot.slane %v2665_v42, 3  ;;  %v1293_v42 = vld [vmem:[#allocation3 + $0x2c] sm:$0x3] }
  0x78   :  { %v1549_v33 = vor.u32 %v1548_v29, %v1545_v28  ;;  %v1576_v28 = vor.u32 %v1575_v22, %v1572_v21 }
  0x79   :  { %v1753_v54 = vsel %vm758_vm0, %v1751_v49, %v1752_v50  ;;  %v1332_v49 = vunpack.c.l.b16 %v1293_v42 }
  0x7a   :  { %v1550_v36 = vsel %vm1524_vm4, %v1540_v10, %v1549_v33  ;;  %v1559_v56 = vsel %vm1524_vm4, %v1549_v33, %v1558_v55  ;;  %v1568_v10 = vsel %vm1524_vm4, %v1558_v55, %v1567_v8 }
  0x83   :  { %476 = vmatmul.bf16.gmra.mxu1 %v391_v3  ;;  %1073 = vmatmul.bf16.gmra.mxu0 %v987_v7  ;;  %v2626_v3 = vld [vmem:[#allocation3 + $0xc] sm:$0xff]  ;;  %v1755_v7 = vsel %vm758_vm0, %v1752_v50, %v1754_v63 }
  0x86   :  { %661 = vmatmul.bf16.gmra.mxu2 %v582_v2  ;;  %1639 = vmatmul.bf16.vlgmr.msrb.gmra.mxu3 %v1541_v15  ;;  %v1344_v2 = vsel %vm1339_vm5, %v1341_v47, %v1343_v62  ;;  %v2667_v15 = vld [vmem:[#allocation3 + $0x1c] sm:$0xff]  ;;  %v1705_v47 = vld [vmem:[#allocation3 + $0x2c] sm:$0x7] }
  0x87   :  { %v1756_v20 = vrot.slane %v2667_v15, 3  ;;  %v1744_v52 = vunpack.c.l.b16 %v1705_v47 }
  0x89   :  { %v1757_v27 = vsel %vm758_vm0, %v1754_v63, %v1756_v20  ;;  %v1759_v45 = vsel %vm758_vm0, %v1756_v20, %v1758_v39  ;;  %v1750_v57 = vpack.c.b16 %v1744_v52, %v1744_v52 }
  0x8b   :  { %v1760_v63 = vrot.slane %v1750_v57, 3 }
  0x93   :  { %481 = vmatmul.bf16.gmra.mxu1 %v399_v31  ;;  %1078 = vmatmul.bf16.gmra.mxu0 %v996_v32  ;;  %v1577_v31 = vsel %vm1524_vm4, %v1567_v8, %v1576_v28  ;;  %v2642_v32 = vld [vmem:[#allocation3 + $0x24] sm:$0xff] }
  0x96   :  { %666 = vmatmul.bf16.gmra.mxu2 %v584_v30  ;;  %1644 = vmatmul.bf16.gmra.mxu3 %v1550_v36  ;;  %v1347_v36 = vrot.slane %v2642_v32, 2 }
  0x98   :  { %v1348_v40 = vsel %vm1339_vm5, %v1345_v18, %v1347_v36 }
  0xa3   :  { %1227 = vmatmul.bf16.vlgmr.msra.gmra.mxu1 %v2625_v53  ;;  %1823 = vmatmul.bf16.vlgmr.msra.gmra.mxu0 %v1753_v54  ;;  %v1338_v53 = vpack.c.b16 %v1332_v49, %v1332_v49 }
  0xa5   :  { %v1349_v60 = vrot.slane %v1338_v53, 2 }
  0xa6   :  { %1412 = vmatmul.bf16.vlgmr.msra.gmra.mxu2 %v1342_v48  ;;  %1649 = vmatmul.bf16.gmra.mxu3 %v1559_v56 }
  0xa7   :  { %v1350_v1 = vsel %vm1339_vm5, %v1347_v36, %v1349_v60 }
  0xb0   :  { %v254_v5 = vpop.f32.mrf.mxu0  ;;  %v3122_v6 = vpop.f32.mrf.mxu1 }
  0xb3   :  { %1232 = vmatmul.bf16.gmra.mxu1 %v2626_v3  ;;  %1828 = vmatmul.bf16.gmra.mxu0 %v1755_v7  ;;  %v2629_v3 = vld [vmem:[#allocation3 + $0x24] sm:$0xff]  ;;  %v1761_v7 = vsel %vm758_vm0, %v1758_v39, %v1760_v63 }
  0xb6   :  { %1417 = vmatmul.bf16.gmra.mxu2 %v1344_v2  ;;  %1654 = vmatmul.bf16.gmra.mxu3 %v1568_v10 }
  0xb8   :  { %v256_v13 = vpop.f32.mrf.mxu0  ;;  %v3126_v14 = vpop.f32.mrf.mxu1 }
  0xb9   :  { %v832_v19 = vpop.f32.mrf.mxu3  ;;  %v3132_v29 = vpop.f32.mrf.mxu2 }
  0xc0   :  { %v259_v25 = vpop.f32.mrf.mxu0  ;;  %v3129_v26 = vpop.f32.mrf.mxu1 }
  0xc1   :  { %v834_v30 = vpop.f32.mrf.mxu3  ;;  %v3137_v38 = vpop.f32.mrf.mxu2 }
  0xc3   :  { %1237 = vmatmul.bf16.gmra.mxu1 %v2627_v24  ;;  %1833 = vmatmul.bf16.gmra.mxu0 %v1757_v27 }
  0xc6   :  { %1422 = vmatmul.bf16.gmra.mxu2 %v1346_v23  ;;  %1659 = vmatmul.bf16.gmra.mxu3 %v1577_v31 }
  0xc8   :  { %v261_v33 = vpop.f32.mrf.mxu0  ;;  %v3135_v34 = vpop.f32.mrf.mxu1 }
  0xc9   :  { %v837_v37 = vpop.f32.mrf.mxu3 }
  0xd0   :  { %v462_v43 = vpop.f32.mrf.mxu1  ;;  %v1059_v44 = vpop.f32.mrf.mxu0 }
  0xd1   :  { %v487_v46 = vadd.f32 %v462_v43, %v254_v5  ;;  %v839_v50 = vpop.f32.mrf.mxu3 }
  0xd3   :  { %1242 = vmatmul.bf16.gmra.mxu1 %v2628_v41  ;;  %1838 = vmatmul.bf16.gmra.mxu0 %v1759_v45 }
  0xd6   :  { %1427 = vmatmul.bf16.gmra.mxu2 %v1348_v40 }
  0xd8   :  { %v464_v55 = vpop.f32.mrf.mxu1  ;;  %v1061_v56 = vpop.f32.mrf.mxu0 }
  0xd9   :  { %v647_v51 = vpop.f32.mrf.mxu2  ;;  %v488_v58 = vadd.f32 %v464_v55, %v256_v13  ;;  %v842_v61 = vpop.f32.mrf.mxu3 }
  0xda   :  { %v672_v48 = vadd.f32 %v647_v51, %v487_v46 }
  0xdc   :  { %v857_v54 = vadd.f32 %v832_v19, %v672_v48 }
  0xde   :  { %v3141_v59 = vadd.f32 %v1059_v44, %v857_v54 }
  0xe0   :  { %v467_v4 = vpop.f32.mrf.mxu1  ;;  %v1064_v5 = vpop.f32.mrf.mxu0 }
  0xe1   :  { %v649_v62 = vpop.f32.mrf.mxu2  ;;  %v489_v8 = vadd.f32 %v467_v4, %v259_v25  ;;  %v844_v10 = vpop.f32.mrf.mxu3 }
  0xe2   :  { %v673_v0 = vadd.f32 %v649_v62, %v488_v58 }
  0xe3   :  { %1247 = vmatmul.bf16.gmra.mxu1 %v2629_v3  ;;  %1843 = vmatmul.bf16.gmra.mxu0 %v1761_v7 }
  0xe4   :  { %v858_v2 = vadd.f32 %v834_v30, %v673_v0 }
  0xe6   :  { %1432 = vmatmul.bf16.gmra.mxu2 %v1350_v1  ;;  %v3145_v9 = vadd.f32 %v1061_v56, %v858_v2 }
  0xe8   :  { %v469_v15 = vpop.f32.mrf.mxu1  ;;  %v1066_v16 = vpop.f32.mrf.mxu0 }
  0xe9   :  { %v652_v11 = vpop.f32.mrf.mxu2  ;;  %v490_v17 = vadd.f32 %v469_v15, %v261_v33  ;;  %v847_v19 = vpop.f32.mrf.mxu3 }
  0xea   :  { %v674_v12 = vadd.f32 %v652_v11, %v489_v8 }
  0xec   :  { %v859_v13 = vadd.f32 %v837_v37, %v674_v12 }
  0xee   :  { %v3147_v18 = vadd.f32 %v1064_v5, %v859_v13 }
  0xf0   :  { %v472_v23 = vpop.f32.mrf.mxu1  ;;  %v1069_v24 = vpop.f32.mrf.mxu0 }
  0xf1   :  { %v654_v20 = vpop.f32.mrf.mxu2  ;;  %v491_v25 = vadd.f32 %v472_v23, %v3122_v6  ;;  %v849_v31 = vpop.f32.mrf.mxu3 }
  0xf2   :  { %v675_v21 = vadd.f32 %v654_v20, %v490_v17 }
  0xf4   :  { %v860_v22 = vadd.f32 %v839_v50, %v675_v21 }
  0xf6   :  { %v3150_v27 = vadd.f32 %v1066_v16, %v860_v22  ;;  %v3171_v22 = vld [vmem:[#allocation5] ss:$0 sm:$0xff] }
  0xf8   :  { %v474_v35 = vpop.f32.mrf.mxu1  ;;  %v1071_v36 = vpop.f32.mrf.mxu0 }
  0xf9   :  { %v657_v28 = vpop.f32.mrf.mxu2  ;;  %v492_v33 = vadd.f32 %v474_v35, %v3126_v14  ;;  %v852_v42 = vpop.f32.mrf.mxu3 }
  0xfa   :  { %v676_v30 = vadd.f32 %v657_v28, %v491_v25 }
  0xfc   :  { %v861_v32 = vadd.f32 %v842_v61, %v676_v30  ;;  %v3174_v30 = vld [vmem:[#allocation7] ss:$0 sm:$0xff] }
  0xfe   :  { %v3153_v37 = vadd.f32 %v1069_v24, %v861_v32 }
 0x100   :  { %v477_v43 = vpop.f32.mrf.mxu1  ;;  %v1074_v44 = vpop.f32.mrf.mxu0 }
 0x101   :  { %v659_v39 = vpop.f32.mrf.mxu2  ;;  %v493_v6 = vadd.f32 %v477_v43, %v3129_v26  ;;  %v854_v14 = vpop.f32.mrf.mxu3 }
 0x102   :  { %v677_v40 = vadd.f32 %v659_v39, %v492_v33 }
 0x104   :  { %v862_v41 = vadd.f32 %v844_v10, %v677_v40 }
 0x106   :  { %v3156_v45 = vadd.f32 %v1071_v36, %v862_v41 }
 0x108   :  { %v479_v50 = vpop.f32.mrf.mxu1  ;;  %v1076_v51 = vpop.f32.mrf.mxu0 }
 0x109   :  { %v662_v46 = vpop.f32.mrf.mxu2  ;;  %v494_v52 = vadd.f32 %v479_v50, %v3135_v34  ;;  %v1640_v60 = vpop.f32.mrf.mxu3 }
 0x10a   :  { %v678_v47 = vadd.f32 %v662_v46, %v493_v6 }
 0x10c   :  { %v863_v49 = vadd.f32 %v847_v19, %v678_v47 }
 0x10e   :  { %v3159_v48 = vadd.f32 %v1074_v44, %v863_v49 }
 0x110   :  { %v482_v56 = vpop.f32.mrf.mxu1  ;;  %v1079_v57 = vpop.f32.mrf.mxu0 }
 0x111   :  { %v664_v53 = vpop.f32.mrf.mxu2  ;;  %v495_v58 = vadd.f32 %v482_v56, %v3132_v29  ;;  %v1642_v5 = vpop.f32.mrf.mxu3 }
 0x112   :  { %v679_v54 = vadd.f32 %v664_v53, %v494_v52 }
 0x114   :  { %v864_v55 = vadd.f32 %v849_v31, %v679_v54 }
 0x116   :  { %v3162_v26 = vadd.f32 %v1076_v51, %v864_v55 }
 0x118   :  { %v484_v0 = vpop.f32.mrf.mxu1  ;;  %v1081_v1 = vpop.f32.mrf.mxu0 }
 0x119   :  { %v667_v61 = vpop.f32.mrf.mxu2  ;;  %v496_v34 = vadd.f32 %v484_v0, %v3137_v38  ;;  %v1645_v15 = vpop.f32.mrf.mxu3 }
 0x11a   :  { %v680_v62 = vadd.f32 %v667_v61, %v495_v58 }
 0x11c   :  { %v865_v63 = vadd.f32 %v852_v42, %v680_v62 }
 0x11e   :  { %v3165_v2 = vadd.f32 %v1079_v57, %v865_v63 }
 0x120   :  { %v1228_v8 = vpop.f32.mrf.mxu1  ;;  %v1824_v10 = vpop.f32.mrf.mxu0 }
 0x121   :  { %v669_v3 = vpop.f32.mrf.mxu2  ;;  %v1253_v29 = vadd.f32 %v1228_v8, %v3141_v59  ;;  %v1647_v35 = vpop.f32.mrf.mxu3 }
 0x122   :  { %v681_v4 = vadd.f32 %v669_v3, %v496_v34 }
 0x124   :  { %v866_v7 = vadd.f32 %v854_v14, %v681_v4 }
 0x126   :  { %v3168_v11 = vadd.f32 %v1081_v1, %v866_v7 }
 0x128   :  { %v1230_v16 = vpop.f32.mrf.mxu1  ;;  %v1826_v17 = vpop.f32.mrf.mxu0 }
 0x129   :  { %v1413_v12 = vpop.f32.mrf.mxu2  ;;  %v1254_v38 = vadd.f32 %v1230_v16, %v3145_v9  ;;  %v1650_v46 = vpop.f32.mrf.mxu3 }
 0x12a   :  { %v1438_v13 = vadd.f32 %v1413_v12, %v1253_v29 }
 0x12c   :  { %v1665_v19 = vadd.f32 %v1640_v60, %v1438_v13 }
 0x12e   :  { %v1849_v21 = vadd.f32 %v1824_v10, %v1665_v19 }
 0x130   :  { %v1233_v25 = vpop.f32.mrf.mxu1  ;;  %v1829_v28 = vpop.f32.mrf.mxu0  ;;  %v1883_v59 = vmul.f32 %v3171_v22, %v1849_v21 }
 0x131   :  { %v1415_v20 = vpop.f32.mrf.mxu2  ;;  %v1255_v32 = vadd.f32 %v1233_v25, %v3147_v18  ;;  %v1652_v60 = vpop.f32.mrf.mxu3 }
 0x132   :  { %v1439_v23 = vadd.f32 %v1415_v20, %v1254_v38  ;;  %v1897_v9 = vadd.f32 %v3174_v30, %v1883_v59 }
 0x134   :  { %v1666_v24 = vadd.f32 %v1642_v5, %v1439_v23 }
 0x136   :  { %v1850_v31 = vadd.f32 %v1826_v17, %v1666_v24 }
 0x138   :  { %v1884_v36 = vmul.f32 %v3171_v22, %v1850_v31  ;;  %v1235_v42 = vpop.f32.mrf.mxu1  ;;  %v1831_v43 = vpop.f32.mrf.mxu0 }
 0x139   :  { %v1418_v33 = vpop.f32.mrf.mxu2  ;;  %v1256_v6 = vadd.f32 %v1235_v42, %v3150_v27  ;;  %v1655_v5 = vpop.f32.mrf.mxu3 }
 0x13a   :  { %v1898_v39 = vadd.f32 %v3174_v30, %v1884_v36  ;;  %v1440_v40 = vadd.f32 %v1418_v33, %v1255_v32 }
 0x13c   :  { %v2680_v41 = vpack.c.bf16 %v1898_v39, %v1897_v9  ;;  %v1667_v44 = vadd.f32 %v1645_v15, %v1440_v40 }
 0x13e   :  { %2681 = vst [vmem:[%s3222_s4] sm:$0xff] %v2680_v41   ;;  %v1851_v47 = vadd.f32 %v1829_v28, %v1667_v44 }
 0x140   :  { %v1238_v51 = vpop.f32.mrf.mxu1  ;;  %v1834_v52 = vpop.f32.mrf.mxu0  ;;  %v1885_v14 = vmul.f32 %v3171_v22, %v1851_v47 }
 0x141   :  { %v1420_v18 = vpop.f32.mrf.mxu2  ;;  %v1257_v54 = vadd.f32 %v1238_v51, %v3153_v37  ;;  %v1657_v23 = vpop.f32.mrf.mxu3 }
 0x142   :  { %v1441_v49 = vadd.f32 %v1420_v18, %v1256_v6  ;;  %v1899_v57 = vadd.f32 %v3174_v30, %v1885_v14 }
 0x144   :  { %v1668_v50 = vadd.f32 %v1647_v35, %v1441_v49 }
 0x146   :  { %v1852_v53 = vadd.f32 %v1831_v43, %v1668_v50 }
 0x148   :  { %v1886_v55 = vmul.f32 %v3171_v22, %v1852_v53  ;;  %v1240_v62 = vpop.f32.mrf.mxu1  ;;  %v1836_v63 = vpop.f32.mrf.mxu0 }
 0x149   :  { %v1423_v56 = vpop.f32.mrf.mxu2  ;;  %v1258_v1 = vadd.f32 %v1240_v62, %v3156_v45  ;;  %v1660_v9 = vpop.f32.mrf.mxu3 }
 0x14a   :  { %v1900_v58 = vadd.f32 %v3174_v30, %v1886_v55  ;;  %v1442_v27 = vadd.f32 %v1423_v56, %v1257_v54 }
 0x14c   :  { %v2685_v61 = vpack.c.bf16 %v1900_v58, %v1899_v57  ;;  %v1669_v0 = vadd.f32 %v1650_v46, %v1442_v27 }
 0x14e   :  { %2702 = vst [vmem:[%s3222_s4 + $0x8] sm:$0xff] %v2685_v61   ;;  %v1853_v34 = vadd.f32 %v1834_v52, %v1669_v0 }
 0x150   :  { %v1243_v7 = vpop.f32.mrf.mxu1  ;;  %v1887_v8 = vmul.f32 %v3171_v22, %v1853_v34  ;;  %v1839_v12 = vpop.f32.mrf.mxu0 }
 0x151   :  { %v1425_v37 = vpop.f32.mrf.mxu2  ;;  %v1259_v29 = vadd.f32 %v1243_v7, %v3159_v48  ;;  %v1662_v51 = vpop.f32.mrf.mxu3 }
 0x152   :  { %v1443_v3 = vadd.f32 %v1425_v37, %v1258_v1  ;;  %v1901_v16 = vadd.f32 %v3174_v30, %v1887_v8 }
 0x154   :  { %v1670_v4 = vadd.f32 %v1652_v60, %v1443_v3 }
 0x156   :  { %v1854_v10 = vadd.f32 %v1836_v63, %v1670_v4 }
 0x158   :  { %v1888_v13 = vmul.f32 %v3171_v22, %v1854_v10  ;;  %v1245_v38 = vpop.f32.mrf.mxu1  ;;  %v1841_v48 = vpop.f32.mrf.mxu0 }
 0x159   :  { %v1428_v15 = vpop.f32.mrf.mxu2  ;;  %v1260_v21 = vadd.f32 %v1245_v38, %v3162_v26 }
 0x15a   :  { %v1902_v17 = vadd.f32 %v3174_v30, %v1888_v13  ;;  %v1444_v45 = vadd.f32 %v1428_v15, %v1259_v29 }
 0x15c   :  { %v2690_v19 = vpack.c.bf16 %v1902_v17, %v1901_v16  ;;  %v1671_v20 = vadd.f32 %v1655_v5, %v1444_v45 }
 0x15e   :  { %2703 = vst [vmem:[%s3222_s4 + $0x10] sm:$0xff] %v2690_v19   ;;  %v1855_v25 = vadd.f32 %v1839_v12, %v1671_v20 }
 0x160   :  { %v1248_v31 = vpop.f32.mrf.mxu1  ;;  %v1889_v32 = vmul.f32 %v3171_v22, %v1855_v25  ;;  %v1844_v42 = vpop.f32.mrf.mxu0 }
 0x161   :  { %v1430_v24 = vpop.f32.mrf.mxu2  ;;  %v1261_v36 = vadd.f32 %v1248_v31, %v3165_v2 }
 0x162   :  { %v1445_v28 = vadd.f32 %v1430_v24, %v1260_v21  ;;  %v1903_v40 = vadd.f32 %v3174_v30, %v1889_v32 }
 0x164   :  { %v1672_v59 = vadd.f32 %v1657_v23, %v1445_v28 }
 0x166   :  { %v1856_v35 = vadd.f32 %v1841_v48, %v1672_v59 }
 0x168   :  { %v1890_v33 = vmul.f32 %v3171_v22, %v1856_v35  ;;  %v1250_v6 = vpop.f32.mrf.mxu1  ;;  %v1846_v14 = vpop.f32.mrf.mxu0 }
 0x169   :  { %v1433_v39 = vpop.f32.mrf.mxu2  ;;  %v1262_v2 = vadd.f32 %v1250_v6, %v3168_v11 }
 0x16a   :  { %v1904_v26 = vadd.f32 %v3174_v30, %v1890_v33  ;;  %v1446_v41 = vadd.f32 %v1433_v39, %v1261_v36 }
 0x16c   :  { %v2695_v43 = vpack.c.bf16 %v1904_v26, %v1903_v40  ;;  %v1673_v44 = vadd.f32 %v1660_v9, %v1446_v41 }
 0x16e   :  { %2704 = vst [vmem:[%s3222_s4 + $0x18] sm:$0xff] %v2695_v43   ;;  %v1857_v18 = vadd.f32 %v1844_v42, %v1673_v44 }
 0x170   :  { %v1891_v46 = vmul.f32 %v3171_v22, %v1857_v18 }
 0x171   :  { %v1435_v47 = vpop.f32.mrf.mxu2 }
 0x172   :  { %v1905_v49 = vadd.f32 %v3174_v30, %v1891_v46  ;;  %v1447_v50 = vadd.f32 %v1435_v47, %v1262_v2 }
 0x174   :  { %v1674_v52 = vadd.f32 %v1662_v51, %v1447_v50 }
 0x176   :  { %v1858_v53 = vadd.f32 %v1846_v14, %v1674_v52 }
 0x178   :  { %v1892_v54 = vmul.f32 %v3171_v22, %v1858_v53 }
 0x17a   :  { %v1906_v55 = vadd.f32 %v3174_v30, %v1892_v54 }
 0x17c   :  { %v2700_v56 = vpack.c.bf16 %v1906_v55, %v1905_v49 }
 0x17e   :  { %2705 = vst [vmem:[%s3222_s4 + $0x20] sm:$0xff] %v2700_v56  }
 0x17f   :  { %1931 = vsyncpa [#allocation6], 1 }
 0x180   :  { %1932 = vsyncpa [#allocation8], 1 }
 0x181   :  { %1933 = vsyncmov [#allocation4] }
 0x184   :  { %s1934_s16 = vpop.sfrf %1933 }
 0x185   :  { %p2558_p0 = scmp.ne.s32.totalorder %s1934_s16, 0 }
 0x187   :  { %1938 = shalt.err (%p2558_p0)  }
 0x188   :  { %1940 = vsyncmov [#allocation4 + $0x1] }
 0x18b   :  { %s1941_s17 = vpop.sfrf %1940 }
 0x18c   :  { %p2559_p1 = scmp.ne.s32.totalorder %s1941_s17, 0 }
 0x18e   :  { %1945 = shalt.err (%p2559_p1)  }

// kernel: _lambda_.102
= control target key start
LH: loop header
LB: loop body
LE: loop exit
PB: predicated region body
PF: predicated region fallthrough
CT: control target
= control target key end

     0   :  { %9 = vsyncpa [#allocation4], 0  ;;  %s660_s0 = inlined_call_operand.vmem [shape: bf16[16,384], index: 0, kind: input, shape index: {}]   ;;  %s661_s1 = inlined_call_operand.vmem [shape: bf16[384,128], index: 1, kind: input, shape index: {}]   ;;  %s662_s2 = inlined_call_operand.hbm [shape: f32[1,128], index: 2, kind: input, shape index: {}]   ;;  %s663_s3 = inlined_call_operand.hbm [shape: f32[1,128], index: 3, kind: input, shape index: {}]   ;;  %s664_s4 = inlined_call_operand.vmem [shape: bf16[16,128], index: 4, kind: output, shape index: {}]  }
   0x1   :  { %s20_s17 = sshll.u32 %s662_s2, 4  ;;  %s21_s17 = int_to_ptr.hbm [resolvable:$true] %s20_s17 }
   0x2   :  { %10 = vsyncpa [#allocation6], 0  ;;  %s534_s18 = smov [#allocation3]   ;;  %s31_s22 = sshll.u32 %s663_s3, 4  ;;  %s32_s22 = int_to_ptr.hbm [resolvable:$true] %s31_s22 }
   0x3   :  { %s22_s19 = sshll.u32 %s534_s18, 4  ;;  %s535_s23 = smov [#allocation5]   ;;  %s23_s19 = int_to_ptr.vmem [resolvable:$true] %s22_s19 }
   0x4   :  { %25 = dma.hbm_to_vmem [thread:$0]  %s21_s17, 16, %s23_s19, [#allocation4]  }
   0x5   :  { %s33_s24 = sshll.u32 %s535_s23, 4  ;;  %s34_s24 = int_to_ptr.vmem [resolvable:$true] %s33_s24 }
   0x6   :  { %36 = dma.hbm_to_vmem [thread:$0]  %s32_s22, 16, %s34_s24, [#allocation6]  }
   0x7   :  { %530 = dma.done.wait [#allocation4], 16  }
   0x8   :  { %531 = vsyncadd [#allocation4], 4294967280 }
   0x9   :  { %532 = dma.done.wait [#allocation6], 16  }
   0xa   :  { %533 = vsyncadd [#allocation6], 4294967280  ;;  %v456_v0 = vld [vmem:[%s661_s1 + $0x38] sm:$0xff]  ;;  %v455_v3 = vld [vmem:[%s661_s1 + $0x30] sm:$0xff] }
   0xb   :  { %v464_v1 = vld [vmem:[%s661_s1 + $0x78] sm:$0xff]  ;;  %265 = vmatpush.bf16.msra.mxu0 %v456_v0  ;;  %v463_v4 = vld [vmem:[%s661_s1 + $0x70] sm:$0xff]  ;;  %v454_v6 = vld [vmem:[%s661_s1 + $0x28] sm:$0xff] }
   0xc   :  { %v472_v2 = vld [vmem:[%s661_s1 + $0xb8] sm:$0xff]  ;;  %279 = vmatpush.bf16.msra.mxu1 %v464_v1  ;;  %v471_v5 = vld [vmem:[%s661_s1 + $0xb0] sm:$0xff]  ;;  %v462_v7 = vld [vmem:[%s661_s1 + $0x68] sm:$0xff] }
   0xd   :  { %293 = vmatpush.bf16.msra.mxu2 %v472_v2  ;;  %v470_v8 = vld [vmem:[%s661_s1 + $0xa8] sm:$0xff]  ;;  %v453_v9 = vld [vmem:[%s661_s1 + $0x20] sm:$0xff]  ;;  %v452_v12 = vld [vmem:[%s661_s1 + $0x18] sm:$0xff] }
   0xe   :  { %v461_v10 = vld [vmem:[%s661_s1 + $0x60] sm:$0xff]  ;;  %v460_v13 = vld [vmem:[%s661_s1 + $0x58] sm:$0xff]  ;;  %v451_v15 = vld [vmem:[%s661_s1 + $0x10] sm:$0xff] }
   0xf   :  { %266 = vmatpush.bf16.msra.mxu0 %v455_v3  ;;  %v469_v11 = vld [vmem:[%s661_s1 + $0xa0] sm:$0xff]  ;;  %v468_v14 = vld [vmem:[%s661_s1 + $0x98] sm:$0xff]  ;;  %v459_v16 = vld [vmem:[%s661_s1 + $0x50] sm:$0xff] }
  0x10   :  { %280 = vmatpush.bf16.msra.mxu1 %v463_v4  ;;  %v467_v17 = vld [vmem:[%s661_s1 + $0x90] sm:$0xff]  ;;  %v450_v18 = vld [vmem:[%s661_s1 + $0x8] sm:$0xff]  ;;  %v449_v21 = vld [vmem:[%s661_s1] sm:$0xff] }
  0x11   :  { %294 = vmatpush.bf16.msra.mxu2 %v471_v5  ;;  %v458_v19 = vld [vmem:[%s661_s1 + $0x48] sm:$0xff]  ;;  %v457_v22 = vld [vmem:[%s661_s1 + $0x40] sm:$0xff]  ;;  %v342_v26 = vld [vmem:[%s660_s0 + $0xc] sm:$0xf0] }
  0x12   :  { %v466_v20 = vld [vmem:[%s661_s1 + $0x88] sm:$0xff]  ;;  %v340_v23 = vld [vmem:[%s660_s0] sm:$0xf]  ;;  %v446_v25 = vld [vmem:[%s660_s0 + $0x4] sm:$0xf] }
  0x13   :  { %267 = vmatpush.bf16.msra.mxu0 %v454_v6  ;;  %v447_v24 = vld [vmem:[%s660_s0 + $0x8] sm:$0xf0]  ;;  %v465_v27 = vld [vmem:[%s661_s1 + $0x80] sm:$0xff]  ;;  %v348_v28 = vld [vmem:[%s660_s0 + $0x8] sm:$0xf]  ;;  %v345_v31 = vor.u32 %v446_v25, %v342_v26 }
  0x14   :  { %281 = vmatpush.bf16.msra.mxu1 %v462_v7  ;;  %v448_v29 = vld [vmem:[%s660_s0 + $0x10] sm:$0xf0]  ;;  %v341_v30 = vor.u32 %v447_v24, %v340_v23  ;;  %v480_v40 = vld [vmem:[#allocation3] ss:$0 sm:$0xff]  ;;  %v481_v44 = vld [vmem:[#allocation5] ss:$0 sm:$0xff] }
  0x15   :  { %295 = vmatpush.bf16.msra.mxu2 %v470_v8  ;;  %v349_v32 = vor.u32 %v448_v29, %v348_v28 }
  0x17   :  { %268 = vmatpush.bf16.msra.mxu0 %v453_v9 }
  0x18   :  { %282 = vmatpush.bf16.msra.mxu1 %v461_v10 }
  0x19   :  { %296 = vmatpush.bf16.msra.mxu2 %v469_v11 }
  0x1b   :  { %269 = vmatpush.bf16.msra.mxu0 %v452_v12 }
  0x1c   :  { %283 = vmatpush.bf16.msra.mxu1 %v460_v13 }
  0x1d   :  { %297 = vmatpush.bf16.msra.mxu2 %v468_v14 }
  0x1f   :  { %270 = vmatpush.bf16.msra.mxu0 %v451_v15 }
  0x20   :  { %284 = vmatpush.bf16.msra.mxu1 %v459_v16 }
  0x21   :  { %298 = vmatpush.bf16.msra.mxu2 %v467_v17 }
  0x23   :  { %271 = vmatpush.bf16.msra.mxu0 %v450_v18 }
  0x24   :  { %285 = vmatpush.bf16.msra.mxu1 %v458_v19 }
  0x25   :  { %299 = vmatpush.bf16.msra.mxu2 %v466_v20 }
  0x27   :  { %272 = vmatpush.bf16.msra.mxu0 %v449_v21 }
  0x28   :  { %286 = vmatpush.bf16.msra.mxu1 %v457_v22 }
  0x29   :  { %300 = vmatpush.bf16.msra.mxu2 %v465_v27 }
  0x2a   :  { %273 = vmatmul.bf16.vlgmr.msra.gmra.mxu0 %v341_v30 }
  0x2b   :  { %287 = vmatmul.bf16.vlgmr.msra.gmra.mxu1 %v345_v31 }
  0x2c   :  { %301 = vmatmul.bf16.vlgmr.msra.gmra.mxu2 %v349_v32 }
  0xa7   :  { %v274_v33 = vpop.f32.mrf.mxu0 }
  0xa8   :  { %v288_v34 = vpop.f32.mrf.mxu1 }
  0xa9   :  { %v289_v36 = vadd.f32 %v288_v34, %v274_v33 }
  0xaf   :  { %v302_v35 = vpop.f32.mrf.mxu2  ;;  %v276_v37 = vpop.f32.mrf.mxu0 }
  0xb0   :  { %v290_v38 = vpop.f32.mrf.mxu1  ;;  %v303_v39 = vadd.f32 %v302_v35, %v289_v36 }
  0xb1   :  { %v291_v41 = vadd.f32 %v290_v38, %v276_v37 }
  0xb2   :  { %v320_v43 = vmul.f32 %v480_v40, %v303_v39 }
  0xb4   :  { %v326_v47 = vadd.f32 %v481_v44, %v320_v43 }
  0xb7   :  { %v304_v42 = vpop.f32.mrf.mxu2 }
  0xb8   :  { %v305_v45 = vadd.f32 %v304_v42, %v291_v41 }
  0xba   :  { %v321_v46 = vmul.f32 %v480_v40, %v305_v45 }
  0xbc   :  { %v327_v48 = vadd.f32 %v481_v44, %v321_v46 }
  0xbe   :  { %v476_v49 = vpack.c.bf16 %v327_v48, %v326_v47 }
  0xc0   :  { %477 = vst [vmem:[%s664_s4] sm:$0xff] %v476_v49  }
  0xc1   :  { %336 = vsyncpa [#allocation4], 1 }
  0xc2   :  { %337 = vsyncpa [#allocation6], 1 }

// kernel: _lambda_.115
= control target key start
LH: loop header
LB: loop body
LE: loop exit
PB: predicated region body
PF: predicated region fallthrough
CT: control target
= control target key end

     0   :  { %9 = vsyncpa [#allocation5], 0  ;;  %s1281_s0 = inlined_call_operand.vmem [shape: bf16[16,128], index: 0, kind: input, shape index: {}]   ;;  %s1282_s1 = inlined_call_operand.vmem [shape: bf16[128,1024], index: 1, kind: input, shape index: {}]   ;;  %s1283_s2 = inlined_call_operand.hbm [shape: f32[1,1024], index: 2, kind: input, shape index: {}]   ;;  %s1284_s3 = inlined_call_operand.hbm [shape: f32[1,1024], index: 3, kind: input, shape index: {}]   ;;  %s1285_s4 = inlined_call_operand.vmem [shape: bf16[16,1024], index: 4, kind: output, shape index: {}]  }
   0x1   :  { %11 = vsyncpa [#allocation5 + $0x1], 0 }
   0x2   :  { %12 = vsyncpa [#allocation7], 0 }
   0x3   :  { %14 = vsyncpa [#allocation7 + $0x1], 0  ;;  %s1104_s15 = smov 0   ;;  %s1106_s16 = smov 0  }
   0x4   :  { %s1108_s17 = smov 0   ;;  %s1110_s18 = smov 0  }
   0x5   :  { %s1112_s19 = smov 0   ;;  %s1114_s20 = smov 0  }
   0x6 LB: > { %s806_s21 = sadd.s32 4294967295, %s1077_s20   ;;  %s35_s22 = sadd.s32 1, %s1073_s19  ;;  %s1077_s20 = sphi %s1114_s20, %s20_s20   ;;  %s1073_s19 = sphi %s1112_s19, %s1293_s19   ;;  %s1069_s18 = sphi %s1110_s18, %s1292_s18   ;;  %s1065_s17 = sphi %s1108_s17, %s1291_s17   ;;  %s1061_s16 = sphi %s1106_s16, %s1290_s16   ;;  %s1057_s15 = sphi %s1104_s15, %s1289_s15  }
   0x7   : > { %p37_p0 = scmp.ge.s32.totalorder %s35_s22, 4  ;;  %s76_s23 = sadd.s32 1, %s1065_s17 }
   0x8   : > { %p83_p1 = scmp.ne.s32.totalorder %s1065_s17, %s1061_s16  ;;  %p84_p2 = scmp.eq.s32.totalorder %s1077_s20, 0 }
   0x9   : > { %s1295_s22 = smov (%p37_p0, %s35_s22), 0  ;;  %p115_p4 = scmp.ne.s32.totalorder %s1061_s16, %s1057_s15 }
   0xa   : > { %p1140_p3 = por %p84_p2, %p83_p1  ;;  %s72_s25 = ssub.s32 %s1073_s19, %s1295_s22 }
   0xb   : > { %p116_p5 = scmp.eq.s32.totalorder %s806_s21, 0  ;;  %p74_p6 = scmp.eq.s32.totalorder %s72_s25, 0 }
   0xc   : > { %p167_p7 = scmp.eq.s32.totalorder %s806_s21, 3  ;;  %p810_p10 = scmp.ge.s32.totalorder %s1077_s20, 4 }
   0xd   : > { %p1147_p8 = por %p116_p5, %p115_p4 }
   0xe   : > { %s1152_s27 = scalar_select %p74_p6, %s1065_s17, %s76_s23  }
   0xf   : > { %p1154_p9 = por %p167_p7, %p83_p1  ;;  %201 = sbr.rel (%p810_p10) target bundleno = 49 (0x31), region = 20 }
  0x14   : > { %204 = sbr.rel (!%p1140_p3) target bundleno = 40 (0x28), region = 24  ;;  %s206_s29 = sand.u32 (%p1140_p3), 1, %s1065_s17  }
  0x15   : > { %s896_s30 = sshll.u32 (%p1140_p3), %s1073_s19, 3  ;;  %s811_s5 = sshll.u32 (%p1140_p3), %s206_s29, 7 }
  0x16   : > { %s1166_s8 = scalar_lea.vmem (%p1140_p3), %s1282_s1, %s896_s30  ;;  %s208_s9 = scalar_lea.vmem (%p1140_p3), [#allocation3], %s811_s5 }
  0x17   : > { %v273_v0 = vld [vmem:[%s1166_s8] sm:$0xff] (%p1140_p3) }
  0x18   : > { %v275_v1 = vld [vmem:[%s1166_s8 + $0x20] sm:$0xff] (%p1140_p3)  ;;  %274 = vst [vmem:[%s208_s9] sm:$0xff] (%p1140_p3), %v273_v0 }
  0x19   : > { %v277_v2 = vld [vmem:[%s1166_s8 + $0x40] sm:$0xff]  ;;  %276 = vst [vmem:[%s208_s9 + $0x8] sm:$0xff] %v275_v1 }
  0x1a   : > { %v279_v3 = vld [vmem:[%s1166_s8 + $0x60] sm:$0xff]  ;;  %278 = vst [vmem:[%s208_s9 + $0x10] sm:$0xff] %v277_v2 }
  0x1b   : > { %v281_v4 = vld [vmem:[%s1166_s8 + $0x80] sm:$0xff]  ;;  %280 = vst [vmem:[%s208_s9 + $0x18] sm:$0xff] %v279_v3 }
  0x1c   : > { %v283_v5 = vld [vmem:[%s1166_s8 + $0xa0] sm:$0xff]  ;;  %282 = vst [vmem:[%s208_s9 + $0x20] sm:$0xff] %v281_v4 }
  0x1d   : > { %v285_v6 = vld [vmem:[%s1166_s8 + $0xc0] sm:$0xff]  ;;  %284 = vst [vmem:[%s208_s9 + $0x28] sm:$0xff] %v283_v5 }
  0x1e   : > { %v287_v7 = vld [vmem:[%s1166_s8 + $0xe0] sm:$0xff]  ;;  %286 = vst [vmem:[%s208_s9 + $0x30] sm:$0xff] %v285_v6 }
  0x1f   : > { %v289_v8 = vld [vmem:[%s1166_s8 + $0x100] sm:$0xff]  ;;  %288 = vst [vmem:[%s208_s9 + $0x38] sm:$0xff] %v287_v7 }
  0x20   : > { %v291_v9 = vld [vmem:[%s1166_s8 + $0x120] sm:$0xff]  ;;  %290 = vst [vmem:[%s208_s9 + $0x40] sm:$0xff] %v289_v8 }
  0x21   : > { %v293_v10 = vld [vmem:[%s1166_s8 + $0x140] sm:$0xff]  ;;  %292 = vst [vmem:[%s208_s9 + $0x48] sm:$0xff] %v291_v9 }
  0x22   : > { %v295_v11 = vld [vmem:[%s1166_s8 + $0x160] sm:$0xff]  ;;  %294 = vst [vmem:[%s208_s9 + $0x50] sm:$0xff] %v293_v10 }
  0x23   : > { %v297_v12 = vld [vmem:[%s1166_s8 + $0x180] sm:$0xff]  ;;  %296 = vst [vmem:[%s208_s9 + $0x58] sm:$0xff] %v295_v11 }
  0x24   : > { %v299_v13 = vld [vmem:[%s1166_s8 + $0x1a0] sm:$0xff]  ;;  %298 = vst [vmem:[%s208_s9 + $0x60] sm:$0xff] %v297_v12 }
  0x25   : > { %v301_v14 = vld [vmem:[%s1166_s8 + $0x1c0] sm:$0xff]  ;;  %300 = vst [vmem:[%s208_s9 + $0x68] sm:$0xff] %v299_v13 }
  0x26   : > { %v303_v15 = vld [vmem:[%s1166_s8 + $0x1e0] sm:$0xff]  ;;  %302 = vst [vmem:[%s208_s9 + $0x70] sm:$0xff] %v301_v14 }
  0x27   : > { %304 = vst [vmem:[%s208_s9 + $0x78] sm:$0xff] %v303_v15 }
  0x28 PF: > { %s311_s10 = sand.u32 1, %s1065_s17   ;;  %s815_s11 = sshll.u32 %s1073_s19, 1 }
  0x29   : > { %s814_s12 = sshll.u32 %s311_s10, 1  ;;  %s319_s15 = scalar_lea.hbm %s1283_s2, %s815_s11 }
  0x2a   : > { %s321_s21 = sshll.u32 %s319_s15, 4  ;;  %s315_s23 = scalar_lea.vmem [#allocation4], %s814_s12  ;;  %s322_s21 = int_to_ptr.hbm [resolvable:$true] %s321_s21 }
  0x2b   : > { %s323_s25 = sshll.u32 %s315_s23, 4  ;;  %s312_s29 = scalar_lea.sflag [#allocation5], %s311_s10  ;;  %s324_s25 = int_to_ptr.vmem [resolvable:$true] %s323_s25 }
  0x2c   : > { %915 = dma.hbm_to_vmem [thread:$0]  (%p1140_p3), %s322_s21, 32, %s324_s25, %s312_s29  }
  0x2d   : > { %s338_s6 = scalar_lea.hbm %s1284_s3, %s815_s11  ;;  %s334_s7 = scalar_lea.vmem [#allocation6], %s814_s12 }
  0x2e   : > { %s342_s8 = sshll.u32 %s334_s7, 4  ;;  %s340_s9 = sshll.u32 %s338_s6, 4  ;;  %s343_s8 = int_to_ptr.vmem [resolvable:$true] %s342_s8  ;;  %s341_s9 = int_to_ptr.hbm [resolvable:$true] %s340_s9 }
  0x2f   : > { %s331_s13 = scalar_lea.sflag [#allocation7], %s311_s10 }
  0x30   : > { %916 = dma.hbm_to_vmem [thread:$0]  (%p1140_p3), %s341_s9, 32, %s343_s8, %s331_s13  }
  0x31 PF: > { %p818_p11 = scmp.ge.s32.totalorder %s1077_s20, 1  ;;  %p347_p12 = scmp.lt.s32.totalorder %s1077_s20, 5 }
  0x33   : > { %p348_p13 = pnand %p818_p11, %p347_p12 }
  0x34   : > { %s1199_s14 = sand.u32 (!%p348_p13), 1, %s1061_s16  }
  0x35   : > { %351 = sbr.rel (%p348_p13) target bundleno = 247 (0xf7), region = 70  ;;  %s819_s11 = sshll.u32 (!%p348_p13), %s1199_s14, 7 }
  0x36   : > { %s820_s12 = sshll.u32 (!%p348_p13), %s1199_s14, 1  ;;  %s1203_s15 = scalar_lea.vmem (!%p348_p13), [#allocation3], %s819_s11 }
  0x37   : > { %s361_s24 = scalar_lea.sflag (!%p348_p13), [#allocation5], %s1199_s14  ;;  %s1206_s10 = scalar_lea.vmem (!%p348_p13), [#allocation4], %s820_s12 }
  0x3a   : > { %1048 = dma.done.wait (%p1147_p8), %s361_s24, 32  }
  0x3b   : > { %1050 = vsyncadd (%p1147_p8), %s361_s24, 4294967264  ;;  %s371_s21 = scalar_lea.sflag [#allocation7], %s1199_s14  ;;  %s1213_s23 = scalar_lea.vmem [#allocation6], %s820_s12 }
  0x3c   : > { %1052 = dma.done.wait (%p1147_p8), %s371_s21, 32  }
  0x3d   : > { %1054 = vsyncadd (%p1147_p8), %s371_s21, 4294967264  ;;  %v885_v16 = vld [vmem:[%s1203_s15 + $0x70] sm:$0xf]  ;;  %v913_v17 = vld [vmem:[%s1203_s15 + $0x74] sm:$0xf0]  ;;  %s822_s29 = sshll.u32 %s1199_s14, 4 }
  0x3e   : > { %v912_v18 = vld [vmem:[%s1203_s15 + $0x74] sm:$0xf]  ;;  %v886_v19 = vor.u32 %v913_v17, %v885_v16  ;;  %v887_v20 = vld [vmem:[%s1203_s15 + $0x78] sm:$0xf0]  ;;  %v877_v21 = vld [vmem:[%s1203_s15 + $0x60] sm:$0xf] }
  0x3f   : > { %v911_v22 = vld [vmem:[%s1203_s15 + $0x64] sm:$0xf0]  ;;  %v890_v23 = vor.u32 %v912_v18, %v887_v20  ;;  %v910_v24 = vld [vmem:[%s1203_s15 + $0x64] sm:$0xf]  ;;  %v879_v25 = vld [vmem:[%s1203_s15 + $0x68] sm:$0xf0] }
  0x40   : > { %547 = vmatpush.bf16.msra.mxu0 %v886_v19  ;;  %v878_v26 = vor.u32 %v911_v22, %v877_v21  ;;  %v882_v27 = vor.u32 %v910_v24, %v879_v25  ;;  %v869_v28 = vld [vmem:[%s1203_s15 + $0x50] sm:$0xf]  ;;  %v909_v29 = vld [vmem:[%s1203_s15 + $0x54] sm:$0xf0]  ;;  %v908_v30 = vld [vmem:[%s1203_s15 + $0x54] sm:$0xf] }
  0x41   : > { %561 = vmatpush.bf16.msra.mxu1 %v890_v23  ;;  %v871_v31 = vld [vmem:[%s1203_s15 + $0x58] sm:$0xf0]  ;;  %v870_v32 = vor.u32 %v909_v29, %v869_v28  ;;  %v861_v34 = vld [vmem:[%s1203_s15 + $0x40] sm:$0xf]  ;;  %v907_v35 = vld [vmem:[%s1203_s15 + $0x44] sm:$0xf0] }
  0x42   : > { %v874_v33 = vor.u32 %v908_v30, %v871_v31  ;;  %v906_v36 = vld [vmem:[%s1203_s15 + $0x44] sm:$0xf]  ;;  %v863_v37 = vld [vmem:[%s1203_s15 + $0x48] sm:$0xf0]  ;;  %v862_v38 = vor.u32 %v907_v35, %v861_v34  ;;  %v853_v40 = vld [vmem:[%s1203_s15 + $0x30] sm:$0xf] }
  0x43   : > { %v866_v39 = vor.u32 %v906_v36, %v863_v37  ;;  %v905_v41 = vld [vmem:[%s1203_s15 + $0x34] sm:$0xf0]  ;;  %v904_v42 = vld [vmem:[%s1203_s15 + $0x34] sm:$0xf]  ;;  %v855_v43 = vld [vmem:[%s1203_s15 + $0x38] sm:$0xf0] }
  0x44   : > { %548 = vmatpush.bf16.msra.mxu0 %v878_v26  ;;  %v854_v44 = vor.u32 %v905_v41, %v853_v40  ;;  %v858_v45 = vor.u32 %v904_v42, %v855_v43  ;;  %v845_v46 = vld [vmem:[%s1203_s15 + $0x20] sm:$0xf]  ;;  %v903_v47 = vld [vmem:[%s1203_s15 + $0x24] sm:$0xf0]  ;;  %v902_v48 = vld [vmem:[%s1203_s15 + $0x24] sm:$0xf] }
  0x45   : > { %562 = vmatpush.bf16.msra.mxu1 %v882_v27  ;;  %v847_v49 = vld [vmem:[%s1203_s15 + $0x28] sm:$0xf0]  ;;  %v846_v50 = vor.u32 %v903_v47, %v845_v46  ;;  %v837_v52 = vld [vmem:[%s1203_s15 + $0x10] sm:$0xf]  ;;  %v901_v53 = vld [vmem:[%s1203_s15 + $0x14] sm:$0xf0] }
  0x46   : > { %v850_v51 = vor.u32 %v902_v48, %v847_v49  ;;  %v900_v54 = vld [vmem:[%s1203_s15 + $0x14] sm:$0xf]  ;;  %v839_v55 = vld [vmem:[%s1203_s15 + $0x18] sm:$0xf0]  ;;  %v838_v56 = vor.u32 %v901_v53, %v837_v52  ;;  %v829_v58 = vld [vmem:[%s1203_s15] sm:$0xf] }
  0x47   : > { %v842_v57 = vor.u32 %v900_v54, %v839_v55  ;;  %v899_v59 = vld [vmem:[%s1203_s15 + $0x4] sm:$0xf0]  ;;  %v898_v60 = vld [vmem:[%s1203_s15 + $0x4] sm:$0xf]  ;;  %v831_v61 = vld [vmem:[%s1203_s15 + $0x8] sm:$0xf0] }
  0x48   : > { %549 = vmatpush.bf16.msra.mxu0 %v870_v32  ;;  %v830_v62 = vor.u32 %v899_v59, %v829_v58  ;;  %v834_v63 = vor.u32 %v898_v60, %v831_v61  ;;  %v897_v0 = vld [vmem:[%s1281_s0] sm:$0xff]  ;;  %s415_s30 = scalar_lea.vmem [#allocation8], %s822_s29  ;;  %s914_s5 = sshll.u32 (%p1154_p9), %s1069_s18, 3 }
  0x49   : > { %563 = vmatpush.bf16.msra.mxu1 %v874_v33  ;;  %v590_v1 = vld [vmem:[%s1206_s10] sm:$0x3]  ;;  %v600_v2 = vld [vmem:[%s1213_s23] sm:$0x3]  ;;  %s630_s8 = scalar_lea.vmem (%p1154_p9), %s1285_s4, %s914_s5 }
  0x4a   : > { %v592_v3 = vperm.slane %v590_v1, 0  ;;  %v593_v4 = vperm.slane %v590_v1, 1  ;;  %v602_v5 = vperm.slane %v600_v2, 0  ;;  %v603_v7 = vperm.slane %v600_v2, 1 }
  0x4c   : > { %550 = vmatpush.bf16.msra.mxu0 %v862_v38 }
  0x4d   : > { %564 = vmatpush.bf16.msra.mxu1 %v866_v39 }
  0x50   : > { %551 = vmatpush.bf16.msra.mxu0 %v854_v44 }
  0x51   : > { %565 = vmatpush.bf16.msra.mxu1 %v858_v45 }
  0x54   : > { %552 = vmatpush.bf16.msra.mxu0 %v846_v50 }
  0x55   : > { %566 = vmatpush.bf16.msra.mxu1 %v850_v51 }
  0x58   : > { %553 = vmatpush.bf16.msra.mxu0 %v838_v56 }
  0x59   : > { %567 = vmatpush.bf16.msra.mxu1 %v842_v57 }
  0x5c   : > { %554 = vmatpush.bf16.msra.mxu0 %v830_v62 }
  0x5d   : > { %568 = vmatpush.bf16.msra.mxu1 %v834_v63 }
  0x5f   : > { %555 = vmatmul.bf16.vlgmr.msra.gmra.mxu0 %v897_v0 }
  0x60   : > { %569 = vmatmul.bf16.vlgmr.msra.gmra.mxu1 %v897_v0 }
  0xdc   : > { %v556_v6 = vpop.f32.mrf.mxu0 }
  0xdd   : > { %v596_v8 = vmul.f32 %v592_v3, %v556_v6  ;;  %v570_v9 = vpop.f32.mrf.mxu1 }
  0xde   : > { %v597_v10 = vmul.f32 %v593_v4, %v570_v9 }
  0xdf   : > { %v606_v11 = vadd.f32 %v602_v5, %v596_v8 }
  0xe0   : > { %v607_v12 = vadd.f32 %v603_v7, %v597_v10 }
  0xe1   : > { %v610_v13 = vmax.f32 %v606_v11, 0.0 }
  0xe2   : > { %v611_v14 = vmax.f32 %v607_v12, 0.0 }
  0xe4   : > { %v614_v15 = vpack.c.bf16 %v611_v14, %v610_v13  ;;  %v558_v16 = vpop.f32.mrf.mxu0 }
  0xe5   : > { %v598_v17 = vmul.f32 %v592_v3, %v558_v16  ;;  %v572_v18 = vpop.f32.mrf.mxu1 }
  0xe6   : > { %616 = vst [vmem:[%s415_s30] sm:$0xff] %v614_v15  ;;  %v599_v19 = vmul.f32 %v593_v4, %v572_v18 }
  0xe7   : > { %v608_v20 = vadd.f32 %v602_v5, %v598_v17 }
  0xe8   : > { %v609_v21 = vadd.f32 %v603_v7, %v599_v19 }
  0xe9   : > { %v612_v22 = vmax.f32 %v608_v20, 0.0 }
  0xea   : > { %v613_v23 = vmax.f32 %v609_v21, 0.0  ;;  %624 = sbr.rel (!%p1154_p9) target bundleno = 247 (0xf7), region = 94 }
  0xec   : > { %v615_v24 = vpack.c.bf16 %v613_v23, %v612_v22 }
  0xed   : > { %v661_v25 = vld [vmem:[%s415_s30] sm:$0xff] (%p1154_p9) }
  0xee   : > { %617 = vst [vmem:[%s415_s30 + $0x8] sm:$0xff] %v615_v24 }
  0xef   : > { %662 = vst [vmem:[%s630_s8] sm:$0xff] %v661_v25 }
  0xf5   : > { %v663_v26 = vld [vmem:[%s415_s30 + $0x8] sm:$0xff] }
  0xf6   : > { %664 = vst [vmem:[%s630_s8 + $0x20] sm:$0xff] %v663_v26 }
  0xf7 PF: > { %s20_s20 = sadd.s32 1, %s1077_s20   ;;  %s1289_s15 = smov %s1061_s16 }
  0xf8   : > { %p17_p0 = scmp.ge.s32.totalorder %s20_s20, 6   ;;  %s1290_s16 = smov %s1065_s17 }
  0xf9   : > { %s1291_s17 = smov %s1152_s27  ;;  %s1292_s18 = smov %s1073_s19 }
  0xfa   : > { %s1293_s19 = smov %s1295_s22  ;;  %19 = sbr.rel (!%p17_p0) target bundleno = 6 (0x6), region = 184 }
  0xff   :  { %680 = vsyncpa [#allocation5], 1 }
 0x100   :  { %682 = vsyncpa [#allocation5 + $0x1], 1 }
 0x101   :  { %683 = vsyncpa [#allocation7], 1 }
 0x102   :  { %685 = vsyncpa [#allocation7 + $0x1], 1 }

// kernel: _lambda_.81
= control target key start
LH: loop header
LB: loop body
LE: loop exit
PB: predicated region body
PF: predicated region fallthrough
CT: control target
= control target key end

     0   :  { %9 = vsyncpa [#allocation6], 0  ;;  %s2270_s0 = inlined_call_operand.vmem [shape: bf16[48,128], index: 0, kind: input, shape index: {}]   ;;  %s2271_s1 = inlined_call_operand.vmem [shape: bf16[9,128,128], index: 1, kind: input, shape index: {}]   ;;  %s2272_s2 = inlined_call_operand.hbm [shape: f32[1,128], index: 2, kind: input, shape index: {}]   ;;  %s2273_s3 = inlined_call_operand.hbm [shape: f32[1,128], index: 3, kind: input, shape index: {}]   ;;  %s2274_s4 = inlined_call_operand.vmem [shape: bf16[32,128], index: 4, kind: output, shape index: {}]  }
   0x1   :  { %s18_s17 = sshll.u32 %s2272_s2, 4  ;;  %s19_s17 = int_to_ptr.hbm [resolvable:$true] %s18_s17 }
   0x2   :  { %10 = vsyncpa [#allocation8], 0  ;;  %s1967_s18 = smov [#allocation5]   ;;  %s29_s22 = sshll.u32 %s2273_s3, 4  ;;  %s30_s22 = int_to_ptr.hbm [resolvable:$true] %s29_s22 }
   0x3   :  { %s20_s19 = sshll.u32 %s1967_s18, 4  ;;  %s1968_s23 = smov [#allocation7]   ;;  %s21_s19 = int_to_ptr.vmem [resolvable:$true] %s20_s19 }
   0x4   :  { %23 = dma.hbm_to_vmem [thread:$0]  %s19_s17, 16, %s21_s19, [#allocation6]  }
   0x5   :  { %s31_s24 = sshll.u32 %s1968_s23, 4  ;;  %s32_s24 = int_to_ptr.vmem [resolvable:$true] %s31_s24 }
   0x6   :  { %34 = dma.hbm_to_vmem [thread:$0]  %s30_s22, 16, %s32_s24, [#allocation8]  }
   0x7   :  { %1961 = dma.done.wait [#allocation6], 16  }
   0x8   :  { %1962 = vsyncadd [#allocation6], 4294967280 }
   0x9   :  { %1963 = dma.done.wait [#allocation8], 16  }
   0xa   :  { %1964 = vsyncadd [#allocation8], 4294967280  ;;  %v71_v0 = vld [vmem:[%s2270_s0] sm:$0xff]  ;;  %v73_v1 = vld [vmem:[%s2270_s0 + $0x8] sm:$0xff] }
   0xb   :  { %v75_v2 = vld [vmem:[%s2270_s0 + $0x10] sm:$0xff]  ;;  %72 = vst [vmem:[#allocation3] sm:$0xff] %v71_v0 }
   0xc   :  { %74 = vst [vmem:[#allocation3 + $0x8] sm:$0xff] %v73_v1 }
   0xd   :  { %76 = vst [vmem:[#allocation3 + $0x10] sm:$0xff] %v75_v2 }
   0xe   :  { %82 = vsyncadd [#allocation4], 384 }
   0xf   :  { %1965 = dma.done.wait [#allocation4], 384 }
  0x10   :  { %1966 = vsyncadd [#allocation4], 4294966912  ;;  %v1809_v3 = vld [vmem:[%s2271_s1 + $0x38] sm:$0xff]  ;;  %v1808_v7 = vld [vmem:[%s2271_s1 + $0x30] sm:$0xff]  ;;  %vm271_vm0 = vsmask.f32 7424 }
  0x11   :  { %v1819_v4 = vld [vmem:[%s2271_s1 + $0x78] sm:$0xff]  ;;  %209 = vmatpush.bf16.msra.mxu0 %v1809_v3  ;;  %v1818_v8 = vld [vmem:[%s2271_s1 + $0x70] sm:$0xff]  ;;  %v1807_v11 = vld [vmem:[%s2271_s1 + $0x28] sm:$0xff]  ;;  %vm408_vm1 = vcmask 1046528   ;;  %vm530_vm2 = vcmask 1045504   ;;  %vm795_vm4 = vcmask 1044480  }
  0x12   :  { %v1829_v5 = vld [vmem:[%s2271_s1 + $0xb8] sm:$0xff]  ;;  %342 = vmatpush.bf16.msra.mxu1 %v1819_v4  ;;  %v1828_v9 = vld [vmem:[%s2271_s1 + $0xb0] sm:$0xff]  ;;  %v1817_v12 = vld [vmem:[%s2271_s1 + $0x68] sm:$0xff]  ;;  %vm652_vm3 = vsmask.f32 5376 }
  0x13   :  { %v1839_v6 = vld [vmem:[%s2271_s1 + $0xf8] sm:$0xff]  ;;  %464 = vmatpush.bf16.msra.mxu2 %v1829_v5  ;;  %v1838_v10 = vld [vmem:[%s2271_s1 + $0xf0] sm:$0xff]  ;;  %v1827_v13 = vld [vmem:[%s2271_s1 + $0xa8] sm:$0xff] }
  0x14   :  { %586 = vmatpush.bf16.msra.mxu3 %v1839_v6  ;;  %v1837_v14 = vld [vmem:[%s2271_s1 + $0xe8] sm:$0xff]  ;;  %v1806_v15 = vld [vmem:[%s2271_s1 + $0x20] sm:$0xff]  ;;  %v1805_v19 = vld [vmem:[%s2271_s1 + $0x18] sm:$0xff] }
  0x15   :  { %210 = vmatpush.bf16.msra.mxu0 %v1808_v7  ;;  %v1816_v16 = vld [vmem:[%s2271_s1 + $0x60] sm:$0xff]  ;;  %v1815_v20 = vld [vmem:[%s2271_s1 + $0x58] sm:$0xff]  ;;  %v1804_v24 = vld [vmem:[%s2271_s1 + $0x10] sm:$0xff] }
  0x16   :  { %343 = vmatpush.bf16.msra.mxu1 %v1818_v8  ;;  %v1826_v17 = vld [vmem:[%s2271_s1 + $0xa0] sm:$0xff]  ;;  %v1825_v22 = vld [vmem:[%s2271_s1 + $0x98] sm:$0xff]  ;;  %v1814_v25 = vld [vmem:[%s2271_s1 + $0x50] sm:$0xff] }
  0x17   :  { %465 = vmatpush.bf16.msra.mxu2 %v1828_v9  ;;  %v1836_v18 = vld [vmem:[%s2271_s1 + $0xe0] sm:$0xff]  ;;  %v1835_v23 = vld [vmem:[%s2271_s1 + $0xd8] sm:$0xff]  ;;  %v1824_v26 = vld [vmem:[%s2271_s1 + $0x90] sm:$0xff] }
  0x18   :  { %587 = vmatpush.bf16.msra.mxu3 %v1838_v10  ;;  %v1810_v21 = vld [vmem:[#allocation3] sm:$0xff]  ;;  %v2078_v27 = vld [vmem:[#allocation3 + $0x8] sm:$0xff]  ;;  %v1834_v29 = vld [vmem:[%s2271_s1 + $0xd0] sm:$0xff] }
  0x19   :  { %211 = vmatpush.bf16.msra.mxu0 %v1807_v11  ;;  %v275_v28 = vshll.u32 %v1810_v21, 16  ;;  %v1424_v30 = vld [vmem:[#allocation3] sm:$0xe]  ;;  %v1820_v31 = vld [vmem:[#allocation3] sm:$0xf0]  ;;  %v1803_v34 = vld [vmem:[%s2271_s1 + $0x8] sm:$0xff] }
  0x1a   :  { %344 = vmatpush.bf16.msra.mxu1 %v1817_v12  ;;  %v1480_v32 = vld [vmem:[#allocation3] sm:$0xc]  ;;  %v1830_v33 = vld [vmem:[#allocation3] sm:$0xf0]  ;;  %v1813_v35 = vld [vmem:[%s2271_s1 + $0x48] sm:$0xff]  ;;  %v273_v36 = vshrl.u32 %v1810_v21, 16  ;;  %v1425_v40 = vor.u32 %v1820_v31, %v1424_v30 }
  0x1b   :  { %466 = vmatpush.bf16.msra.mxu2 %v1827_v13  ;;  %v277_v37 = vrot.slane %v275_v28, 1  ;;  %v280_v38 = vshll.u32 %v2078_v27, 16  ;;  %v2090_v39 = vld [vmem:[#allocation3 + $0x8] sm:$0xff]  ;;  %v1481_v44 = vor.u32 %v1830_v33, %v1480_v32  ;;  %v1802_v45 = vld [vmem:[%s2271_s1] sm:$0xff]  ;;  %v240_v55 = vld [vmem:[#allocation3 + $0x10] sm:$0x1] }
  0x1c   :  { %588 = vmatpush.bf16.msra.mxu3 %v1837_v14  ;;  %v1823_v41 = vld [vmem:[%s2271_s1 + $0x88] sm:$0xff]  ;;  %v1812_v46 = vld [vmem:[%s2271_s1 + $0x40] sm:$0xff]  ;;  %v409_v51 = vrot.slane %v1425_v40, 1  ;;  %v410_v52 = vrot.slane %v2090_v39, 1  ;;  %v1849_v56 = vld [vmem:[%s2271_s1 + $0x138] sm:$0xff]  ;;  %v267_v60 = vunpack.c.l.b16 %v240_v55  ;;  %v284_v12 = vshrl.u32 %v2078_v27, 16 }
  0x1d   :  { %212 = vmatpush.bf16.msra.mxu0 %v1806_v15  ;;  %v1833_v42 = vld [vmem:[%s2271_s1 + $0xc8] sm:$0xff]  ;;  %v1822_v47 = vld [vmem:[%s2271_s1 + $0x80] sm:$0xff]  ;;  %v278_v49 = vor.u32 %v277_v37, %v273_v36  ;;  %v282_v50 = vrot.slane %v280_v38, 1  ;;  %v531_v53 = vrot.slane %v1481_v44, 2  ;;  %v1859_v57 = vld [vmem:[%s2271_s1 + $0x178] sm:$0xff] }
  0x1e   :  { %345 = vmatpush.bf16.msra.mxu1 %v1816_v16  ;;  %v2098_v43 = vld [vmem:[#allocation3 + $0x8] sm:$0xff]  ;;  %v1832_v48 = vld [vmem:[%s2271_s1 + $0xc0] sm:$0xff]  ;;  %v411_v61 = vsel %vm408_vm1, %v409_v51, %v410_v52  ;;  %v1869_v63 = vld [vmem:[%s2271_s1 + $0x1b8] sm:$0xff]  ;;  %v270_v5 = vpack.c.b16 %v267_v60, %v267_v60 }
  0x1f   :  { %467 = vmatpush.bf16.msra.mxu2 %v1826_v17  ;;  %v532_v54 = vrot.slane %v2098_v43, 2  ;;  %v1800_v58 = vld [vmem:[#allocation3] sm:$0xff]  ;;  %v283_v59 = vsel %vm271_vm0, %v278_v49, %v282_v50  ;;  %v1879_v0 = vld [vmem:[%s2271_s1 + $0x1f8] sm:$0xff]  ;;  %v1848_v1 = vld [vmem:[%s2271_s1 + $0x130] sm:$0xff] }
  0x20   :  { %589 = vmatpush.bf16.msra.mxu3 %v1836_v18  ;;  %v1858_v2 = vld [vmem:[%s2271_s1 + $0x170] sm:$0xff]  ;;  %v1847_v10 = vld [vmem:[%s2271_s1 + $0x128] sm:$0xff]  ;;  %v288_v13 = vshll.u32 %v270_v5, 16  ;;  %v1846_v18 = vld [vmem:[%s2271_s1 + $0x120] sm:$0xff] }
  0x21   :  { %213 = vmatpush.bf16.msra.mxu0 %v1805_v19  ;;  %v533_v62 = vsel %vm530_vm2, %v531_v53, %v532_v54  ;;  %v377_v3 = vld [vmem:[#allocation3 + $0x10] sm:$0x1]  ;;  %v1857_v11 = vld [vmem:[%s2271_s1 + $0x168] sm:$0xff]  ;;  %v1856_v19 = vld [vmem:[%s2271_s1 + $0x160] sm:$0xff] }
  0x22   :  { %346 = vmatpush.bf16.msra.mxu1 %v1815_v20  ;;  %v499_v4 = vld [vmem:[#allocation3 + $0x10] sm:$0x3]  ;;  %v404_v8 = vunpack.c.l.b16 %v377_v3  ;;  %v1867_v14 = vld [vmem:[%s2271_s1 + $0x1a8] sm:$0xff]  ;;  %v286_v20 = vor.u32 %v284_v12, %v282_v50  ;;  %v290_v21 = vrot.slane %v288_v13, 1  ;;  %v1845_v28 = vld [vmem:[%s2271_s1 + $0x118] sm:$0xff] }
  0x23   :  { %468 = vmatpush.bf16.msra.mxu2 %v1825_v22  ;;  %v1868_v6 = vld [vmem:[%s2271_s1 + $0x1b0] sm:$0xff]  ;;  %v526_v9 = vunpack.c.l.b16 %v499_v4  ;;  %v1877_v15 = vld [vmem:[%s2271_s1 + $0x1e8] sm:$0xff]  ;;  %v1536_v22 = vld [vmem:[#allocation3] sm:$0xc] }
  0x24   :  { %590 = vmatpush.bf16.msra.mxu3 %v1835_v23  ;;  %v1878_v7 = vld [vmem:[%s2271_s1 + $0x1f0] sm:$0xff]  ;;  %v407_v16 = vpack.c.b16 %v404_v8, %v404_v8  ;;  %v1840_v23 = vld [vmem:[#allocation3] sm:$0xf0]  ;;  %v1801_v30 = vld [vmem:[#allocation3 + $0x8] sm:$0xff]  ;;  %v291_v32 = vsel %vm271_vm0, %v286_v20, %v290_v21 }
  0x25   :  { %214 = vmatpush.bf16.msra.mxu0 %v1804_v24  ;;  %v529_v17 = vpack.c.b16 %v526_v9, %v526_v9  ;;  %v1866_v24 = vld [vmem:[%s2271_s1 + $0x1a0] sm:$0xff]  ;;  %v1537_v31 = vor.u32 %v1840_v23, %v1536_v22  ;;  %v1841_v33 = vld [vmem:[#allocation3 + $0x8] sm:$0xff]  ;;  %v1865_v36 = vld [vmem:[%s2271_s1 + $0x198] sm:$0xff] }
  0x26   :  { %347 = vmatpush.bf16.msra.mxu1 %v1814_v25  ;;  %v1876_v25 = vld [vmem:[%s2271_s1 + $0x1e0] sm:$0xff]  ;;  %v1875_v37 = vld [vmem:[%s2271_s1 + $0x1d8] sm:$0xff]  ;;  %v1844_v39 = vld [vmem:[%s2271_s1 + $0x110] sm:$0xff] }
  0x27   :  { %469 = vmatpush.bf16.msra.mxu2 %v1824_v26  ;;  %v412_v26 = vrot.slane %v407_v16, 1  ;;  %v534_v27 = vrot.slane %v529_v17, 2  ;;  %v1870_v38 = vld [vmem:[#allocation3 + $0x4] sm:$0xff]  ;;  %v1854_v40 = vld [vmem:[%s2271_s1 + $0x150] sm:$0xff]  ;;  %v1889_v4 = vld [vmem:[%s2271_s1 + $0x238] sm:$0xff] }
  0x28   :  { %591 = vmatpush.bf16.msra.mxu3 %v1834_v29  ;;  %v1855_v29 = vld [vmem:[%s2271_s1 + $0x158] sm:$0xff]  ;;  %v1864_v43 = vld [vmem:[%s2271_s1 + $0x190] sm:$0xff]  ;;  %v1032_v50 = vshll.u32 %v1870_v38, 16  ;;  %v1843_v51 = vld [vmem:[%s2271_s1 + $0x108] sm:$0xff] }
  0x29   :  { %215 = vmatpush.bf16.msra.mxu0 %v1803_v34  ;;  %v413_v34 = vsel %vm408_vm1, %v410_v52, %v412_v26  ;;  %v1874_v44 = vld [vmem:[%s2271_s1 + $0x1d0] sm:$0xff]  ;;  %v1853_v52 = vld [vmem:[%s2271_s1 + $0x148] sm:$0xff]  ;;  %v1862_v9 = vld [vmem:[%s2271_s1 + $0x180] sm:$0xff] }
  0x2a   :  { %348 = vmatpush.bf16.msra.mxu1 %v1813_v35  ;;  %v535_v35 = vsel %vm530_vm2, %v532_v54, %v534_v27  ;;  %v2201_v49 = vld [vmem:[#allocation3 + $0xc] sm:$0xff]  ;;  %v998_v13 = vld [vmem:[#allocation3 + $0x14] sm:$0x1]  ;;  %v1860_v16 = vld [vmem:[#allocation3 + $0x4] sm:$0xff] }
  0x2b   :  { %470 = vmatpush.bf16.msra.mxu2 %v1823_v41  ;;  %v654_v41 = vshrl.u32 %v1537_v31, 16  ;;  %v1863_v55 = vld [vmem:[%s2271_s1 + $0x188] sm:$0xff]  ;;  %v764_v20 = vld [vmem:[#allocation3 + $0x10] sm:$0x7]  ;;  %v1025_v21 = vunpack.c.l.b16 %v998_v13 }
  0x2c   :  { %592 = vmatpush.bf16.msra.mxu3 %v1833_v42  ;;  %v657_v42 = vshll.u32 %v1537_v31, 16  ;;  %v1873_v60 = vld [vmem:[%s2271_s1 + $0x1c8] sm:$0xff]  ;;  %v1041_v31 = vshrl.u32 %v2201_v49, 16 }
  0x2d   :  { %216 = vmatpush.bf16.msra.mxu0 %v1802_v45  ;;  %v662_v45 = vshrl.u32 %v1841_v33, 16  ;;  %v656_v53 = vrot.slane %v654_v41, 2  ;;  %v1028_v26 = vpack.c.b16 %v1025_v21, %v1025_v21 }
  0x2e   :  { %349 = vmatpush.bf16.msra.mxu1 %v1812_v46  ;;  %v665_v46 = vshll.u32 %v1841_v33, 16  ;;  %v659_v54 = vrot.slane %v657_v42, 3  ;;  %v1884_v42 = vld [vmem:[%s2271_s1 + $0x210] sm:$0xff] }
  0x2f   :  { %471 = vmatpush.bf16.msra.mxu2 %v1822_v47  ;;  %v1592_v47 = vld [vmem:[#allocation3] sm:$0x8] }
  0x30   :  { %593 = vmatpush.bf16.msra.mxu3 %v1832_v48  ;;  %217 = vmatmul.bf16.vlgmr.msra.gmra.mxu0 %v1800_v58  ;;  %v1850_v48 = vld [vmem:[#allocation3] sm:$0xf0]  ;;  %v2212_v58 = vld [vmem:[#allocation3 + $0x8] sm:$0xff]  ;;  %v660_v3 = vor.u32 %v659_v54, %v656_v53 }
  0x31   :  { %729 = vmatpush.bf16.msrb.mxu0 %v1849_v56  ;;  %350 = vmatmul.bf16.vlgmr.msra.gmra.mxu1 %v283_v59  ;;  %v664_v56 = vrot.slane %v662_v45, 2  ;;  %v1593_v59 = vor.u32 %v1850_v48, %v1592_v47  ;;  %v1883_v45 = vld [vmem:[%s2271_s1 + $0x208] sm:$0xff] }
  0x32   :  { %851 = vmatpush.bf16.msrb.mxu1 %v1859_v57  ;;  %472 = vmatmul.bf16.vlgmr.msra.gmra.mxu2 %v411_v61  ;;  %v667_v57 = vrot.slane %v665_v46, 3  ;;  %v1030_v61 = vshrl.u32 %v1870_v38, 16  ;;  %v1760_v46 = vld [vmem:[#allocation3 + $0x4] sm:$0xe]  ;;  %v1880_v47 = vld [vmem:[#allocation3 + $0x4] sm:$0xf0] }
  0x33   :  { %594 = vmatmul.bf16.vlgmr.msra.gmra.mxu3 %v533_v62  ;;  %963 = vmatpush.bf16.msrb.mxu2 %v1869_v63  ;;  %v1034_v62 = vrot.slane %v1032_v50, 1  ;;  %v1037_v63 = vshll.u32 %v2201_v49, 16  ;;  %v1881_v48 = vld [vmem:[#allocation3 + $0xc] sm:$0xff]  ;;  %v1761_v49 = vor.u32 %v1880_v47, %v1760_v46 }
  0x34   :  { %1099 = vmatpush.bf16.msrb.mxu3 %v1879_v0  ;;  %v621_v0 = vld [vmem:[#allocation3 + $0x10] sm:$0x7]  ;;  %v668_v5 = vor.u32 %v667_v57, %v664_v56  ;;  %v1166_v53 = vrot.slane %v1881_v48, 1 }
  0x35   :  { %730 = vmatpush.bf16.msrb.mxu0 %v1848_v1  ;;  %v1842_v1 = vld [vmem:[%s2271_s1 + $0x100] sm:$0xff]  ;;  %v648_v8 = vunpack.c.l.b16 %v621_v0  ;;  %v1039_v12 = vrot.slane %v1037_v63, 1 }
  0x36   :  { %852 = vmatpush.bf16.msrb.mxu1 %v1858_v2  ;;  %v1852_v2 = vld [vmem:[%s2271_s1 + $0x140] sm:$0xff] }
  0x37   :  { %964 = vmatpush.bf16.msrb.mxu2 %v1868_v6  ;;  %v796_v6 = vrot.slane %v1593_v59, 3  ;;  %v651_v17 = vpack.c.b16 %v648_v8, %v648_v8 }
  0x38   :  { %1100 = vmatpush.bf16.msrb.mxu3 %v1878_v7  ;;  %v797_v7 = vrot.slane %v2212_v58, 3 }
  0x39   :  { %731 = vmatpush.bf16.msrb.mxu0 %v1847_v10  ;;  %v1872_v10 = vld [vmem:[%s2271_s1 + $0x1c0] sm:$0xff]  ;;  %v671_v22 = vshrl.u32 %v651_v17, 16  ;;  %v674_v23 = vshll.u32 %v651_v17, 16 }
  0x3a   :  { %853 = vmatpush.bf16.msrb.mxu1 %v1857_v11  ;;  %v1035_v11 = vor.u32 %v1034_v62, %v1030_v61 }
  0x3b   :  { %965 = vmatpush.bf16.msrb.mxu2 %v1867_v14  ;;  %v669_v14 = vsel %vm652_vm3, %v660_v3, %v668_v5  ;;  %v673_v27 = vrot.slane %v671_v22, 2 }
  0x3c   :  { %1101 = vmatpush.bf16.msrb.mxu3 %v1877_v15  ;;  %v798_v15 = vsel %vm795_vm4, %v796_v6, %v797_v7 }
  0x3d   :  { %732 = vmatpush.bf16.msrb.mxu0 %v1846_v18  ;;  %v1040_v18 = vsel %vm271_vm0, %v1035_v11, %v1039_v12 }
  0x3e   :  { %854 = vmatpush.bf16.msrb.mxu1 %v1856_v19  ;;  %v1888_v19 = vld [vmem:[%s2271_s1 + $0x230] sm:$0xff] }
  0x3f   :  { %966 = vmatpush.bf16.msrb.mxu2 %v1866_v24  ;;  %v791_v24 = vunpack.c.l.b16 %v764_v20 }
  0x40   :  { %1102 = vmatpush.bf16.msrb.mxu3 %v1876_v25  ;;  %222 = vmatmul.bf16.gmra.mxu0 %v1801_v30  ;;  %v1887_v25 = vld [vmem:[%s2271_s1 + $0x228] sm:$0xff]  ;;  %v1886_v30 = vld [vmem:[%s2271_s1 + $0x220] sm:$0xff] }
  0x41   :  { %733 = vmatpush.bf16.msrb.mxu0 %v1845_v28  ;;  %355 = vmatmul.bf16.gmra.mxu1 %v291_v32  ;;  %v676_v28 = vrot.slane %v674_v23, 3  ;;  %v1045_v32 = vshll.u32 %v1028_v26, 16 }
  0x42   :  { %855 = vmatpush.bf16.msrb.mxu1 %v1855_v29  ;;  %477 = vmatmul.bf16.gmra.mxu2 %v413_v34  ;;  %v794_v29 = vpack.c.b16 %v791_v24, %v791_v24 }
  0x43   :  { %599 = vmatmul.bf16.gmra.mxu3 %v535_v35  ;;  %967 = vmatpush.bf16.msrb.mxu2 %v1865_v36  ;;  %v677_v33 = vor.u32 %v676_v28, %v673_v27  ;;  %v1043_v35 = vor.u32 %v1041_v31, %v1039_v12  ;;  %v1047_v36 = vrot.slane %v1045_v32, 1 }
  0x44   :  { %1103 = vmatpush.bf16.msrb.mxu3 %v1875_v37  ;;  %v799_v34 = vrot.slane %v794_v29, 3  ;;  %v1885_v37 = vld [vmem:[%s2271_s1 + $0x218] sm:$0xff] }
  0x45   :  { %734 = vmatpush.bf16.msrb.mxu0 %v1844_v39  ;;  %v678_v38 = vsel %vm652_vm3, %v668_v5, %v677_v33  ;;  %v1048_v41 = vsel %vm271_vm0, %v1043_v35, %v1047_v36 }
  0x46   :  { %856 = vmatpush.bf16.msrb.mxu1 %v1854_v40  ;;  %v800_v39 = vsel %vm795_vm4, %v797_v7, %v799_v34  ;;  %v1861_v40 = vld [vmem:[#allocation3 + $0xc] sm:$0xff] }
  0x47   :  { %968 = vmatpush.bf16.msrb.mxu2 %v1864_v43  ;;  %v1134_v43 = vld [vmem:[#allocation3 + $0x14] sm:$0x1] }
  0x48   :  { %1104 = vmatpush.bf16.msrb.mxu3 %v1874_v44  ;;  %v1161_v44 = vunpack.c.l.b16 %v1134_v43 }
  0x49   :  { %735 = vmatpush.bf16.msrb.mxu0 %v1843_v51  ;;  %v1882_v51 = vld [vmem:[%s2271_s1 + $0x200] sm:$0xff] }
  0x4a   :  { %857 = vmatpush.bf16.msrb.mxu1 %v1853_v52  ;;  %v1164_v50 = vpack.c.b16 %v1161_v44, %v1161_v44  ;;  %v1165_v52 = vrot.slane %v1761_v49, 1 }
  0x4b   :  { %969 = vmatpush.bf16.msrb.mxu2 %v1863_v55 }
  0x4c   :  { %1105 = vmatpush.bf16.msrb.mxu3 %v1873_v60  ;;  %v1168_v54 = vrot.slane %v1164_v50, 1  ;;  %v1167_v55 = vsel %vm408_vm1, %v1165_v52, %v1166_v53 }
  0x4d   :  { %736 = vmatpush.bf16.msrb.mxu0 %v1842_v1 }
  0x4e   :  { %858 = vmatpush.bf16.msrb.mxu1 %v1852_v2  ;;  %v1169_v56 = vsel %vm408_vm1, %v1166_v53, %v1168_v54  ;;  %v1911_v53 = vld [vmem:[#allocation5] ss:$0 sm:$0xff] }
  0x4f   :  { %970 = vmatpush.bf16.msrb.mxu2 %v1862_v9 }
  0x50   :  { %1106 = vmatpush.bf16.msrb.mxu3 %v1872_v10  ;;  %737 = vmatmul.bf16.vlgmr.msrb.gmra.mxu0 %v669_v14 }
  0x51   :  { %1220 = vmatpush.bf16.msra.mxu0 %v1889_v4  ;;  %859 = vmatmul.bf16.vlgmr.msrb.gmra.mxu1 %v798_v15 }
  0x52   :  { %1901 = vmatpush.bf16.msra.mxu1 %v1889_v4  ;;  %971 = vmatmul.bf16.vlgmr.msrb.gmra.mxu2 %v1860_v16 }
  0x53   :  { %1107 = vmatmul.bf16.vlgmr.msrb.gmra.mxu3 %v1040_v18 }
  0x55   :  { %1221 = vmatpush.bf16.msra.mxu0 %v1888_v19 }
  0x56   :  { %1902 = vmatpush.bf16.msra.mxu1 %v1888_v19 }
  0x59   :  { %1222 = vmatpush.bf16.msra.mxu0 %v1887_v25 }
  0x5a   :  { %1903 = vmatpush.bf16.msra.mxu1 %v1887_v25 }
  0x5d   :  { %1223 = vmatpush.bf16.msra.mxu0 %v1886_v30 }
  0x5e   :  { %1904 = vmatpush.bf16.msra.mxu1 %v1886_v30 }
  0x60   :  { %742 = vmatmul.bf16.gmra.mxu0 %v678_v38 }
  0x61   :  { %1224 = vmatpush.bf16.msra.mxu0 %v1885_v37  ;;  %864 = vmatmul.bf16.gmra.mxu1 %v800_v39 }
  0x62   :  { %1905 = vmatpush.bf16.msra.mxu1 %v1885_v37  ;;  %976 = vmatmul.bf16.gmra.mxu2 %v1861_v40 }
  0x63   :  { %1112 = vmatmul.bf16.gmra.mxu3 %v1048_v41 }
  0x65   :  { %1225 = vmatpush.bf16.msra.mxu0 %v1884_v42 }
  0x66   :  { %1906 = vmatpush.bf16.msra.mxu1 %v1884_v42 }
  0x69   :  { %1226 = vmatpush.bf16.msra.mxu0 %v1883_v45 }
  0x6a   :  { %1907 = vmatpush.bf16.msra.mxu1 %v1883_v45 }
  0x6d   :  { %1227 = vmatpush.bf16.msra.mxu0 %v1882_v51 }
  0x6e   :  { %1908 = vmatpush.bf16.msra.mxu1 %v1882_v51 }
  0x70   :  { %1228 = vmatmul.bf16.vlgmr.msra.gmra.mxu0 %v1167_v55 }
  0x71   :  { %1233 = vmatmul.bf16.vlgmr.msra.gmra.mxu1 %v1169_v56 }
  0xad   :  { %v218_v57 = vpop.f32.mrf.mxu0 }
  0xae   :  { %v351_v58 = vpop.f32.mrf.mxu1 }
  0xaf   :  { %v361_v18 = vadd.f32 %v351_v58, %v218_v57 }
  0xb5   :  { %v473_v59 = vpop.f32.mrf.mxu2  ;;  %v220_v61 = vpop.f32.mrf.mxu0 }
  0xb6   :  { %v595_v60 = vpop.f32.mrf.mxu3  ;;  %v353_v62 = vpop.f32.mrf.mxu1  ;;  %v483_v21 = vadd.f32 %v473_v59, %v361_v18 }
  0xb7   :  { %v362_v23 = vadd.f32 %v353_v62, %v220_v61  ;;  %v1912_v61 = vld [vmem:[#allocation7] ss:$0 sm:$0xff] }
  0xb8   :  { %v605_v25 = vadd.f32 %v595_v60, %v483_v21 }
  0xbd   :  { %v475_v63 = vpop.f32.mrf.mxu2  ;;  %v223_v1 = vpop.f32.mrf.mxu0 }
  0xbe   :  { %v597_v0 = vpop.f32.mrf.mxu3  ;;  %v356_v2 = vpop.f32.mrf.mxu1  ;;  %v484_v26 = vadd.f32 %v475_v63, %v362_v23 }
  0xbf   :  { %v363_v19 = vadd.f32 %v356_v2, %v223_v1 }
  0xc0   :  { %v606_v34 = vadd.f32 %v597_v0, %v484_v26 }
  0xc5   :  { %v478_v3 = vpop.f32.mrf.mxu2  ;;  %v225_v5 = vpop.f32.mrf.mxu0 }
  0xc6   :  { %v600_v4 = vpop.f32.mrf.mxu3  ;;  %v358_v6 = vpop.f32.mrf.mxu1  ;;  %v485_v22 = vadd.f32 %v478_v3, %v363_v19 }
  0xc7   :  { %v364_v24 = vadd.f32 %v358_v6, %v225_v5 }
  0xc8   :  { %v607_v27 = vadd.f32 %v600_v4, %v485_v22 }
  0xcd   :  { %v480_v7 = vpop.f32.mrf.mxu2  ;;  %v738_v9 = vpop.f32.mrf.mxu0 }
  0xce   :  { %v602_v8 = vpop.f32.mrf.mxu3  ;;  %v860_v10 = vpop.f32.mrf.mxu1  ;;  %v486_v28 = vadd.f32 %v480_v7, %v364_v24  ;;  %v748_v32 = vadd.f32 %v738_v9, %v605_v25 }
  0xd0   :  { %v608_v35 = vadd.f32 %v602_v8, %v486_v28  ;;  %v870_v37 = vadd.f32 %v860_v10, %v748_v32 }
  0xd5   :  { %v972_v11 = vpop.f32.mrf.mxu2  ;;  %v740_v13 = vpop.f32.mrf.mxu0 }
  0xd6   :  { %v1108_v12 = vpop.f32.mrf.mxu3  ;;  %v862_v14 = vpop.f32.mrf.mxu1  ;;  %v749_v38 = vadd.f32 %v740_v13, %v606_v34  ;;  %v982_v41 = vadd.f32 %v972_v11, %v870_v37 }
  0xd8   :  { %v871_v46 = vadd.f32 %v862_v14, %v749_v38  ;;  %v1118_v48 = vadd.f32 %v1108_v12, %v982_v41 }
  0xdd   :  { %v974_v15 = vpop.f32.mrf.mxu2  ;;  %v743_v16 = vpop.f32.mrf.mxu0 }
  0xde   :  { %v865_v17 = vpop.f32.mrf.mxu1  ;;  %v1110_v20 = vpop.f32.mrf.mxu3  ;;  %v750_v33 = vadd.f32 %v743_v16, %v607_v27  ;;  %v983_v49 = vadd.f32 %v974_v15, %v871_v46 }
  0xe0   :  { %v872_v39 = vadd.f32 %v865_v17, %v750_v33  ;;  %v1119_v56 = vadd.f32 %v1110_v20, %v983_v49 }
  0xe5   :  { %v977_v29 = vpop.f32.mrf.mxu2  ;;  %v745_v30 = vpop.f32.mrf.mxu0 }
  0xe6   :  { %v867_v31 = vpop.f32.mrf.mxu1  ;;  %v1113_v36 = vpop.f32.mrf.mxu3  ;;  %v751_v40 = vadd.f32 %v745_v30, %v608_v35  ;;  %v984_v42 = vadd.f32 %v977_v29, %v872_v39 }
  0xe8   :  { %v873_v47 = vadd.f32 %v867_v31, %v751_v40  ;;  %v1120_v50 = vadd.f32 %v1113_v36, %v984_v42 }
  0xed   :  { %v979_v43 = vpop.f32.mrf.mxu2  ;;  %v1229_v44 = vpop.f32.mrf.mxu0 }
  0xee   :  { %v1234_v45 = vpop.f32.mrf.mxu1  ;;  %v985_v51 = vadd.f32 %v979_v43, %v873_v47  ;;  %v1239_v52 = vadd.f32 %v1229_v44, %v1118_v48  ;;  %v1115_v55 = vpop.f32.mrf.mxu3 }
  0xef   :  { %v1241_v54 = vadd.f32 %v1234_v45, %v1120_v50 }
  0xf0   :  { %v1121_v57 = vadd.f32 %v1115_v55, %v985_v51  ;;  %v1255_v60 = vmul.f32 %v1911_v53, %v1239_v52 }
  0xf1   :  { %v1257_v62 = vmul.f32 %v1911_v53, %v1241_v54 }
  0xf2   :  { %v1263_v3 = vadd.f32 %v1912_v61, %v1255_v60 }
  0xf3   :  { %v1265_v4 = vadd.f32 %v1912_v61, %v1257_v62 }
  0xf5   :  { %v1231_v58 = vpop.f32.mrf.mxu0 }
  0xf6   :  { %v1236_v59 = vpop.f32.mrf.mxu1  ;;  %v1240_v63 = vadd.f32 %v1231_v58, %v1119_v56 }
  0xf7   :  { %v1242_v0 = vadd.f32 %v1236_v59, %v1121_v57 }
  0xf8   :  { %v1256_v1 = vmul.f32 %v1911_v53, %v1240_v63 }
  0xf9   :  { %v1258_v2 = vmul.f32 %v1911_v53, %v1242_v0 }
  0xfa   :  { %v1264_v5 = vadd.f32 %v1912_v61, %v1256_v1 }
  0xfb   :  { %v1266_v6 = vadd.f32 %v1912_v61, %v1258_v2 }
  0xfc   :  { %v1893_v7 = vpack.c.bf16 %v1264_v5, %v1263_v3 }
  0xfd   :  { %v1898_v8 = vpack.c.bf16 %v1266_v6, %v1265_v4 }
  0xfe   :  { %1894 = vst [vmem:[%s2274_s4] sm:$0xff] %v1893_v7  }
  0xff   :  { %1900 = vst [vmem:[%s2274_s4 + $0x8] sm:$0xff] %v1898_v8  }
 0x100   :  { %1279 = vsyncpa [#allocation6], 1 }
 0x101   :  { %1280 = vsyncpa [#allocation8], 1 }
 0x102   :  { %1281 = vsyncmov [#allocation4] }
 0x105   :  { %s1282_s5 = vpop.sfrf %1281 }
 0x106   :  { %p1798_p0 = scmp.ne.s32.totalorder %s1282_s5, 0 }
 0x108   :  { %1286 = shalt.err (%p1798_p0)  }
 0x109   :  { %1288 = vsyncmov [#allocation4 + $0x1] }
 0x10c   :  { %s1289_s6 = vpop.sfrf %1288 }
 0x10d   :  { %p1799_p1 = scmp.ne.s32.totalorder %s1289_s6, 0 }
 0x10f   :  { %1293 = shalt.err (%p1799_p1)  }

// kernel: _lambda_.116
= control target key start
LH: loop header
LB: loop body
LE: loop exit
PB: predicated region body
PF: predicated region fallthrough
CT: control target
= control target key end

     0   :  { %s574_s6 = smov 0   ;;  %s576_s7 = smov 0   ;;  %s708_s0 = inlined_call_operand.vmem [shape: bf16[16,1,1024], index: 0, kind: input, shape index: {}]   ;;  %s709_s1 = inlined_call_operand.vmem [shape: bf16[16,1024], index: 1, kind: output, shape index: {}]  }
   0x1   :  { %s578_s8 = smov 0  }
   0x2 LB: > { %s501_s9 = sadd.s32 4294967295, %s562_s8   ;;  %s591_s10 = sadd.s32 1, %s562_s8   ;;  %s562_s8 = sphi %s578_s8, %s713_s8   ;;  %s558_s7 = sphi %s576_s7, %s712_s7   ;;  %s554_s6 = sphi %s574_s6, %s711_s6  }
   0x3   : > { %s15_s11 = ssub.s32 %s562_s8, %s591_s10  ;;  %s18_s12 = sadd.s32 1, %s558_s7 }
   0x4   : > { %p16_p0 = scmp.eq.s32.totalorder %s15_s11, 0  ;;  %p25_p1 = scmp.ne.s32.totalorder %s558_s7, %s554_s6 }
   0x5   : > { %p26_p2 = scmp.eq.s32.totalorder %s562_s8, 0  ;;  %p55_p3 = scmp.eq.s32.totalorder %s501_s9, 3 }
   0x6   : > { %s602_s13 = scalar_select %p16_p0, %s558_s7, %s18_s12  }
   0x7   : > { %p27_p4 = por %p26_p2, %p25_p1  ;;  %p604_p5 = por %p55_p3, %p25_p1 }
   0x8   : > { %p504_p6 = scmp.ge.s32.totalorder %s562_s8, 4 }
   0xa   : > { %77 = sbr.rel (%p504_p6) target bundleno = 35 (0x23), region = 16 }
   0xf   : > { %80 = sbr.rel (!%p27_p4) target bundleno = 35 (0x23), region = 20  ;;  %s82_s15 = sand.u32 (%p27_p4), 1, %s558_s7  }
  0x10   : > { %s506_s16 = sshll.u32 (%p27_p4), %s562_s8, 1  ;;  %s505_s17 = sshll.u32 (%p27_p4), %s82_s15, 5 }
  0x11   : > { %s614_s20 = scalar_lea.vmem (%p27_p4), %s708_s0, %s506_s16  ;;  %s84_s21 = scalar_lea.vmem (%p27_p4), [#allocation2], %s505_s17 }
  0x12   : > { %v103_v0 = vld [vmem:[%s614_s20] sm:$0x3] (%p27_p4)  ;;  %v105_v1 = vld [vmem:[%s614_s20 + $0x8] sm:$0x3] (%p27_p4)  ;;  %v107_v2 = vld [vmem:[%s614_s20 + $0x10] sm:$0x3] (%p27_p4) }
  0x13   : > { %104 = vst [vmem:[%s84_s21] sm:$0x3] (%p27_p4), %v103_v0  ;;  %v109_v3 = vld [vmem:[%s614_s20 + $0x18] sm:$0x3] (%p27_p4)  ;;  %v111_v4 = vld [vmem:[%s614_s20 + $0x20] sm:$0x3] (%p27_p4) }
  0x14   : > { %106 = vst [vmem:[%s84_s21 + $0x2] sm:$0x3] %v105_v1  ;;  %v113_v5 = vld [vmem:[%s614_s20 + $0x28] sm:$0x3]  ;;  %v115_v6 = vld [vmem:[%s614_s20 + $0x30] sm:$0x3] }
  0x15   : > { %108 = vst [vmem:[%s84_s21 + $0x4] sm:$0x3] %v107_v2  ;;  %v117_v7 = vld [vmem:[%s614_s20 + $0x38] sm:$0x3]  ;;  %v119_v8 = vld [vmem:[%s614_s20 + $0x40] sm:$0x3] }
  0x16   : > { %110 = vst [vmem:[%s84_s21 + $0x6] sm:$0x3] %v109_v3  ;;  %v121_v9 = vld [vmem:[%s614_s20 + $0x48] sm:$0x3]  ;;  %v123_v10 = vld [vmem:[%s614_s20 + $0x50] sm:$0x3] }
  0x17   : > { %112 = vst [vmem:[%s84_s21 + $0x8] sm:$0x3] %v111_v4  ;;  %v125_v11 = vld [vmem:[%s614_s20 + $0x58] sm:$0x3]  ;;  %v127_v12 = vld [vmem:[%s614_s20 + $0x60] sm:$0x3] }
  0x18   : > { %114 = vst [vmem:[%s84_s21 + $0xa] sm:$0x3] %v113_v5  ;;  %v129_v13 = vld [vmem:[%s614_s20 + $0x68] sm:$0x3]  ;;  %v131_v14 = vld [vmem:[%s614_s20 + $0x70] sm:$0x3] }
  0x19   : > { %116 = vst [vmem:[%s84_s21 + $0xc] sm:$0x3] %v115_v6  ;;  %v133_v15 = vld [vmem:[%s614_s20 + $0x78] sm:$0x3] }
  0x1a   : > { %118 = vst [vmem:[%s84_s21 + $0xe] sm:$0x3] %v117_v7 }
  0x1b   : > { %120 = vst [vmem:[%s84_s21 + $0x10] sm:$0x3] %v119_v8 }
  0x1c   : > { %122 = vst [vmem:[%s84_s21 + $0x12] sm:$0x3] %v121_v9 }
  0x1d   : > { %124 = vst [vmem:[%s84_s21 + $0x14] sm:$0x3] %v123_v10 }
  0x1e   : > { %126 = vst [vmem:[%s84_s21 + $0x16] sm:$0x3] %v125_v11 }
  0x1f   : > { %128 = vst [vmem:[%s84_s21 + $0x18] sm:$0x3] %v127_v12 }
  0x20   : > { %130 = vst [vmem:[%s84_s21 + $0x1a] sm:$0x3] %v129_v13 }
  0x21   : > { %132 = vst [vmem:[%s84_s21 + $0x1c] sm:$0x3] %v131_v14 }
  0x22   : > { %134 = vst [vmem:[%s84_s21 + $0x1e] sm:$0x3] %v133_v15 }
  0x23 PF: > { %p507_p7 = scmp.ge.s32.totalorder %s562_s8, 1  ;;  %p189_p8 = scmp.lt.s32.totalorder %s562_s8, 5 }
  0x25   : > { %p190_p9 = pnand %p507_p7, %p189_p8 }
  0x26   : > { %s196_s22 = sand.u32 (!%p190_p9), 1, %s554_s6  }
  0x27   : > { %193 = sbr.rel (%p190_p9) target bundleno = 127 (0x7f), region = 61  ;;  %s508_s23 = sshll.u32 (!%p190_p9), %s196_s22, 5 }
  0x28   : > { %s637_s24 = scalar_lea.vmem (!%p190_p9), [#allocation2], %s508_s23  ;;  %s509_s25 = sshll.u32 (!%p190_p9), %s196_s22, 4 }
  0x29   : > { %s667_s26 = scalar_lea.vmem (!%p190_p9), [#allocation3], %s509_s25 }
  0x2c   : > { %v216_v16 = vld [vmem:[%s637_s24] sm:$0x3]  ;;  %v217_v17 = vld [vmem:[%s637_s24 + $0x2] sm:$0x3]  ;;  %v218_v18 = vld [vmem:[%s637_s24 + $0x4] sm:$0x3] }
  0x2d   : > { %233 = vst [vmem:[#allocation1] ss:$4 sm:$0xff] %v216_v16  ;;  %v219_v19 = vld [vmem:[%s637_s24 + $0x6] sm:$0x3]  ;;  %v220_v22 = vld [vmem:[%s637_s24 + $0x8] sm:$0x3] }
  0x2e   : > { %238 = vst [vmem:[#allocation1 + $0x20] ss:$4 sm:$0xff] %v217_v17  ;;  %v221_v23 = vld [vmem:[%s637_s24 + $0xa] sm:$0x3]  ;;  %v222_v30 = vld [vmem:[%s637_s24 + $0xc] sm:$0x3] }
  0x2f   : > { %v223_v31 = vld [vmem:[%s637_s24 + $0xe] sm:$0x3]  ;;  %vm330_vm0 = vcmask 1041409   ;;  %vm333_vm1 = vcmask 1042434   ;;  %vm336_vm2 = vcmask 1043459   ;;  %vm339_vm3 = vcmask 1044484  }
  0x30   : > { %v224_v54 = vld [vmem:[%s637_s24 + $0x10] sm:$0x3]  ;;  %v225_v55 = vld [vmem:[%s637_s24 + $0x12] sm:$0x3]  ;;  %vm342_vm4 = vcmask 1045509   ;;  %vm345_vm5 = vcmask 1046534  }
  0x31   : > { %vm348_vm6 = vcmask 1047559   ;;  %v226_v12 = vld [vmem:[%s637_s24 + $0x14] sm:$0x3]  ;;  %v227_v17 = vld [vmem:[%s637_s24 + $0x16] sm:$0x3]  ;;  %s515_s27 = sshll.u32 (%p604_p5), %s501_s9, 3 }
  0x32   : > { %s407_s30 = scalar_lea.vmem (%p604_p5), %s709_s1, %s515_s27 }
  0x34   : > { %v234_v20 = vld [vmem:[#allocation1] sm:$0xff] }
  0x35   : > { %242 = vst [vmem:[#allocation1] ss:$4 sm:$0xff] %v218_v18  ;;  %v239_v21 = vld [vmem:[#allocation1 + $0x20] sm:$0xff]  ;;  %v297_v35 = vunpack.c.l.b16 %v234_v20  ;;  %v298_v36 = vunpack.c.h.b16 %v234_v20 }
  0x36   : > { %246 = vst [vmem:[#allocation1 + $0x20] ss:$4 sm:$0xff] %v219_v19  ;;  %v299_v26 = vunpack.c.l.b16 %v239_v21  ;;  %v300_v27 = vunpack.c.h.b16 %v239_v21  ;;  %v228_v19 = vld [vmem:[%s637_s24 + $0x18] sm:$0x3]  ;;  %v229_v21 = vld [vmem:[%s637_s24 + $0x1a] sm:$0x3] }
  0x38   : > { %v329_v32 = vrot.slane %v299_v26, 7  ;;  %v350_v33 = vrot.slane %v300_v27, 7  ;;  %v230_v27 = vld [vmem:[%s637_s24 + $0x1c] sm:$0x3] }
  0x3a   : > { %v331_v44 = vsel %vm330_vm0, %v329_v32, %v297_v35  ;;  %v351_v45 = vsel %vm330_vm0, %v350_v33, %v298_v36  ;;  %v231_v33 = vld [vmem:[%s637_s24 + $0x1e] sm:$0x3] }
  0x3c   : > { %v243_v24 = vld [vmem:[#allocation1] sm:$0xff] }
  0x3d   : > { %250 = vst [vmem:[#allocation1] ss:$4 sm:$0xff] %v220_v22  ;;  %v247_v25 = vld [vmem:[#allocation1 + $0x20] sm:$0xff]  ;;  %v301_v28 = vunpack.c.l.b16 %v243_v24  ;;  %v302_v29 = vunpack.c.h.b16 %v243_v24 }
  0x3e   : > { %254 = vst [vmem:[#allocation1 + $0x20] ss:$4 sm:$0xff] %v221_v23  ;;  %v303_v37 = vunpack.c.l.b16 %v247_v25  ;;  %v304_v38 = vunpack.c.h.b16 %v247_v25 }
  0x3f   : > { %v332_v42 = vrot.slane %v301_v28, 6  ;;  %v352_v43 = vrot.slane %v302_v29, 6 }
  0x40   : > { %v335_v48 = vrot.slane %v303_v37, 5  ;;  %v354_v49 = vrot.slane %v304_v38, 5 }
  0x41   : > { %v334_v50 = vsel %vm333_vm1, %v332_v42, %v331_v44  ;;  %v353_v52 = vsel %vm333_vm1, %v352_v43, %v351_v45 }
  0x42   : > { %v337_v57 = vsel %vm336_vm2, %v335_v48, %v334_v50  ;;  %v355_v59 = vsel %vm336_vm2, %v354_v49, %v353_v52 }
  0x44   : > { %v251_v34 = vld [vmem:[#allocation1] sm:$0xff] }
  0x45   : > { %258 = vst [vmem:[#allocation1] ss:$4 sm:$0xff] %v222_v30  ;;  %v255_v39 = vld [vmem:[#allocation1 + $0x20] sm:$0xff]  ;;  %v305_v40 = vunpack.c.l.b16 %v251_v34  ;;  %v306_v41 = vunpack.c.h.b16 %v251_v34 }
  0x46   : > { %262 = vst [vmem:[#allocation1 + $0x20] ss:$4 sm:$0xff] %v223_v31  ;;  %v307_v46 = vunpack.c.l.b16 %v255_v39  ;;  %v308_v47 = vunpack.c.h.b16 %v255_v39 }
  0x47   : > { %v338_v51 = vrot.slane %v305_v40, 4  ;;  %v356_v53 = vrot.slane %v306_v41, 4 }
  0x48   : > { %v341_v58 = vrot.slane %v307_v46, 3  ;;  %v358_v60 = vrot.slane %v308_v47, 3 }
  0x49   : > { %v340_v0 = vsel %vm339_vm3, %v338_v51, %v337_v57  ;;  %v357_v1 = vsel %vm339_vm3, %v356_v53, %v355_v59 }
  0x4a   : > { %v343_v6 = vsel %vm342_vm4, %v341_v58, %v340_v0  ;;  %v359_v8 = vsel %vm342_vm4, %v358_v60, %v357_v1 }
  0x4c   : > { %v259_v56 = vld [vmem:[#allocation1] sm:$0xff] }
  0x4d   : > { %266 = vst [vmem:[#allocation1] ss:$4 sm:$0xff] %v224_v54  ;;  %v263_v61 = vld [vmem:[#allocation1 + $0x20] sm:$0xff]  ;;  %v309_v62 = vunpack.c.l.b16 %v259_v56  ;;  %v310_v63 = vunpack.c.h.b16 %v259_v56 }
  0x4e   : > { %270 = vst [vmem:[#allocation1 + $0x20] ss:$4 sm:$0xff] %v225_v55  ;;  %v311_v2 = vunpack.c.l.b16 %v263_v61  ;;  %v312_v3 = vunpack.c.h.b16 %v263_v61 }
  0x4f   : > { %v344_v4 = vrot.slane %v309_v62, 2  ;;  %v360_v5 = vrot.slane %v310_v63, 2 }
  0x50   : > { %v347_v7 = vrot.slane %v311_v2, 1  ;;  %v362_v9 = vrot.slane %v312_v3, 1 }
  0x51   : > { %v346_v10 = vsel %vm345_vm5, %v344_v4, %v343_v6  ;;  %v361_v11 = vsel %vm345_vm5, %v360_v5, %v359_v8 }
  0x52   : > { %v349_v13 = vsel %vm348_vm6, %v347_v7, %v346_v10  ;;  %v363_v14 = vsel %vm348_vm6, %v362_v9, %v361_v11 }
  0x53   : > { %v392_v15 = vpack.c.b16 %v363_v14, %v349_v13 }
  0x54   : > { %v267_v16 = vld [vmem:[#allocation1] sm:$0xff] }
  0x55   : > { %274 = vst [vmem:[#allocation1] ss:$4 sm:$0xff] %v226_v12  ;;  %v271_v18 = vld [vmem:[#allocation1 + $0x20] sm:$0xff]  ;;  %v313_v30 = vunpack.c.l.b16 %v267_v16  ;;  %v314_v31 = vunpack.c.h.b16 %v267_v16 }
  0x56   : > { %396 = vst [vmem:[%s667_s26] sm:$0xff] %v392_v15  ;;  %v315_v23 = vunpack.c.l.b16 %v271_v18  ;;  %v316_v24 = vunpack.c.h.b16 %v271_v18 }
  0x57   : > { %278 = vst [vmem:[#allocation1 + $0x20] ss:$4 sm:$0xff] %v227_v17 }
  0x58   : > { %v364_v28 = vrot.slane %v315_v23, 7  ;;  %v378_v29 = vrot.slane %v316_v24, 7 }
  0x5a   : > { %v365_v41 = vsel %vm330_vm0, %v364_v28, %v313_v30  ;;  %v379_v42 = vsel %vm330_vm0, %v378_v29, %v314_v31 }
  0x5c   : > { %v275_v20 = vld [vmem:[#allocation1] sm:$0xff] }
  0x5d   : > { %282 = vst [vmem:[#allocation1] ss:$4 sm:$0xff] %v228_v19  ;;  %v317_v25 = vunpack.c.l.b16 %v275_v20  ;;  %v318_v26 = vunpack.c.h.b16 %v275_v20  ;;  %v438_v10 = vld [vmem:[%s667_s26] sm:$0xff] (%p604_p5) }
  0x5e   : > { %v279_v22 = vld [vmem:[#allocation1 + $0x20] sm:$0xff]  ;;  %439 = vst [vmem:[%s407_s30] sm:$0xff] (%p604_p5), %v438_v10 }
  0x5f   : > { %286 = vst [vmem:[#allocation1 + $0x20] ss:$4 sm:$0xff] %v229_v21  ;;  %v319_v34 = vunpack.c.l.b16 %v279_v22  ;;  %v320_v35 = vunpack.c.h.b16 %v279_v22  ;;  %v366_v38 = vrot.slane %v317_v25, 6  ;;  %v380_v39 = vrot.slane %v318_v26, 6 }
  0x61   : > { %v368_v45 = vrot.slane %v319_v34, 5  ;;  %v382_v46 = vrot.slane %v320_v35, 5  ;;  %v367_v47 = vsel %vm333_vm1, %v366_v38, %v365_v41  ;;  %v381_v49 = vsel %vm333_vm1, %v380_v39, %v379_v42 }
  0x63   : > { %v369_v52 = vsel %vm336_vm2, %v368_v45, %v367_v47  ;;  %v383_v54 = vsel %vm336_vm2, %v382_v46, %v381_v49 }
  0x64   : > { %v283_v32 = vld [vmem:[#allocation1] sm:$0xff] }
  0x65   : > { %290 = vst [vmem:[#allocation1] ss:$4 sm:$0xff] %v230_v27  ;;  %v321_v36 = vunpack.c.l.b16 %v283_v32  ;;  %v322_v37 = vunpack.c.h.b16 %v283_v32 }
  0x66   : > { %v287_v40 = vld [vmem:[#allocation1 + $0x20] sm:$0xff] }
  0x67   : > { %294 = vst [vmem:[#allocation1 + $0x20] ss:$4 sm:$0xff] %v231_v33  ;;  %v323_v43 = vunpack.c.l.b16 %v287_v40  ;;  %v324_v44 = vunpack.c.h.b16 %v287_v40  ;;  %v370_v48 = vrot.slane %v321_v36, 4  ;;  %v384_v50 = vrot.slane %v322_v37, 4 }
  0x69   : > { %v372_v53 = vrot.slane %v323_v43, 3  ;;  %v386_v55 = vrot.slane %v324_v44, 3  ;;  %v371_v58 = vsel %vm339_vm3, %v370_v48, %v369_v52  ;;  %v385_v59 = vsel %vm339_vm3, %v384_v50, %v383_v54 }
  0x6b   : > { %v373_v1 = vsel %vm342_vm4, %v372_v53, %v371_v58  ;;  %v387_v2 = vsel %vm342_vm4, %v386_v55, %v385_v59 }
  0x6c   : > { %v291_v51 = vld [vmem:[#allocation1] sm:$0xff] }
  0x6d   : > { %v325_v56 = vunpack.c.l.b16 %v291_v51  ;;  %v326_v57 = vunpack.c.h.b16 %v291_v51 }
  0x6e   : > { %v295_v60 = vld [vmem:[#allocation1 + $0x20] sm:$0xff] }
  0x6f   : > { %v327_v61 = vunpack.c.l.b16 %v295_v60  ;;  %v328_v62 = vunpack.c.h.b16 %v295_v60  ;;  %v374_v63 = vrot.slane %v325_v56, 2  ;;  %v388_v0 = vrot.slane %v326_v57, 2 }
  0x71   : > { %v375_v3 = vsel %vm345_vm5, %v374_v63, %v373_v1  ;;  %v376_v4 = vrot.slane %v327_v61, 1  ;;  %v389_v5 = vsel %vm345_vm5, %v388_v0, %v387_v2  ;;  %v390_v6 = vrot.slane %v328_v62, 1 }
  0x72   : > { %404 = sbr.rel (!%p604_p5) target bundleno = 127 (0x7f), region = 69 }
  0x73   : > { %v377_v7 = vsel %vm348_vm6, %v376_v4, %v375_v3  ;;  %v391_v8 = vsel %vm348_vm6, %v390_v6, %v389_v5 }
  0x74   : > { %v393_v9 = vpack.c.b16 %v391_v8, %v377_v7 }
  0x76   : > { %397 = vst [vmem:[%s667_s26 + $0x8] sm:$0xff] %v393_v9 }
  0x7d   : > { %v440_v11 = vld [vmem:[%s667_s26 + $0x8] sm:$0xff] }
  0x7e   : > { %441 = vst [vmem:[%s407_s30 + $0x20] sm:$0xff] %v440_v11 }
  0x7f PF: > { %p8_p10 = scmp.ge.s32.totalorder %s591_s10, 6   ;;  %s711_s6 = smov %s558_s7 }
  0x80   : > { %s712_s7 = smov %s602_s13  ;;  %s713_s8 = smov %s591_s10 }
  0x81   :  { %10 = sbr.rel (!%p8_p10) target bundleno = 2 (0x2), region = 139 }

// kernel: _lambda_.107
= control target key start
LH: loop header
LB: loop body
LE: loop exit
PB: predicated region body
PF: predicated region fallthrough
CT: control target
= control target key end

     0   :  { %9 = vsyncpa [#allocation6], 0  ;;  %s2299_s0 = inlined_call_operand.vmem [shape: bf16[48,128], index: 0, kind: input, shape index: {}]   ;;  %s2300_s1 = inlined_call_operand.vmem [shape: bf16[9,128,128], index: 1, kind: input, shape index: {}]   ;;  %s2301_s2 = inlined_call_operand.hbm [shape: f32[1,128], index: 2, kind: input, shape index: {}]   ;;  %s2302_s3 = inlined_call_operand.hbm [shape: f32[1,128], index: 3, kind: input, shape index: {}]   ;;  %s2303_s4 = inlined_call_operand.vmem [shape: bf16[32,128], index: 4, kind: output, shape index: {}]  }
   0x1   :  { %s18_s17 = sshll.u32 %s2301_s2, 4  ;;  %s19_s17 = int_to_ptr.hbm [resolvable:$true] %s18_s17 }
   0x2   :  { %10 = vsyncpa [#allocation8], 0  ;;  %s1996_s18 = smov [#allocation5]   ;;  %s29_s22 = sshll.u32 %s2302_s3, 4  ;;  %s30_s22 = int_to_ptr.hbm [resolvable:$true] %s29_s22 }
   0x3   :  { %s20_s19 = sshll.u32 %s1996_s18, 4  ;;  %s1997_s23 = smov [#allocation7]   ;;  %s21_s19 = int_to_ptr.vmem [resolvable:$true] %s20_s19 }
   0x4   :  { %23 = dma.hbm_to_vmem [thread:$0]  %s19_s17, 16, %s21_s19, [#allocation6]  }
   0x5   :  { %s31_s24 = sshll.u32 %s1997_s23, 4  ;;  %s32_s24 = int_to_ptr.vmem [resolvable:$true] %s31_s24 }
   0x6   :  { %34 = dma.hbm_to_vmem [thread:$0]  %s30_s22, 16, %s32_s24, [#allocation8]  }
   0x7   :  { %1990 = dma.done.wait [#allocation6], 16  }
   0x8   :  { %1991 = vsyncadd [#allocation6], 4294967280 }
   0x9   :  { %1992 = dma.done.wait [#allocation8], 16  }
   0xa   :  { %1993 = vsyncadd [#allocation8], 4294967280  ;;  %v71_v0 = vld [vmem:[%s2299_s0] sm:$0xff]  ;;  %v73_v1 = vld [vmem:[%s2299_s0 + $0x8] sm:$0xff] }
   0xb   :  { %v75_v2 = vld [vmem:[%s2299_s0 + $0x10] sm:$0xff]  ;;  %72 = vst [vmem:[#allocation3] sm:$0xff] %v71_v0 }
   0xc   :  { %74 = vst [vmem:[#allocation3 + $0x8] sm:$0xff] %v73_v1 }
   0xd   :  { %76 = vst [vmem:[#allocation3 + $0x10] sm:$0xff] %v75_v2 }
   0xe   :  { %82 = vsyncadd [#allocation4], 384 }
   0xf   :  { %1994 = dma.done.wait [#allocation4], 384 }
  0x10   :  { %1995 = vsyncadd [#allocation4], 4294966912  ;;  %v1838_v3 = vld [vmem:[%s2300_s1 + $0x38] sm:$0xff]  ;;  %v1837_v7 = vld [vmem:[%s2300_s1 + $0x30] sm:$0xff]  ;;  %vm271_vm0 = vsmask.f32 7424 }
  0x11   :  { %v1848_v4 = vld [vmem:[%s2300_s1 + $0x78] sm:$0xff]  ;;  %209 = vmatpush.bf16.msra.mxu0 %v1838_v3  ;;  %v1847_v8 = vld [vmem:[%s2300_s1 + $0x70] sm:$0xff]  ;;  %v1836_v11 = vld [vmem:[%s2300_s1 + $0x28] sm:$0xff]  ;;  %vm408_vm1 = vcmask 1046528   ;;  %vm530_vm2 = vsmask.f32 6400 }
  0x12   :  { %v1858_v5 = vld [vmem:[%s2300_s1 + $0xb8] sm:$0xff]  ;;  %342 = vmatpush.bf16.msra.mxu1 %v1848_v4  ;;  %v1857_v9 = vld [vmem:[%s2300_s1 + $0xb0] sm:$0xff]  ;;  %v1846_v12 = vld [vmem:[%s2300_s1 + $0x68] sm:$0xff]  ;;  %vm673_vm3 = vcmask 1045504   ;;  %vm795_vm4 = vsmask.f32 5376 }
  0x13   :  { %v1868_v6 = vld [vmem:[%s2300_s1 + $0xf8] sm:$0xff]  ;;  %464 = vmatpush.bf16.msra.mxu2 %v1858_v5  ;;  %v1867_v10 = vld [vmem:[%s2300_s1 + $0xf0] sm:$0xff]  ;;  %v1856_v13 = vld [vmem:[%s2300_s1 + $0xa8] sm:$0xff]  ;;  %vm938_vm5 = vcmask 1044480   ;;  %vm1060_vm6 = vsmask.f32 4352 }
  0x14   :  { %607 = vmatpush.bf16.msra.mxu3 %v1868_v6  ;;  %v1866_v14 = vld [vmem:[%s2300_s1 + $0xe8] sm:$0xff]  ;;  %v1835_v15 = vld [vmem:[%s2300_s1 + $0x20] sm:$0xff]  ;;  %v1834_v21 = vld [vmem:[%s2300_s1 + $0x18] sm:$0xff] }
  0x15   :  { %210 = vmatpush.bf16.msra.mxu0 %v1837_v7  ;;  %v1845_v16 = vld [vmem:[%s2300_s1 + $0x60] sm:$0xff]  ;;  %v1844_v22 = vld [vmem:[%s2300_s1 + $0x58] sm:$0xff]  ;;  %v1860_v26 = vld [vmem:[#allocation3 + $0x8] sm:$0xff] }
  0x16   :  { %343 = vmatpush.bf16.msra.mxu1 %v1847_v8  ;;  %v1855_v17 = vld [vmem:[%s2300_s1 + $0xa0] sm:$0xff]  ;;  %v1854_v24 = vld [vmem:[%s2300_s1 + $0x98] sm:$0xff]  ;;  %v1833_v28 = vld [vmem:[%s2300_s1 + $0x10] sm:$0xff]  ;;  %v540_v38 = vshrl.u32 %v1860_v26, 16  ;;  %v543_v39 = vshll.u32 %v1860_v26, 16 }
  0x17   :  { %465 = vmatpush.bf16.msra.mxu2 %v1857_v9  ;;  %v1865_v18 = vld [vmem:[%s2300_s1 + $0xe0] sm:$0xff]  ;;  %v1864_v25 = vld [vmem:[%s2300_s1 + $0xd8] sm:$0xff]  ;;  %v1843_v29 = vld [vmem:[%s2300_s1 + $0x50] sm:$0xff] }
  0x18   :  { %608 = vmatpush.bf16.msra.mxu3 %v1867_v10  ;;  %v1509_v19 = vld [vmem:[#allocation3] sm:$0xe]  ;;  %v1859_v20 = vld [vmem:[#allocation3] sm:$0xf0]  ;;  %v1853_v30 = vld [vmem:[%s2300_s1 + $0x90] sm:$0xff]  ;;  %v542_v51 = vrot.slane %v540_v38, 1 }
  0x19   :  { %211 = vmatpush.bf16.msra.mxu0 %v1836_v11  ;;  %v1839_v23 = vld [vmem:[#allocation3] sm:$0xff]  ;;  %v1510_v27 = vor.u32 %v1859_v20, %v1509_v19  ;;  %v1863_v31 = vld [vmem:[%s2300_s1 + $0xd0] sm:$0xff]  ;;  %v2110_v32 = vld [vmem:[#allocation3 + $0x8] sm:$0xff]  ;;  %v545_v52 = vrot.slane %v543_v39, 2 }
  0x1a   :  { %344 = vmatpush.bf16.msra.mxu1 %v1846_v12  ;;  %v275_v33 = vshll.u32 %v1839_v23, 16  ;;  %v1453_v34 = vld [vmem:[#allocation3] sm:$0xe]  ;;  %v1849_v35 = vld [vmem:[#allocation3] sm:$0xf0]  ;;  %v1832_v40 = vld [vmem:[%s2300_s1 + $0x8] sm:$0xff] }
  0x1b   :  { %466 = vmatpush.bf16.msra.mxu2 %v1856_v13  ;;  %v532_v36 = vshrl.u32 %v1510_v27, 16  ;;  %v535_v37 = vshll.u32 %v1510_v27, 16  ;;  %v1842_v41 = vld [vmem:[%s2300_s1 + $0x48] sm:$0xff]  ;;  %v273_v42 = vshrl.u32 %v1839_v23, 16  ;;  %v280_v44 = vshll.u32 %v2110_v32, 16  ;;  %v1831_v54 = vld [vmem:[%s2300_s1] sm:$0xff] }
  0x1c   :  { %609 = vmatpush.bf16.msra.mxu3 %v1866_v14  ;;  %v277_v43 = vrot.slane %v275_v33, 1  ;;  %v2119_v45 = vld [vmem:[#allocation3 + $0x8] sm:$0xff]  ;;  %v1454_v46 = vor.u32 %v1849_v35, %v1453_v34  ;;  %v499_v53 = vld [vmem:[#allocation3 + $0x10] sm:$0x3]  ;;  %v1841_v55 = vld [vmem:[%s2300_s1 + $0x40] sm:$0xff]  ;;  %v2142_v63 = vor.u32 %v545_v52, %v542_v51  ;;  %v284_v23 = vshrl.u32 %v2110_v32, 16 }
  0x1d   :  { %212 = vmatpush.bf16.msra.mxu0 %v1835_v15  ;;  %v1852_v47 = vld [vmem:[%s2300_s1 + $0x88] sm:$0xff]  ;;  %v534_v49 = vrot.slane %v532_v36, 1  ;;  %v537_v50 = vrot.slane %v535_v37, 2  ;;  %v2133_v57 = vrot.slane %v280_v44, 1  ;;  %v410_v58 = vrot.slane %v2119_v45, 1  ;;  %v1851_v59 = vld [vmem:[%s2300_s1 + $0x80] sm:$0xff] }
  0x1e   :  { %345 = vmatpush.bf16.msra.mxu1 %v1845_v16  ;;  %v1862_v48 = vld [vmem:[%s2300_s1 + $0xc8] sm:$0xff]  ;;  %v278_v56 = vor.u32 %v277_v43, %v273_v42  ;;  %v1861_v60 = vld [vmem:[%s2300_s1 + $0xc0] sm:$0xff]  ;;  %v409_v61 = vrot.slane %v1454_v46, 1  ;;  %v240_v0 = vld [vmem:[#allocation3 + $0x10] sm:$0x1]  ;;  %v526_v1 = vunpack.c.l.b16 %v499_v53 }
  0x1f   :  { %467 = vmatpush.bf16.msra.mxu2 %v1855_v17  ;;  %v538_v62 = vor.u32 %v537_v50, %v534_v49  ;;  %v1878_v2 = vld [vmem:[%s2300_s1 + $0x138] sm:$0xff]  ;;  %v1829_v4 = vld [vmem:[#allocation3] sm:$0xff]  ;;  %v267_v6 = vunpack.c.l.b16 %v240_v0  ;;  %v1877_v12 = vld [vmem:[%s2300_s1 + $0x130] sm:$0xff]  ;;  %v286_v34 = vor.u32 %v284_v23, %v2133_v57 }
  0x20   :  { %610 = vmatpush.bf16.msra.mxu3 %v1865_v18  ;;  %v1888_v3 = vld [vmem:[%s2300_s1 + $0x178] sm:$0xff]  ;;  %v283_v5 = vsel %vm271_vm0, %v278_v56, %v2133_v57  ;;  %v411_v7 = vsel %vm408_vm1, %v409_v61, %v410_v58  ;;  %v529_v11 = vpack.c.b16 %v526_v1, %v526_v1  ;;  %v1887_v13 = vld [vmem:[%s2300_s1 + $0x170] sm:$0xff]  ;;  %v1906_v26 = vld [vmem:[%s2300_s1 + $0x1e8] sm:$0xff] }
  0x21   :  { %213 = vmatpush.bf16.msra.mxu0 %v1834_v21  ;;  %v547_v8 = vsel %vm530_vm2, %v538_v62, %v2142_v63  ;;  %v1898_v9 = vld [vmem:[%s2300_s1 + $0x1b8] sm:$0xff]  ;;  %v377_v14 = vld [vmem:[#allocation3 + $0x10] sm:$0x1]  ;;  %v270_v15 = vpack.c.b16 %v267_v6, %v267_v6  ;;  %v1876_v21 = vld [vmem:[%s2300_s1 + $0x128] sm:$0xff] }
  0x22   :  { %346 = vmatpush.bf16.msra.mxu1 %v1844_v22  ;;  %v1908_v10 = vld [vmem:[%s2300_s1 + $0x1f8] sm:$0xff]  ;;  %v1897_v16 = vld [vmem:[%s2300_s1 + $0x1b0] sm:$0xff]  ;;  %v404_v18 = vunpack.c.l.b16 %v377_v14  ;;  %v549_v19 = vshrl.u32 %v529_v11, 16  ;;  %v552_v20 = vshll.u32 %v529_v11, 16  ;;  %v1886_v22 = vld [vmem:[%s2300_s1 + $0x168] sm:$0xff] }
  0x23   :  { %468 = vmatpush.bf16.msra.mxu2 %v1854_v24  ;;  %v1907_v17 = vld [vmem:[%s2300_s1 + $0x1f0] sm:$0xff]  ;;  %v288_v24 = vshll.u32 %v270_v15, 16  ;;  %v1895_v32 = vld [vmem:[%s2300_s1 + $0x1a0] sm:$0xff]  ;;  %v1874_v38 = vld [vmem:[%s2300_s1 + $0x118] sm:$0xff] }
  0x24   :  { %611 = vmatpush.bf16.msra.mxu3 %v1864_v25  ;;  %v1896_v25 = vld [vmem:[%s2300_s1 + $0x1a8] sm:$0xff]  ;;  %v407_v27 = vpack.c.b16 %v404_v18, %v404_v18  ;;  %v1905_v33 = vld [vmem:[%s2300_s1 + $0x1e0] sm:$0xff]  ;;  %v1894_v52 = vld [vmem:[%s2300_s1 + $0x198] sm:$0xff] }
  0x25   :  { %214 = vmatpush.bf16.msra.mxu0 %v1833_v28  ;;  %v551_v28 = vrot.slane %v549_v19, 1  ;;  %v290_v35 = vrot.slane %v288_v24, 1  ;;  %v1621_v39 = vld [vmem:[#allocation3] sm:$0xc]  ;;  %v1899_v43 = vld [vmem:[#allocation3] sm:$0xf0] }
  0x26   :  { %347 = vmatpush.bf16.msra.mxu1 %v1843_v29  ;;  %v554_v29 = vrot.slane %v552_v20, 2  ;;  %v412_v36 = vrot.slane %v407_v27, 1  ;;  %v1733_v42 = vld [vmem:[#allocation3] sm:$0x8]  ;;  %v1830_v44 = vld [vmem:[#allocation3 + $0x8] sm:$0xff]  ;;  %v1904_v53 = vld [vmem:[%s2300_s1 + $0x1d8] sm:$0xff] }
  0x27   :  { %469 = vmatpush.bf16.msra.mxu2 %v1853_v30  ;;  %v1875_v30 = vld [vmem:[%s2300_s1 + $0x120] sm:$0xff]  ;;  %v1880_v46 = vld [vmem:[#allocation3 + $0x8] sm:$0xff]  ;;  %v1873_v45 = vld [vmem:[%s2300_s1 + $0x110] sm:$0xff] }
  0x28   :  { %612 = vmatpush.bf16.msra.mxu3 %v1863_v31  ;;  %v1885_v31 = vld [vmem:[%s2300_s1 + $0x160] sm:$0xff]  ;;  %v555_v37 = vor.u32 %v554_v29, %v551_v28  ;;  %v1900_v49 = vld [vmem:[#allocation3 + $0x8] sm:$0xff]  ;;  %v413_v50 = vsel %vm408_vm1, %v410_v58, %v412_v36  ;;  %v1893_v56 = vld [vmem:[%s2300_s1 + $0x190] sm:$0xff] }
  0x29   :  { %215 = vmatpush.bf16.msra.mxu0 %v1832_v40  ;;  %v1879_v40 = vld [vmem:[#allocation3] sm:$0xf0]  ;;  %v1903_v57 = vld [vmem:[%s2300_s1 + $0x1d0] sm:$0xff]  ;;  %v1565_v58 = vld [vmem:[#allocation3] sm:$0xc]  ;;  %v1070_v0 = vshrl.u32 %v1900_v49, 16 }
  0x2a   :  { %348 = vmatpush.bf16.msra.mxu1 %v1842_v41  ;;  %v1884_v41 = vld [vmem:[%s2300_s1 + $0x158] sm:$0xff]  ;;  %v556_v51 = vsel %vm530_vm2, %v2142_v63, %v555_v37  ;;  %v1869_v61 = vld [vmem:[#allocation3] sm:$0xf0]  ;;  %v1073_v1 = vshll.u32 %v1900_v49, 16  ;;  %v1872_v6 = vld [vmem:[%s2300_s1 + $0x108] sm:$0xff] }
  0x2b   :  { %470 = vmatpush.bf16.msra.mxu2 %v1852_v47  ;;  %v291_v47 = vsel %vm271_vm0, %v286_v34, %v290_v35  ;;  %v1892_v11 = vld [vmem:[%s2300_s1 + $0x188] sm:$0xff]  ;;  %v1072_v20 = vrot.slane %v1070_v0, 3  ;;  %v1871_v23 = vld [vmem:[%s2300_s1 + $0x100] sm:$0xff]  ;;  %v1918_v28 = vld [vmem:[%s2300_s1 + $0x238] sm:$0xff] }
  0x2c   :  { %613 = vmatpush.bf16.msra.mxu3 %v1862_v48  ;;  %v1622_v48 = vor.u32 %v1879_v40, %v1621_v39  ;;  %v1881_v24 = vld [vmem:[%s2300_s1 + $0x140] sm:$0xff] }
  0x2d   :  { %216 = vmatpush.bf16.msra.mxu0 %v1831_v54  ;;  %v1734_v54 = vor.u32 %v1899_v43, %v1733_v42  ;;  %v1901_v34 = vld [vmem:[%s2300_s1 + $0x1c0] sm:$0xff] }
  0x2e   :  { %349 = vmatpush.bf16.msra.mxu1 %v1841_v55  ;;  %v1883_v55 = vld [vmem:[%s2300_s1 + $0x150] sm:$0xff]  ;;  %v797_v62 = vshrl.u32 %v1622_v48, 16  ;;  %v800_v63 = vshll.u32 %v1622_v48, 16 }
  0x2f   :  { %471 = vmatpush.bf16.msra.mxu2 %v1851_v59  ;;  %v805_v59 = vshrl.u32 %v1880_v46, 16  ;;  %v907_v48 = vld [vmem:[#allocation3 + $0x10] sm:$0x7] }
  0x30   :  { %614 = vmatpush.bf16.msra.mxu3 %v1861_v60  ;;  %217 = vmatmul.bf16.vlgmr.msra.gmra.mxu0 %v1829_v4  ;;  %v808_v60 = vshll.u32 %v1880_v46, 16  ;;  %v1062_v4 = vshrl.u32 %v1734_v54, 16  ;;  %v802_v14 = vrot.slane %v800_v63, 3  ;;  %v642_v46 = vld [vmem:[#allocation3 + $0x10] sm:$0x3] }
  0x31   :  { %729 = vmatpush.bf16.msrb.mxu0 %v1878_v2  ;;  %350 = vmatmul.bf16.vlgmr.msra.gmra.mxu1 %v283_v5  ;;  %v1677_v2 = vld [vmem:[#allocation3] sm:$0x8]  ;;  %v1065_v5 = vshll.u32 %v1734_v54, 16  ;;  %v669_v49 = vunpack.c.l.b16 %v642_v46 }
  0x32   :  { %872 = vmatpush.bf16.msrb.mxu1 %v1888_v3  ;;  %472 = vmatmul.bf16.vlgmr.msra.gmra.mxu2 %v411_v7  ;;  %v1889_v3 = vld [vmem:[#allocation3] sm:$0xf0]  ;;  %v1882_v7 = vld [vmem:[%s2300_s1 + $0x148] sm:$0xff]  ;;  %v810_v15 = vrot.slane %v808_v60, 3  ;;  %v1064_v18 = vrot.slane %v1062_v4, 3 }
  0x33   :  { %615 = vmatmul.bf16.vlgmr.msra.gmra.mxu3 %v547_v8  ;;  %994 = vmatpush.bf16.msrb.mxu2 %v1898_v9  ;;  %v2237_v8 = vld [vmem:[#allocation3 + $0x8] sm:$0xff]  ;;  %v1566_v9 = vor.u32 %v1869_v61, %v1565_v58  ;;  %v1067_v19 = vrot.slane %v1065_v5, 4  ;;  %v1915_v58 = vld [vmem:[%s2300_s1 + $0x220] sm:$0xff] }
  0x34   :  { %1137 = vmatpush.bf16.msrb.mxu3 %v1908_v10  ;;  %v807_v10 = vrot.slane %v805_v59, 2  ;;  %v675_v27 = vrot.slane %v2237_v8, 2  ;;  %v1912_v8 = vld [vmem:[%s2300_s1 + $0x208] sm:$0xff] }
  0x35   :  { %730 = vmatpush.bf16.msrb.mxu0 %v1877_v12  ;;  %v1902_v12 = vld [vmem:[%s2300_s1 + $0x1c8] sm:$0xff]  ;;  %v1068_v36 = vor.u32 %v1067_v19, %v1064_v18 }
  0x36   :  { %873 = vmatpush.bf16.msrb.mxu1 %v1887_v13  ;;  %v799_v13 = vrot.slane %v797_v62, 2 }
  0x37   :  { %995 = vmatpush.bf16.msrb.mxu2 %v1897_v16  ;;  %v2245_v16 = vld [vmem:[#allocation3 + $0x8] sm:$0xff] }
  0x38   :  { %1138 = vmatpush.bf16.msrb.mxu3 %v1907_v17  ;;  %v1678_v17 = vor.u32 %v1889_v3, %v1677_v2  ;;  %v803_v29 = vor.u32 %v802_v14, %v799_v13  ;;  %v1914_v2 = vld [vmem:[%s2300_s1 + $0x218] sm:$0xff] }
  0x39   :  { %731 = vmatpush.bf16.msrb.mxu0 %v1876_v21  ;;  %v1075_v21 = vrot.slane %v1073_v1, 4 }
  0x3a   :  { %874 = vmatpush.bf16.msrb.mxu1 %v1886_v22  ;;  %v764_v22 = vld [vmem:[#allocation3 + $0x10] sm:$0x7]  ;;  %v939_v35 = vrot.slane %v1678_v17, 3 }
  0x3b   :  { %996 = vmatpush.bf16.msrb.mxu2 %v1896_v25  ;;  %v1029_v25 = vld [vmem:[#allocation3 + $0x10] sm:$0xf]  ;;  %v1076_v37 = vor.u32 %v1075_v21, %v1072_v20 }
  0x3c   :  { %1139 = vmatpush.bf16.msrb.mxu3 %v1906_v26  ;;  %v674_v26 = vrot.slane %v1566_v9, 2  ;;  %v1911_v9 = vld [vmem:[%s2300_s1 + $0x200] sm:$0xff] }
  0x3d   :  { %732 = vmatpush.bf16.msrb.mxu0 %v1875_v30  ;;  %v811_v30 = vor.u32 %v810_v15, %v807_v10  ;;  %v1077_v43 = vsel %vm1060_vm6, %v1068_v36, %v1076_v37  ;;  %v1909_v10 = vld [vmem:[#allocation3 + $0x4] sm:$0xff] }
  0x3e   :  { %875 = vmatpush.bf16.msrb.mxu1 %v1885_v31  ;;  %v940_v31 = vrot.slane %v2245_v16, 3  ;;  %v676_v39 = vsel %vm673_vm3, %v674_v26, %v675_v27 }
  0x3f   :  { %997 = vmatpush.bf16.msrb.mxu2 %v1895_v32  ;;  %v791_v32 = vunpack.c.l.b16 %v764_v22  ;;  %v812_v40 = vsel %vm795_vm4, %v803_v29, %v811_v30 }
  0x40   :  { %1140 = vmatpush.bf16.msrb.mxu3 %v1905_v33  ;;  %222 = vmatmul.bf16.gmra.mxu0 %v1830_v44  ;;  %v1891_v33 = vld [vmem:[%s2300_s1 + $0x180] sm:$0xff]  ;;  %v941_v42 = vsel %vm938_vm5, %v939_v35, %v940_v31  ;;  %v1917_v44 = vld [vmem:[%s2300_s1 + $0x230] sm:$0xff] }
  0x41   :  { %733 = vmatpush.bf16.msrb.mxu0 %v1874_v38  ;;  %355 = vmatmul.bf16.gmra.mxu1 %v291_v47  ;;  %v1056_v38 = vunpack.c.l.b16 %v1029_v25 }
  0x42   :  { %876 = vmatpush.bf16.msrb.mxu1 %v1884_v41  ;;  %477 = vmatmul.bf16.gmra.mxu2 %v413_v50  ;;  %v794_v41 = vpack.c.b16 %v791_v32, %v791_v32 }
  0x43   :  { %620 = vmatmul.bf16.gmra.mxu3 %v556_v51  ;;  %998 = vmatpush.bf16.msrb.mxu2 %v1894_v52  ;;  %v1059_v47 = vpack.c.b16 %v1056_v38, %v1056_v38  ;;  %v1916_v52 = vld [vmem:[%s2300_s1 + $0x228] sm:$0xff] }
  0x44   :  { %1141 = vmatpush.bf16.msrb.mxu3 %v1904_v53  ;;  %v814_v50 = vshrl.u32 %v794_v41, 16  ;;  %v817_v51 = vshll.u32 %v794_v41, 16  ;;  %v934_v53 = vunpack.c.l.b16 %v907_v48 }
  0x45   :  { %734 = vmatpush.bf16.msrb.mxu0 %v1873_v45  ;;  %v1079_v54 = vshrl.u32 %v1059_v47, 16  ;;  %v1082_v45 = vshll.u32 %v1059_v47, 16 }
  0x46   :  { %877 = vmatpush.bf16.msrb.mxu1 %v1883_v55  ;;  %v672_v55 = vpack.c.b16 %v669_v49, %v669_v49  ;;  %v937_v59 = vpack.c.b16 %v934_v53, %v934_v53 }
  0x47   :  { %999 = vmatpush.bf16.msrb.mxu2 %v1893_v56  ;;  %v816_v56 = vrot.slane %v814_v50, 2  ;;  %v1081_v60 = vrot.slane %v1079_v54, 3  ;;  %v1084_v61 = vrot.slane %v1082_v45, 4 }
  0x48   :  { %1142 = vmatpush.bf16.msrb.mxu3 %v1903_v57  ;;  %v819_v57 = vrot.slane %v817_v51, 3  ;;  %v677_v62 = vrot.slane %v672_v55, 2  ;;  %v942_v0 = vrot.slane %v937_v59, 3 }
  0x49   :  { %735 = vmatpush.bf16.msrb.mxu0 %v1872_v6  ;;  %v1085_v1 = vor.u32 %v1084_v61, %v1081_v60 }
  0x4a   :  { %878 = vmatpush.bf16.msrb.mxu1 %v1882_v7  ;;  %v820_v63 = vor.u32 %v819_v57, %v816_v56  ;;  %v678_v3 = vsel %vm673_vm3, %v675_v27, %v677_v62  ;;  %v943_v5 = vsel %vm938_vm5, %v940_v31, %v942_v0  ;;  %v1913_v7 = vld [vmem:[%s2300_s1 + $0x210] sm:$0xff] }
  0x4b   :  { %1000 = vmatpush.bf16.msrb.mxu2 %v1892_v11  ;;  %v1086_v6 = vsel %vm1060_vm6, %v1076_v37, %v1085_v1  ;;  %v1910_v11 = vld [vmem:[#allocation3 + $0xc] sm:$0xff] }
  0x4c   :  { %1143 = vmatpush.bf16.msrb.mxu3 %v1902_v12  ;;  %v821_v4 = vsel %vm795_vm4, %v811_v30, %v820_v63 }
  0x4d   :  { %736 = vmatpush.bf16.msrb.mxu0 %v1871_v23 }
  0x4e   :  { %879 = vmatpush.bf16.msrb.mxu1 %v1881_v24 }
  0x4f   :  { %1001 = vmatpush.bf16.msrb.mxu2 %v1891_v33 }
  0x50   :  { %1144 = vmatpush.bf16.msrb.mxu3 %v1901_v34  ;;  %737 = vmatmul.bf16.vlgmr.msrb.gmra.mxu0 %v676_v39 }
  0x51   :  { %1249 = vmatpush.bf16.msra.mxu0 %v1918_v28  ;;  %880 = vmatmul.bf16.vlgmr.msrb.gmra.mxu1 %v812_v40 }
  0x52   :  { %1930 = vmatpush.bf16.msra.mxu1 %v1918_v28  ;;  %1002 = vmatmul.bf16.vlgmr.msrb.gmra.mxu2 %v941_v42 }
  0x53   :  { %1145 = vmatmul.bf16.vlgmr.msrb.gmra.mxu3 %v1077_v43 }
  0x55   :  { %1250 = vmatpush.bf16.msra.mxu0 %v1917_v44 }
  0x56   :  { %1931 = vmatpush.bf16.msra.mxu1 %v1917_v44 }
  0x59   :  { %1251 = vmatpush.bf16.msra.mxu0 %v1916_v52 }
  0x5a   :  { %1932 = vmatpush.bf16.msra.mxu1 %v1916_v52 }
  0x5d   :  { %1252 = vmatpush.bf16.msra.mxu0 %v1915_v58 }
  0x5e   :  { %1933 = vmatpush.bf16.msra.mxu1 %v1915_v58 }
  0x60   :  { %742 = vmatmul.bf16.gmra.mxu0 %v678_v3 }
  0x61   :  { %1253 = vmatpush.bf16.msra.mxu0 %v1914_v2  ;;  %885 = vmatmul.bf16.gmra.mxu1 %v821_v4 }
  0x62   :  { %1934 = vmatpush.bf16.msra.mxu1 %v1914_v2  ;;  %1007 = vmatmul.bf16.gmra.mxu2 %v943_v5 }
  0x63   :  { %1150 = vmatmul.bf16.gmra.mxu3 %v1086_v6 }
  0x65   :  { %1254 = vmatpush.bf16.msra.mxu0 %v1913_v7 }
  0x66   :  { %1935 = vmatpush.bf16.msra.mxu1 %v1913_v7 }
  0x69   :  { %1255 = vmatpush.bf16.msra.mxu0 %v1912_v8 }
  0x6a   :  { %1936 = vmatpush.bf16.msra.mxu1 %v1912_v8  ;;  %v1940_v8 = vld [vmem:[#allocation5] ss:$0 sm:$0xff] }
  0x6d   :  { %1256 = vmatpush.bf16.msra.mxu0 %v1911_v9 }
  0x6e   :  { %1937 = vmatpush.bf16.msra.mxu1 %v1911_v9 }
  0x70   :  { %1257 = vmatmul.bf16.vlgmr.msra.gmra.mxu0 %v1909_v10 }
  0x71   :  { %1262 = vmatmul.bf16.vlgmr.msra.gmra.mxu1 %v1910_v11 }
  0xad   :  { %v218_v12 = vpop.f32.mrf.mxu0 }
  0xae   :  { %v351_v13 = vpop.f32.mrf.mxu1 }
  0xaf   :  { %v361_v37 = vadd.f32 %v351_v13, %v218_v12 }
  0xb5   :  { %v473_v14 = vpop.f32.mrf.mxu2  ;;  %v220_v16 = vpop.f32.mrf.mxu0 }
  0xb6   :  { %v616_v15 = vpop.f32.mrf.mxu3  ;;  %v353_v17 = vpop.f32.mrf.mxu1  ;;  %v483_v40 = vadd.f32 %v473_v14, %v361_v37 }
  0xb7   :  { %v362_v42 = vadd.f32 %v353_v17, %v220_v16  ;;  %v1941_v16 = vld [vmem:[#allocation7] ss:$0 sm:$0xff] }
  0xb8   :  { %v626_v44 = vadd.f32 %v616_v15, %v483_v40 }
  0xbd   :  { %v475_v18 = vpop.f32.mrf.mxu2  ;;  %v223_v20 = vpop.f32.mrf.mxu0 }
  0xbe   :  { %v618_v19 = vpop.f32.mrf.mxu3  ;;  %v356_v21 = vpop.f32.mrf.mxu1  ;;  %v484_v46 = vadd.f32 %v475_v18, %v362_v42 }
  0xbf   :  { %v363_v38 = vadd.f32 %v356_v21, %v223_v20 }
  0xc0   :  { %v627_v54 = vadd.f32 %v618_v19, %v484_v46 }
  0xc5   :  { %v478_v22 = vpop.f32.mrf.mxu2  ;;  %v225_v24 = vpop.f32.mrf.mxu0 }
  0xc6   :  { %v621_v23 = vpop.f32.mrf.mxu3  ;;  %v358_v25 = vpop.f32.mrf.mxu1  ;;  %v485_v41 = vadd.f32 %v478_v22, %v363_v38 }
  0xc7   :  { %v364_v43 = vadd.f32 %v358_v25, %v225_v24 }
  0xc8   :  { %v628_v47 = vadd.f32 %v621_v23, %v485_v41 }
  0xcd   :  { %v480_v26 = vpop.f32.mrf.mxu2  ;;  %v738_v28 = vpop.f32.mrf.mxu0 }
  0xce   :  { %v623_v27 = vpop.f32.mrf.mxu3  ;;  %v881_v29 = vpop.f32.mrf.mxu1  ;;  %v486_v48 = vadd.f32 %v480_v26, %v364_v43  ;;  %v748_v52 = vadd.f32 %v738_v28, %v626_v44 }
  0xd0   :  { %v629_v45 = vadd.f32 %v623_v27, %v486_v48  ;;  %v891_v56 = vadd.f32 %v881_v29, %v748_v52 }
  0xd5   :  { %v1003_v30 = vpop.f32.mrf.mxu2  ;;  %v740_v32 = vpop.f32.mrf.mxu0 }
  0xd6   :  { %v1146_v31 = vpop.f32.mrf.mxu3  ;;  %v883_v33 = vpop.f32.mrf.mxu1  ;;  %v749_v57 = vadd.f32 %v740_v32, %v627_v54  ;;  %v1013_v60 = vadd.f32 %v1003_v30, %v891_v56 }
  0xd8   :  { %v892_v1 = vadd.f32 %v883_v33, %v749_v57  ;;  %v1156_v3 = vadd.f32 %v1146_v31, %v1013_v60 }
  0xdd   :  { %v1005_v34 = vpop.f32.mrf.mxu2  ;;  %v743_v35 = vpop.f32.mrf.mxu0 }
  0xde   :  { %v886_v36 = vpop.f32.mrf.mxu1  ;;  %v1148_v39 = vpop.f32.mrf.mxu3  ;;  %v750_v53 = vadd.f32 %v743_v35, %v628_v47  ;;  %v1014_v4 = vadd.f32 %v1005_v34, %v892_v1 }
  0xe0   :  { %v893_v58 = vadd.f32 %v886_v36, %v750_v53  ;;  %v1157_v11 = vadd.f32 %v1148_v39, %v1014_v4 }
  0xe5   :  { %v1008_v49 = vpop.f32.mrf.mxu2  ;;  %v745_v50 = vpop.f32.mrf.mxu0 }
  0xe6   :  { %v888_v51 = vpop.f32.mrf.mxu1  ;;  %v1151_v55 = vpop.f32.mrf.mxu3  ;;  %v751_v59 = vadd.f32 %v745_v50, %v629_v45  ;;  %v1015_v61 = vadd.f32 %v1008_v49, %v893_v58 }
  0xe8   :  { %v894_v2 = vadd.f32 %v888_v51, %v751_v59  ;;  %v1158_v5 = vadd.f32 %v1151_v55, %v1015_v61 }
  0xed   :  { %v1010_v62 = vpop.f32.mrf.mxu2  ;;  %v1258_v63 = vpop.f32.mrf.mxu0 }
  0xee   :  { %v1263_v0 = vpop.f32.mrf.mxu1  ;;  %v1016_v6 = vadd.f32 %v1010_v62, %v894_v2  ;;  %v1268_v7 = vadd.f32 %v1258_v63, %v1156_v3  ;;  %v1153_v10 = vpop.f32.mrf.mxu3 }
  0xef   :  { %v1270_v9 = vadd.f32 %v1263_v0, %v1158_v5 }
  0xf0   :  { %v1159_v12 = vadd.f32 %v1153_v10, %v1016_v6  ;;  %v1284_v15 = vmul.f32 %v1940_v8, %v1268_v7 }
  0xf1   :  { %v1286_v17 = vmul.f32 %v1940_v8, %v1270_v9 }
  0xf2   :  { %v1292_v22 = vadd.f32 %v1941_v16, %v1284_v15 }
  0xf3   :  { %v1294_v23 = vadd.f32 %v1941_v16, %v1286_v17 }
  0xf5   :  { %v1260_v13 = vpop.f32.mrf.mxu0 }
  0xf6   :  { %v1265_v14 = vpop.f32.mrf.mxu1  ;;  %v1269_v18 = vadd.f32 %v1260_v13, %v1157_v11 }
  0xf7   :  { %v1271_v19 = vadd.f32 %v1265_v14, %v1159_v12 }
  0xf8   :  { %v1285_v20 = vmul.f32 %v1940_v8, %v1269_v18 }
  0xf9   :  { %v1287_v21 = vmul.f32 %v1940_v8, %v1271_v19 }
  0xfa   :  { %v1293_v24 = vadd.f32 %v1941_v16, %v1285_v20 }
  0xfb   :  { %v1295_v25 = vadd.f32 %v1941_v16, %v1287_v21 }
  0xfc   :  { %v1922_v26 = vpack.c.bf16 %v1293_v24, %v1292_v22 }
  0xfd   :  { %v1927_v27 = vpack.c.bf16 %v1295_v25, %v1294_v23 }
  0xfe   :  { %1923 = vst [vmem:[%s2303_s4] sm:$0xff] %v1922_v26  }
  0xff   :  { %1929 = vst [vmem:[%s2303_s4 + $0x8] sm:$0xff] %v1927_v27  }
 0x100   :  { %1308 = vsyncpa [#allocation6], 1 }
 0x101   :  { %1309 = vsyncpa [#allocation8], 1 }
 0x102   :  { %1310 = vsyncmov [#allocation4] }
 0x105   :  { %s1311_s5 = vpop.sfrf %1310 }
 0x106   :  { %p1827_p0 = scmp.ne.s32.totalorder %s1311_s5, 0 }
 0x108   :  { %1315 = shalt.err (%p1827_p0)  }
 0x109   :  { %1317 = vsyncmov [#allocation4 + $0x1] }
 0x10c   :  { %s1318_s6 = vpop.sfrf %1317 }
 0x10d   :  { %p1828_p1 = scmp.ne.s32.totalorder %s1318_s6, 0 }
 0x10f   :  { %1322 = shalt.err (%p1828_p1)  }

// kernel: _lambda_.117
= control target key start
LH: loop header
LB: loop body
LE: loop exit
PB: predicated region body
PF: predicated region fallthrough
CT: control target
= control target key end

     0   :  { %s2375_s0 = inlined_call_operand.vmem [shape: bf16[16,1024], index: 0, kind: input, shape index: {}]   ;;  %s2376_s1 = inlined_call_operand.vmem [shape: bf16[1024,1024], index: 1, kind: input, shape index: {}]   ;;  %s2377_s2 = inlined_call_operand.vmem [shape: f32[1,1024], index: 2, kind: input, shape index: {}]   ;;  %s2378_s3 = inlined_call_operand.vmem [shape: f32[1,1024], index: 3, kind: input, shape index: {}]   ;;  %s2379_s4 = inlined_call_operand.vmem [shape: f32[16,1024], index: 4, kind: output, shape index: {}]  }
   0x1   :  { %2382 = sst [smem:[#allocation8_spill]] %s2375_s0 }
   0x2   :  { %2383 = sst [smem:[#allocation9_spill]] %s2376_s1 }
   0x3   :  { %s1896_s15 = smov 0   ;;  %s1898_s16 = smov 0  }
   0x4   :  { %s1900_s17 = smov 0   ;;  %s1902_s18 = smov 0  }
   0x5   :  { %s1904_s19 = smov 0   ;;  %s1906_s20 = smov 0  }
   0x6   :  { %s1908_s21 = smov 0   ;;  %s1910_s22 = smov 0  }
   0x7   :  { %s1912_s23 = smov 0   ;;  %s1914_s24 = smov 0  }
   0x8   :  { %s1916_s25 = smov 0  }
   0x9 LB: > { %s1325_s26 = sadd.s32 4294967295, %s1868_s25   ;;  %s26_s27 = sadd.s32 1, %s1860_s23  ;;  %s1868_s25 = sphi %s1916_s25, %s14_s25   ;;  %s1864_s24 = sphi %s1914_s24, %s2402_s24   ;;  %s1860_s23 = sphi %s1912_s23, %s2401_s23   ;;  %s1856_s22 = sphi %s1910_s22, %s2400_s22   ;;  %s1852_s21 = sphi %s1908_s21, %s2399_s21   ;;  %s1848_s20 = sphi %s1906_s20, %s2398_s20   ;;  %s1844_s19 = sphi %s1904_s19, %s2397_s19   ;;  %s1840_s18 = sphi %s1902_s18, %s2396_s18   ;;  %s1836_s17 = sphi %s1900_s17, %s2395_s17   ;;  %s1832_s16 = sphi %s1898_s16, %s2394_s16   ;;  %s1828_s15 = sphi %s1896_s15, %s2393_s15  }
   0xa   : > { %p27_p0 = scmp.ge.s32.totalorder %s26_s27, 2  ;;  %s29_s28 = sadd.s32 1, %s1864_s24 }
   0xb   : > { %s42_s29 = sadd.s32 1, %s1848_s20  ;;  %p49_p1 = scmp.ne.s32.totalorder %s1848_s20, %s1844_s19 }
   0xc   : > { %s2404_s27 = smov (%p27_p0, %s26_s27), 0  ;;  %s2406_s28 = smov (!%p27_p0, %s29_s28), %s1864_s24 }
   0xd   : > { %2384 = sst [smem:[#allocation6_spill]] %s2404_s27  ;;  %s38_s30 = ssub.s32 %s1860_s23, %s2404_s27 }
   0xe   : > { %p50_p2 = scmp.eq.s32.totalorder %s1868_s25, 0  ;;  %p31_p3 = scmp.ge.s32.totalorder %s2406_s28, 4 }
   0xf   : > { %p40_p4 = scmp.eq.s32.totalorder %s38_s30, 0  ;;  %s70_s6 = sadd.s32 1, %s1840_s18 }
  0x10   : > { %p1963_p5 = por %p50_p2, %p49_p1  ;;  %s2408_s28 = smov (%p31_p3, %s2406_s28), 0 }
  0x11   : > { %2386 = sst [smem:[#allocation7_spill]] %s2408_s28  ;;  %s66_s8 = ssub.s32 %s1864_s24, %s2408_s28 }
  0x12   : > { %s1971_s7 = scalar_select %p40_p4, %s1848_s20, %s42_s29  }
  0x13   : > { %p77_p6 = scmp.ne.s32.totalorder %s1840_s18, %s1836_s17  ;;  %s67_s9 = sor.u32 %s66_s8, %s38_s30 }
  0x14   : > { %p148_p7 = scmp.eq.s32.totalorder %s66_s8, 0  ;;  %p68_p8 = scmp.eq.s32.totalorder %s67_s9, 0 }
  0x15   : > { %p1977_p9 = por %p77_p6, %p50_p2  ;;  %s150_s11 = sadd.s32 1, %s1832_s16 }
  0x16   : > { %p160_p10 = scmp.ne.s32.totalorder %s1832_s16, %s1828_s15  ;;  %p161_p11 = scmp.eq.s32.totalorder %s1325_s26, 7 }
  0x17   : > { %s1985_s12 = scalar_select %p68_p8, %s1840_s18, %s70_s6  }
  0x18   : > { %s1988_s13 = scalar_select %p148_p7, %s1832_s16, %s150_s11  }
  0x19   : > { %p1990_p12 = por %p161_p11, %p160_p10  ;;  %p1328_p13 = scmp.ge.s32.totalorder %s1868_s25, 8 }
  0x1b   : > { %183 = sbr.rel (%p1328_p13) target bundleno = 120 (0x78), region = 16 }
  0x20   : > { %186 = sbr.rel (!%p1963_p5) target bundleno = 46 (0x2e), region = 20  ;;  %s188_s29 = sand.u32 (%p1963_p5), 1, %s1848_s20  }
  0x21   : > { %s1622_s30 = sshll.u32 (%p1963_p5), %s1860_s23, 4  ;;  %s1329_s8 = sshll.u32 (%p1963_p5), %s188_s29, 5 }
  0x22   : > { %s2389_s0 = sld [smem:[#allocation8_spill]] (%p1963_p5)  ;;  %s190_s26 = scalar_lea.vmem (%p1963_p5), [#allocation3], %s1329_s8 }
  0x28   : > { %s196_s11 = scalar_lea.vmem %s2389_s0, %s1622_s30 }
  0x29   : > { %v209_v0 = vld [vmem:[%s196_s11] sm:$0xff]  ;;  %v211_v1 = vld [vmem:[%s196_s11 + $0x8] sm:$0xff] }
  0x2a   : > { %v213_v2 = vld [vmem:[%s196_s11 + $0x20] sm:$0xff]  ;;  %210 = vst [vmem:[%s190_s26] sm:$0xff] %v209_v0  ;;  %v215_v3 = vld [vmem:[%s196_s11 + $0x28] sm:$0xff] }
  0x2b   : > { %212 = vst [vmem:[%s190_s26 + $0x8] sm:$0xff] %v211_v1 }
  0x2c   : > { %214 = vst [vmem:[%s190_s26 + $0x10] sm:$0xff] %v213_v2 }
  0x2d   : > { %216 = vst [vmem:[%s190_s26 + $0x18] sm:$0xff] %v215_v3 }
  0x2e PF: > { %222 = sbr.rel (!%p1977_p9) target bundleno = 120 (0x78), region = 43  ;;  %s224_s5 = sand.u32 (%p1977_p9), 1, %s1840_s18  }
  0x2f   : > { %s1334_s29 = sshll.u32 (%p1977_p9), %s1864_s24, 1  ;;  %s1332_s6 = sshll.u32 (%p1977_p9), %s224_s5, 9 }
  0x30   : > { %s1623_s30 = sshll.u32 (%p1977_p9), %s1860_s23, 9  ;;  %s2390_s1 = sld [smem:[#allocation9_spill]] (%p1977_p9) }
  0x31   : > { %s230_s9 = sadd.s32 (%p1977_p9), %s1623_s30, %s1334_s29  ;;  %s2015_s10 = scalar_lea.vmem (%p1977_p9), [#allocation4], %s1332_s6 }
  0x32   : > { %s1336_s0 = sshll.u32 (%p1977_p9), %s230_s9, 2 }
  0x36   : > { %s2010_s11 = scalar_lea.vmem %s2390_s1, %s1336_s0 }
  0x37   : > { %v387_v4 = vld [vmem:[%s2010_s11] sm:$0xff] }
  0x38   : > { %v389_v5 = vld [vmem:[%s2010_s11 + $0x20] sm:$0xff]  ;;  %388 = vst [vmem:[%s2015_s10] sm:$0xff] %v387_v4 }
  0x39   : > { %v391_v6 = vld [vmem:[%s2010_s11 + $0x40] sm:$0xff]  ;;  %390 = vst [vmem:[%s2015_s10 + $0x8] sm:$0xff] %v389_v5 }
  0x3a   : > { %v393_v7 = vld [vmem:[%s2010_s11 + $0x60] sm:$0xff]  ;;  %392 = vst [vmem:[%s2015_s10 + $0x10] sm:$0xff] %v391_v6 }
  0x3b   : > { %v395_v8 = vld [vmem:[%s2010_s11 + $0x80] sm:$0xff]  ;;  %394 = vst [vmem:[%s2015_s10 + $0x18] sm:$0xff] %v393_v7 }
  0x3c   : > { %v397_v9 = vld [vmem:[%s2010_s11 + $0xa0] sm:$0xff]  ;;  %396 = vst [vmem:[%s2015_s10 + $0x20] sm:$0xff] %v395_v8 }
  0x3d   : > { %v399_v10 = vld [vmem:[%s2010_s11 + $0xc0] sm:$0xff]  ;;  %398 = vst [vmem:[%s2015_s10 + $0x28] sm:$0xff] %v397_v9 }
  0x3e   : > { %v401_v11 = vld [vmem:[%s2010_s11 + $0xe0] sm:$0xff]  ;;  %400 = vst [vmem:[%s2015_s10 + $0x30] sm:$0xff] %v399_v10 }
  0x3f   : > { %v403_v12 = vld [vmem:[%s2010_s11 + $0x100] sm:$0xff]  ;;  %402 = vst [vmem:[%s2015_s10 + $0x38] sm:$0xff] %v401_v11 }
  0x40   : > { %v405_v13 = vld [vmem:[%s2010_s11 + $0x120] sm:$0xff]  ;;  %404 = vst [vmem:[%s2015_s10 + $0x40] sm:$0xff] %v403_v12 }
  0x41   : > { %v407_v14 = vld [vmem:[%s2010_s11 + $0x140] sm:$0xff]  ;;  %406 = vst [vmem:[%s2015_s10 + $0x48] sm:$0xff] %v405_v13 }
  0x42   : > { %v409_v15 = vld [vmem:[%s2010_s11 + $0x160] sm:$0xff]  ;;  %408 = vst [vmem:[%s2015_s10 + $0x50] sm:$0xff] %v407_v14 }
  0x43   : > { %v411_v16 = vld [vmem:[%s2010_s11 + $0x180] sm:$0xff]  ;;  %410 = vst [vmem:[%s2015_s10 + $0x58] sm:$0xff] %v409_v15 }
  0x44   : > { %v413_v17 = vld [vmem:[%s2010_s11 + $0x1a0] sm:$0xff]  ;;  %412 = vst [vmem:[%s2015_s10 + $0x60] sm:$0xff] %v411_v16 }
  0x45   : > { %v415_v18 = vld [vmem:[%s2010_s11 + $0x1c0] sm:$0xff]  ;;  %414 = vst [vmem:[%s2015_s10 + $0x68] sm:$0xff] %v413_v17 }
  0x46   : > { %v417_v19 = vld [vmem:[%s2010_s11 + $0x1e0] sm:$0xff]  ;;  %416 = vst [vmem:[%s2015_s10 + $0x70] sm:$0xff] %v415_v18 }
  0x47   : > { %v419_v20 = vld [vmem:[%s2010_s11 + $0x200] sm:$0xff]  ;;  %418 = vst [vmem:[%s2015_s10 + $0x78] sm:$0xff] %v417_v19 }
  0x48   : > { %v421_v21 = vld [vmem:[%s2010_s11 + $0x220] sm:$0xff]  ;;  %420 = vst [vmem:[%s2015_s10 + $0x80] sm:$0xff] %v419_v20 }
  0x49   : > { %v423_v22 = vld [vmem:[%s2010_s11 + $0x240] sm:$0xff]  ;;  %422 = vst [vmem:[%s2015_s10 + $0x88] sm:$0xff] %v421_v21 }
  0x4a   : > { %v425_v23 = vld [vmem:[%s2010_s11 + $0x260] sm:$0xff]  ;;  %424 = vst [vmem:[%s2015_s10 + $0x90] sm:$0xff] %v423_v22 }
  0x4b   : > { %v427_v24 = vld [vmem:[%s2010_s11 + $0x280] sm:$0xff]  ;;  %426 = vst [vmem:[%s2015_s10 + $0x98] sm:$0xff] %v425_v23 }
  0x4c   : > { %v429_v25 = vld [vmem:[%s2010_s11 + $0x2a0] sm:$0xff]  ;;  %428 = vst [vmem:[%s2015_s10 + $0xa0] sm:$0xff] %v427_v24 }
  0x4d   : > { %v431_v26 = vld [vmem:[%s2010_s11 + $0x2c0] sm:$0xff]  ;;  %430 = vst [vmem:[%s2015_s10 + $0xa8] sm:$0xff] %v429_v25 }
  0x4e   : > { %v433_v27 = vld [vmem:[%s2010_s11 + $0x2e0] sm:$0xff]  ;;  %432 = vst [vmem:[%s2015_s10 + $0xb0] sm:$0xff] %v431_v26 }
  0x4f   : > { %v435_v28 = vld [vmem:[%s2010_s11 + $0x300] sm:$0xff]  ;;  %434 = vst [vmem:[%s2015_s10 + $0xb8] sm:$0xff] %v433_v27 }
  0x50   : > { %v437_v29 = vld [vmem:[%s2010_s11 + $0x320] sm:$0xff]  ;;  %436 = vst [vmem:[%s2015_s10 + $0xc0] sm:$0xff] %v435_v28 }
  0x51   : > { %v439_v30 = vld [vmem:[%s2010_s11 + $0x340] sm:$0xff]  ;;  %438 = vst [vmem:[%s2015_s10 + $0xc8] sm:$0xff] %v437_v29 }
  0x52   : > { %v441_v31 = vld [vmem:[%s2010_s11 + $0x360] sm:$0xff]  ;;  %440 = vst [vmem:[%s2015_s10 + $0xd0] sm:$0xff] %v439_v30 }
  0x53   : > { %v443_v32 = vld [vmem:[%s2010_s11 + $0x380] sm:$0xff]  ;;  %442 = vst [vmem:[%s2015_s10 + $0xd8] sm:$0xff] %v441_v31 }
  0x54   : > { %v445_v33 = vld [vmem:[%s2010_s11 + $0x3a0] sm:$0xff]  ;;  %444 = vst [vmem:[%s2015_s10 + $0xe0] sm:$0xff] %v443_v32 }
  0x55   : > { %v447_v34 = vld [vmem:[%s2010_s11 + $0x3c0] sm:$0xff]  ;;  %446 = vst [vmem:[%s2015_s10 + $0xe8] sm:$0xff] %v445_v33 }
  0x56   : > { %v449_v35 = vld [vmem:[%s2010_s11 + $0x3e0] sm:$0xff]  ;;  %448 = vst [vmem:[%s2015_s10 + $0xf0] sm:$0xff] %v447_v34 }
  0x57   : > { %v451_v36 = vld [vmem:[%s2010_s11 + $0x400] sm:$0xff]  ;;  %450 = vst [vmem:[%s2015_s10 + $0xf8] sm:$0xff] %v449_v35 }
  0x58   : > { %v453_v37 = vld [vmem:[%s2010_s11 + $0x420] sm:$0xff]  ;;  %452 = vst [vmem:[%s2015_s10 + $0x100] sm:$0xff] %v451_v36 }
  0x59   : > { %v455_v38 = vld [vmem:[%s2010_s11 + $0x440] sm:$0xff]  ;;  %454 = vst [vmem:[%s2015_s10 + $0x108] sm:$0xff] %v453_v37 }
  0x5a   : > { %v457_v39 = vld [vmem:[%s2010_s11 + $0x460] sm:$0xff]  ;;  %456 = vst [vmem:[%s2015_s10 + $0x110] sm:$0xff] %v455_v38 }
  0x5b   : > { %v459_v40 = vld [vmem:[%s2010_s11 + $0x480] sm:$0xff]  ;;  %458 = vst [vmem:[%s2015_s10 + $0x118] sm:$0xff] %v457_v39 }
  0x5c   : > { %v461_v41 = vld [vmem:[%s2010_s11 + $0x4a0] sm:$0xff]  ;;  %460 = vst [vmem:[%s2015_s10 + $0x120] sm:$0xff] %v459_v40 }
  0x5d   : > { %v463_v42 = vld [vmem:[%s2010_s11 + $0x4c0] sm:$0xff]  ;;  %462 = vst [vmem:[%s2015_s10 + $0x128] sm:$0xff] %v461_v41 }
  0x5e   : > { %v465_v43 = vld [vmem:[%s2010_s11 + $0x4e0] sm:$0xff]  ;;  %464 = vst [vmem:[%s2015_s10 + $0x130] sm:$0xff] %v463_v42 }
  0x5f   : > { %v467_v44 = vld [vmem:[%s2010_s11 + $0x500] sm:$0xff]  ;;  %466 = vst [vmem:[%s2015_s10 + $0x138] sm:$0xff] %v465_v43 }
  0x60   : > { %v469_v45 = vld [vmem:[%s2010_s11 + $0x520] sm:$0xff]  ;;  %468 = vst [vmem:[%s2015_s10 + $0x140] sm:$0xff] %v467_v44 }
  0x61   : > { %v471_v46 = vld [vmem:[%s2010_s11 + $0x540] sm:$0xff]  ;;  %470 = vst [vmem:[%s2015_s10 + $0x148] sm:$0xff] %v469_v45 }
  0x62   : > { %v473_v47 = vld [vmem:[%s2010_s11 + $0x560] sm:$0xff]  ;;  %472 = vst [vmem:[%s2015_s10 + $0x150] sm:$0xff] %v471_v46 }
  0x63   : > { %v475_v48 = vld [vmem:[%s2010_s11 + $0x580] sm:$0xff]  ;;  %474 = vst [vmem:[%s2015_s10 + $0x158] sm:$0xff] %v473_v47 }
  0x64   : > { %v477_v49 = vld [vmem:[%s2010_s11 + $0x5a0] sm:$0xff]  ;;  %476 = vst [vmem:[%s2015_s10 + $0x160] sm:$0xff] %v475_v48 }
  0x65   : > { %v479_v50 = vld [vmem:[%s2010_s11 + $0x5c0] sm:$0xff]  ;;  %478 = vst [vmem:[%s2015_s10 + $0x168] sm:$0xff] %v477_v49 }
  0x66   : > { %v481_v51 = vld [vmem:[%s2010_s11 + $0x5e0] sm:$0xff]  ;;  %480 = vst [vmem:[%s2015_s10 + $0x170] sm:$0xff] %v479_v50 }
  0x67   : > { %v483_v52 = vld [vmem:[%s2010_s11 + $0x600] sm:$0xff]  ;;  %482 = vst [vmem:[%s2015_s10 + $0x178] sm:$0xff] %v481_v51 }
  0x68   : > { %v485_v53 = vld [vmem:[%s2010_s11 + $0x620] sm:$0xff]  ;;  %484 = vst [vmem:[%s2015_s10 + $0x180] sm:$0xff] %v483_v52 }
  0x69   : > { %v487_v54 = vld [vmem:[%s2010_s11 + $0x640] sm:$0xff]  ;;  %486 = vst [vmem:[%s2015_s10 + $0x188] sm:$0xff] %v485_v53 }
  0x6a   : > { %v489_v55 = vld [vmem:[%s2010_s11 + $0x660] sm:$0xff]  ;;  %488 = vst [vmem:[%s2015_s10 + $0x190] sm:$0xff] %v487_v54 }
  0x6b   : > { %v491_v56 = vld [vmem:[%s2010_s11 + $0x680] sm:$0xff]  ;;  %490 = vst [vmem:[%s2015_s10 + $0x198] sm:$0xff] %v489_v55 }
  0x6c   : > { %v493_v57 = vld [vmem:[%s2010_s11 + $0x6a0] sm:$0xff]  ;;  %492 = vst [vmem:[%s2015_s10 + $0x1a0] sm:$0xff] %v491_v56 }
  0x6d   : > { %v495_v58 = vld [vmem:[%s2010_s11 + $0x6c0] sm:$0xff]  ;;  %494 = vst [vmem:[%s2015_s10 + $0x1a8] sm:$0xff] %v493_v57 }
  0x6e   : > { %v497_v59 = vld [vmem:[%s2010_s11 + $0x6e0] sm:$0xff]  ;;  %496 = vst [vmem:[%s2015_s10 + $0x1b0] sm:$0xff] %v495_v58 }
  0x6f   : > { %v499_v60 = vld [vmem:[%s2010_s11 + $0x700] sm:$0xff]  ;;  %498 = vst [vmem:[%s2015_s10 + $0x1b8] sm:$0xff] %v497_v59 }
  0x70   : > { %v501_v61 = vld [vmem:[%s2010_s11 + $0x720] sm:$0xff]  ;;  %500 = vst [vmem:[%s2015_s10 + $0x1c0] sm:$0xff] %v499_v60 }
  0x71   : > { %v503_v62 = vld [vmem:[%s2010_s11 + $0x740] sm:$0xff]  ;;  %502 = vst [vmem:[%s2015_s10 + $0x1c8] sm:$0xff] %v501_v61 }
  0x72   : > { %v505_v63 = vld [vmem:[%s2010_s11 + $0x760] sm:$0xff]  ;;  %504 = vst [vmem:[%s2015_s10 + $0x1d0] sm:$0xff] %v503_v62 }
  0x73   : > { %v507_v0 = vld [vmem:[%s2010_s11 + $0x780] sm:$0xff]  ;;  %506 = vst [vmem:[%s2015_s10 + $0x1d8] sm:$0xff] %v505_v63 }
  0x74   : > { %v509_v1 = vld [vmem:[%s2010_s11 + $0x7a0] sm:$0xff]  ;;  %508 = vst [vmem:[%s2015_s10 + $0x1e0] sm:$0xff] %v507_v0 }
  0x75   : > { %v511_v2 = vld [vmem:[%s2010_s11 + $0x7c0] sm:$0xff]  ;;  %510 = vst [vmem:[%s2015_s10 + $0x1e8] sm:$0xff] %v509_v1 }
  0x76   : > { %v513_v3 = vld [vmem:[%s2010_s11 + $0x7e0] sm:$0xff]  ;;  %512 = vst [vmem:[%s2015_s10 + $0x1f0] sm:$0xff] %v511_v2 }
  0x77   : > { %514 = vst [vmem:[%s2015_s10 + $0x1f8] sm:$0xff] %v513_v3 }
  0x78 PF: > { %p1337_p0 = scmp.ge.s32.totalorder %s1868_s25, 1  ;;  %p535_p1 = scmp.lt.s32.totalorder %s1868_s25, 9 }
  0x7a   : > { %p536_p2 = pnand %p1337_p0, %p535_p1 }
  0x7b   : > { %s542_s0 = sand.u32 (!%p536_p2), 1, %s1844_s19   ;;  %s549_s28 = sand.u32 (!%p536_p2), 1, %s1836_s17  }
  0x7c   : > { %539 = sbr.rel (%p536_p2) target bundleno = 376 (0x178), region = 89  ;;  %s1338_s26 = sshll.u32 (!%p536_p2), %s542_s0, 5 }
  0x7d   : > { %s1339_s5 = sshll.u32 (!%p536_p2), %s549_s28, 9  ;;  %s582_s29 = sand.u32 (!%p536_p2), 1, %s1828_s15  }
  0x7e   : > { %s1341_s6 = sshll.u32 (!%p536_p2), %s1856_s22, 1  ;;  %s1340_s30 = sshll.u32 (!%p536_p2), %s582_s29, 5 }
  0x7f   : > { %p590_p3 = scmp.lt.s32.totalorder (!%p536_p2), %s1341_s6, 7  ;;  %s2158_s19 = scalar_lea.vmem (!%p536_p2), [#allocation3], %s1338_s26 }
  0x80   : > { %s2160_s17 = scalar_lea.vmem (!%p536_p2), [#allocation4], %s1339_s5  ;;  %s2162_s15 = scalar_lea.vmem (!%p536_p2), [#allocation5], %s1340_s30 }
  0x81   : > { %s2410_s6 = smov (!%p590_p3, %s1341_s6), 7  ;;  %p1343_p4 = scmp.ne.s32.totalorder %s1852_s21, 0 }
  0x82   : > { %s592_s11 = scalar_lea.vmem %s2377_s2, %s2410_s6  ;;  %s597_s27 = scalar_lea.vmem %s2378_s3, %s2410_s6 }
  0x83   : > { %604 = sbr.rel (%p1343_p4) target bundleno = 141 (0x8d), region = 101 }
  0x88   : > { %v1870_v4 = vmov 0.0  }
  0x89   : > { %605 = vst [vmem:[#allocation2 + $0x10] sm:$0xff] %v1870_v4 }
  0x8a   : > { %606 = vst [vmem:[#allocation2] sm:$0xff] %v1870_v4 }
  0x8b   : > { %607 = vst [vmem:[#allocation2 + $0x18] sm:$0xff] %v1870_v4 }
  0x8c   : > { %608 = vst [vmem:[#allocation2 + $0x8] sm:$0xff] %v1870_v4 }
  0x8d PF: > { %v1418_v5 = vld [vmem:[%s2160_s17 + $0x70] sm:$0xf]  ;;  %v1643_v6 = vld [vmem:[%s2160_s17 + $0x74] sm:$0xf0]  ;;  %v1410_v16 = vld [vmem:[%s2160_s17 + $0x60] sm:$0xf] }
  0x8e   : > { %v1482_v7 = vld [vmem:[%s2160_s17 + $0xf0] sm:$0xf]  ;;  %v1419_v8 = vor.u32 %v1643_v6, %v1418_v5  ;;  %v1659_v9 = vld [vmem:[%s2160_s17 + $0xf4] sm:$0xf0]  ;;  %v1641_v18 = vld [vmem:[%s2160_s17 + $0x64] sm:$0xf0] }
  0x8f   : > { %v1546_v10 = vld [vmem:[%s2160_s17 + $0x170] sm:$0xf]  ;;  %v1675_v11 = vld [vmem:[%s2160_s17 + $0x174] sm:$0xf0]  ;;  %v1483_v12 = vor.u32 %v1659_v9, %v1482_v7  ;;  %v1474_v19 = vld [vmem:[%s2160_s17 + $0xe0] sm:$0xf]  ;;  %v1411_v21 = vor.u32 %v1641_v18, %v1410_v16 }
  0x90   : > { %v1547_v13 = vor.u32 %v1675_v11, %v1546_v10  ;;  %v1610_v14 = vld [vmem:[%s2160_s17 + $0x1f0] sm:$0xf]  ;;  %v1691_v15 = vld [vmem:[%s2160_s17 + $0x1f4] sm:$0xf0]  ;;  %1021 = vmatpush.bf16.msra.mxu0 %v1419_v8  ;;  %v1657_v20 = vld [vmem:[%s2160_s17 + $0xe4] sm:$0xf0] }
  0x91   : > { %v1611_v17 = vor.u32 %v1691_v15, %v1610_v14  ;;  %1035 = vmatpush.bf16.msra.mxu1 %v1483_v12  ;;  %v1475_v22 = vor.u32 %v1657_v20, %v1474_v19  ;;  %v1538_v23 = vld [vmem:[%s2160_s17 + $0x160] sm:$0xf]  ;;  %v1673_v24 = vld [vmem:[%s2160_s17 + $0x164] sm:$0xf0]  ;;  %v1402_v28 = vld [vmem:[%s2160_s17 + $0x50] sm:$0xf] }
  0x92   : > { %1049 = vmatpush.bf16.msra.mxu2 %v1547_v13  ;;  %v1602_v25 = vld [vmem:[%s2160_s17 + $0x1e0] sm:$0xf]  ;;  %v1539_v26 = vor.u32 %v1673_v24, %v1538_v23  ;;  %v1689_v27 = vld [vmem:[%s2160_s17 + $0x1e4] sm:$0xf0]  ;;  %v1639_v29 = vld [vmem:[%s2160_s17 + $0x54] sm:$0xf0] }
  0x93   : > { %1063 = vmatpush.bf16.msra.mxu3 %v1611_v17  ;;  %v1603_v30 = vor.u32 %v1689_v27, %v1602_v25  ;;  %v1466_v31 = vld [vmem:[%s2160_s17 + $0xd0] sm:$0xf]  ;;  %v1655_v32 = vld [vmem:[%s2160_s17 + $0xd4] sm:$0xf0]  ;;  %v1403_v34 = vor.u32 %v1639_v29, %v1402_v28  ;;  %v1394_v40 = vld [vmem:[%s2160_s17 + $0x40] sm:$0xf] }
  0x94   : > { %v1530_v33 = vld [vmem:[%s2160_s17 + $0x150] sm:$0xf]  ;;  %1022 = vmatpush.bf16.msra.mxu0 %v1411_v21  ;;  %v1671_v35 = vld [vmem:[%s2160_s17 + $0x154] sm:$0xf0]  ;;  %v1467_v38 = vor.u32 %v1655_v32, %v1466_v31  ;;  %v1637_v41 = vld [vmem:[%s2160_s17 + $0x44] sm:$0xf0] }
  0x95   : > { %v1594_v36 = vld [vmem:[%s2160_s17 + $0x1d0] sm:$0xf]  ;;  %v1687_v37 = vld [vmem:[%s2160_s17 + $0x1d4] sm:$0xf0]  ;;  %1036 = vmatpush.bf16.msra.mxu1 %v1475_v22  ;;  %v1531_v39 = vor.u32 %v1671_v35, %v1530_v33  ;;  %v1458_v42 = vld [vmem:[%s2160_s17 + $0xc0] sm:$0xf]  ;;  %v1395_v49 = vor.u32 %v1637_v41, %v1394_v40 }
  0x96   : > { %1050 = vmatpush.bf16.msra.mxu2 %v1539_v26  ;;  %v1595_v43 = vor.u32 %v1687_v37, %v1594_v36  ;;  %v1653_v44 = vld [vmem:[%s2160_s17 + $0xc4] sm:$0xf0]  ;;  %v1522_v45 = vld [vmem:[%s2160_s17 + $0x140] sm:$0xf]  ;;  %v1386_v52 = vld [vmem:[%s2160_s17 + $0x30] sm:$0xf] }
  0x97   : > { %1064 = vmatpush.bf16.msra.mxu3 %v1603_v30  ;;  %v1669_v46 = vld [vmem:[%s2160_s17 + $0x144] sm:$0xf0]  ;;  %v1586_v47 = vld [vmem:[%s2160_s17 + $0x1c0] sm:$0xf]  ;;  %v1459_v50 = vor.u32 %v1653_v44, %v1458_v42  ;;  %v1635_v53 = vld [vmem:[%s2160_s17 + $0x34] sm:$0xf0] }
  0x98   : > { %v1685_v48 = vld [vmem:[%s2160_s17 + $0x1c4] sm:$0xf0]  ;;  %1023 = vmatpush.bf16.msra.mxu0 %v1403_v34  ;;  %v1523_v51 = vor.u32 %v1669_v46, %v1522_v45  ;;  %v1450_v54 = vld [vmem:[%s2160_s17 + $0xb0] sm:$0xf]  ;;  %v1651_v56 = vld [vmem:[%s2160_s17 + $0xb4] sm:$0xf0]  ;;  %v1387_v61 = vor.u32 %v1635_v53, %v1386_v52 }
  0x99   : > { %1037 = vmatpush.bf16.msra.mxu1 %v1467_v38  ;;  %v1587_v55 = vor.u32 %v1685_v48, %v1586_v47  ;;  %v1514_v57 = vld [vmem:[%s2160_s17 + $0x130] sm:$0xf]  ;;  %v1667_v58 = vld [vmem:[%s2160_s17 + $0x134] sm:$0xf0]  ;;  %v1451_v62 = vor.u32 %v1651_v56, %v1450_v54  ;;  %v1378_v0 = vld [vmem:[%s2160_s17 + $0x20] sm:$0xf] }
  0x9a   : > { %1051 = vmatpush.bf16.msra.mxu2 %v1531_v39  ;;  %v1578_v59 = vld [vmem:[%s2160_s17 + $0x1b0] sm:$0xf]  ;;  %v1683_v60 = vld [vmem:[%s2160_s17 + $0x1b4] sm:$0xf0]  ;;  %v1515_v63 = vor.u32 %v1667_v58, %v1514_v57  ;;  %v1633_v1 = vld [vmem:[%s2160_s17 + $0x24] sm:$0xf0] }
  0x9b   : > { %1065 = vmatpush.bf16.msra.mxu3 %v1595_v43  ;;  %v1442_v2 = vld [vmem:[%s2160_s17 + $0xa0] sm:$0xf]  ;;  %v1579_v3 = vor.u32 %v1683_v60, %v1578_v59  ;;  %v1649_v4 = vld [vmem:[%s2160_s17 + $0xa4] sm:$0xf0]  ;;  %v1379_v9 = vor.u32 %v1633_v1, %v1378_v0  ;;  %v1370_v12 = vld [vmem:[%s2160_s17 + $0x10] sm:$0xf] }
  0x9c   : > { %1024 = vmatpush.bf16.msra.mxu0 %v1395_v49  ;;  %v1506_v5 = vld [vmem:[%s2160_s17 + $0x120] sm:$0xf]  ;;  %v1665_v6 = vld [vmem:[%s2160_s17 + $0x124] sm:$0xf0]  ;;  %v1443_v10 = vor.u32 %v1649_v4, %v1442_v2  ;;  %v1631_v13 = vld [vmem:[%s2160_s17 + $0x14] sm:$0xf0] }
  0x9d   : > { %1038 = vmatpush.bf16.msra.mxu1 %v1459_v50  ;;  %v1570_v7 = vld [vmem:[%s2160_s17 + $0x1a0] sm:$0xf]  ;;  %v1681_v8 = vld [vmem:[%s2160_s17 + $0x1a4] sm:$0xf0]  ;;  %v1507_v11 = vor.u32 %v1665_v6, %v1506_v5  ;;  %v1434_v14 = vld [vmem:[%s2160_s17 + $0x90] sm:$0xf]  ;;  %v1371_v22 = vor.u32 %v1631_v13, %v1370_v12 }
  0x9e   : > { %1052 = vmatpush.bf16.msra.mxu2 %v1523_v51  ;;  %v1571_v15 = vor.u32 %v1681_v8, %v1570_v7  ;;  %v1647_v16 = vld [vmem:[%s2160_s17 + $0x94] sm:$0xf0]  ;;  %v1498_v17 = vld [vmem:[%s2160_s17 + $0x110] sm:$0xf]  ;;  %v1362_v21 = vld [vmem:[%s2160_s17] sm:$0xf] }
  0x9f   : > { %1066 = vmatpush.bf16.msra.mxu3 %v1587_v55  ;;  %v1663_v18 = vld [vmem:[%s2160_s17 + $0x114] sm:$0xf0]  ;;  %v1562_v19 = vld [vmem:[%s2160_s17 + $0x190] sm:$0xf]  ;;  %v1629_v23 = vld [vmem:[%s2160_s17 + $0x4] sm:$0xf0]  ;;  %v1435_v26 = vor.u32 %v1647_v16, %v1434_v14 }
  0xa0   : > { %1025 = vmatpush.bf16.msra.mxu0 %v1387_v61  ;;  %v1679_v20 = vld [vmem:[%s2160_s17 + $0x194] sm:$0xf0]  ;;  %v1426_v24 = vld [vmem:[%s2160_s17 + $0x80] sm:$0xf]  ;;  %v1645_v25 = vld [vmem:[%s2160_s17 + $0x84] sm:$0xf0]  ;;  %v1499_v27 = vor.u32 %v1663_v18, %v1498_v17  ;;  %v1363_v38 = vor.u32 %v1629_v23, %v1362_v21 }
  0xa1   : > { %1039 = vmatpush.bf16.msra.mxu1 %v1451_v62  ;;  %v1490_v28 = vld [vmem:[%s2160_s17 + $0x100] sm:$0xf]  ;;  %v1661_v29 = vld [vmem:[%s2160_s17 + $0x104] sm:$0xf0]  ;;  %v1563_v31 = vor.u32 %v1679_v20, %v1562_v19  ;;  %v1642_v33 = vld [vmem:[%s2160_s17 + $0x74] sm:$0xf]  ;;  %v1427_v42 = vor.u32 %v1645_v25, %v1426_v24 }
  0xa2   : > { %1053 = vmatpush.bf16.msra.mxu2 %v1515_v63  ;;  %v1554_v30 = vld [vmem:[%s2160_s17 + $0x180] sm:$0xf]  ;;  %v1677_v32 = vld [vmem:[%s2160_s17 + $0x184] sm:$0xf0]  ;;  %v1420_v34 = vld [vmem:[%s2160_s17 + $0x78] sm:$0xf0]  ;;  %v1491_v43 = vor.u32 %v1661_v29, %v1490_v28 }
  0xa3   : > { %1067 = vmatpush.bf16.msra.mxu3 %v1579_v3  ;;  %v1658_v35 = vld [vmem:[%s2160_s17 + $0xf4] sm:$0xf]  ;;  %v1484_v36 = vld [vmem:[%s2160_s17 + $0xf8] sm:$0xf0]  ;;  %v1640_v44 = vld [vmem:[%s2160_s17 + $0x64] sm:$0xf]  ;;  %v1555_v48 = vor.u32 %v1677_v32, %v1554_v30  ;;  %v1423_v49 = vor.u32 %v1642_v33, %v1420_v34 }
  0xa4   : > { %1026 = vmatpush.bf16.msra.mxu0 %v1379_v9  ;;  %v1674_v37 = vld [vmem:[%s2160_s17 + $0x174] sm:$0xf]  ;;  %v1548_v39 = vld [vmem:[%s2160_s17 + $0x178] sm:$0xf0]  ;;  %v1412_v45 = vld [vmem:[%s2160_s17 + $0x68] sm:$0xf0]  ;;  %v1487_v54 = vor.u32 %v1658_v35, %v1484_v36 }
  0xa5   : > { %1040 = vmatpush.bf16.msra.mxu1 %v1443_v10  ;;  %v1690_v40 = vld [vmem:[%s2160_s17 + $0x1f4] sm:$0xf]  ;;  %v1612_v41 = vld [vmem:[%s2160_s17 + $0x1f8] sm:$0xf0]  ;;  %v1354_v46 = vld [vmem:[%s2158_s19 + $0x8] sm:$0xf]  ;;  %v1551_v55 = vor.u32 %v1674_v37, %v1548_v39  ;;  %v1415_v4 = vor.u32 %v1640_v44, %v1412_v45 }
  0xa6   : > { %1054 = vmatpush.bf16.msra.mxu2 %v1507_v11  ;;  %v1627_v47 = vld [vmem:[%s2158_s19 + $0x14] sm:$0xf0]  ;;  %v1656_v50 = vld [vmem:[%s2160_s17 + $0xe4] sm:$0xf]  ;;  %v1476_v51 = vld [vmem:[%s2160_s17 + $0xe8] sm:$0xf0]  ;;  %v1615_v59 = vor.u32 %v1690_v40, %v1612_v41 }
  0xa7   : > { %1068 = vmatpush.bf16.msra.mxu3 %v1571_v15  ;;  %v1672_v52 = vld [vmem:[%s2160_s17 + $0x164] sm:$0xf]  ;;  %v1540_v53 = vld [vmem:[%s2160_s17 + $0x168] sm:$0xf0]  ;;  %v1356_v57 = vld [vmem:[%s2158_s19 + $0x18] sm:$0xf0]  ;;  %v2248_v60 = vor.u32 %v1627_v47, %v1354_v46  ;;  %v1479_v6 = vor.u32 %v1656_v50, %v1476_v51 }
  0xa8   : > { %1027 = vmatpush.bf16.msra.mxu0 %v1371_v22  ;;  %v1625_v56 = vld [vmem:[%s2158_s19 + $0xc] sm:$0xf]  ;;  %v1346_v58 = vld [vmem:[%s2158_s19] sm:$0xf]  ;;  %v1626_v61 = vld [vmem:[%s2158_s19 + $0xc] sm:$0xf0]  ;;  %v1543_v7 = vor.u32 %v1672_v52, %v1540_v53 }
  0xa9   : > { %1041 = vmatpush.bf16.msra.mxu1 %v1435_v26  ;;  %v1624_v62 = vld [vmem:[%s2158_s19 + $0x4] sm:$0xf]  ;;  %v1348_v63 = vld [vmem:[%s2158_s19 + $0x10] sm:$0xf0]  ;;  %v1604_v1 = vld [vmem:[%s2160_s17 + $0x1e8] sm:$0xf0]  ;;  %v2255_v2 = vor.u32 %v1625_v56, %v1356_v57  ;;  %v2257_v3 = vor.u32 %v1626_v61, %v1346_v58 }
  0xaa   : > { %1055 = vmatpush.bf16.msra.mxu2 %v1499_v27  ;;  %v1688_v0 = vld [vmem:[%s2160_s17 + $0x1e4] sm:$0xf]  ;;  %v2259_v5 = vor.u32 %v1624_v62, %v1348_v63  ;;  %v1638_v8 = vld [vmem:[%s2160_s17 + $0x54] sm:$0xf]  ;;  %v1404_v9 = vld [vmem:[%s2160_s17 + $0x58] sm:$0xf0] }
  0xab   : > { %1069 = vmatpush.bf16.msra.mxu3 %v1563_v31  ;;  %v1654_v10 = vld [vmem:[%s2160_s17 + $0xd4] sm:$0xf]  ;;  %v1607_v11 = vor.u32 %v1688_v0, %v1604_v1  ;;  %v1468_v12 = vld [vmem:[%s2160_s17 + $0xd8] sm:$0xf0]  ;;  %v1407_v17 = vor.u32 %v1638_v8, %v1404_v9  ;;  %v1636_v20 = vld [vmem:[%s2160_s17 + $0x44] sm:$0xf] }
  0xac   : > { %1028 = vmatpush.bf16.msra.mxu0 %v1363_v38  ;;  %v1670_v13 = vld [vmem:[%s2160_s17 + $0x154] sm:$0xf]  ;;  %v1532_v14 = vld [vmem:[%s2160_s17 + $0x158] sm:$0xf0]  ;;  %v1471_v18 = vor.u32 %v1654_v10, %v1468_v12  ;;  %v1396_v21 = vld [vmem:[%s2160_s17 + $0x48] sm:$0xf0] }
  0xad   : > { %1042 = vmatpush.bf16.msra.mxu1 %v1427_v42  ;;  %v1686_v15 = vld [vmem:[%s2160_s17 + $0x1d4] sm:$0xf]  ;;  %v1596_v16 = vld [vmem:[%s2160_s17 + $0x1d8] sm:$0xf0]  ;;  %v1535_v19 = vor.u32 %v1670_v13, %v1532_v14  ;;  %v1652_v22 = vld [vmem:[%s2160_s17 + $0xc4] sm:$0xf]  ;;  %v1399_v29 = vor.u32 %v1636_v20, %v1396_v21 }
  0xae   : > { %1056 = vmatpush.bf16.msra.mxu2 %v1491_v43  ;;  %v1599_v23 = vor.u32 %v1686_v15, %v1596_v16  ;;  %v1460_v24 = vld [vmem:[%s2160_s17 + $0xc8] sm:$0xf0]  ;;  %v1668_v25 = vld [vmem:[%s2160_s17 + $0x144] sm:$0xf]  ;;  %v1634_v32 = vld [vmem:[%s2160_s17 + $0x34] sm:$0xf] }
  0xaf   : > { %1070 = vmatpush.bf16.msra.mxu3 %v1555_v48  ;;  %1029 = vmatmul.bf16.vlgmr.msra.gmra.mxu0 %v2257_v3  ;;  %v1524_v26 = vld [vmem:[%s2160_s17 + $0x148] sm:$0xf0]  ;;  %v1684_v27 = vld [vmem:[%s2160_s17 + $0x1c4] sm:$0xf]  ;;  %v1463_v30 = vor.u32 %v1652_v22, %v1460_v24  ;;  %v1388_v33 = vld [vmem:[%s2160_s17 + $0x38] sm:$0xf0] }
  0xb0   : > { %1077 = vmatpush.bf16.msrb.mxu0 %v1423_v49  ;;  %1043 = vmatmul.bf16.vlgmr.msra.gmra.mxu1 %v2259_v5  ;;  %v1588_v28 = vld [vmem:[%s2160_s17 + $0x1c8] sm:$0xf0]  ;;  %v1527_v31 = vor.u32 %v1668_v25, %v1524_v26  ;;  %v1650_v34 = vld [vmem:[%s2160_s17 + $0xb4] sm:$0xf]  ;;  %v1452_v36 = vld [vmem:[%s2160_s17 + $0xb8] sm:$0xf0]  ;;  %v1391_v41 = vor.u32 %v1634_v32, %v1388_v33 }
  0xb1   : > { %1091 = vmatpush.bf16.msrb.mxu1 %v1487_v54  ;;  %1057 = vmatmul.bf16.vlgmr.msra.gmra.mxu2 %v2248_v60  ;;  %v1591_v35 = vor.u32 %v1684_v27, %v1588_v28  ;;  %v1666_v37 = vld [vmem:[%s2160_s17 + $0x134] sm:$0xf]  ;;  %v1516_v38 = vld [vmem:[%s2160_s17 + $0x138] sm:$0xf0]  ;;  %v1455_v42 = vor.u32 %v1650_v34, %v1452_v36  ;;  %v1632_v44 = vld [vmem:[%s2160_s17 + $0x24] sm:$0xf] }
  0xb2   : > { %1105 = vmatpush.bf16.msrb.mxu2 %v1551_v55  ;;  %1071 = vmatmul.bf16.vlgmr.msra.gmra.mxu3 %v2255_v2  ;;  %v1682_v39 = vld [vmem:[%s2160_s17 + $0x1b4] sm:$0xf]  ;;  %v1580_v40 = vld [vmem:[%s2160_s17 + $0x1b8] sm:$0xf0]  ;;  %v1519_v43 = vor.u32 %v1666_v37, %v1516_v38  ;;  %v1380_v45 = vld [vmem:[%s2160_s17 + $0x28] sm:$0xf0] }
  0xb3   : > { %1119 = vmatpush.bf16.msrb.mxu3 %v1615_v59  ;;  %v1648_v46 = vld [vmem:[%s2160_s17 + $0xa4] sm:$0xf]  ;;  %v1583_v47 = vor.u32 %v1682_v39, %v1580_v40  ;;  %v1444_v48 = vld [vmem:[%s2160_s17 + $0xa8] sm:$0xf0]  ;;  %v1383_v53 = vor.u32 %v1632_v44, %v1380_v45  ;;  %v1630_v56 = vld [vmem:[%s2160_s17 + $0x14] sm:$0xf] }
  0xb4   : > { %1078 = vmatpush.bf16.msrb.mxu0 %v1415_v4  ;;  %v1664_v49 = vld [vmem:[%s2160_s17 + $0x124] sm:$0xf]  ;;  %v1508_v50 = vld [vmem:[%s2160_s17 + $0x128] sm:$0xf0]  ;;  %v1447_v54 = vor.u32 %v1648_v46, %v1444_v48  ;;  %v1372_v57 = vld [vmem:[%s2160_s17 + $0x18] sm:$0xf0] }
  0xb5   : > { %1092 = vmatpush.bf16.msrb.mxu1 %v1479_v6  ;;  %v1680_v51 = vld [vmem:[%s2160_s17 + $0x1a4] sm:$0xf]  ;;  %v1572_v52 = vld [vmem:[%s2160_s17 + $0x1a8] sm:$0xf0]  ;;  %v1511_v55 = vor.u32 %v1664_v49, %v1508_v50  ;;  %v1646_v58 = vld [vmem:[%s2160_s17 + $0x94] sm:$0xf]  ;;  %v1375_v4 = vor.u32 %v1630_v56, %v1372_v57 }
  0xb6   : > { %1106 = vmatpush.bf16.msrb.mxu2 %v1543_v7  ;;  %v1575_v59 = vor.u32 %v1680_v51, %v1572_v52  ;;  %v1436_v61 = vld [vmem:[%s2160_s17 + $0x98] sm:$0xf0]  ;;  %v1662_v62 = vld [vmem:[%s2160_s17 + $0x114] sm:$0xf]  ;;  %v1628_v8 = vld [vmem:[%s2160_s17 + $0x4] sm:$0xf] }
  0xb7   : > { %1120 = vmatpush.bf16.msrb.mxu3 %v1607_v11  ;;  %v1500_v63 = vld [vmem:[%s2160_s17 + $0x118] sm:$0xf0]  ;;  %v1678_v0 = vld [vmem:[%s2160_s17 + $0x194] sm:$0xf]  ;;  %v1439_v6 = vor.u32 %v1646_v58, %v1436_v61  ;;  %v1364_v9 = vld [vmem:[%s2160_s17 + $0x8] sm:$0xf0] }
  0xb8   : > { %1079 = vmatpush.bf16.msrb.mxu0 %v1407_v17  ;;  %v1564_v1 = vld [vmem:[%s2160_s17 + $0x198] sm:$0xf0]  ;;  %v1503_v7 = vor.u32 %v1662_v62, %v1500_v63  ;;  %v1644_v10 = vld [vmem:[%s2160_s17 + $0x84] sm:$0xf]  ;;  %v1428_v12 = vld [vmem:[%s2160_s17 + $0x88] sm:$0xf0]  ;;  %v1367_v17 = vor.u32 %v1628_v8, %v1364_v9 }
  0xb9   : > { %1093 = vmatpush.bf16.msrb.mxu1 %v1471_v18  ;;  %v1567_v11 = vor.u32 %v1678_v0, %v1564_v1  ;;  %v1660_v13 = vld [vmem:[%s2160_s17 + $0x104] sm:$0xf]  ;;  %v1492_v14 = vld [vmem:[%s2160_s17 + $0x108] sm:$0xf0]  ;;  %v1431_v18 = vor.u32 %v1644_v10, %v1428_v12  ;;  %v609_v27 = vld [vmem:[#allocation2 + $0x10] sm:$0xff]  ;;  %p1616_p5 = scmp.ne.s32.totalorder %s1852_s21, 1 }
  0xba   : > { %1107 = vmatpush.bf16.msrb.mxu2 %v1535_v19  ;;  %v1676_v15 = vld [vmem:[%s2160_s17 + $0x184] sm:$0xf]  ;;  %v1556_v16 = vld [vmem:[%s2160_s17 + $0x188] sm:$0xf0]  ;;  %v1495_v19 = vor.u32 %v1660_v13, %v1492_v14  ;;  %v611_v34 = vld [vmem:[#allocation2 + $0x18] sm:$0xff] }
  0xbb   : > { %1121 = vmatpush.bf16.msrb.mxu3 %v1599_v23  ;;  %v1559_v20 = vor.u32 %v1676_v15, %v1556_v16  ;;  %v612_v49 = vld [vmem:[#allocation2 + $0x8] sm:$0xff] }
  0xbc   : > { %1080 = vmatpush.bf16.msrb.mxu0 %v1399_v29 }
  0xbd   : > { %1094 = vmatpush.bf16.msrb.mxu1 %v1463_v30 }
  0xbe   : > { %1108 = vmatpush.bf16.msrb.mxu2 %v1527_v31 }
  0xbf   : > { %1122 = vmatpush.bf16.msrb.mxu3 %v1591_v35 }
  0xc0   : > { %1081 = vmatpush.bf16.msrb.mxu0 %v1391_v41  ;;  %v610_v41 = vld [vmem:[#allocation2] sm:$0xff] }
  0xc1   : > { %1095 = vmatpush.bf16.msrb.mxu1 %v1455_v42 }
  0xc2   : > { %1109 = vmatpush.bf16.msrb.mxu2 %v1519_v43 }
  0xc3   : > { %1123 = vmatpush.bf16.msrb.mxu3 %v1583_v47 }
  0xc4   : > { %1082 = vmatpush.bf16.msrb.mxu0 %v1383_v53 }
  0xc5   : > { %1096 = vmatpush.bf16.msrb.mxu1 %v1447_v54 }
  0xc6   : > { %1110 = vmatpush.bf16.msrb.mxu2 %v1511_v55 }
  0xc7   : > { %1124 = vmatpush.bf16.msrb.mxu3 %v1575_v59 }
  0xc8   : > { %1083 = vmatpush.bf16.msrb.mxu0 %v1375_v4 }
  0xc9   : > { %1097 = vmatpush.bf16.msrb.mxu1 %v1439_v6 }
  0xca   : > { %1111 = vmatpush.bf16.msrb.mxu2 %v1503_v7 }
  0xcb   : > { %1125 = vmatpush.bf16.msrb.mxu3 %v1567_v11 }
  0xcc   : > { %1084 = vmatpush.bf16.msrb.mxu0 %v1367_v17 }
  0xcd   : > { %1098 = vmatpush.bf16.msrb.mxu1 %v1431_v18 }
  0xce   : > { %1112 = vmatpush.bf16.msrb.mxu2 %v1495_v19 }
  0xcf   : > { %1126 = vmatpush.bf16.msrb.mxu3 %v1559_v20  ;;  %1085 = vmatmul.bf16.vlgmr.msrb.gmra.mxu0 %v2257_v3 }
  0xd0   : > { %1099 = vmatmul.bf16.vlgmr.msrb.gmra.mxu1 %v2259_v5 }
  0xd1   : > { %1113 = vmatmul.bf16.vlgmr.msrb.gmra.mxu2 %v2248_v60 }
  0xd2   : > { %1127 = vmatmul.bf16.vlgmr.msrb.gmra.mxu3 %v2255_v2 }
 0x12c   : > { %v1030_v21 = vpop.f32.mrf.mxu0 }
 0x12d   : > { %v1044_v22 = vpop.f32.mrf.mxu1 }
 0x12e   : > { %v1045_v23 = vadd.f32 %v1044_v22, %v1030_v21 }
 0x134   : > { %v1058_v24 = vpop.f32.mrf.mxu2  ;;  %v1032_v29 = vpop.f32.mrf.mxu0 }
 0x135   : > { %v1059_v25 = vadd.f32 %v1058_v24, %v1045_v23  ;;  %v1072_v26 = vpop.f32.mrf.mxu3  ;;  %v1046_v30 = vpop.f32.mrf.mxu1 }
 0x136   : > { %v1047_v32 = vadd.f32 %v1046_v30, %v1032_v29 }
 0x137   : > { %v1073_v28 = vadd.f32 %v1072_v26, %v1059_v25 }
 0x139   : > { %v1133_v31 = vadd.f32 %v1073_v28, %v609_v27 }
 0x13b   : > { %1137 = vst [vmem:[#allocation2 + $0x10] sm:$0xff] %v1133_v31 }
 0x13c   : > { %v1060_v3 = vpop.f32.mrf.mxu2 }
 0x13d   : > { %v1061_v33 = vadd.f32 %v1060_v3, %v1047_v32  ;;  %v1074_v5 = vpop.f32.mrf.mxu3 }
 0x13f   : > { %v1075_v60 = vadd.f32 %v1074_v5, %v1061_v33 }
 0x141   : > { %v1135_v35 = vadd.f32 %v1075_v60, %v611_v34 }
 0x143   : > { %1139 = vst [vmem:[#allocation2 + $0x18] sm:$0xff] %v1135_v35 }
 0x14c   : > { %v1086_v2 = vpop.f32.mrf.mxu0 }
 0x14d   : > { %v1100_v36 = vpop.f32.mrf.mxu1 }
 0x14e   : > { %v1101_v37 = vadd.f32 %v1100_v36, %v1086_v2 }
 0x154   : > { %v1114_v38 = vpop.f32.mrf.mxu2  ;;  %v1088_v43 = vpop.f32.mrf.mxu0 }
 0x155   : > { %v1115_v39 = vadd.f32 %v1114_v38, %v1101_v37  ;;  %v1128_v40 = vpop.f32.mrf.mxu3  ;;  %v1102_v44 = vpop.f32.mrf.mxu1 }
 0x156   : > { %v1103_v46 = vadd.f32 %v1102_v44, %v1088_v43 }
 0x157   : > { %v1129_v42 = vadd.f32 %v1128_v40, %v1115_v39 }
 0x159   : > { %v1134_v45 = vadd.f32 %v1129_v42, %v610_v41 }
 0x15b   : > { %1138 = vst [vmem:[#allocation2] sm:$0xff] %v1134_v45 }
 0x15c   : > { %v1116_v47 = vpop.f32.mrf.mxu2 }
 0x15d   : > { %v1117_v48 = vadd.f32 %v1116_v47, %v1103_v46  ;;  %v1130_v50 = vpop.f32.mrf.mxu3 }
 0x15f   : > { %v1131_v51 = vadd.f32 %v1130_v50, %v1117_v48  ;;  %1144 = sbr.rel (%p1616_p5) target bundleno = 368 (0x170), region = 105 }
 0x161   : > { %v1136_v52 = vadd.f32 %v1131_v51, %v612_v49 }
 0x163   : > { %1140 = vst [vmem:[#allocation2 + $0x8] sm:$0xff] %v1136_v52 }
 0x164   : > { %v1145_v53 = vld [vmem:[#allocation2 + $0x10] sm:$0xff]  ;;  %v1149_v54 = vld [vmem:[%s592_s11] sm:$0x3]  ;;  %v1147_v62 = vld [vmem:[#allocation2 + $0x18] sm:$0xff] }
 0x165   : > { %v1159_v55 = vld [vmem:[%s597_s27] sm:$0x3]  ;;  %v1151_v56 = vperm.slane %v1149_v54, 0  ;;  %v1152_v59 = vperm.slane %v1149_v54, 1 }
 0x166   : > { %v1161_v57 = vperm.slane %v1159_v55, 0  ;;  %v1146_v58 = vld [vmem:[#allocation2] sm:$0xff]  ;;  %v1162_v61 = vperm.slane %v1159_v55, 1 }
 0x167   : > { %v1155_v0 = vmul.f32 %v1151_v56, %v1145_v53  ;;  %v1156_v1 = vmul.f32 %v1152_v59, %v1146_v58  ;;  %v1157_v4 = vmul.f32 %v1151_v56, %v1147_v62 }
 0x169   : > { %v1165_v7 = vadd.f32 %v1161_v57, %v1155_v0  ;;  %v1166_v8 = vadd.f32 %v1162_v61, %v1156_v1  ;;  %v1167_v9 = vadd.f32 %v1161_v57, %v1157_v4 }
 0x16a   : > { %v1148_v63 = vld [vmem:[#allocation2 + $0x8] sm:$0xff] }
 0x16b   : > { %v1158_v6 = vmul.f32 %v1152_v59, %v1148_v63  ;;  %1169 = vst [vmem:[%s2162_s15] sm:$0xff] %v1165_v7 }
 0x16c   : > { %1170 = vst [vmem:[%s2162_s15 + $0x8] sm:$0xff] %v1166_v8 }
 0x16d   : > { %v1168_v10 = vadd.f32 %v1162_v61, %v1158_v6  ;;  %1171 = vst [vmem:[%s2162_s15 + $0x10] sm:$0xff] %v1167_v9 }
 0x16f   : > { %1172 = vst [vmem:[%s2162_s15 + $0x18] sm:$0xff] %v1168_v10 }
 0x170 PF: > { %1179 = sbr.rel (!%p1990_p12) target bundleno = 376 (0x178), region = 109  ;;  %s1692_s21 = sshll.u32 (%p1990_p12), %s1856_s22, 4 }
 0x171   : > { %s1185_s29 = scalar_lea.vmem (%p1990_p12), %s2379_s4, %s1692_s21 }
 0x172   : > { %v1198_v11 = vld [vmem:[%s2162_s15] sm:$0xff] (%p1990_p12) }
 0x173   : > { %v1200_v12 = vld [vmem:[%s2162_s15 + $0x8] sm:$0xff] (%p1990_p12)  ;;  %1199 = vst [vmem:[%s1185_s29] sm:$0xff] (%p1990_p12), %v1198_v11 }
 0x174   : > { %v1202_v13 = vld [vmem:[%s2162_s15 + $0x10] sm:$0xff] (%p1990_p12)  ;;  %1201 = vst [vmem:[%s1185_s29 + $0x8] sm:$0xff] (%p1990_p12), %v1200_v12 }
 0x175   : > { %1203 = vst [vmem:[%s1185_s29 + $0x40] sm:$0xff] %v1202_v13 }
 0x176   : > { %v1204_v14 = vld [vmem:[%s2162_s15 + $0x18] sm:$0xff] }
 0x177   : > { %1205 = vst [vmem:[%s1185_s29 + $0x48] sm:$0xff] %v1204_v14 }
 0x178 PF: > { %s14_s25 = sadd.s32 1, %s1868_s25   ;;  %s2391_s14 = sld [smem:[#allocation6_spill]] }
 0x179   : > { %p11_p6 = scmp.ge.s32.totalorder %s14_s25, 10   ;;  %s2392_s6 = sld [smem:[#allocation7_spill]] }
 0x17a   : > { %s2393_s15 = smov %s1832_s16  ;;  %s2394_s16 = smov %s1988_s13 }
 0x17b   : > { %s2395_s17 = smov %s1840_s18  ;;  %s2396_s18 = smov %s1985_s12 }
 0x17c   : > { %s2397_s19 = smov %s1848_s20  ;;  %s2398_s20 = smov %s1971_s7 }
 0x17d   : > { %s2399_s21 = smov %s1860_s23  ;;  %s2400_s22 = smov %s1864_s24 }
 0x17e   : > { %s2401_s23 = smov %s2391_s14  ;;  %13 = sbr.rel (!%p11_p6) target bundleno = 9 (0x9), region = 177 }
 0x17f   : > { %s2402_s24 = smov %s2392_s6 }

</bundles_post_ra>
